<compile_context>
chip_gen: v6e
topology: v6e:2x2x1
jax: 0.10.0
libtpu: 0.0.40
codegen_flags: <defaults>
</compile_context>

<pallas_src>
import jax
import jax.numpy as jnp
from jax.experimental import pallas as pl
from jax.experimental.pallas import tpu as pltpu


# ----------------------------------------------------------------------------- kernel

def _inception4e_kernel(x_ref, w1_ref, b1_ref, w2_ref, b2_ref,
                        w3_ref, b3_ref, w4_ref, b4_ref, o_ref):
    # x_ref : (1, H, W, 528) f32   input image (NHWC)
    # w1    : (528, 448) bf16      merged 1x1 weights [b1:256 | b2 reduce:160 | b3 reduce:32]
    # b1    : (1, 448)   f32       merged folded BN bias
    # w2    : (9, 160, 320) bf16   branch2 3x3 weights (tap-major: kh*3+kw)
    # b2    : (1, 320)   f32
    # w3    : (9, 32, 128)  bf16   branch3 3x3 weights
    # b3    : (1, 128)   f32
    # w4    : (528, 128) bf16      branch4 1x1 weights (after 3x3 maxpool)
    # b4    : (1, 128)   f32
    # o_ref : (1, H//2, W//2, 832) f32 output (NHWC)
    _, H, W, Cin = x_ref.shape
    Wp = W + 2
    Ho, Wo = H // 2, W // 2
    Ctot = o_ref.shape[-1]

    x = x_ref[0]                                    # (H, W, Cin) f32
    x2d = x.reshape(H * W, Cin)

    # ---- merged 1x1 Conv+BN+ReLU (branch1 + branch2/3 reduce convs) --------
    y1 = jnp.dot(x2d.astype(jnp.bfloat16), w1_ref[...],
                 preferred_element_type=jnp.float32)
    y1 = jnp.maximum(y1 + b1_ref[...], 0.0)         # (H*W, 448)
    b1v = y1[:, 0:256]                              # branch1 output       (H*W, 256)
    b2a = y1[:, 256:416]                            # branch2 reduce conv  (H*W, 160)
    b3a = y1[:, 416:448]                            # branch3 reduce conv  (H*W, 32)

    def pad_flat(v2d, c):
        # (H*W, c) -> flattened zero-padded plane ((H+3)*Wp, c), f32.
        # Row ph*Wp + pw holds the pad-1 plane element (ph, pw); one extra
        # all-zero row block at the bottom lets every 3x3 tap read a
        # contiguous H*Wp-row window (no strided slicing).
        v = v2d.reshape(H, W, c)
        zc = jnp.zeros((H, 1, c), jnp.float32)
        v = jnp.concatenate([zc, v, zc], axis=1).reshape(H * Wp, c)
        zt = jnp.zeros((Wp, c), jnp.float32)
        zb = jnp.zeros((2 * Wp, c), jnp.float32)
        return jnp.concatenate([zt, v, zb], axis=0)

    def conv3x3(pflat, w_ref, b_ref, cout):
        # Accumulate over the 9 taps; columns w >= W of each row are garbage
        # (window wrap-around) and are dropped at the end.
        acc = jnp.zeros((H * Wp, cout), jnp.float32)
        for kh in range(3):
            for kw in range(3):
                s = kh * Wp + kw
                win = pflat[s:s + H * Wp, :].astype(jnp.bfloat16)
                acc = acc + jnp.dot(win, w_ref[kh * 3 + kw],
                                    preferred_element_type=jnp.float32)
        y = jnp.maximum(acc + b_ref[...], 0.0)      # (H*Wp, cout)
        return y.reshape(H, Wp, cout)[:, 0:W, :]    # (H, W, cout)

    b2v = conv3x3(pad_flat(b2a, 160), w2_ref, b2_ref, 320)   # (H, W, 320)
    b3v = conv3x3(pad_flat(b3a, 32), w3_ref, b3_ref, 128)    # (H, W, 128)

    # ---- branch4: 3x3 / stride 1 / pad 1 maxpool (separable) + 1x1 conv ----
    ncol = jnp.full((H, 1, Cin), -jnp.inf, jnp.float32)
    xw = jnp.concatenate([ncol, x, ncol], axis=1)                   # (H, Wp, Cin)
    hmax = jnp.maximum(jnp.maximum(xw[:, 0:W, :], xw[:, 1:W + 1, :]),
                       xw[:, 2:W + 2, :])                           # (H, W, Cin)
    nrow = jnp.full((1, W, Cin), -jnp.inf, jnp.float32)
    xv = jnp.concatenate([nrow, hmax, nrow], axis=0)                # (H+2, W, Cin)
    pooled = jnp.maximum(jnp.maximum(xv[0:H], xv[1:H + 1]), xv[2:H + 2])
    y4 = jnp.dot(pooled.reshape(H * W, Cin).astype(jnp.bfloat16), w4_ref[...],
                 preferred_element_type=jnp.float32)
    b4v = jnp.maximum(y4 + b4_ref[...], 0.0)                        # (H*W, 128)

    # ---- channel concat (PyTorch order) + 2x2 / stride 2 maxpool -----------
    y = jnp.concatenate([b1v.reshape(H, W, 256), b2v, b3v,
                         b4v.reshape(H, W, 128)], axis=-1)          # (H, W, 832)
    hm = jnp.max(y.reshape(Ho, 2, W, Ctot), axis=1)                 # (Ho, W, 832)
    o_ref[0] = jnp.max(hm.reshape(Ho, Wo, 2, Ctot), axis=2)         # (Ho, Wo, 832)


# ----------------------------------------------------------------------------- params

def init_params(key):
    """Deterministic synthetic Conv+BN parameters, folded for inference."""
    eps = 1e-3

    def conv_bn(k, cin, cout, ksz):
        k1, k2, k3, k4, k5 = jax.random.split(k, 5)
        w = jax.random.normal(k1, (cout, cin, ksz, ksz), jnp.float32)
        w = w * (1.0 / jnp.sqrt(float(cin * ksz * ksz)))
        gamma = 1.0 + 0.1 * jax.random.normal(k2, (cout,), jnp.float32)
        beta = 0.1 * jax.random.normal(k3, (cout,), jnp.float32)
        mean = 0.1 * jax.random.normal(k4, (cout,), jnp.float32)
        var = jnp.abs(jax.random.normal(k5, (cout,), jnp.float32)) + 0.5
        scale = gamma / jnp.sqrt(var + eps)
        w_f = w * scale[:, None, None, None]
        b_f = beta - mean * scale
        if ksz == 1:
            w_out = w_f[:, :, 0, 0].T                                     # (Cin, Cout)
        else:
            w_out = jnp.transpose(w_f, (2, 3, 1, 0)).reshape(ksz * ksz, cin, cout)
        return w_out, b_f.reshape(1, cout)

    keys = jax.random.split(key, 6)
    w_b1, b_b1 = conv_bn(keys[0], 528, 256, 1)
    w_b2a, b_b2a = conv_bn(keys[1], 528, 160, 1)
    w_b2b, b_b2b = conv_bn(keys[2], 160, 320, 3)
    w_b3a, b_b3a = conv_bn(keys[3], 528, 32, 1)
    w_b3b, b_b3b = conv_bn(keys[4], 32, 128, 3)
    w_b4, b_b4 = conv_bn(keys[5], 528, 128, 1)

    bf16 = jnp.bfloat16
    return {
        # merged 1x1 weights/bias for [branch1 | branch2 reduce | branch3 reduce]
        'w1': jnp.concatenate([w_b1, w_b2a, w_b3a], axis=1).astype(bf16),  # (528, 448)
        'b1': jnp.concatenate([b_b1, b_b2a, b_b3a], axis=1),               # (1, 448)
        'w2': w_b2b.astype(bf16), 'b2': b_b2b,                             # (9,160,320)/(1,320)
        'w3': w_b3b.astype(bf16), 'b3': b_b3b,                             # (9,32,128)/(1,128)
        'w4': w_b4.astype(bf16),  'b4': b_b4,                              # (528,128)/(1,128)
    }


# ----------------------------------------------------------------------------- forward

def inception4e_forward(x_nchw, params):
    x = jnp.transpose(x_nchw, (0, 2, 3, 1)).astype(jnp.float32)   # NCHW -> NHWC
    N, H, W, Cin = x.shape
    assert H % 2 == 0 and W % 2 == 0   # ceil_mode 2x2 maxpool is a no-op pad for even H, W
    Ho, Wo = H // 2, W // 2

    out_nhwc = pl.pallas_call(
        _inception4e_kernel,
        out_shape=jax.ShapeDtypeStruct((N, Ho, Wo, 832), jnp.float32),
        grid=(N,),
        in_specs=[
            pl.BlockSpec((1, H, W, Cin), lambda n: (n, 0, 0, 0)),
            pl.BlockSpec((Cin, 448), lambda n: (0, 0)),
            pl.BlockSpec((1, 448), lambda n: (0, 0)),
            pl.BlockSpec((9, 160, 320), lambda n: (0, 0, 0)),
            pl.BlockSpec((1, 320), lambda n: (0, 0)),
            pl.BlockSpec((9, 32, 128), lambda n: (0, 0, 0)),
            pl.BlockSpec((1, 128), lambda n: (0, 0)),
            pl.BlockSpec((Cin, 128), lambda n: (0, 0)),
            pl.BlockSpec((1, 128), lambda n: (0, 0)),
        ],
        out_specs=pl.BlockSpec((1, Ho, Wo, 832), lambda n: (n, 0, 0, 0)),
        compiler_params=pltpu.CompilerParams(
            dimension_semantics=("parallel",)),
    )(x, params['w1'], params['b1'], params['w2'], params['b2'],
      params['w3'], params['b3'], params['w4'], params['b4'])

    return jnp.transpose(out_nhwc, (0, 3, 1, 2))                  # NHWC -> NCHW


# ----------------------------------------------------------------------------- main

if __name__ == "__main__":
    key = jax.random.PRNGKey(0)
    kx, kp = jax.random.split(key)
    # 528 input channels are fixed by the module; small batch / spatial size.
    x = jax.random.normal(kx, (2, 528, 8, 8), jnp.float32)
    params = init_params(kp)

    fwd = jax.jit(inception4e_forward)
    out = fwd(x, params)
    jax.block_until_ready(out)
    assert out.shape == (2, 832, 4, 4), out.shape
    assert bool(jnp.all(jnp.isfinite(out)))
    print("KERNEL_OK")
</pallas_src>

<mosaic_0001>
module attributes {stable_mosaic.version = 11 : i64} {
  func.func @_inception4e_kernel(%arg0: i32, %arg1: memref<1x8x8x528xf32, #tpu.memory_space<vmem>>, %arg2: memref<528x448xbf16, #tpu.memory_space<vmem>>, %arg3: memref<1x448xf32, #tpu.memory_space<vmem>>, %arg4: memref<9x160x320xbf16, #tpu.memory_space<vmem>>, %arg5: memref<1x320xf32, #tpu.memory_space<vmem>>, %arg6: memref<9x32x128xbf16, #tpu.memory_space<vmem>>, %arg7: memref<1x128xf32, #tpu.memory_space<vmem>>, %arg8: memref<528x128xbf16, #tpu.memory_space<vmem>>, %arg9: memref<1x128xf32, #tpu.memory_space<vmem>>, %arg10: memref<1x4x4x832xf32, #tpu.memory_space<vmem>>) attributes {dimension_semantics = [#tpu.dimension_semantics<parallel>], iteration_bounds = array<i64: 2>, scalar_prefetch = 0 : i64, scratch_operands = 0 : i64, tpu.core_type = #tpu.core_type<tc>, window_params = [{transform_indices = @transform_0, window_bounds = array<i64: 1, 8, 8, 528>}, {pipeline_mode = #tpu.pipeline_mode<synchronous>, transform_indices = @transform_1, window_bounds = array<i64: 528, 448>}, {pipeline_mode = #tpu.pipeline_mode<synchronous>, transform_indices = @transform_2, window_bounds = array<i64: 1, 448>}, {pipeline_mode = #tpu.pipeline_mode<synchronous>, transform_indices = @transform_3, window_bounds = array<i64: 9, 160, 320>}, {pipeline_mode = #tpu.pipeline_mode<synchronous>, transform_indices = @transform_4, window_bounds = array<i64: 1, 320>}, {pipeline_mode = #tpu.pipeline_mode<synchronous>, transform_indices = @transform_5, window_bounds = array<i64: 9, 32, 128>}, {pipeline_mode = #tpu.pipeline_mode<synchronous>, transform_indices = @transform_6, window_bounds = array<i64: 1, 128>}, {pipeline_mode = #tpu.pipeline_mode<synchronous>, transform_indices = @transform_7, window_bounds = array<i64: 528, 128>}, {pipeline_mode = #tpu.pipeline_mode<synchronous>, transform_indices = @transform_8, window_bounds = array<i64: 1, 128>}, {transform_indices = @transform_9, window_bounds = array<i64: 1, 4, 4, 832>}]} {
    %c0 = arith.constant 0 : index
    %c0_0 = arith.constant 0 : index
    %c0_1 = arith.constant 0 : index
    %c0_2 = arith.constant 0 : index
    %0 = vector.load %arg1[%c0, %c0_0, %c0_1, %c0_2] : memref<1x8x8x528xf32, #tpu.memory_space<vmem>>, vector<1x8x8x528xf32>
    %1 = vector.shape_cast %0 : vector<1x8x8x528xf32> to vector<8x8x528xf32>
    %2 = vector.shape_cast %1 : vector<8x8x528xf32> to vector<64x528xf32>
    %3 = arith.truncf %2 : vector<64x528xf32> to vector<64x528xbf16>
    %c0_3 = arith.constant 0 : index
    %c0_4 = arith.constant 0 : index
    %4 = vector.load %arg2[%c0_3, %c0_4] : memref<528x448xbf16, #tpu.memory_space<vmem>>, vector<528x448xbf16>
    %cst = arith.constant dense<0.000000e+00> : vector<64x448xf32>
    %5 = tpu.matmul %3, %4, %cst {dimension_numbers = #tpu.dot_dimension_numbers<[1], [0], [0], [1], [0, 0, 1, 1], [], []>} : vector<64x528xbf16>, vector<528x448xbf16>, vector<64x448xf32> -> vector<64x448xf32>
    %c0_5 = arith.constant 0 : index
    %c0_6 = arith.constant 0 : index
    %6 = vector.load %arg3[%c0_5, %c0_6] : memref<1x448xf32, #tpu.memory_space<vmem>>, vector<1x448xf32>
    %7 = vector.broadcast %6 : vector<1x448xf32> to vector<64x448xf32>
    %8 = arith.addf %5, %7 : vector<64x448xf32>
    %cst_7 = arith.constant 0.000000e+00 : f32
    %9 = vector.broadcast %cst_7 : f32 to vector<64x448xf32>
    %10 = arith.maximumf %8, %9 : vector<64x448xf32>
    %11 = vector.extract_strided_slice %10 {offsets = [0, 0], sizes = [64, 256], strides = [1, 1]} : vector<64x448xf32> to vector<64x256xf32>
    %12 = vector.extract_strided_slice %10 {offsets = [0, 256], sizes = [64, 160], strides = [1, 1]} : vector<64x448xf32> to vector<64x160xf32>
    %13 = vector.extract_strided_slice %10 {offsets = [0, 416], sizes = [64, 32], strides = [1, 1]} : vector<64x448xf32> to vector<64x32xf32>
    %14 = vector.shape_cast %12 : vector<64x160xf32> to vector<8x8x160xf32>
    %cst_8 = arith.constant 0.000000e+00 : f32
    %15 = vector.broadcast %cst_8 : f32 to vector<8x1x160xf32>
    %16 = tpu.concatenate %15, %14, %15 in 1 : vector<8x1x160xf32>, vector<8x8x160xf32>, vector<8x1x160xf32> -> vector<8x10x160xf32>
    %17 = vector.shape_cast %16 : vector<8x10x160xf32> to vector<80x160xf32>
    %cst_9 = arith.constant 0.000000e+00 : f32
    %18 = vector.broadcast %cst_9 : f32 to vector<10x160xf32>
    %cst_10 = arith.constant 0.000000e+00 : f32
    %19 = vector.broadcast %cst_10 : f32 to vector<20x160xf32>
    %20 = tpu.concatenate %18, %17, %19 in 0 : vector<10x160xf32>, vector<80x160xf32>, vector<20x160xf32> -> vector<110x160xf32>
    %cst_11 = arith.constant 0.000000e+00 : f32
    %21 = vector.broadcast %cst_11 : f32 to vector<80x320xf32>
    %22 = vector.extract_strided_slice %20 {offsets = [0, 0], sizes = [80, 160], strides = [1, 1]} : vector<110x160xf32> to vector<80x160xf32>
    %23 = arith.truncf %22 : vector<80x160xf32> to vector<80x160xbf16>
    %c0_12 = arith.constant 0 : index
    %c0_13 = arith.constant 0 : index
    %c0_14 = arith.constant 0 : index
    %24 = vector.load %arg4[%c0_12, %c0_13, %c0_14] : memref<9x160x320xbf16, #tpu.memory_space<vmem>>, vector<1x160x320xbf16>
    %25 = vector.shape_cast %24 : vector<1x160x320xbf16> to vector<160x320xbf16>
    %cst_15 = arith.constant dense<0.000000e+00> : vector<80x320xf32>
    %26 = tpu.matmul %23, %25, %cst_15 {dimension_numbers = #tpu.dot_dimension_numbers<[1], [0], [0], [1], [0, 0, 1, 1], [], []>} : vector<80x160xbf16>, vector<160x320xbf16>, vector<80x320xf32> -> vector<80x320xf32>
    %27 = arith.addf %21, %26 : vector<80x320xf32>
    %28 = vector.extract_strided_slice %20 {offsets = [1, 0], sizes = [80, 160], strides = [1, 1]} : vector<110x160xf32> to vector<80x160xf32>
    %29 = arith.truncf %28 : vector<80x160xf32> to vector<80x160xbf16>
    %c1 = arith.constant 1 : index
    %c0_16 = arith.constant 0 : index
    %c0_17 = arith.constant 0 : index
    %30 = vector.load %arg4[%c1, %c0_16, %c0_17] : memref<9x160x320xbf16, #tpu.memory_space<vmem>>, vector<1x160x320xbf16>
    %31 = vector.shape_cast %30 : vector<1x160x320xbf16> to vector<160x320xbf16>
    %cst_18 = arith.constant dense<0.000000e+00> : vector<80x320xf32>
    %32 = tpu.matmul %29, %31, %cst_18 {dimension_numbers = #tpu.dot_dimension_numbers<[1], [0], [0], [1], [0, 0, 1, 1], [], []>} : vector<80x160xbf16>, vector<160x320xbf16>, vector<80x320xf32> -> vector<80x320xf32>
    %33 = arith.addf %27, %32 : vector<80x320xf32>
    %34 = vector.extract_strided_slice %20 {offsets = [2, 0], sizes = [80, 160], strides = [1, 1]} : vector<110x160xf32> to vector<80x160xf32>
    %35 = arith.truncf %34 : vector<80x160xf32> to vector<80x160xbf16>
    %c2 = arith.constant 2 : index
    %c0_19 = arith.constant 0 : index
    %c0_20 = arith.constant 0 : index
    %36 = vector.load %arg4[%c2, %c0_19, %c0_20] : memref<9x160x320xbf16, #tpu.memory_space<vmem>>, vector<1x160x320xbf16>
    %37 = vector.shape_cast %36 : vector<1x160x320xbf16> to vector<160x320xbf16>
    %cst_21 = arith.constant dense<0.000000e+00> : vector<80x320xf32>
    %38 = tpu.matmul %35, %37, %cst_21 {dimension_numbers = #tpu.dot_dimension_numbers<[1], [0], [0], [1], [0, 0, 1, 1], [], []>} : vector<80x160xbf16>, vector<160x320xbf16>, vector<80x320xf32> -> vector<80x320xf32>
    %39 = arith.addf %33, %38 : vector<80x320xf32>
    %40 = vector.extract_strided_slice %20 {offsets = [10, 0], sizes = [80, 160], strides = [1, 1]} : vector<110x160xf32> to vector<80x160xf32>
    %41 = arith.truncf %40 : vector<80x160xf32> to vector<80x160xbf16>
    %c3 = arith.constant 3 : index
    %c0_22 = arith.constant 0 : index
    %c0_23 = arith.constant 0 : index
    %42 = vector.load %arg4[%c3, %c0_22, %c0_23] : memref<9x160x320xbf16, #tpu.memory_space<vmem>>, vector<1x160x320xbf16>
    %43 = vector.shape_cast %42 : vector<1x160x320xbf16> to vector<160x320xbf16>
    %cst_24 = arith.constant dense<0.000000e+00> : vector<80x320xf32>
    %44 = tpu.matmul %41, %43, %cst_24 {dimension_numbers = #tpu.dot_dimension_numbers<[1], [0], [0], [1], [0, 0, 1, 1], [], []>} : vector<80x160xbf16>, vector<160x320xbf16>, vector<80x320xf32> -> vector<80x320xf32>
    %45 = arith.addf %39, %44 : vector<80x320xf32>
    %46 = vector.extract_strided_slice %20 {offsets = [11, 0], sizes = [80, 160], strides = [1, 1]} : vector<110x160xf32> to vector<80x160xf32>
    %47 = arith.truncf %46 : vector<80x160xf32> to vector<80x160xbf16>
    %c4 = arith.constant 4 : index
    %c0_25 = arith.constant 0 : index
    %c0_26 = arith.constant 0 : index
    %48 = vector.load %arg4[%c4, %c0_25, %c0_26] : memref<9x160x320xbf16, #tpu.memory_space<vmem>>, vector<1x160x320xbf16>
    %49 = vector.shape_cast %48 : vector<1x160x320xbf16> to vector<160x320xbf16>
    %cst_27 = arith.constant dense<0.000000e+00> : vector<80x320xf32>
    %50 = tpu.matmul %47, %49, %cst_27 {dimension_numbers = #tpu.dot_dimension_numbers<[1], [0], [0], [1], [0, 0, 1, 1], [], []>} : vector<80x160xbf16>, vector<160x320xbf16>, vector<80x320xf32> -> vector<80x320xf32>
    %51 = arith.addf %45, %50 : vector<80x320xf32>
    %52 = vector.extract_strided_slice %20 {offsets = [12, 0], sizes = [80, 160], strides = [1, 1]} : vector<110x160xf32> to vector<80x160xf32>
    %53 = arith.truncf %52 : vector<80x160xf32> to vector<80x160xbf16>
    %c5 = arith.constant 5 : index
    %c0_28 = arith.constant 0 : index
    %c0_29 = arith.constant 0 : index
    %54 = vector.load %arg4[%c5, %c0_28, %c0_29] : memref<9x160x320xbf16, #tpu.memory_space<vmem>>, vector<1x160x320xbf16>
    %55 = vector.shape_cast %54 : vector<1x160x320xbf16> to vector<160x320xbf16>
    %cst_30 = arith.constant dense<0.000000e+00> : vector<80x320xf32>
    %56 = tpu.matmul %53, %55, %cst_30 {dimension_numbers = #tpu.dot_dimension_numbers<[1], [0], [0], [1], [0, 0, 1, 1], [], []>} : vector<80x160xbf16>, vector<160x320xbf16>, vector<80x320xf32> -> vector<80x320xf32>
    %57 = arith.addf %51, %56 : vector<80x320xf32>
    %58 = vector.extract_strided_slice %20 {offsets = [20, 0], sizes = [80, 160], strides = [1, 1]} : vector<110x160xf32> to vector<80x160xf32>
    %59 = arith.truncf %58 : vector<80x160xf32> to vector<80x160xbf16>
    %c6 = arith.constant 6 : index
    %c0_31 = arith.constant 0 : index
    %c0_32 = arith.constant 0 : index
    %60 = vector.load %arg4[%c6, %c0_31, %c0_32] : memref<9x160x320xbf16, #tpu.memory_space<vmem>>, vector<1x160x320xbf16>
    %61 = vector.shape_cast %60 : vector<1x160x320xbf16> to vector<160x320xbf16>
    %cst_33 = arith.constant dense<0.000000e+00> : vector<80x320xf32>
    %62 = tpu.matmul %59, %61, %cst_33 {dimension_numbers = #tpu.dot_dimension_numbers<[1], [0], [0], [1], [0, 0, 1, 1], [], []>} : vector<80x160xbf16>, vector<160x320xbf16>, vector<80x320xf32> -> vector<80x320xf32>
    %63 = arith.addf %57, %62 : vector<80x320xf32>
    %64 = vector.extract_strided_slice %20 {offsets = [21, 0], sizes = [80, 160], strides = [1, 1]} : vector<110x160xf32> to vector<80x160xf32>
    %65 = arith.truncf %64 : vector<80x160xf32> to vector<80x160xbf16>
    %c7 = arith.constant 7 : index
    %c0_34 = arith.constant 0 : index
    %c0_35 = arith.constant 0 : index
    %66 = vector.load %arg4[%c7, %c0_34, %c0_35] : memref<9x160x320xbf16, #tpu.memory_space<vmem>>, vector<1x160x320xbf16>
    %67 = vector.shape_cast %66 : vector<1x160x320xbf16> to vector<160x320xbf16>
    %cst_36 = arith.constant dense<0.000000e+00> : vector<80x320xf32>
    %68 = tpu.matmul %65, %67, %cst_36 {dimension_numbers = #tpu.dot_dimension_numbers<[1], [0], [0], [1], [0, 0, 1, 1], [], []>} : vector<80x160xbf16>, vector<160x320xbf16>, vector<80x320xf32> -> vector<80x320xf32>
    %69 = arith.addf %63, %68 : vector<80x320xf32>
    %70 = vector.extract_strided_slice %20 {offsets = [22, 0], sizes = [80, 160], strides = [1, 1]} : vector<110x160xf32> to vector<80x160xf32>
    %71 = arith.truncf %70 : vector<80x160xf32> to vector<80x160xbf16>
    %c8 = arith.constant 8 : index
    %c0_37 = arith.constant 0 : index
    %c0_38 = arith.constant 0 : index
    %72 = vector.load %arg4[%c8, %c0_37, %c0_38] : memref<9x160x320xbf16, #tpu.memory_space<vmem>>, vector<1x160x320xbf16>
    %73 = vector.shape_cast %72 : vector<1x160x320xbf16> to vector<160x320xbf16>
    %cst_39 = arith.constant dense<0.000000e+00> : vector<80x320xf32>
    %74 = tpu.matmul %71, %73, %cst_39 {dimension_numbers = #tpu.dot_dimension_numbers<[1], [0], [0], [1], [0, 0, 1, 1], [], []>} : vector<80x160xbf16>, vector<160x320xbf16>, vector<80x320xf32> -> vector<80x320xf32>
    %75 = arith.addf %69, %74 : vector<80x320xf32>
    %c0_40 = arith.constant 0 : index
    %c0_41 = arith.constant 0 : index
    %76 = vector.load %arg5[%c0_40, %c0_41] : memref<1x320xf32, #tpu.memory_space<vmem>>, vector<1x320xf32>
    %77 = vector.broadcast %76 : vector<1x320xf32> to vector<80x320xf32>
    %78 = arith.addf %75, %77 : vector<80x320xf32>
    %cst_42 = arith.constant 0.000000e+00 : f32
    %79 = vector.broadcast %cst_42 : f32 to vector<80x320xf32>
    %80 = arith.maximumf %78, %79 : vector<80x320xf32>
    %81 = vector.shape_cast %80 : vector<80x320xf32> to vector<8x10x320xf32>
    %82 = vector.extract_strided_slice %81 {offsets = [0, 0, 0], sizes = [8, 8, 320], strides = [1, 1, 1]} : vector<8x10x320xf32> to vector<8x8x320xf32>
    %83 = vector.shape_cast %13 : vector<64x32xf32> to vector<8x8x32xf32>
    %cst_43 = arith.constant 0.000000e+00 : f32
    %84 = vector.broadcast %cst_43 : f32 to vector<8x1x32xf32>
    %85 = tpu.concatenate %84, %83, %84 in 1 : vector<8x1x32xf32>, vector<8x8x32xf32>, vector<8x1x32xf32> -> vector<8x10x32xf32>
    %86 = vector.shape_cast %85 : vector<8x10x32xf32> to vector<80x32xf32>
    %cst_44 = arith.constant 0.000000e+00 : f32
    %87 = vector.broadcast %cst_44 : f32 to vector<10x32xf32>
    %cst_45 = arith.constant 0.000000e+00 : f32
    %88 = vector.broadcast %cst_45 : f32 to vector<20x32xf32>
    %89 = tpu.concatenate %87, %86, %88 in 0 : vector<10x32xf32>, vector<80x32xf32>, vector<20x32xf32> -> vector<110x32xf32>
    %cst_46 = arith.constant 0.000000e+00 : f32
    %90 = vector.broadcast %cst_46 : f32 to vector<80x128xf32>
    %91 = vector.extract_strided_slice %89 {offsets = [0, 0], sizes = [80, 32], strides = [1, 1]} : vector<110x32xf32> to vector<80x32xf32>
    %92 = arith.truncf %91 : vector<80x32xf32> to vector<80x32xbf16>
    %c0_47 = arith.constant 0 : index
    %c0_48 = arith.constant 0 : index
    %c0_49 = arith.constant 0 : index
    %93 = vector.load %arg6[%c0_47, %c0_48, %c0_49] : memref<9x32x128xbf16, #tpu.memory_space<vmem>>, vector<1x32x128xbf16>
    %94 = vector.shape_cast %93 : vector<1x32x128xbf16> to vector<32x128xbf16>
    %cst_50 = arith.constant dense<0.000000e+00> : vector<80x128xf32>
    %95 = tpu.matmul %92, %94, %cst_50 {dimension_numbers = #tpu.dot_dimension_numbers<[1], [0], [0], [1], [0, 0, 1, 1], [], []>} : vector<80x32xbf16>, vector<32x128xbf16>, vector<80x128xf32> -> vector<80x128xf32>
    %96 = arith.addf %90, %95 : vector<80x128xf32>
    %97 = vector.extract_strided_slice %89 {offsets = [1, 0], sizes = [80, 32], strides = [1, 1]} : vector<110x32xf32> to vector<80x32xf32>
    %98 = arith.truncf %97 : vector<80x32xf32> to vector<80x32xbf16>
    %c1_51 = arith.constant 1 : index
    %c0_52 = arith.constant 0 : index
    %c0_53 = arith.constant 0 : index
    %99 = vector.load %arg6[%c1_51, %c0_52, %c0_53] : memref<9x32x128xbf16, #tpu.memory_space<vmem>>, vector<1x32x128xbf16>
    %100 = vector.shape_cast %99 : vector<1x32x128xbf16> to vector<32x128xbf16>
    %cst_54 = arith.constant dense<0.000000e+00> : vector<80x128xf32>
    %101 = tpu.matmul %98, %100, %cst_54 {dimension_numbers = #tpu.dot_dimension_numbers<[1], [0], [0], [1], [0, 0, 1, 1], [], []>} : vector<80x32xbf16>, vector<32x128xbf16>, vector<80x128xf32> -> vector<80x128xf32>
    %102 = arith.addf %96, %101 : vector<80x128xf32>
    %103 = vector.extract_strided_slice %89 {offsets = [2, 0], sizes = [80, 32], strides = [1, 1]} : vector<110x32xf32> to vector<80x32xf32>
    %104 = arith.truncf %103 : vector<80x32xf32> to vector<80x32xbf16>
    %c2_55 = arith.constant 2 : index
    %c0_56 = arith.constant 0 : index
    %c0_57 = arith.constant 0 : index
    %105 = vector.load %arg6[%c2_55, %c0_56, %c0_57] : memref<9x32x128xbf16, #tpu.memory_space<vmem>>, vector<1x32x128xbf16>
    %106 = vector.shape_cast %105 : vector<1x32x128xbf16> to vector<32x128xbf16>
    %cst_58 = arith.constant dense<0.000000e+00> : vector<80x128xf32>
    %107 = tpu.matmul %104, %106, %cst_58 {dimension_numbers = #tpu.dot_dimension_numbers<[1], [0], [0], [1], [0, 0, 1, 1], [], []>} : vector<80x32xbf16>, vector<32x128xbf16>, vector<80x128xf32> -> vector<80x128xf32>
    %108 = arith.addf %102, %107 : vector<80x128xf32>
    %109 = vector.extract_strided_slice %89 {offsets = [10, 0], sizes = [80, 32], strides = [1, 1]} : vector<110x32xf32> to vector<80x32xf32>
    %110 = arith.truncf %109 : vector<80x32xf32> to vector<80x32xbf16>
    %c3_59 = arith.constant 3 : index
    %c0_60 = arith.constant 0 : index
    %c0_61 = arith.constant 0 : index
    %111 = vector.load %arg6[%c3_59, %c0_60, %c0_61] : memref<9x32x128xbf16, #tpu.memory_space<vmem>>, vector<1x32x128xbf16>
    %112 = vector.shape_cast %111 : vector<1x32x128xbf16> to vector<32x128xbf16>
    %cst_62 = arith.constant dense<0.000000e+00> : vector<80x128xf32>
    %113 = tpu.matmul %110, %112, %cst_62 {dimension_numbers = #tpu.dot_dimension_numbers<[1], [0], [0], [1], [0, 0, 1, 1], [], []>} : vector<80x32xbf16>, vector<32x128xbf16>, vector<80x128xf32> -> vector<80x128xf32>
    %114 = arith.addf %108, %113 : vector<80x128xf32>
    %115 = vector.extract_strided_slice %89 {offsets = [11, 0], sizes = [80, 32], strides = [1, 1]} : vector<110x32xf32> to vector<80x32xf32>
    %116 = arith.truncf %115 : vector<80x32xf32> to vector<80x32xbf16>
    %c4_63 = arith.constant 4 : index
    %c0_64 = arith.constant 0 : index
    %c0_65 = arith.constant 0 : index
    %117 = vector.load %arg6[%c4_63, %c0_64, %c0_65] : memref<9x32x128xbf16, #tpu.memory_space<vmem>>, vector<1x32x128xbf16>
    %118 = vector.shape_cast %117 : vector<1x32x128xbf16> to vector<32x128xbf16>
    %cst_66 = arith.constant dense<0.000000e+00> : vector<80x128xf32>
    %119 = tpu.matmul %116, %118, %cst_66 {dimension_numbers = #tpu.dot_dimension_numbers<[1], [0], [0], [1], [0, 0, 1, 1], [], []>} : vector<80x32xbf16>, vector<32x128xbf16>, vector<80x128xf32> -> vector<80x128xf32>
    %120 = arith.addf %114, %119 : vector<80x128xf32>
    %121 = vector.extract_strided_slice %89 {offsets = [12, 0], sizes = [80, 32], strides = [1, 1]} : vector<110x32xf32> to vector<80x32xf32>
    %122 = arith.truncf %121 : vector<80x32xf32> to vector<80x32xbf16>
    %c5_67 = arith.constant 5 : index
    %c0_68 = arith.constant 0 : index
    %c0_69 = arith.constant 0 : index
    %123 = vector.load %arg6[%c5_67, %c0_68, %c0_69] : memref<9x32x128xbf16, #tpu.memory_space<vmem>>, vector<1x32x128xbf16>
    %124 = vector.shape_cast %123 : vector<1x32x128xbf16> to vector<32x128xbf16>
    %cst_70 = arith.constant dense<0.000000e+00> : vector<80x128xf32>
    %125 = tpu.matmul %122, %124, %cst_70 {dimension_numbers = #tpu.dot_dimension_numbers<[1], [0], [0], [1], [0, 0, 1, 1], [], []>} : vector<80x32xbf16>, vector<32x128xbf16>, vector<80x128xf32> -> vector<80x128xf32>
    %126 = arith.addf %120, %125 : vector<80x128xf32>
    %127 = vector.extract_strided_slice %89 {offsets = [20, 0], sizes = [80, 32], strides = [1, 1]} : vector<110x32xf32> to vector<80x32xf32>
    %128 = arith.truncf %127 : vector<80x32xf32> to vector<80x32xbf16>
    %c6_71 = arith.constant 6 : index
    %c0_72 = arith.constant 0 : index
    %c0_73 = arith.constant 0 : index
    %129 = vector.load %arg6[%c6_71, %c0_72, %c0_73] : memref<9x32x128xbf16, #tpu.memory_space<vmem>>, vector<1x32x128xbf16>
    %130 = vector.shape_cast %129 : vector<1x32x128xbf16> to vector<32x128xbf16>
    %cst_74 = arith.constant dense<0.000000e+00> : vector<80x128xf32>
    %131 = tpu.matmul %128, %130, %cst_74 {dimension_numbers = #tpu.dot_dimension_numbers<[1], [0], [0], [1], [0, 0, 1, 1], [], []>} : vector<80x32xbf16>, vector<32x128xbf16>, vector<80x128xf32> -> vector<80x128xf32>
    %132 = arith.addf %126, %131 : vector<80x128xf32>
    %133 = vector.extract_strided_slice %89 {offsets = [21, 0], sizes = [80, 32], strides = [1, 1]} : vector<110x32xf32> to vector<80x32xf32>
    %134 = arith.truncf %133 : vector<80x32xf32> to vector<80x32xbf16>
    %c7_75 = arith.constant 7 : index
    %c0_76 = arith.constant 0 : index
    %c0_77 = arith.constant 0 : index
    %135 = vector.load %arg6[%c7_75, %c0_76, %c0_77] : memref<9x32x128xbf16, #tpu.memory_space<vmem>>, vector<1x32x128xbf16>
    %136 = vector.shape_cast %135 : vector<1x32x128xbf16> to vector<32x128xbf16>
    %cst_78 = arith.constant dense<0.000000e+00> : vector<80x128xf32>
    %137 = tpu.matmul %134, %136, %cst_78 {dimension_numbers = #tpu.dot_dimension_numbers<[1], [0], [0], [1], [0, 0, 1, 1], [], []>} : vector<80x32xbf16>, vector<32x128xbf16>, vector<80x128xf32> -> vector<80x128xf32>
    %138 = arith.addf %132, %137 : vector<80x128xf32>
    %139 = vector.extract_strided_slice %89 {offsets = [22, 0], sizes = [80, 32], strides = [1, 1]} : vector<110x32xf32> to vector<80x32xf32>
    %140 = arith.truncf %139 : vector<80x32xf32> to vector<80x32xbf16>
    %c8_79 = arith.constant 8 : index
    %c0_80 = arith.constant 0 : index
    %c0_81 = arith.constant 0 : index
    %141 = vector.load %arg6[%c8_79, %c0_80, %c0_81] : memref<9x32x128xbf16, #tpu.memory_space<vmem>>, vector<1x32x128xbf16>
    %142 = vector.shape_cast %141 : vector<1x32x128xbf16> to vector<32x128xbf16>
    %cst_82 = arith.constant dense<0.000000e+00> : vector<80x128xf32>
    %143 = tpu.matmul %140, %142, %cst_82 {dimension_numbers = #tpu.dot_dimension_numbers<[1], [0], [0], [1], [0, 0, 1, 1], [], []>} : vector<80x32xbf16>, vector<32x128xbf16>, vector<80x128xf32> -> vector<80x128xf32>
    %144 = arith.addf %138, %143 : vector<80x128xf32>
    %c0_83 = arith.constant 0 : index
    %c0_84 = arith.constant 0 : index
    %145 = vector.load %arg7[%c0_83, %c0_84] : memref<1x128xf32, #tpu.memory_space<vmem>>, vector<1x128xf32>
    %146 = vector.broadcast %145 : vector<1x128xf32> to vector<80x128xf32>
    %147 = arith.addf %144, %146 : vector<80x128xf32>
    %cst_85 = arith.constant 0.000000e+00 : f32
    %148 = vector.broadcast %cst_85 : f32 to vector<80x128xf32>
    %149 = arith.maximumf %147, %148 : vector<80x128xf32>
    %150 = vector.shape_cast %149 : vector<80x128xf32> to vector<8x10x128xf32>
    %151 = vector.extract_strided_slice %150 {offsets = [0, 0, 0], sizes = [8, 8, 128], strides = [1, 1, 1]} : vector<8x10x128xf32> to vector<8x8x128xf32>
    %cst_86 = arith.constant 0xFF800000 : f32
    %152 = vector.broadcast %cst_86 : f32 to vector<8x1x528xf32>
    %153 = tpu.concatenate %152, %1, %152 in 1 : vector<8x1x528xf32>, vector<8x8x528xf32>, vector<8x1x528xf32> -> vector<8x10x528xf32>
    %154 = vector.extract_strided_slice %153 {offsets = [0, 0, 0], sizes = [8, 8, 528], strides = [1, 1, 1]} : vector<8x10x528xf32> to vector<8x8x528xf32>
    %155 = vector.extract_strided_slice %153 {offsets = [0, 1, 0], sizes = [8, 8, 528], strides = [1, 1, 1]} : vector<8x10x528xf32> to vector<8x8x528xf32>
    %156 = arith.maximumf %154, %155 : vector<8x8x528xf32>
    %157 = vector.extract_strided_slice %153 {offsets = [0, 2, 0], sizes = [8, 8, 528], strides = [1, 1, 1]} : vector<8x10x528xf32> to vector<8x8x528xf32>
    %158 = arith.maximumf %156, %157 : vector<8x8x528xf32>
    %cst_87 = arith.constant 0xFF800000 : f32
    %159 = vector.broadcast %cst_87 : f32 to vector<1x8x528xf32>
    %160 = tpu.concatenate %159, %158, %159 in 0 : vector<1x8x528xf32>, vector<8x8x528xf32>, vector<1x8x528xf32> -> vector<10x8x528xf32>
    %161 = vector.extract_strided_slice %160 {offsets = [0, 0, 0], sizes = [8, 8, 528], strides = [1, 1, 1]} : vector<10x8x528xf32> to vector<8x8x528xf32>
    %162 = vector.extract_strided_slice %160 {offsets = [1, 0, 0], sizes = [8, 8, 528], strides = [1, 1, 1]} : vector<10x8x528xf32> to vector<8x8x528xf32>
    %163 = arith.maximumf %161, %162 : vector<8x8x528xf32>
    %164 = vector.extract_strided_slice %160 {offsets = [2, 0, 0], sizes = [8, 8, 528], strides = [1, 1, 1]} : vector<10x8x528xf32> to vector<8x8x528xf32>
    %165 = arith.maximumf %163, %164 : vector<8x8x528xf32>
    %166 = vector.shape_cast %165 : vector<8x8x528xf32> to vector<64x528xf32>
    %167 = arith.truncf %166 : vector<64x528xf32> to vector<64x528xbf16>
    %c0_88 = arith.constant 0 : index
    %c0_89 = arith.constant 0 : index
    %168 = vector.load %arg8[%c0_88, %c0_89] : memref<528x128xbf16, #tpu.memory_space<vmem>>, vector<528x128xbf16>
    %cst_90 = arith.constant dense<0.000000e+00> : vector<64x128xf32>
    %169 = tpu.matmul %167, %168, %cst_90 {dimension_numbers = #tpu.dot_dimension_numbers<[1], [0], [0], [1], [0, 0, 1, 1], [], []>} : vector<64x528xbf16>, vector<528x128xbf16>, vector<64x128xf32> -> vector<64x128xf32>
    %c0_91 = arith.constant 0 : index
    %c0_92 = arith.constant 0 : index
    %170 = vector.load %arg9[%c0_91, %c0_92] : memref<1x128xf32, #tpu.memory_space<vmem>>, vector<1x128xf32>
    %171 = vector.broadcast %170 : vector<1x128xf32> to vector<64x128xf32>
    %172 = arith.addf %169, %171 : vector<64x128xf32>
    %cst_93 = arith.constant 0.000000e+00 : f32
    %173 = vector.broadcast %cst_93 : f32 to vector<64x128xf32>
    %174 = arith.maximumf %172, %173 : vector<64x128xf32>
    %175 = vector.shape_cast %11 : vector<64x256xf32> to vector<8x8x256xf32>
    %176 = vector.shape_cast %174 : vector<64x128xf32> to vector<8x8x128xf32>
    %177 = tpu.concatenate %175, %82, %151, %176 in 2 : vector<8x8x256xf32>, vector<8x8x320xf32>, vector<8x8x128xf32>, vector<8x8x128xf32> -> vector<8x8x832xf32>
    %178 = vector.shape_cast %177 : vector<8x8x832xf32> to vector<4x2x8x832xf32>
    %cst_94 = arith.constant dense<0xFF800000> : vector<4x8x832xf32>
    %179 = vector.multi_reduction <maximumf>, %178, %cst_94 [1] : vector<4x2x8x832xf32> to vector<4x8x832xf32>
    %180 = vector.shape_cast %179 : vector<4x8x832xf32> to vector<4x4x2x832xf32>
    %cst_95 = arith.constant dense<0xFF800000> : vector<4x4x832xf32>
    %181 = vector.multi_reduction <maximumf>, %180, %cst_95 [2] : vector<4x4x2x832xf32> to vector<4x4x832xf32>
    %c0_96 = arith.constant 0 : index
    %c0_97 = arith.constant 0 : index
    %c0_98 = arith.constant 0 : index
    %c0_99 = arith.constant 0 : index
    %182 = vector.load %arg10[%c0_96, %c0_97, %c0_98, %c0_99] : memref<1x4x4x832xf32, #tpu.memory_space<vmem>>, vector<1x4x4x832xf32>
    %183 = vector.shape_cast %182 : vector<1x4x4x832xf32> to vector<4x4x832xf32>
    %184 = vector.shape_cast %181 : vector<4x4x832xf32> to vector<1x4x4x832xf32>
    tpu.vector_store %arg10[%c0_96, %c0_97, %c0_98, %c0_99], %184 {strides = array<i32>} : memref<1x4x4x832xf32, #tpu.memory_space<vmem>>, vector<1x4x4x832xf32>,
    return
  }
  func.func @transform_0(%arg0: i32) -> (i32, i32, i32, i32) {
    %c0_i32 = arith.constant 0 : i32
    %c0_i32_0 = arith.constant 0 : i32
    %c0_i32_1 = arith.constant 0 : i32
    %c0_i32_2 = arith.constant 0 : i32
    return %arg0, %c0_i32, %c0_i32_0, %c0_i32_1 : i32, i32, i32, i32
  }
  func.func @transform_1(%arg0: i32) -> (i32, i32) {
    %c0_i32 = arith.constant 0 : i32
    %c0_i32_0 = arith.constant 0 : i32
    %c0_i32_1 = arith.constant 0 : i32
    return %c0_i32, %c0_i32_0 : i32, i32
  }
  func.func @transform_2(%arg0: i32) -> (i32, i32) {
    %c0_i32 = arith.constant 0 : i32
    %c0_i32_0 = arith.constant 0 : i32
    %c0_i32_1 = arith.constant 0 : i32
    return %c0_i32, %c0_i32_0 : i32, i32
  }
  func.func @transform_3(%arg0: i32) -> (i32, i32, i32) {
    %c0_i32 = arith.constant 0 : i32
    %c0_i32_0 = arith.constant 0 : i32
    %c0_i32_1 = arith.constant 0 : i32
    %c0_i32_2 = arith.constant 0 : i32
    return %c0_i32, %c0_i32_0, %c0_i32_1 : i32, i32, i32
  }
  func.func @transform_4(%arg0: i32) -> (i32, i32) {
    %c0_i32 = arith.constant 0 : i32
    %c0_i32_0 = arith.constant 0 : i32
    %c0_i32_1 = arith.constant 0 : i32
    return %c0_i32, %c0_i32_0 : i32, i32
  }
  func.func @transform_5(%arg0: i32) -> (i32, i32, i32) {
    %c0_i32 = arith.constant 0 : i32
    %c0_i32_0 = arith.constant 0 : i32
    %c0_i32_1 = arith.constant 0 : i32
    %c0_i32_2 = arith.constant 0 : i32
    return %c0_i32, %c0_i32_0, %c0_i32_1 : i32, i32, i32
  }
  func.func @transform_6(%arg0: i32) -> (i32, i32) {
    %c0_i32 = arith.constant 0 : i32
    %c0_i32_0 = arith.constant 0 : i32
    %c0_i32_1 = arith.constant 0 : i32
    return %c0_i32, %c0_i32_0 : i32, i32
  }
  func.func @transform_7(%arg0: i32) -> (i32, i32) {
    %c0_i32 = arith.constant 0 : i32
    %c0_i32_0 = arith.constant 0 : i32
    %c0_i32_1 = arith.constant 0 : i32
    return %c0_i32, %c0_i32_0 : i32, i32
  }
  func.func @transform_8(%arg0: i32) -> (i32, i32) {
    %c0_i32 = arith.constant 0 : i32
    %c0_i32_0 = arith.constant 0 : i32
    %c0_i32_1 = arith.constant 0 : i32
    return %c0_i32, %c0_i32_0 : i32, i32
  }
  func.func @transform_9(%arg0: i32) -> (i32, i32, i32, i32) {
    %c0_i32 = arith.constant 0 : i32
    %c0_i32_0 = arith.constant 0 : i32
    %c0_i32_1 = arith.constant 0 : i32
    %c0_i32_2 = arith.constant 0 : i32
    return %arg0, %c0_i32, %c0_i32_0, %c0_i32_1 : i32, i32, i32, i32
  }
}

</mosaic_0001>

<bundles_post_ra>
// kernel: inception4e_forward.1
= control target key start
LH: loop header
LB: loop body
LE: loop exit
PB: predicated region body
PF: predicated region fallthrough
CT: control target
= control target key end

     0   :  { %s20125_s0 = inlined_call_operand.hbm [shape: f32[2,8,8,528], index: 0, kind: input, shape index: {}]   ;;  %s20126_s1 = inlined_call_operand.hbm [shape: bf16[528,448], index: 1, kind: input, shape index: {}]   ;;  %s20127_s2 = inlined_call_operand.hbm [shape: f32[1,448], index: 2, kind: input, shape index: {}]   ;;  %s20128_s3 = inlined_call_operand.hbm [shape: bf16[9,160,320], index: 3, kind: input, shape index: {}]   ;;  %s20129_s4 = inlined_call_operand.hbm [shape: f32[1,320], index: 4, kind: input, shape index: {}]   ;;  %s20130_s5 = inlined_call_operand.hbm [shape: bf16[9,32,128], index: 5, kind: input, shape index: {}]   ;;  %s20131_s6 = inlined_call_operand.hbm [shape: f32[1,128], index: 6, kind: input, shape index: {}]   ;;  %s20132_s7 = inlined_call_operand.hbm [shape: bf16[528,128], index: 7, kind: input, shape index: {}]   ;;  %s20133_s8 = inlined_call_operand.hbm [shape: f32[1,128], index: 8, kind: input, shape index: {}]   ;;  %s20134_s9 = inlined_call_operand.hbm [shape: f32[2,4,4,832], index: 9, kind: output, shape index: {}]  }
   0x1   :  { %20370 = sst [smem:[#allocation118_spill]] %s20126_s1 }
   0x2   :  { %20371 = sst [smem:[#allocation119_spill]] %s20127_s2 }
   0x3   :  { %20372 = sst [smem:[#allocation120_spill]] %s20128_s3 }
   0x4   :  { %14 = vsyncpa [#allocation3], 0 }
   0x5   :  { %16 = vsyncpa [#allocation3 + $0x1], 0 }
   0x6   :  { %17 = vsyncpa [#allocation6], 0 }
   0x7   :  { %18 = vsyncpa [#allocation9], 0 }
   0x8   :  { %19 = vsyncpa [#allocation12], 0 }
   0x9   :  { %20 = vsyncpa [#allocation15], 0 }
   0xa   :  { %21 = vsyncpa [#allocation4], 0 }
   0xb   :  { %23 = vsyncpa [#allocation4 + $0x1], 0  ;;  %s14956_s30 = smov 0   ;;  %s14958_s10 = smov 0  }
   0xc   :  { %s14960_s11 = smov 0   ;;  %s14962_s12 = smov 0  }
   0xd LB: > { %s14878_s13 = smov [#allocation5]   ;;  %s14977_s15 = sadd.s32 4294967295, %s14876_s12   ;;  %s14876_s12 = sphi %s14962_s12, %s21048_s12   ;;  %s14872_s11 = sphi %s14960_s11, %s21047_s11   ;;  %s14868_s10 = sphi %s14958_s10, %s21046_s10   ;;  %s14864_s30 = sphi %s14956_s30, %s21045_s30  }
   0xe   : > { %s266_s14 = sshll.u32 %s14878_s13, 4  ;;  %p12712_p0 = scmp.ge.s32.totalorder %s14876_s12, 1  ;;  %s267_s14 = int_to_ptr.vmem [resolvable:$true] %s266_s14 }
   0xf   : > { %p20135_p1 = scmp.eq.s32.totalorder %s14977_s15, 0  ;;  %p254_p2 = scmp.lt.s32.totalorder %s14876_s12, 3 }
  0x10   : > { %s14879_s17 = smov [#allocation8]   ;;  %s14880_s20 = smov [#allocation11]  }
  0x11   : > { %p14982_p3 = pnand %p12712_p0, %p254_p2  ;;  %s290_s18 = sshll.u32 %s14879_s17, 4  ;;  %s14995_s18 = int_to_ptr.vmem [resolvable:$true] %s290_s18 }
  0x12   : > { %s14997_s21 = sshll.u32 %s14880_s20, 4  ;;  %s14571_s23 = scalar_lea.vmem %s267_s14, 16896  ;;  %s315_s21 = int_to_ptr.vmem [resolvable:$true] %s14997_s21 }
  0x13   : > { %s20373_s16 = scalar_select %p14982_p3, 1, 0 }
  0x14   : > { %p13808_p5 = pneg %p14982_p3  ;;  %p14572_p8 = scmp.ne.s32.totalorder %s267_s14, %s14571_s23 }
  0x15   : > { %p14579_p11 = scmp.lt.s32.totalorder %s267_s14, %s267_s14  ;;  %p14580_p12 = scmp.lt.s32.totalorder %s14571_s23, %s14571_s23 }
  0x16   : > { %p14991_p6 = pnand %p13808_p5, %p20135_p1 }
  0x17   : > { %p14581_p13 = por %p14580_p12, %p14579_p11 }
  0x18   : > { %p15001_p7 = pneg %p14991_p6 }
  0x1a   : > { %p14574_p9 = pnand %p14572_p8, %p15001_p7 }
  0x1c   : > { %p14575_p10 = pneg %p14574_p9 }
  0x1e   : > { %p14582_p0 = pnand %p14581_p13, %p14575_p10 }
  0x20   : > { %14585 = shalt.err (!%p14582_p0)
}
  0x21   : > { %s14881_s24 = smov 256   ;;  %s14882_s25 = smov 16  }
  0x22   : > { %s20376_s1 = sld [smem:[#allocation118_spill]]  ;;  %s14597_s28 = scalar_lea.vmem %s14995_s18, 34560 }
  0x23   : > { %p14598_p2 = scmp.ne.s32.totalorder %s14995_s18, %s14597_s28  ;;  %p14605_p9 = scmp.lt.s32.totalorder %s14995_s18, %s14995_s18 }
  0x24   : > { %p14606_p10 = scmp.lt.s32.totalorder %s14597_s28, %s14597_s28 }
  0x25   : > { %p14600_p5 = pnand %p14598_p2, %p15001_p7 }
  0x26   : > { %p14607_p11 = por %p14606_p10, %p14605_p9 }
  0x27   : > { %p14601_p8 = pneg %p14600_p5 }
  0x28   : > { %13811 = dma.hbm_to_vmem [thread:$0]  (!%p14991_p6), %s20376_s1, 16896, %s267_s14, [#allocation6], %s14881_s24, %s14881_s24, %s14882_s25  }
  0x29   : > { %p14608_p12 = pnand %p14607_p11, %p14601_p8 }
  0x2b   : > { %14611 = shalt.err (!%p14608_p12)
}
  0x2c   : > { %s14883_s29 = smov 192   ;;  %s14884_s13 = smov 12  }
  0x2d   : > { %s20377_s3 = sld [smem:[#allocation120_spill]]  ;;  %s14623_s20 = scalar_lea.vmem %s315_s21, 2304 }
  0x2e   : > { %p14624_p13 = scmp.ne.s32.totalorder %s315_s21, %s14623_s20  ;;  %p14631_p5 = scmp.lt.s32.totalorder %s315_s21, %s315_s21 }
  0x2f   : > { %p14632_p8 = scmp.lt.s32.totalorder %s14623_s20, %s14623_s20 }
  0x30   : > { %p14626_p0 = pnand %p14624_p13, %p15001_p7 }
  0x31   : > { %p14633_p9 = por %p14632_p8, %p14631_p5 }
  0x32   : > { %p14627_p2 = pneg %p14626_p0 }
  0x33   : > { %13817 = dma.hbm_to_vmem [thread:$0]  (!%p14991_p6), %s20377_s3, 34560, %s14995_s18, [#allocation9], %s14883_s29, %s14883_s29, %s14884_s13  }
  0x34   : > { %p14634_p10 = pnand %p14633_p9, %p14627_p2 }
  0x36   : > { %14637 = shalt.err (!%p14634_p10)
}
  0x37   : > { %s14885_s23 = smov 64   ;;  %s14886_s24 = smov 4  }
  0x38   : > { %13823 = dma.hbm_to_vmem [thread:$0]  (!%p14991_p6), %s20130_s5, 2304, %s315_s21, [#allocation12], %s14885_s23, %s14885_s23, %s14886_s24  }
  0x39   : > { %s14887_s18 = smov [#allocation14]   ;;  %s14888_s28 = smov [#allocation7]  }
  0x3a   : > { %s338_s27 = sshll.u32 %s14887_s18, 4  ;;  %s280_s29 = sshll.u32 %s14888_s28, 4  ;;  %s339_s27 = int_to_ptr.vmem [resolvable:$true] %s338_s27  ;;  %s281_s29 = int_to_ptr.vmem [resolvable:$true] %s280_s29 }
  0x3b   : > { %s14649_s13 = scalar_lea.vmem %s339_s27, 4224  ;;  %p14657_p0 = scmp.lt.s32.totalorder %s339_s27, %s339_s27 }
  0x3c   : > { %p14650_p11 = scmp.ne.s32.totalorder %s339_s27, %s14649_s13  ;;  %p14658_p2 = scmp.lt.s32.totalorder %s14649_s13, %s14649_s13 }
  0x3e   : > { %p14652_p12 = pnand %p14650_p11, %p15001_p7  ;;  %p14659_p5 = por %p14658_p2, %p14657_p0 }
  0x40   : > { %p14653_p13 = pneg %p14652_p12 }
  0x42   : > { %p14660_p8 = pnand %p14659_p5, %p14653_p13 }
  0x44   : > { %14663 = shalt.err (!%p14660_p8)
}
  0x45   : > { %13829 = dma.hbm_to_vmem [thread:$0]  (!%p14991_p6), %s20132_s7, 4224, %s339_s27, [#allocation15], %s14885_s23, %s14885_s23, %s14886_s24  }
  0x46   : > { %s14675_s21 = scalar_lea.vmem %s281_s29, 64  ;;  %p14683_p11 = scmp.lt.s32.totalorder %s281_s29, %s281_s29 }
  0x47   : > { %p14676_p9 = scmp.ne.s32.totalorder %s281_s29, %s14675_s21  ;;  %p14684_p12 = scmp.lt.s32.totalorder %s14675_s21, %s14675_s21 }
  0x49   : > { %p14678_p10 = pnand %p14676_p9, %p15001_p7  ;;  %p14685_p1 = por %p14684_p12, %p14683_p11 }
  0x4b   : > { %p14679_p4 = pneg %p14678_p10 }
  0x4d   : > { %p14686_p3 = pnand %p14685_p1, %p14679_p4 }
  0x4f   : > { %14689 = shalt.err (!%p14686_p3)
}
  0x50   : > { %s20378_s2 = sld [smem:[#allocation119_spill]]  ;;  %s14889_s26 = smov [#allocation10]  }
  0x51   : > { %s304_s23 = sshll.u32 %s14889_s26, 4  ;;  %s14890_s24 = smov [#allocation13]   ;;  %s305_s23 = int_to_ptr.vmem [resolvable:$true] %s304_s23 }
  0x52   : > { %s328_s18 = sshll.u32 %s14890_s24, 4  ;;  %s14701_s27 = scalar_lea.vmem %s305_s23, 48  ;;  %s329_s18 = int_to_ptr.vmem [resolvable:$true] %s328_s18 }
  0x53   : > { %p14702_p13 = scmp.ne.s32.totalorder %s305_s23, %s14701_s27  ;;  %s14708_s28 = scalar_lea.vmem %s305_s23, 64 }
  0x54   : > { %p14709_p1 = scmp.lt.s32.totalorder %s305_s23, %s305_s23  ;;  %p14710_p3 = scmp.lt.s32.totalorder %s14708_s28, %s14701_s27 }
  0x55   : > { %p14704_p0 = pnand %p14702_p13, %p15001_p7 }
  0x56   : > { %13814 = dma.hbm_to_vmem [thread:$0]  (!%p14991_p6), %s20378_s2, 64, %s281_s29, [#allocation6]  }
  0x57   : > { %p14705_p2 = pneg %p14704_p0  ;;  %p14711_p4 = por %p14710_p3, %p14709_p1 }
  0x59   : > { %p14712_p5 = pnand %p14711_p4, %p14705_p2 }
  0x5b   : > { %14715 = shalt.err (!%p14712_p5)
}
  0x5c   : > { %13820 = dma.hbm_to_vmem [thread:$0]  (!%p14991_p6), %s20129_s4, 48, %s305_s23, [#allocation9]  }
  0x5d   : > { %s14727_s17 = scalar_lea.vmem %s329_s18, 16  ;;  %s14734_s14 = scalar_lea.vmem %s329_s18, 32 }
  0x5e   : > { %p14728_p8 = scmp.ne.s32.totalorder %s329_s18, %s14727_s17  ;;  %p14735_p11 = scmp.lt.s32.totalorder %s329_s18, %s329_s18 }
  0x5f   : > { %p14736_p12 = scmp.lt.s32.totalorder %s14734_s14, %s14727_s17 }
  0x60   : > { %p14730_p9 = pnand %p14728_p8, %p15001_p7 }
  0x61   : > { %p14737_p13 = por %p14736_p12, %p14735_p11 }
  0x62   : > { %p14731_p10 = pneg %p14730_p9 }
  0x64   : > { %p14738_p0 = pnand %p14737_p13, %p14731_p10 }
  0x66   : > { %14741 = shalt.err (!%p14738_p0)
}
  0x67   : > { %13826 = dma.hbm_to_vmem [thread:$0]  (!%p14991_p6), %s20131_s6, 16, %s329_s18, [#allocation12]  }
  0x68   : > { %s14891_s25 = smov [#allocation16]  }
  0x69   : > { %s352_s26 = sshll.u32 %s14891_s25, 4  ;;  %s353_s26 = int_to_ptr.vmem [resolvable:$true] %s352_s26 }
  0x6a   : > { %s14753_s23 = scalar_lea.vmem %s353_s26, 16  ;;  %s14760_s24 = scalar_lea.vmem %s353_s26, 32 }
  0x6b   : > { %p14754_p2 = scmp.ne.s32.totalorder %s353_s26, %s14753_s23  ;;  %p14761_p4 = scmp.lt.s32.totalorder %s353_s26, %s353_s26 }
  0x6c   : > { %p14762_p5 = scmp.lt.s32.totalorder %s14760_s24, %s14753_s23 }
  0x6d   : > { %p14756_p1 = pnand %p14754_p2, %p15001_p7 }
  0x6e   : > { %p14763_p8 = por %p14762_p5, %p14761_p4 }
  0x6f   : > { %p14757_p3 = pneg %p14756_p1 }
  0x71   : > { %p14764_p9 = pnand %p14763_p8, %p14757_p3 }
  0x73   : > { %14767 = shalt.err (!%p14764_p9)
}
  0x74   : > { %13832 = dma.hbm_to_vmem [thread:$0]  (!%p14991_p6), %s20133_s8, 16, %s353_s26, [#allocation15]  }
  0x75   : > { %s12711_s22 = sadd.s32 4294967294, %s14876_s12   ;;  %s15069_s19 = sadd.s32 1, %s14876_s12  }
  0x76   : > { %s33_s18 = ssub.s32 %s14876_s12, %s15069_s19  ;;  %s36_s13 = sadd.s32 1, %s14872_s11 }
  0x77   : > { %p34_p7 = scmp.eq.s32.totalorder %s33_s18, 0  ;;  %p43_p10 = scmp.ne.s32.totalorder %s14872_s11, %s14868_s10 }
  0x78   : > { %p44_p11 = scmp.eq.s32.totalorder %s14876_s12, 0  ;;  %p49_p12 = scmp.ne.s32.totalorder %s14868_s10, %s14864_s30 }
  0x79   : > { %s15080_s29 = scalar_select %p34_p7, %s14872_s11, %s36_s13  }
  0x7a   : > { %p45_p13 = por %p44_p11, %p43_p10  ;;  %p20379_p0 = scmp.eq.s32.totalorder %s14977_s15, 0 }
  0x7b   : > { %p241_p6 = scmp.eq.s32.totalorder %s14977_s15, 1  ;;  %p247_p1 = scmp.eq.s32.totalorder %s12711_s22, 1 }
  0x7c   : > { %p15084_p2 = por %p20379_p0, %p49_p12  ;;  %p13849_p3 = scmp.lt.s32.totalorder %s14876_s12, 2 }
  0x7d   : > { %s363_s14 = sand.u32 1, %s14872_s11   ;;  %p15091_p4 = por %p241_p6, %p43_p10 }
  0x7e   : > { %s20380_s17 = scalar_select %p15084_p2, 1, 0 }
  0x7f   : > { %s20381_s21 = scalar_select %p15091_p4, 1, 0 }
  0x80   : > { %p15095_p5 = por %p247_p1, %p49_p12  ;;  %s13767_s25 = smul.u32 320, %s363_s14 }
  0x81   : > { %s13768_s26 = smul.u32 5120, %s14876_s12  ;;  %p15100_p8 = pnand %p13849_p3, %p45_p13 }
  0x82   : > { %s20382_s20 = scalar_select %p15095_p5, 1, 0 }
  0x83   : > { %s15107_s28 = scalar_lea.hbm %s20125_s0, %s13768_s26  ;;  %s367_s22 = scalar_lea.vmem [#allocation2], %s13767_s25 }
  0x84   : > { %s374_s18 = sshll.u32 %s367_s22, 4  ;;  %s15111_s13 = scalar_lea.sflag [#allocation3], %s363_s14  ;;  %s15109_s18 = int_to_ptr.vmem [resolvable:$true] %s374_s18 }
  0x85   : > { %s14768_s1 = scalar_lea.hbm %s15107_s28, 5120  ;;  %p14770_p7 = pneg %p15100_p8 }
  0x86   : > { %p14769_p9 = scmp.ne.s32.totalorder %s15107_s28, %s14768_s1  ;;  %s14773_s26 = scalar_lea.hbm %s20125_s0, 10240 }
  0x87   : > { %p14774_p12 = scmp.lt.s32.totalorder %s15107_s28, %s20125_s0  ;;  %p14775_p13 = scmp.lt.s32.totalorder %s14773_s26, %s14768_s1 }
  0x88   : > { %p14771_p10 = pnand %p14770_p7, %p14769_p9 }
  0x89   : > { %p14776_p0 = por %p14775_p13, %p14774_p12 }
  0x8a   : > { %p14772_p11 = pneg %p14771_p10 }
  0x8c   : > { %p14777_p6 = pnand %p14776_p0, %p14772_p11 }
  0x8e   : > { %14780 = shalt.err (!%p14777_p6)
}
  0x8f   : > { %s14781_s14 = scalar_lea.vmem %s15109_s18, 5120  ;;  %s14892_s25 = smov [#allocation2]  }
  0x90   : > { %p14782_p1 = scmp.ne.s32.totalorder %s15109_s18, %s14781_s14  ;;  %s14786_s22 = sshll.u32 %s14892_s25, 4  ;;  %s14787_s22 = int_to_ptr.vmem [resolvable:$false] %s14786_s22 }
  0x91   : > { %s14788_s2 = scalar_lea.vmem %s14787_s22, 10240  ;;  %p14789_p10 = scmp.lt.s32.totalorder %s15109_s18, %s14787_s22 }
  0x92   : > { %p14784_p3 = pnand %p14782_p1, %p14770_p7  ;;  %p14790_p5 = scmp.lt.s32.totalorder %s14788_s2, %s14781_s14 }
  0x94   : > { %p14785_p9 = pneg %p14784_p3  ;;  %p14791_p4 = por %p14790_p5, %p14789_p10 }
  0x96   : > { %p14792_p2 = pnand %p14791_p4, %p14785_p9 }
  0x98   : > { %14795 = shalt.err (!%p14792_p2)
}
  0x99   : > { %s14893_s1 = smov 640   ;;  %s14894_s3 = smov 40  }
  0x9a   : > { %13836 = dma.hbm_to_vmem [thread:$0]  (!%p15100_p8), %s15107_s28, 5120, %s15109_s18, %s15111_s13, %s14893_s1, %s14893_s1, %s14894_s3  }
  0x9b   : > { %p20384_p7 = scmp.ne.s32.totalorder %s20373_s16, 0 }
  0x9d   : > { %386 = sbr.rel (%p20384_p7) target bundleno = 1887 (0x75f), region = 56 }
  0xa2   : > { %s15135_s24 = sand.u32 1, %s14868_s10   ;;  %p20385_p2 = scmp.ne.s32.totalorder %s20380_s17, 0 }
  0xa3   : > { %s13769_s26 = smul.u32 320, %s15135_s24  ;;  %s389_s27 = scalar_lea.sflag [#allocation3], %s15135_s24 }
  0xa5   : > { %s15139_s14 = scalar_lea.vmem [#allocation2], %s13769_s26 }
  0xa6   : > { %14839 = dma.done.wait (%p20385_p2), %s389_s27, 5120  }
  0xa7   : > { %14841 = vsyncadd (%p20385_p2), %s389_s27, 4294962176  ;;  %p20386_p4 = scmp.eq.s32.totalorder %s14977_s15, 0 }
  0xa9   : > { %14843 = dma.done.wait (%p20386_p4), [#allocation6], 16960   ;;  %p20387_p5 = pmov %p20386_p4 }
  0xaa   : > { %p20388_p8 = pmov %p20386_p4 }
  0xab   : > { %14845 = vsyncadd (%p20387_p5), [#allocation6], 4294950336 }
  0xac   : > { %14847 = dma.done.wait (%p20388_p8), [#allocation9], 34608   ;;  %p20389_p11 = pmov %p20386_p4 }
  0xad   : > { %p20390_p12 = pmov %p20386_p4 }
  0xae   : > { %14849 = vsyncadd (%p20389_p11), [#allocation9], 4294932688 }
  0xaf   : > { %14851 = dma.done.wait (%p20390_p12), [#allocation12], 2320   ;;  %p20391_p13 = pmov %p20386_p4 }
  0xb0   : > { %p20392_p0 = pmov %p20386_p4 }
  0xb1   : > { %14853 = vsyncadd (%p20391_p13), [#allocation12], 4294964976 }
  0xb2   : > { %14855 = dma.done.wait (%p20392_p0), [#allocation15], 4240   ;;  %p20393_p6 = pmov %p20392_p0 }
  0xb3   : > { %v13917_v0 = vld [vmem:[#allocation5 + $0xe4] ss:$16 sps:$4 sm:$0xff]   ;;  %v13921_v2 = vld [vmem:[#allocation5 + $0xe0] ss:$16 sps:$4 sm:$0xff]   ;;  %v461_v46 = vld [vmem:[%s15139_s14 + $0x8] sm:$0xff]  ;;  %vm1865_vm0 = vcmask 1040384  }
  0xb4   : > { %14857 = vsyncadd (%p20393_p6), [#allocation15], 4294963056  ;;  %v13919_v1 = vld [vmem:[#allocation5 + $0x2e4] ss:$16 sps:$4 sm:$0xff]   ;;  %1347 = vmatprep.subr.bf16.mxu0 %v13917_v0  ;;  %v13922_v3 = vld [vmem:[#allocation5 + $0x2e0] ss:$16 sps:$4 sm:$0xff]  }
  0xb5   : > { %1420 = vmatprep.subr.bf16.mxu1 %v13919_v1  ;;  %v13923_v4 = vld [vmem:[#allocation5 + $0xc4] ss:$16 sps:$4 sm:$0xff]   ;;  %1348 = vmatpush1.bf16.msra.mxu0 %v13921_v2  ;;  %v13927_v6 = vld [vmem:[#allocation5 + $0xc0] ss:$16 sps:$4 sm:$0xff]   ;;  %v463_v48 = vld [vmem:[%s15139_s14 + $0x18] sm:$0xff]  ;;  %vm3251_vm1 = vcmask 1046528  }
  0xb6   : > { %1421 = vmatpush1.bf16.msra.mxu1 %v13922_v3  ;;  %v13925_v5 = vld [vmem:[#allocation5 + $0x2c4] ss:$16 sps:$4 sm:$0xff]   ;;  %1349 = vmatprep.subr.bf16.mxu0 %v13923_v4  ;;  %v13928_v7 = vld [vmem:[#allocation5 + $0x2c0] ss:$16 sps:$4 sm:$0xff]   ;;  %v465_v63 = vld [vmem:[%s15139_s14 + $0x28] sm:$0xff]  ;;  %vm4648_vm2 = vcmask 1045504  }
  0xb7   : > { %1422 = vmatprep.subr.bf16.mxu1 %v13925_v5  ;;  %v13929_v8 = vld [vmem:[#allocation5 + $0xa4] ss:$16 sps:$4 sm:$0xff]   ;;  %v13933_v10 = vld [vmem:[#allocation5 + $0xa0] ss:$16 sps:$4 sm:$0xff]   ;;  %v8711_v3 = vrot.slane %v465_v63, 7  ;;  %vm1334_vm3 = vcmask 130048  }
  0xb8   : > { %v13931_v9 = vld [vmem:[#allocation5 + $0x2a4] ss:$16 sps:$4 sm:$0xff]   ;;  %v13934_v11 = vld [vmem:[#allocation5 + $0x2a0] ss:$16 sps:$4 sm:$0xff]   ;;  %s14897_s16 = smov 96   ;;  %vm2348_vm4 = vcmask 1041408  }
  0xb9   : > { %1350 = vmatpush1.bf16.msra.mxu0 %v13927_v6  ;;  %v13935_v12 = vld [vmem:[#allocation5 + $0x84] ss:$16 sps:$4 sm:$0xff]   ;;  %v13939_v14 = vld [vmem:[#allocation5 + $0x80] ss:$16 sps:$4 sm:$0xff]   ;;  %vm2446_vm5 = vsmask.f32 7424  ;;  %vm15990_vm9 = vmneg %vm2348_vm4 }
  0xba   : > { %1423 = vmatpush1.bf16.msra.mxu1 %v13928_v7  ;;  %1351 = vmatprep.subr.bf16.mxu0 %v13929_v8  ;;  %v13937_v13 = vld [vmem:[#allocation5 + $0x284] ss:$16 sps:$4 sm:$0xff]   ;;  %v13940_v15 = vld [vmem:[#allocation5 + $0x280] ss:$16 sps:$4 sm:$0xff]   ;;  %vm2700_vm6 = vcmask 261120   ;;  %vm14899_vm10 = vmmov 1  }
  0xbb   : > { %1424 = vmatprep.subr.bf16.mxu1 %v13931_v9  ;;  %v13941_v16 = vld [vmem:[#allocation5 + $0x64] ss:$16 sps:$4 sm:$0xff]   ;;  %v13945_v18 = vld [vmem:[#allocation5 + $0x60] ss:$16 sps:$4 sm:$0xff]   ;;  %vm5512_vm7 = vsmask.f32 5376  ;;  %vm16010_vm11 = vmpackc.low %vm15990_vm9, %vm14899_vm10 }
  0xbc   : > { %v13943_v17 = vld [vmem:[#allocation5 + $0x264] ss:$16 sps:$4 sm:$0xff]   ;;  %v13946_v19 = vld [vmem:[#allocation5 + $0x260] ss:$16 sps:$4 sm:$0xff]   ;;  %vm4134_vm8 = vsmask.f32 6400 }
  0xbd   : > { %1352 = vmatpush1.bf16.msra.mxu0 %v13933_v10  ;;  %v13947_v20 = vld [vmem:[#allocation5 + $0x44] ss:$16 sps:$4 sm:$0xff]   ;;  %v13951_v22 = vld [vmem:[#allocation5 + $0x40] ss:$16 sps:$4 sm:$0xff]   ;;  %vm5978_vm12 = vcmask 1044480   ;;  %vm14901_vm13 = vmmov 0  }
  0xbe   : > { %1425 = vmatpush1.bf16.msra.mxu1 %v13934_v11  ;;  %1353 = vmatprep.subr.bf16.mxu0 %v13935_v12  ;;  %v13949_v21 = vld [vmem:[#allocation5 + $0x244] ss:$16 sps:$4 sm:$0xff]   ;;  %v13952_v23 = vld [vmem:[#allocation5 + $0x240] ss:$16 sps:$4 sm:$0xff]   ;;  %vm12366_vm14 = vcmask 1041409   ;;  %vm12368_vm15 = vcmask 1045509  }
  0xbf   : > { %1426 = vmatprep.subr.bf16.mxu1 %v13937_v13  ;;  %v13953_v24 = vld [vmem:[#allocation5 + $0x24] ss:$16 sps:$4 sm:$0xff]   ;;  %v13957_v26 = vld [vmem:[#allocation5 + $0x20] ss:$16 sps:$4 sm:$0xff]   ;;  %v8791_v13 = vsel %vm1865_vm0, -inf, %v8711_v3  ;;  %s13770_s17 = smul.u32 112, %s15135_s24 }
  0xc0   : > { %v13955_v25 = vld [vmem:[#allocation5 + $0x224] ss:$16 sps:$4 sm:$0xff]   ;;  %v13958_v27 = vld [vmem:[#allocation5 + $0x220] ss:$16 sps:$4 sm:$0xff]   ;;  %s14902_s28 = smov 64   ;;  %s13771_s18 = smul.u32 1792, %s14977_s15 }
  0xc1   : > { %1354 = vmatpush1.bf16.msra.mxu0 %v13939_v14  ;;  %v13959_v28 = vld [vmem:[#allocation5 + $0x4] ss:$16 sps:$4 sm:$0xff]   ;;  %v13963_v30 = vld [vmem:[#allocation5] ss:$16 sps:$4 sm:$0xff]   ;;  %v8831_v14 = vsel %vm1865_vm0, %v8711_v3, -inf  ;;  %s18674_s23 = scalar_lea.vmem [#allocation17], %s13770_s17 }
  0xc2   : > { %1427 = vmatpush1.bf16.msra.mxu1 %v13940_v15  ;;  %1355 = vmatprep.subr.bf16.mxu0 %v13941_v16  ;;  %v13961_v29 = vld [vmem:[#allocation5 + $0x204] ss:$16 sps:$4 sm:$0xff]   ;;  %v13964_v31 = vld [vmem:[#allocation5 + $0x200] ss:$16 sps:$4 sm:$0xff]   ;;  %s12562_s13 = sshll.u32 %s18674_s23, 4  ;;  %s20073_s2 = scalar_lea.hbm %s20134_s9, %s13771_s18  ;;  %s20077_s13 = int_to_ptr.vmem [resolvable:$true] %s12562_s13 }
  0xc3   : > { %1428 = vmatprep.subr.bf16.mxu1 %v13943_v17  ;;  %v13965_v32 = vld [vmem:[#allocation5 + $0x1e4] ss:$16 sps:$4 sm:$0xff]   ;;  %v13969_v34 = vld [vmem:[#allocation5 + $0x1e0] ss:$16 sps:$4 sm:$0xff]   ;;  %v8962_v17 = vrot.slane %v8791_v13, 1  ;;  %s12549_s15 = scalar_lea.sflag [#allocation4], %s15135_s24 }
  0xc4   : > { %v13967_v33 = vld [vmem:[#allocation5 + $0x3e4] ss:$16 sps:$4 sm:$0xff]   ;;  %v13970_v35 = vld [vmem:[#allocation5 + $0x3e0] ss:$16 sps:$4 sm:$0xff]   ;;  %s14796_s1 = scalar_lea.vmem %s20077_s13, 1792  ;;  %p21042_p3 = scmp.ne.s32.totalorder %s20381_s21, 0 }
  0xc5   : > { %1356 = vmatpush1.bf16.msra.mxu0 %v13945_v18  ;;  %v13971_v36 = vld [vmem:[#allocation5 + $0x1c4] ss:$16 sps:$4 sm:$0xff]   ;;  %v13975_v38 = vld [vmem:[#allocation5 + $0x1c0] ss:$16 sps:$4 sm:$0xff]   ;;  %v8963_v18 = vrot.slane %v8831_v14, 1  ;;  %p14797_p1 = scmp.ne.s32.totalorder %s20077_s13, %s14796_s1  ;;  %s14903_s3 = smov [#allocation17]  }
  0xc6   : > { %1429 = vmatpush1.bf16.msra.mxu1 %v13946_v19  ;;  %1357 = vmatprep.subr.bf16.mxu0 %v13947_v20  ;;  %v13973_v37 = vld [vmem:[#allocation5 + $0x3c4] ss:$16 sps:$4 sm:$0xff]   ;;  %v13976_v39 = vld [vmem:[#allocation5 + $0x3c0] ss:$16 sps:$4 sm:$0xff]   ;;  %s14800_s26 = sshll.u32 %s14903_s3, 4  ;;  %s14801_s26 = int_to_ptr.vmem [resolvable:$false] %s14800_s26 }
  0xc7   : > { %1430 = vmatprep.subr.bf16.mxu1 %v13949_v21  ;;  %v13977_v40 = vld [vmem:[#allocation5 + $0x1a4] ss:$16 sps:$4 sm:$0xff]   ;;  %v13981_v42 = vld [vmem:[#allocation5 + $0x1a0] ss:$16 sps:$4 sm:$0xff]   ;;  %v467_v21 = vld [vmem:[%s15139_s14 + $0x38] sm:$0xff]  ;;  %p14798_p9 = pnand %p14797_p1, %p21042_p3  ;;  %s14802_s27 = scalar_lea.vmem %s14801_s26, 3584 }
  0xc8   : > { %v13979_v41 = vld [vmem:[#allocation5 + $0x3a4] ss:$16 sps:$4 sm:$0xff]   ;;  %v13982_v43 = vld [vmem:[#allocation5 + $0x3a0] ss:$16 sps:$4 sm:$0xff]   ;;  %p14803_p7 = scmp.lt.s32.totalorder %s20077_s13, %s14801_s26  ;;  %p14804_p2 = scmp.lt.s32.totalorder %s14802_s27, %s14796_s1 }
  0xc9   : > { %1358 = vmatpush1.bf16.msra.mxu0 %v13951_v22  ;;  %v13983_v44 = vld [vmem:[#allocation5 + $0x184] ss:$16 sps:$4 sm:$0xff]   ;;  %v13987_v50 = vld [vmem:[#allocation5 + $0x180] ss:$16 sps:$4 sm:$0xff]   ;;  %p14799_p10 = pneg %p14798_p9 }
  0xca   : > { %1431 = vmatpush1.bf16.msra.mxu1 %v13952_v23  ;;  %1359 = vmatprep.subr.bf16.mxu0 %v13953_v24  ;;  %v13985_v45 = vld [vmem:[#allocation5 + $0x384] ss:$16 sps:$4 sm:$0xff]   ;;  %v13988_v51 = vld [vmem:[#allocation5 + $0x380] ss:$16 sps:$4 sm:$0xff]   ;;  %v9163_v23 = vrot.slane %v8791_v13, 2  ;;  %v9164_v24 = vrot.slane %v8831_v14, 2  ;;  %p14805_p4 = por %p14804_p2, %p14803_p7 }
  0xcb   : > { %1432 = vmatprep.subr.bf16.mxu1 %v13955_v25  ;;  %v466_v47 = vld [vmem:[%s15139_s14 + $0x30] sm:$0xff]  ;;  %v468_v49 = vld [vmem:[%s15139_s14 + $0x40] sm:$0xff]  ;;  %v8713_v25 = vrot.slane %v467_v21, 7 }
  0xcc   : > { %v13989_v52 = vld [vmem:[#allocation5 + $0x164] ss:$16 sps:$4 sm:$0xff]   ;;  %v15165_v53 = vpack.c.bf16 %v466_v47, %v461_v46  ;;  %v15167_v54 = vpack.c.bf16 %v468_v49, %v463_v48  ;;  %v13993_v56 = vld [vmem:[#allocation5 + $0x160] ss:$16 sps:$4 sm:$0xff]   ;;  %p14806_p5 = pnand %p14805_p4, %p14799_p10 }
  0xcd   : > { %1360 = vmatpush1.bf16.msra.mxu0 %v13957_v26  ;;  %v13991_v55 = vld [vmem:[#allocation5 + $0x364] ss:$16 sps:$4 sm:$0xff]   ;;  %v13994_v57 = vld [vmem:[#allocation5 + $0x360] ss:$16 sps:$4 sm:$0xff]  }
  0xce   : > { %1433 = vmatpush1.bf16.msra.mxu1 %v13958_v27  ;;  %1361 = vmatprep.subr.bf16.mxu0 %v13959_v28  ;;  %v13995_v58 = vld [vmem:[#allocation5 + $0x144] ss:$16 sps:$4 sm:$0xff]   ;;  %v13999_v60 = vld [vmem:[#allocation5 + $0x140] ss:$16 sps:$4 sm:$0xff]   ;;  %v8964_v27 = vsel %vm3251_vm1, %v8962_v17, %v8963_v18  ;;  %v14022_v18 = vld [vmem:[#allocation5 + $0xa8] ss:$16 sps:$4 sm:$0xff]  }
  0xcf   : > { %1434 = vmatprep.subr.bf16.mxu1 %v13961_v29  ;;  %1379 = vmatprep.mubr.bf16.mxu0 %v15165_v53  ;;  %v13997_v59 = vld [vmem:[#allocation5 + $0x344] ss:$16 sps:$4 sm:$0xff]   ;;  %v14000_v61 = vld [vmem:[#allocation5 + $0x340] ss:$16 sps:$4 sm:$0xff]  }
  0xd0   : > { %1452 = vmatprep.mubr.bf16.mxu1 %v15167_v54  ;;  %v460_v62 = vld [vmem:[%s15139_s14] sm:$0xff]  ;;  %v462_v4 = vld [vmem:[%s15139_s14 + $0x10] sm:$0xff] }
  0xd1   : > { %1362 = vmatpush1.bf16.msra.mxu0 %v13963_v30  ;;  %v14001_v0 = vld [vmem:[#allocation5 + $0x124] ss:$16 sps:$4 sm:$0xff]   ;;  %v8706_v2 = vrot.slane %v460_v62, 7  ;;  %v14005_v5 = vld [vmem:[#allocation5 + $0x120] ss:$16 sps:$4 sm:$0xff]   ;;  %v15174_v7 = vpack.c.bf16 %v465_v63, %v460_v62  ;;  %v8708_v10 = vrot.slane %v462_v4, 7 }
  0xd2   : > { %1435 = vmatpush1.bf16.msra.mxu1 %v13964_v31  ;;  %1363 = vmatprep.subr.bf16.mxu0 %v13965_v32  ;;  %v14003_v1 = vld [vmem:[#allocation5 + $0x324] ss:$16 sps:$4 sm:$0xff]   ;;  %v14006_v6 = vld [vmem:[#allocation5 + $0x320] ss:$16 sps:$4 sm:$0xff]   ;;  %v9112_v32 = vmax.f32 %v8791_v13, %v8964_v27  ;;  %v14016_v62 = vld [vmem:[#allocation5 + $0xe8] ss:$16 sps:$4 sm:$0xff]  }
  0xd3   : > { %1436 = vmatprep.subr.bf16.mxu1 %v13967_v33  ;;  %v8786_v8 = vsel %vm1865_vm0, -inf, %v8706_v2  ;;  %v8826_v9 = vsel %vm1865_vm0, %v8706_v2, -inf  ;;  %v14007_v11 = vld [vmem:[#allocation5 + $0x104] ss:$16 sps:$4 sm:$0xff]   ;;  %v14011_v26 = vld [vmem:[#allocation5 + $0x100] ss:$16 sps:$4 sm:$0xff]   ;;  %v9165_v33 = vsel %vm4648_vm2, %v9163_v23, %v9164_v24 }
  0xd4   : > { %v14009_v12 = vld [vmem:[#allocation5 + $0x304] ss:$16 sps:$4 sm:$0xff]   ;;  %v8947_v15 = vrot.slane %v8786_v8, 1  ;;  %v8948_v16 = vrot.slane %v8826_v9, 1  ;;  %v9148_v19 = vrot.slane %v8786_v8, 2  ;;  %v9149_v20 = vrot.slane %v8826_v9, 2 }
  0xd5   : > { %1364 = vmatpush2.bf16.msra.mxu0 %v13969_v34  ;;  %v8788_v30 = vsel %vm1865_vm0, -inf, %v8708_v10  ;;  %v14012_v31 = vld [vmem:[#allocation5 + $0x300] ss:$16 sps:$4 sm:$0xff]   ;;  %v8793_v34 = vsel %vm1865_vm0, -inf, %v8713_v25  ;;  %v14024_v9 = vld [vmem:[#allocation5 + $0xac] ss:$16 sps:$4 sm:$0xff]  }
  0xd6   : > { %1437 = vmatpush2.bf16.msra.mxu1 %v13970_v35  ;;  %1365 = vmatprep.subr.bf16.mxu0 %v13971_v36  ;;  %v8949_v22 = vsel %vm3251_vm1, %v8947_v15, %v8948_v16  ;;  %v9150_v29 = vsel %vm4648_vm2, %v9148_v19, %v9149_v20  ;;  %v8828_v35 = vsel %vm1865_vm0, %v8708_v10, -inf  ;;  %v14015_v36 = vld [vmem:[#allocation5 + $0x404] ss:$16 sps:$4 sm:$0xff]   ;;  %v9169_v48 = vrot.slane %v8793_v34, 2  ;;  %v473_v10 = vld [vmem:[%s15139_s14 + $0x68] sm:$0xff] }
  0xd7   : > { %1438 = vmatprep.subr.bf16.mxu1 %v13973_v37  ;;  %v9107_v28 = vmax.f32 %v8786_v8, %v8949_v22  ;;  %v9155_v47 = vrot.slane %v8828_v35, 2  ;;  %v470_v2 = vld [vmem:[%s15139_s14 + $0x50] sm:$0xff]  ;;  %v475_v8 = vld [vmem:[%s15139_s14 + $0x78] sm:$0xff] }
  0xd8   : > { %v15217_v13 = vpack.c.bf16 %v475_v8, %v470_v2  ;;  %v14042_v22 = vld [vmem:[#allocation5 + $0x2ec] ss:$16 sps:$4 sm:$0xff]   ;;  %v14025_v27 = vld [vmem:[#allocation5 + $0x88] ss:$16 sps:$4 sm:$0xff]   ;;  %v482_v8 = vld [vmem:[%s15139_s14 + $0xb0] sm:$0xff] }
  0xd9   : > { %1366 = vmatpush2.bf16.msra.mxu0 %v13975_v38  ;;  %v9308_v37 = vmax.f32 %v9107_v28, %v9150_v29  ;;  %v8833_v38 = vsel %vm1865_vm0, %v8713_v25, -inf  ;;  %v477_v29 = vld [vmem:[%s15139_s14 + $0x88] sm:$0xff] }
  0xda   : > { %1439 = vmatpush2.bf16.msra.mxu1 %v13976_v39  ;;  %1367 = vmatprep.subr.bf16.mxu0 %v13977_v40  ;;  %v8953_v39 = vrot.slane %v8788_v30, 1  ;;  %v8954_v40 = vrot.slane %v8828_v35, 1  ;;  %v9170_v49 = vrot.slane %v8833_v38, 2  ;;  %v485_v35 = vld [vmem:[%s15139_s14 + $0xc8] sm:$0xff] }
  0xdb   : > { %1440 = vmatprep.subr.bf16.mxu1 %v13979_v41  ;;  %v15189_v41 = vmax.f32 %v9112_v32, %v9165_v33  ;;  %v486_v32 = vld [vmem:[%s15139_s14 + $0xd0] sm:$0xff] }
  0xdc   : > { %v8955_v46 = vsel %vm3251_vm1, %v8953_v39, %v8954_v40  ;;  %v14033_v40 = vld [vmem:[#allocation5 + $0x4c] ss:$16 sps:$4 sm:$0xff]  }
  0xdd   : > { %1368 = vmatpush2.bf16.msra.mxu0 %v13981_v42  ;;  %20394 = vst [vmem:[#allocation24_spill] sm:$0xff] %v15189_v41  ;;  %v8968_v42 = vrot.slane %v8793_v34, 1 }
  0xde   : > { %1441 = vmatpush2.bf16.msra.mxu1 %v13982_v43  ;;  %1369 = vmatprep.subr.bf16.mxu0 %v13983_v44  ;;  %v8969_v43 = vrot.slane %v8833_v38, 1  ;;  %v9154_v44 = vrot.slane %v8788_v30, 2  ;;  %v14028_v38 = vld [vmem:[#allocation5 + $0x68] ss:$16 sps:$4 sm:$0xff]  }
  0xdf   : > { %1442 = vmatprep.subr.bf16.mxu1 %v13985_v45  ;;  %v14018_v45 = vld [vmem:[#allocation5 + $0xec] ss:$16 sps:$4 sm:$0xff]  }
  0xe1   : > { %1370 = vmatpush2.bf16.msra.mxu0 %v13987_v50  ;;  %v471_v50 = vld [vmem:[%s15139_s14 + $0x58] sm:$0xff] }
  0xe2   : > { %1443 = vmatpush2.bf16.msra.mxu1 %v13988_v51  ;;  %1371 = vmatprep.subr.bf16.mxu0 %v13989_v52  ;;  %v476_v51 = vld [vmem:[%s15139_s14 + $0x80] sm:$0xff]  ;;  %v15195_v52 = vmax.f32 %v9308_v37, %v15189_v41 }
  0xe3   : > { %1444 = vmatprep.subr.bf16.mxu1 %v13991_v55  ;;  %v15197_v55 = vpack.c.bf16 %v467_v21, %v462_v4  ;;  %v8716_v4 = vrot.slane %v470_v2, 7  ;;  %v14027_v21 = vld [vmem:[#allocation5 + $0x8c] ss:$16 sps:$4 sm:$0xff]   ;;  %v14037_v2 = vld [vmem:[#allocation5 + $0x8] ss:$16 sps:$4 sm:$0xff]  }
  0xe4   : > { %20395 = vst [vmem:[#allocation25_spill] sm:$0xff] %v15195_v52 }
  0xe5   : > { %1372 = vmatpush2.bf16.msra.mxu0 %v13993_v56  ;;  %v8970_v56 = vsel %vm3251_vm1, %v8968_v42, %v8969_v43  ;;  %v8836_v14 = vsel %vm1865_vm0, %v8716_v4, -inf }
  0xe6   : > { %1445 = vmatpush2.bf16.msra.mxu1 %v13994_v57  ;;  %1373 = vmatprep.subr.bf16.mxu0 %v13995_v58  ;;  %v9109_v57 = vmax.f32 %v8788_v30, %v8955_v46  ;;  %v9114_v58 = vmax.f32 %v8793_v34, %v8970_v56  ;;  %v8978_v16 = vrot.slane %v8836_v14, 1  ;;  %v9179_v19 = vrot.slane %v8836_v14, 2  ;;  %v481_v30 = vld [vmem:[%s15139_s14 + $0xa8] sm:$0xff]  ;;  %v480_v34 = vld [vmem:[%s15139_s14 + $0xa0] sm:$0xff] }
  0xe7   : > { %1446 = vmatprep.subr.bf16.mxu1 %v13997_v59  ;;  %v9156_v59 = vsel %vm4648_vm2, %v9154_v44, %v9155_v47  ;;  %v15238_v39 = vpack.c.bf16 %v486_v32, %v481_v30  ;;  %v15243_v44 = vpack.c.bf16 %v485_v35, %v480_v34  ;;  %v14049_v14 = vld [vmem:[#allocation5 + $0x1c8] ss:$16 sps:$4 sm:$0xff]   ;;  %v14075_v35 = vld [vmem:[#allocation5 + $0x14c] ss:$16 sps:$4 sm:$0xff]  }
  0xe8   : > { %v9310_v63 = vmax.f32 %v9109_v57, %v9156_v59  ;;  %v14034_v59 = vld [vmem:[#allocation5 + $0x28] ss:$16 sps:$4 sm:$0xff]  }
  0xe9   : > { %1374 = vmatpush2.bf16.msra.mxu0 %v13999_v60  ;;  %v9171_v60 = vsel %vm4648_vm2, %v9169_v48, %v9170_v49  ;;  %v14031_v49 = vld [vmem:[#allocation5 + $0x48] ss:$16 sps:$4 sm:$0xff]  }
  0xea   : > { %1447 = vmatpush2.bf16.msra.mxu1 %v14000_v61  ;;  %1375 = vmatprep.subr.bf16.mxu0 %v14001_v0  ;;  %v14013_v61 = vld [vmem:[#allocation5 + $0x400] ss:$16 sps:$4 sm:$0xff]   ;;  %v14021_v0 = vld [vmem:[#allocation5 + $0xcc] ss:$16 sps:$4 sm:$0xff]   ;;  %v15205_v3 = vmax.f32 %v9114_v58, %v9171_v60  ;;  %v14067_v32 = vld [vmem:[#allocation5 + $0x168] ss:$16 sps:$4 sm:$0xff]  }
  0xeb   : > { %1448 = vmatprep.subr.bf16.mxu1 %v14003_v1  ;;  %v15202_v1 = vpack.c.bf16 %v476_v51, %v471_v50  ;;  %v14036_v51 = vld [vmem:[#allocation5 + $0x2c] ss:$16 sps:$4 sm:$0xff]  }
  0xec   : > { %20396 = vst [vmem:[#allocation26_spill] sm:$0xff] %v15205_v3  ;;  %v483_v60 = vld [vmem:[%s15139_s14 + $0xb8] sm:$0xff] }
  0xed   : > { %1376 = vmatpush2.bf16.msra.mxu0 %v14005_v5  ;;  %v15210_v5 = vmax.f32 %v9310_v63, %v15205_v3 }
  0xee   : > { %1449 = vmatpush2.bf16.msra.mxu1 %v14006_v6  ;;  %1377 = vmatprep.subr.bf16.mxu0 %v14007_v11  ;;  %v14019_v6 = vld [vmem:[#allocation5 + $0xc8] ss:$16 sps:$4 sm:$0xff]   ;;  %v8796_v11 = vsel %vm1865_vm0, -inf, %v8716_v4  ;;  %v14045_v4 = vld [vmem:[#allocation5 + $0x1ec] ss:$16 sps:$4 sm:$0xff]  }
  0xef   : > { %1450 = vmatprep.subr.bf16.mxu1 %v14009_v12  ;;  %20397 = vst [vmem:[#allocation27_spill] sm:$0xff] %v15210_v5  ;;  %v478_v12 = vld [vmem:[%s15139_s14 + $0x90] sm:$0xff]  ;;  %v8977_v15 = vrot.slane %v8796_v11, 1  ;;  %v9178_v17 = vrot.slane %v8796_v11, 2 }
  0xf0   : > { %v15220_v20 = vpack.c.bf16 %v478_v12, %v473_v10  ;;  %v487_v10 = vld [vmem:[%s15139_s14 + $0xd8] sm:$0xff]  ;;  %v496_v12 = vld [vmem:[%s15139_s14 + $0x120] sm:$0xff] }
  0xf1   : > { %1378 = vmatpush2.bf16.msra.mxu0 %v14011_v26  ;;  %v8979_v23 = vsel %vm3251_vm1, %v8977_v15, %v8978_v16  ;;  %v9180_v25 = vsel %vm4648_vm2, %v9178_v17, %v9179_v19  ;;  %v472_v26 = vld [vmem:[%s15139_s14 + $0x60] sm:$0xff]  ;;  %v15262_v15 = vpack.c.bf16 %v487_v10, %v482_v8  ;;  %v14057_v16 = vld [vmem:[#allocation5 + $0x1ac] ss:$16 sps:$4 sm:$0xff]   ;;  %v14064_v10 = vld [vmem:[#allocation5 + $0x268] ss:$16 sps:$4 sm:$0xff]  }
  0xf2   : > { %1451 = vmatpush2.bf16.msra.mxu1 %v14012_v31  ;;  %1507 = vmatprep.subr.bf16.mxu0 %v14015_v36  ;;  %v9117_v24 = vmax.f32 %v8796_v11, %v8979_v23  ;;  %v14030_v31 = vld [vmem:[#allocation5 + $0x6c] ss:$16 sps:$4 sm:$0xff]   ;;  %v15236_v36 = vpack.c.bf16 %v477_v29, %v472_v26  ;;  %v8718_v37 = vrot.slane %v472_v26, 7 }
  0xf3   : > { %1566 = vmatprep.subr.bf16.mxu1 %v14018_v45  ;;  %v491_v11 = vld [vmem:[%s15139_s14 + $0xf8] sm:$0xff]  ;;  %v493_v23 = vld [vmem:[%s15139_s14 + $0x108] sm:$0xff] }
  0xf4   : > { %1380 = vmatmul.mubr.bf16.vlgmr.msra.gmra.mxu0 %v15174_v7  ;;  %v15227_v28 = vmax.f32 %v9117_v24, %v9180_v25  ;;  %v8798_v42 = vsel %vm1865_vm0, -inf, %v8718_v37  ;;  %v8838_v43 = vsel %vm1865_vm0, %v8718_v37, -inf  ;;  %v15264_v17 = vpack.c.bf16 %v496_v12, %v491_v11  ;;  %v14063_v19 = vld [vmem:[#allocation5 + $0x18c] ss:$16 sps:$4 sm:$0xff]   ;;  %v498_v24 = vld [vmem:[%s15139_s14 + $0x130] sm:$0xff] }
  0xf5   : > { %1453 = vmatmul.mubr.bf16.vlgmr.msra.gmra.mxu1 %v15197_v55  ;;  %1508 = vmatpush1.bf16.msra.mxu0 %v14013_v61  ;;  %v8983_v45 = vrot.slane %v8798_v42, 1  ;;  %v8984_v46 = vrot.slane %v8838_v43, 1  ;;  %v9184_v47 = vrot.slane %v8798_v42, 2  ;;  %v9185_v48 = vrot.slane %v8838_v43, 2  ;;  %v488_v61 = vld [vmem:[%s15139_s14 + $0xe0] sm:$0xff]  ;;  %v497_v29 = vld [vmem:[%s15139_s14 + $0x128] sm:$0xff] }
  0xf6   : > { %1567 = vmatpush1.bf16.msra.mxu1 %v14016_v62  ;;  %1389 = vmatprep.mubr.bf16.mxu0 %v15202_v1  ;;  %20398 = vst [vmem:[#allocation28_spill] sm:$0xff] %v15227_v28  ;;  %v14039_v62 = vld [vmem:[#allocation5 + $0xc] ss:$16 sps:$4 sm:$0xff]   ;;  %v14061_v25 = vld [vmem:[#allocation5 + $0x188] ss:$16 sps:$4 sm:$0xff]   ;;  %v20145_v37 = vmov 0  }
  0xf7   : > { %1568 = vmatprep.subr.bf16.mxu1 %v14021_v0  ;;  %1462 = vmatprep.mubr.bf16.mxu1 %v15220_v20  ;;  %v8985_v50 = vsel %vm3251_vm1, %v8983_v45, %v8984_v46  ;;  %v9186_v57 = vsel %vm4648_vm2, %v9184_v47, %v9185_v48  ;;  %v15255_v0 = vpack.c.bf16 %v488_v61, %v483_v60  ;;  %v14069_v26 = vld [vmem:[#allocation5 + $0x16c] ss:$16 sps:$4 sm:$0xff]   ;;  %v14079_v45 = vld [vmem:[#allocation5 + $0x128] ss:$16 sps:$4 sm:$0xff]  }
  0xf8   : > { %1639 = vmatprep.subr.bf16.mxu0 %v14042_v22  ;;  %v9119_v56 = vmax.f32 %v8798_v42, %v8985_v50  ;;  %v495_v22 = vld [vmem:[%s15139_s14 + $0x118] sm:$0xff]  ;;  %v464_v42 = vld [vmem:[%s15139_s14 + $0x20] sm:$0xff]  ;;  %v469_v43 = vld [vmem:[%s15139_s14 + $0x48] sm:$0xff] }
  0xf9   : > { %v14040_v46 = vld [vmem:[#allocation5 + $0x2e8] ss:$16 sps:$4 sm:$0xff]   ;;  %v14048_v47 = vld [vmem:[#allocation5 + $0x2cc] ss:$16 sps:$4 sm:$0xff]   ;;  %v15287_v48 = vpack.c.bf16 %v469_v43, %v464_v42 }
  0xfa   : > { %1569 = vmatpush1.bf16.msra.mxu1 %v14019_v6  ;;  %v15249_v58 = vmax.f32 %v9119_v56, %v9186_v57  ;;  %v14043_v6 = vld [vmem:[#allocation5 + $0x1e8] ss:$16 sps:$4 sm:$0xff]   ;;  %v14072_v12 = vld [vmem:[#allocation5 + $0x24c] ss:$16 sps:$4 sm:$0xff]  }
  0xfb   : > { %1570 = vmatprep.subr.bf16.mxu1 %v14024_v9  ;;  %v14051_v9 = vld [vmem:[#allocation5 + $0x1cc] ss:$16 sps:$4 sm:$0xff]   ;;  %v14046_v50 = vld [vmem:[#allocation5 + $0x2c8] ss:$16 sps:$4 sm:$0xff]  }
  0xfc   : > { %1390 = vmatmul.mubr.bf16.gmra.mxu0 %v15217_v13  ;;  %20399 = vst [vmem:[#allocation29_spill] sm:$0xff] %v15249_v58  ;;  %v479_v56 = vld [vmem:[%s15139_s14 + $0x98] sm:$0xff]  ;;  %v489_v8 = vld [vmem:[%s15139_s14 + $0xe8] sm:$0xff] }
  0xfd   : > { %1463 = vmatmul.mubr.bf16.gmra.mxu1 %v15236_v36  ;;  %1399 = vmatprep.mubr.bf16.mxu0 %v15238_v39  ;;  %v14085_v57 = vld [vmem:[#allocation5 + $0x108] ss:$16 sps:$4 sm:$0xff]   ;;  %v14117_v43 = vld [vmem:[#allocation8 + $0x19c] ss:$12 sps:$4 sm:$0xff]  }
  0xfe   : > { %1571 = vmatpush1.bf16.msra.mxu1 %v14022_v18  ;;  %1472 = vmatprep.mubr.bf16.mxu1 %v15255_v0  ;;  %v14055_v18 = vld [vmem:[#allocation5 + $0x1a8] ss:$16 sps:$4 sm:$0xff]  }
  0xff   : > { %1572 = vmatprep.subr.bf16.mxu1 %v14027_v21  ;;  %v490_v21 = vld [vmem:[%s15139_s14 + $0xf0] sm:$0xff]  ;;  %v14091_v61 = vld [vmem:[#allocation5 + $0x408] ss:$16 sps:$4 sm:$0xff]  }
 0x100   : > { %v15274_v30 = vpack.c.bf16 %v495_v22, %v490_v21  ;;  %v14084_v21 = vld [vmem:[#allocation5 + $0x20c] ss:$16 sps:$4 sm:$0xff]   ;;  %v14082_v22 = vld [vmem:[#allocation5 + $0x208] ss:$16 sps:$4 sm:$0xff]  }
 0x101   : > { %v14115_v42 = vld [vmem:[#allocation8 + $0x198] ss:$12 sps:$4 sm:$0xff]  }
 0x102   : > { %1573 = vmatpush1.bf16.msra.mxu1 %v14025_v27  ;;  %v492_v27 = vld [vmem:[%s15139_s14 + $0x100] sm:$0xff] }
 0x103   : > { %1574 = vmatprep.subr.bf16.mxu1 %v14030_v31  ;;  %v15276_v31 = vpack.c.bf16 %v498_v24, %v493_v23  ;;  %v15279_v34 = vpack.c.bf16 %v497_v29, %v492_v27  ;;  %v14096_v23 = vld [vmem:[#allocation5 + $0x3cc] ss:$16 sps:$4 sm:$0xff]   ;;  %v14094_v24 = vld [vmem:[#allocation5 + $0x3c8] ss:$16 sps:$4 sm:$0xff]  }
 0x104   : > { %1400 = vmatmul.mubr.bf16.gmra.mxu0 %v15243_v44  ;;  %v14103_v27 = vld [vmem:[#allocation5 + $0x368] ss:$16 sps:$4 sm:$0xff]   ;;  %v14108_v29 = vld [vmem:[#allocation5 + $0x34c] ss:$16 sps:$4 sm:$0xff]  }
 0x105   : > { %1473 = vmatmul.mubr.bf16.gmra.mxu1 %v15262_v15  ;;  %1409 = vmatprep.mubr.bf16.mxu0 %v15264_v17 }
 0x106   : > { %1575 = vmatpush1.bf16.msra.mxu1 %v14028_v38  ;;  %1482 = vmatprep.mubr.bf16.mxu1 %v15276_v31  ;;  %v14073_v38 = vld [vmem:[#allocation5 + $0x148] ss:$16 sps:$4 sm:$0xff]  }
 0x107   : > { %1576 = vmatprep.subr.bf16.mxu1 %v14033_v40  ;;  %v14081_v40 = vld [vmem:[#allocation5 + $0x12c] ss:$16 sps:$4 sm:$0xff]  }
 0x10a   : > { %1577 = vmatpush1.bf16.msra.mxu1 %v14031_v49  ;;  %v14087_v49 = vld [vmem:[#allocation5 + $0x10c] ss:$16 sps:$4 sm:$0xff]  }
 0x10b   : > { %1578 = vmatprep.subr.bf16.mxu1 %v14036_v51  ;;  %v474_v51 = vld [vmem:[%s15139_s14 + $0x70] sm:$0xff] }
 0x10c   : > { %1410 = vmatmul.mubr.bf16.gmra.mxu0 %v15274_v30  ;;  %v15294_v60 = vpack.c.bf16 %v479_v56, %v474_v51 }
 0x10d   : > { %1525 = vmatprep.mubr.bf16.mxu0 %v20145_v37  ;;  %1483 = vmatmul.mubr.bf16.gmra.mxu1 %v15279_v34 }
 0x10e   : > { %1579 = vmatpush1.bf16.msra.mxu1 %v14034_v59  ;;  %1598 = vmatprep.mubr.bf16.mxu1 %v15165_v53  ;;  %v14054_v53 = vld [vmem:[#allocation5 + $0x2ac] ss:$16 sps:$4 sm:$0xff]  }
 0x10f   : > { %1580 = vmatprep.subr.bf16.mxu1 %v14039_v62  ;;  %v14093_v59 = vld [vmem:[#allocation5 + $0x40c] ss:$16 sps:$4 sm:$0xff]   ;;  %v14052_v62 = vld [vmem:[#allocation5 + $0x2a8] ss:$16 sps:$4 sm:$0xff]  }
 0x112   : > { %1581 = vmatpush1.bf16.msra.mxu1 %v14037_v2  ;;  %v14060_v2 = vld [vmem:[#allocation5 + $0x28c] ss:$16 sps:$4 sm:$0xff]  }
 0x113   : > { %1582 = vmatprep.subr.bf16.mxu1 %v14045_v4  ;;  %v14058_v4 = vld [vmem:[#allocation5 + $0x288] ss:$16 sps:$4 sm:$0xff]  }
 0x114   : > { %12864 = vmatmul.mubr.msk.bf16.vlgmr.msra.gmra.mxu0 %vm1334_vm3, %v15287_v48 }
 0x115   : > { %1640 = vmatpush1.bf16.msra.mxu0 %v14040_v46  ;;  %1535 = vmatprep.mubr.bf16.mxu0 %v20145_v37  ;;  %v14119_v46 = vld [vmem:[#allocation8 + $0x180] ss:$12 sps:$4 sm:$0xff]  }
 0x116   : > { %1583 = vmatpush2.bf16.msra.mxu1 %v14043_v6  ;;  %1641 = vmatprep.subr.bf16.mxu0 %v14048_v47  ;;  %v484_v6 = vld [vmem:[%s15139_s14 + $0xc0] sm:$0xff] }
 0x117   : > { %1584 = vmatprep.subr.bf16.mxu1 %v14051_v9  ;;  %v14066_v9 = vld [vmem:[#allocation5 + $0x26c] ss:$16 sps:$4 sm:$0xff]   ;;  %v514_v11 = vpack.c.bf16 %v489_v8, %v484_v6  ;;  %v14127_v6 = vld [vmem:[#allocation8 + $0x150] ss:$12 sps:$4 sm:$0xff]  }
 0x119   : > { %1642 = vmatpush1.bf16.msra.mxu0 %v14046_v50 }
 0x11a   : > { %1585 = vmatpush2.bf16.msra.mxu1 %v14049_v14  ;;  %1643 = vmatprep.subr.bf16.mxu0 %v14054_v53  ;;  %v14078_v14 = vld [vmem:[#allocation5 + $0x22c] ss:$16 sps:$4 sm:$0xff]   ;;  %v14126_v53 = vld [vmem:[#allocation8 + $0x170] ss:$12 sps:$4 sm:$0xff]  }
 0x11b   : > { %1586 = vmatprep.subr.bf16.mxu1 %v14057_v16  ;;  %v494_v16 = vld [vmem:[%s15139_s14 + $0x110] sm:$0xff] }
 0x11c   : > { %12865 = vmatmul.mubr.msk.bf16.gmra.mxu0 %vm1334_vm3, %v15294_v60 }
 0x11d   : > { %1644 = vmatpush1.bf16.msra.mxu0 %v14052_v62  ;;  %1545 = vmatprep.mubr.bf16.mxu0 %v20145_v37 }
 0x11e   : > { %1587 = vmatpush2.bf16.msra.mxu1 %v14055_v18  ;;  %1645 = vmatprep.subr.bf16.mxu0 %v14060_v2  ;;  %v14076_v18 = vld [vmem:[#allocation5 + $0x228] ss:$16 sps:$4 sm:$0xff]  }
 0x11f   : > { %1588 = vmatprep.subr.bf16.mxu1 %v14063_v19  ;;  %v14129_v2 = vld [vmem:[#allocation8 + $0x154] ss:$12 sps:$4 sm:$0xff]  }
 0x121   : > { %1646 = vmatpush1.bf16.msra.mxu0 %v14058_v4 }
 0x122   : > { %1589 = vmatpush2.bf16.msra.mxu1 %v14061_v25  ;;  %1647 = vmatprep.subr.bf16.mxu0 %v14066_v9  ;;  %v14099_v25 = vld [vmem:[#allocation5 + $0x3ac] ss:$16 sps:$4 sm:$0xff]  }
 0x123   : > { %1590 = vmatprep.subr.bf16.mxu1 %v14069_v26  ;;  %v14102_v26 = vld [vmem:[#allocation5 + $0x38c] ss:$16 sps:$4 sm:$0xff]  }
 0x124   : > { %12866 = vmatmul.mubr.msk.bf16.gmra.mxu0 %vm1334_vm3, %v514_v11 }
 0x125   : > { %1648 = vmatpush1.bf16.msra.mxu0 %v14064_v10  ;;  %1555 = vmatprep.mubr.bf16.mxu0 %v20145_v37 }
 0x126   : > { %1591 = vmatpush2.bf16.msra.mxu1 %v14067_v32  ;;  %1649 = vmatprep.subr.bf16.mxu0 %v14072_v12  ;;  %v14111_v32 = vld [vmem:[#allocation5 + $0x32c] ss:$16 sps:$4 sm:$0xff]  }
 0x127   : > { %1592 = vmatprep.subr.bf16.mxu1 %v14075_v35  ;;  %v14109_v35 = vld [vmem:[#allocation5 + $0x328] ss:$16 sps:$4 sm:$0xff]  }
 0x128   : > { %v14130_v12 = vld [vmem:[#allocation8 + $0x158] ss:$12 sps:$4 sm:$0xff]  }
 0x12a   : > { %1593 = vmatpush2.bf16.msra.mxu1 %v14073_v38  ;;  %v14114_v38 = vld [vmem:[#allocation5 + $0x30c] ss:$16 sps:$4 sm:$0xff]  }
 0x12b   : > { %1594 = vmatprep.subr.bf16.mxu1 %v14081_v40  ;;  %v14112_v40 = vld [vmem:[#allocation5 + $0x308] ss:$16 sps:$4 sm:$0xff]  }
 0x12e   : > { %1595 = vmatpush2.bf16.msra.mxu1 %v14079_v45  ;;  %v14118_v45 = vld [vmem:[#allocation8 + $0x1a0] ss:$12 sps:$4 sm:$0xff]  }
 0x12f   : > { %1596 = vmatprep.subr.bf16.mxu1 %v14087_v49  ;;  %v14123_v49 = vld [vmem:[#allocation8 + $0x168] ss:$12 sps:$4 sm:$0xff]  }
 0x132   : > { %1597 = vmatpush2.bf16.msra.mxu1 %v14085_v57 }
 0x133   : > { %1726 = vmatprep.subr.bf16.mxu1 %v14093_v59 }
 0x135   : > { %1599 = vmatmul.mubr.bf16.vlgmr.msra.gmra.mxu1 %v15174_v7  ;;  %v14070_v7 = vld [vmem:[#allocation5 + $0x248] ss:$16 sps:$4 sm:$0xff]  }
 0x136   : > { %1727 = vmatpush1.bf16.msra.mxu1 %v14091_v61  ;;  %1608 = vmatprep.mubr.bf16.mxu1 %v15202_v1  ;;  %v499_v1 = vld [vmem:[%s15139_s14 + $0x138] sm:$0xff] }
 0x137   : > { %2799 = vmatprep.subr.bf16.mxu1 %v20145_v37  ;;  %v519_v19 = vpack.c.bf16 %v499_v1, %v494_v16  ;;  %1650 = vmatpush1.bf16.msra.mxu0 %v14070_v7 }
 0x138   : > { %1651 = vmatprep.subr.bf16.mxu0 %v14078_v14 }
 0x139   : > { %12867 = vmatmul.mubr.msk.bf16.gmra.mxu0 %vm1334_vm3, %v519_v19 }
 0x13a   : > { %1671 = vmatprep.mubr.bf16.mxu0 %v15167_v54  ;;  %v14105_v54 = vld [vmem:[#allocation5 + $0x36c] ss:$16 sps:$4 sm:$0xff]  }
 0x13b   : > { %1652 = vmatpush1.bf16.msra.mxu0 %v14076_v18 }
 0x13c   : > { %1653 = vmatprep.subr.bf16.mxu0 %v14084_v21 }
 0x13d   : > { %1609 = vmatmul.mubr.bf16.gmra.mxu1 %v15217_v13  ;;  %v14090_v13 = vld [vmem:[#allocation5 + $0x3ec] ss:$16 sps:$4 sm:$0xff]  }
 0x13e   : > { %1618 = vmatprep.mubr.bf16.mxu1 %v15238_v39  ;;  %v14088_v39 = vld [vmem:[#allocation5 + $0x3e8] ss:$16 sps:$4 sm:$0xff]  }
 0x13f   : > { %1654 = vmatpush1.bf16.msra.mxu0 %v14082_v22 }
 0x140   : > { %1655 = vmatprep.subr.bf16.mxu0 %v14090_v13  ;;  %v14133_v13 = vld [vmem:[#allocation8 + $0x13c] ss:$12 sps:$4 sm:$0xff]  }
 0x143   : > { %1656 = vmatpush2.bf16.msra.mxu0 %v14088_v39 }
 0x144   : > { %1657 = vmatprep.subr.bf16.mxu0 %v14096_v23  ;;  %v14131_v23 = vld [vmem:[#allocation8 + $0x138] ss:$12 sps:$4 sm:$0xff]  }
 0x145   : > { %1619 = vmatmul.mubr.bf16.gmra.mxu1 %v15243_v44  ;;  %v14097_v44 = vld [vmem:[#allocation5 + $0x3a8] ss:$16 sps:$4 sm:$0xff]  }
 0x146   : > { %1628 = vmatprep.mubr.bf16.mxu1 %v15264_v17  ;;  %v14100_v17 = vld [vmem:[#allocation5 + $0x388] ss:$16 sps:$4 sm:$0xff]  }
 0x147   : > { %1658 = vmatpush2.bf16.msra.mxu0 %v14094_v24  ;;  %v14134_v24 = vld [vmem:[#allocation8 + $0x140] ss:$12 sps:$4 sm:$0xff]  }
 0x148   : > { %1659 = vmatprep.subr.bf16.mxu0 %v14099_v25 }
 0x14b   : > { %1660 = vmatpush2.bf16.msra.mxu0 %v14097_v44 }
 0x14c   : > { %1661 = vmatprep.subr.bf16.mxu0 %v14102_v26 }
 0x14d   : > { %1629 = vmatmul.mubr.bf16.gmra.mxu1 %v15274_v30  ;;  %v14106_v30 = vld [vmem:[#allocation5 + $0x348] ss:$16 sps:$4 sm:$0xff]  }
 0x14e   : > { %1744 = vmatprep.mubr.bf16.mxu1 %v20145_v37 }
 0x14f   : > { %1662 = vmatpush2.bf16.msra.mxu0 %v14100_v17 }
 0x150   : > { %1663 = vmatprep.subr.bf16.mxu0 %v14105_v54 }
 0x153   : > { %1664 = vmatpush2.bf16.msra.mxu0 %v14103_v27 }
 0x154   : > { %1665 = vmatprep.subr.bf16.mxu0 %v14108_v29 }
 0x155   : > { %12868 = vmatmul.mubr.msk.bf16.vlgmr.msra.gmra.mxu1 %vm1334_vm3, %v15287_v48  ;;  %v14125_v48 = vld [vmem:[#allocation8 + $0x16c] ss:$12 sps:$4 sm:$0xff]  }
 0x156   : > { %1754 = vmatprep.mubr.bf16.mxu1 %v20145_v37  ;;  %2800 = vmatpush1.bf16.msra.mxu1 %v14118_v45  ;;  %v14138_v45 = vld [vmem:[#allocation8 + $0x128] ss:$12 sps:$4 sm:$0xff]  }
 0x157   : > { %1666 = vmatpush2.bf16.msra.mxu0 %v14106_v30  ;;  %2801 = vmatprep.subr.bf16.mxu1 %v20145_v37 }
 0x158   : > { %1667 = vmatprep.subr.bf16.mxu0 %v14111_v32 }
 0x15b   : > { %1668 = vmatpush2.bf16.msra.mxu0 %v14109_v35 }
 0x15c   : > { %1669 = vmatprep.subr.bf16.mxu0 %v14114_v38 }
 0x15d   : > { %12869 = vmatmul.mubr.msk.bf16.gmra.mxu1 %vm1334_vm3, %v15294_v60 }
 0x15e   : > { %1764 = vmatprep.mubr.bf16.mxu1 %v20145_v37 }
 0x15f   : > { %1670 = vmatpush2.bf16.msra.mxu0 %v14112_v40 }
 0x160   : > { %2716 = vmatprep.subr.bf16.mxu0 %v14117_v43  ;;  %v14135_v43 = vld [vmem:[#allocation8 + $0x120] ss:$12 sps:$4 sm:$0xff]  }
 0x162   : > { %1672 = vmatmul.mubr.bf16.vlgmr.msra.gmra.mxu0 %v15197_v55  ;;  %v654_v55 = vlaneseq }
 0x163   : > { %1681 = vmatprep.mubr.bf16.mxu0 %v15220_v20  ;;  %2717 = vmatpush1.bf16.msra.mxu0 %v14115_v42  ;;  %v14137_v42 = vld [vmem:[#allocation8 + $0x124] ss:$12 sps:$4 sm:$0xff]  }
 0x164   : > { %v15333_v20 = vshrl.u32 %v654_v55, 7  ;;  %v14141_v55 = vld [vmem:[#allocation8 + $0x10c] ss:$12 sps:$4 sm:$0xff]  }
 0x165   : > { %12870 = vmatmul.mubr.msk.bf16.gmra.mxu1 %vm1334_vm3, %v514_v11 }
 0x166   : > { %1774 = vmatprep.mubr.bf16.mxu1 %v20145_v37  ;;  %20400 = vst [vmem:[#allocation30_spill] sm:$0xff] %v15333_v20 }
 0x16a   : > { %1682 = vmatmul.mubr.bf16.gmra.mxu0 %v15236_v36  ;;  %v20141_v36 = vsub.s32 0, %v15333_v20 }
 0x16b   : > { %1691 = vmatprep.mubr.bf16.mxu0 %v15255_v0  ;;  %v20140_v0 = vsub.s32 1, %v15333_v20 }
 0x16d   : > { %12871 = vmatmul.mubr.msk.bf16.gmra.mxu1 %vm1334_vm3, %v519_v19 }
 0x172   : > { %1692 = vmatmul.mubr.bf16.gmra.mxu0 %v15262_v15  ;;  %v15337_v15 = vld [vmem:[#allocation7] sm:$0xf] }
 0x173   : > { %1701 = vmatprep.mubr.bf16.mxu0 %v15276_v31  ;;  %v14121_v31 = vld [vmem:[#allocation8 + $0x184] ss:$12 sps:$4 sm:$0xff]   ;;  %v15342_v47 = vrot.slane %v15337_v15, %v20141_v36  ;;  %v15348_v50 = vrot.slane %v15337_v15, %v20140_v0 }
 0x174   : > { %2718 = vmatprep.subr.bf16.mxu0 %v14121_v31  ;;  %v14139_v31 = vld [vmem:[#allocation8 + $0x108] ss:$12 sps:$4 sm:$0xff]  }
 0x175   : > { %2719 = vmatpush1.bf16.msra.mxu0 %v14119_v46  ;;  %v14142_v46 = vld [vmem:[#allocation8 + $0x110] ss:$12 sps:$4 sm:$0xff]  }
 0x176   : > { %2720 = vmatprep.subr.bf16.mxu0 %v14125_v48  ;;  %v14145_v48 = vld [vmem:[#allocation8 + $0xf4] ss:$12 sps:$4 sm:$0xff]  }
 0x179   : > { %2721 = vmatpush1.bf16.msra.mxu0 %v14123_v49  ;;  %v14143_v49 = vld [vmem:[#allocation8 + $0xf0] ss:$12 sps:$4 sm:$0xff]  }
 0x17a   : > { %1702 = vmatmul.mubr.bf16.gmra.mxu0 %v15279_v34  ;;  %v14122_v34 = vld [vmem:[#allocation8 + $0x188] ss:$12 sps:$4 sm:$0xff]   ;;  %2722 = vmatprep.subr.bf16.mxu0 %v14129_v2 }
 0x17b   : > { %2802 = vmatpush1.bf16.msra.mxu1 %v14122_v34 }
 0x17c   : > { %2803 = vmatprep.subr.bf16.mxu1 %v20145_v37 }
 0x17d   : > { %2723 = vmatpush1.bf16.msra.mxu0 %v14127_v6  ;;  %v14147_v6 = vld [vmem:[#allocation8 + $0x1c8] ss:$12 sps:$4 sm:$0xff]  }
 0x17e   : > { %2724 = vmatprep.subr.bf16.mxu0 %v14133_v13 }
 0x17f   : > { %2804 = vmatpush1.bf16.msra.mxu1 %v14126_v53 }
 0x180   : > { %2805 = vmatprep.subr.bf16.mxu1 %v20145_v37 }
 0x181   : > { %2725 = vmatpush1.bf16.msra.mxu0 %v14131_v23 }
 0x182   : > { %2726 = vmatprep.subr.bf16.mxu0 %v14137_v42 }
 0x183   : > { %2806 = vmatpush1.bf16.msra.mxu1 %v14130_v12 }
 0x184   : > { %2807 = vmatprep.subr.bf16.mxu1 %v20145_v37 }
 0x185   : > { %2727 = vmatpush1.bf16.msra.mxu0 %v14135_v43 }
 0x186   : > { %2728 = vmatprep.subr.bf16.mxu0 %v14141_v55 }
 0x187   : > { %2808 = vmatpush1.bf16.msra.mxu1 %v14134_v24 }
 0x188   : > { %2809 = vmatprep.subr.bf16.mxu1 %v20145_v37 }
 0x189   : > { %2729 = vmatpush1.bf16.msra.mxu0 %v14139_v31 }
 0x18a   : > { %2730 = vmatprep.subr.bf16.mxu0 %v14145_v48 }
 0x18b   : > { %2810 = vmatpush1.bf16.msra.mxu1 %v14138_v45 }
 0x18c   : > { %2811 = vmatprep.subr.bf16.mxu1 %v20145_v37 }
 0x18d   : > { %2731 = vmatpush1.bf16.msra.mxu0 %v14143_v49 }
 0x18f   : > { %2812 = vmatpush1.bf16.msra.mxu1 %v14142_v46 }
 0x190   : > { %2813 = vmatprep.subr.bf16.mxu1 %v20145_v37 }
 0x1b4   : > { %v1381_v51 = vpop.f32.mrf.mxu0 }
 0x1b5   : > { %v1454_v56 = vpop.f32.mrf.mxu1  ;;  %v1382_v57 = vadd.f32 %v1381_v51, %v15342_v47  ;;  %v14146_v51 = vld [vmem:[#allocation8 + $0xf8] ss:$12 sps:$4 sm:$0xff]  }
 0x1b6   : > { %v1383_v59 = vpop.f32.mrf.mxu0  ;;  %2814 = vmatpush1.bf16.msra.mxu1 %v14146_v51 }
 0x1b7   : > { %v1456_v60 = vpop.f32.mrf.mxu1  ;;  %v15351_v61 = vadd.f32 %v1454_v56, %v1382_v57  ;;  %v1384_v62 = vadd.f32 %v1383_v59, %v15348_v50  ;;  %2827 = vmatprep.subr.bf16.mxu1 %v20145_v37 }
 0x1b8   : > { %v1385_v4 = vpop.f32.mrf.mxu0 }
 0x1b9   : > { %v15355_v8 = vadd.f32 %v1456_v60, %v1384_v62  ;;  %v1386_v9 = vadd.f32 %v1385_v4, %v15342_v47  ;;  %v1458_v10 = vpop.f32.mrf.mxu1  ;;  %v14149_v4 = vld [vmem:[#allocation8 + $0x1cc] ss:$12 sps:$4 sm:$0xff]  }
 0x1ba   : > { %v15358_v11 = vpop.f32.mrf.mxu0  ;;  %2744 = vmatprep.subr.bf16.mxu0 %v14149_v4 }
 0x1bb   : > { %v15360_v7 = vadd.f32 %v1458_v10, %v1386_v9  ;;  %v15364_v19 = vpop.f32.mrf.mxu1  ;;  %v14150_v9 = vld [vmem:[#allocation8 + $0x1d0] ss:$12 sps:$4 sm:$0xff]   ;;  %2745 = vmatpush2.bf16.msra.mxu0 %v14147_v6 }
 0x1bc   : > { %v1391_v14 = vpop.f32.mrf.mxu0  ;;  %2828 = vmatpush2.bf16.msra.mxu1 %v14150_v9 }
 0x1bd   : > { %v1392_v1 = vadd.f32 %v1391_v14, %v15342_v47  ;;  %v1464_v39 = vpop.f32.mrf.mxu1  ;;  %v14153_v14 = vld [vmem:[#allocation8 + $0x1b4] ss:$12 sps:$4 sm:$0xff]   ;;  %2829 = vmatprep.subr.bf16.mxu1 %v20145_v37 }
 0x1be   : > { %v1393_v16 = vpop.f32.mrf.mxu0  ;;  %2746 = vmatprep.subr.bf16.mxu0 %v14153_v14 }
 0x1bf   : > { %v1394_v21 = vadd.f32 %v1393_v16, %v15348_v50  ;;  %v15369_v25 = vadd.f32 %v1464_v39, %v1392_v1  ;;  %v1466_v26 = vpop.f32.mrf.mxu1  ;;  %v14151_v1 = vld [vmem:[#allocation8 + $0x1b0] ss:$12 sps:$4 sm:$0xff]  }
 0x1c0   : > { %v1395_v18 = vpop.f32.mrf.mxu0  ;;  %2747 = vmatpush2.bf16.msra.mxu0 %v14151_v1 }
 0x1c1   : > { %v1396_v44 = vadd.f32 %v1395_v18, %v15342_v47  ;;  %v15372_v54 = vadd.f32 %v1466_v26, %v1394_v21  ;;  %v1468_v29 = vpop.f32.mrf.mxu1  ;;  %v14154_v18 = vld [vmem:[#allocation8 + $0x1b8] ss:$12 sps:$4 sm:$0xff]  }
 0x1c2   : > { %v15367_v22 = vpop.f32.mrf.mxu0  ;;  %2830 = vmatpush2.bf16.msra.mxu1 %v14154_v18 }
 0x1c3   : > { %v15376_v32 = vadd.f32 %v1468_v29, %v1396_v44  ;;  %v15381_v34 = vpop.f32.mrf.mxu1  ;;  %3125 = vmatprep.subr.bf16.mxu1 %v20145_v37 }
 0x1c4   : > { %v1401_v17 = vpop.f32.mrf.mxu0 }
 0x1c5   : > { %v1402_v27 = vadd.f32 %v1401_v17, %v15342_v47  ;;  %v1474_v56 = vpop.f32.mrf.mxu1 }
 0x1c6   : > { %v1403_v30 = vpop.f32.mrf.mxu0 }
 0x1c7   : > { %v1404_v35 = vadd.f32 %v1403_v30, %v15348_v50  ;;  %v15384_v53 = vadd.f32 %v1474_v56, %v1402_v27  ;;  %v1476_v57 = vpop.f32.mrf.mxu1 }
 0x1c8   : > { %v1405_v38 = vpop.f32.mrf.mxu0 }
 0x1c9   : > { %v1406_v40 = vadd.f32 %v1405_v38, %v15342_v47  ;;  %v15387_v59 = vadd.f32 %v1476_v57, %v1404_v35  ;;  %v1478_v60 = vpop.f32.mrf.mxu1  ;;  %v1388_v38 = vadd.f32 %v15358_v11, %v15348_v50  ;;  %v14157_v57 = vld [vmem:[#allocation8 + $0xac] ss:$12 sps:$4 sm:$0xff]  }
 0x1ca   : > { %v15391_v2 = vpop.f32.mrf.mxu0  ;;  %3042 = vmatprep.subr.bf16.mxu0 %v14157_v57 }
 0x1cb   : > { %v15389_v62 = vadd.f32 %v1478_v60, %v1406_v40  ;;  %v15393_v10 = vpop.f32.mrf.mxu1  ;;  %v1461_v55 = vadd.f32 %v15364_v19, %v1388_v38 }
 0x1cc   : > { %v1411_v12 = vpop.f32.mrf.mxu0 }
 0x1cd   : > { %v1412_v16 = vadd.f32 %v1411_v12, %v15342_v47  ;;  %v1484_v13 = vpop.f32.mrf.mxu1 }
 0x1ce   : > { %v1413_v21 = vpop.f32.mrf.mxu0 }
 0x1cf   : > { %v1414_v39 = vadd.f32 %v1413_v21, %v15348_v50  ;;  %v15398_v23 = vadd.f32 %v1484_v13, %v1412_v16  ;;  %v1486_v44 = vpop.f32.mrf.mxu1 }
 0x1d0   : > { %v1415_v24 = vpop.f32.mrf.mxu0 }
 0x1d1   : > { %v1416_v26 = vadd.f32 %v1415_v24, %v15342_v47  ;;  %v15402_v17 = vadd.f32 %v1486_v44, %v1414_v39  ;;  %v1488_v27 = vpop.f32.mrf.mxu1 }
 0x1d2   : > { %v1417_v29 = vpop.f32.mrf.mxu0 }
 0x1d3   : > { %v15404_v30 = vadd.f32 %v1488_v27, %v1416_v26  ;;  %v15411_v31 = vpop.f32.mrf.mxu1  ;;  %v1408_v26 = vadd.f32 %v15391_v2, %v15348_v50 }
 0x1d4   : > { %v1527_v35 = vpop.f32.mrf.mxu0 }
 0x1d5   : > { %v1528_v40 = vadd.f32 %v1527_v35, %v15351_v61  ;;  %v1398_v61 = vadd.f32 %v15367_v22, %v15348_v50 }
 0x1d6   : > { %v1529_v42 = vpop.f32.mrf.mxu0 }
 0x1d7   : > { %v1530_v43 = vadd.f32 %v1529_v42, %v15355_v8  ;;  %v1785_v48 = vmax.f32 %v1528_v40, 0.0  ;;  %v1471_v22 = vadd.f32 %v15381_v34, %v1398_v61 }
 0x1d8   : > { %v1531_v45 = vpop.f32.mrf.mxu0 }
 0x1d9   : > { %v1532_v47 = vadd.f32 %v1531_v45, %v15360_v7  ;;  %v1786_v60 = vmax.f32 %v1530_v43, 0.0 }
 0x1da   : > { %v1533_v46 = vpop.f32.mrf.mxu0 }
 0x1db   : > { %v1789_v49 = vmax.f32 %v1532_v47, 0.0  ;;  %v1534_v51 = vadd.f32 %v1533_v46, %v1461_v55  ;;  %v1481_v46 = vadd.f32 %v15393_v10, %v1408_v26 }
 0x1dc   : > { %v1537_v11 = vpop.f32.mrf.mxu0 }
 0x1dd   : > { %v15418_v8 = vmax.f32 %v1785_v48, %v1789_v49  ;;  %v1790_v4 = vmax.f32 %v1534_v51, 0.0  ;;  %v1538_v19 = vadd.f32 %v1537_v11, %v15369_v25 }
 0x1de   : > { %v1539_v7 = vpop.f32.mrf.mxu0 }
 0x1df   : > { %20401 = vst [vmem:[#allocation31_spill] sm:$0xff] %v15418_v8  ;;  %v15423_v9 = vmax.f32 %v1786_v60, %v1790_v4  ;;  %v1540_v12 = vadd.f32 %v1539_v7, %v15372_v54  ;;  %v1793_v39 = vmax.f32 %v1538_v19, 0.0  ;;  %v1418_v60 = vadd.f32 %v1417_v29, %v15348_v50  ;;  %v14171_v8 = vld [vmem:[#allocation8 + $0x48] ss:$12 sps:$4 sm:$0xff]  }
 0x1e0   : > { %v1541_v16 = vpop.f32.mrf.mxu0 }
 0x1e1   : > { %20402 = vst [vmem:[#allocation32_spill] sm:$0xff] %v15423_v9  ;;  %v1542_v25 = vadd.f32 %v1541_v16, %v15376_v32  ;;  %v1794_v27 = vmax.f32 %v1540_v12, 0.0 }
 0x1e2   : > { %v1543_v13 = vpop.f32.mrf.mxu0 }
 0x1e3   : > { %v1797_v24 = vmax.f32 %v1542_v25, 0.0  ;;  %v1544_v44 = vadd.f32 %v1543_v13, %v1471_v22 }
 0x1e4   : > { %v1547_v34 = vpop.f32.mrf.mxu0 }
 0x1e5   : > { %v15440_v35 = vmax.f32 %v1793_v39, %v1797_v24  ;;  %v1798_v38 = vmax.f32 %v1544_v44, 0.0  ;;  %v1548_v40 = vadd.f32 %v1547_v34, %v15384_v53  ;;  %v1491_v39 = vadd.f32 %v15411_v31, %v1418_v60 }
 0x1e6   : > { %v1549_v32 = vpop.f32.mrf.mxu0 }
 0x1e7   : > { %20403 = vst [vmem:[#allocation33_spill] sm:$0xff] %v15440_v35  ;;  %v15445_v43 = vmax.f32 %v1794_v27, %v1798_v38  ;;  %v1550_v45 = vadd.f32 %v1549_v32, %v15387_v59  ;;  %v1801_v57 = vmax.f32 %v1548_v40, 0.0 }
 0x1e8   : > { %v1551_v47 = vpop.f32.mrf.mxu0 }
 0x1e9   : > { %20404 = vst [vmem:[#allocation34_spill] sm:$0xff] %v15445_v43  ;;  %v1552_v53 = vadd.f32 %v1551_v47, %v15389_v62  ;;  %v1802_v10 = vmax.f32 %v1550_v45, 0.0 }
 0x1ea   : > { %v1553_v51 = vpop.f32.mrf.mxu0 }
 0x1eb   : > { %v1805_v61 = vmax.f32 %v1552_v53, 0.0  ;;  %v1554_v11 = vadd.f32 %v1553_v51, %v1481_v46 }
 0x1ed   : > { %v15461_v19 = vmax.f32 %v1801_v57, %v1805_v61  ;;  %v1806_v7 = vmax.f32 %v1554_v11, 0.0  ;;  %v20139_v61 = vsub.s32 2, %v15333_v20  ;;  %v668_v11 = vsub.s32 3, %v15333_v20 }
 0x1ef   : > { %20405 = vst [vmem:[#allocation35_spill] sm:$0xff] %v15461_v19  ;;  %v15466_v62 = vmax.f32 %v1802_v10, %v1806_v7  ;;  %v15503_v10 = vrot.slane %v15337_v15, %v668_v11 }
 0x1f1   : > { %20406 = vst [vmem:[#allocation36_spill] sm:$0xff] %v15466_v62 }
 0x1f5   : > { %v15414_v56 = vpop.f32.mrf.mxu1 }
 0x1f7   : > { %v15421_v6 = vpop.f32.mrf.mxu1 }
 0x1f9   : > { %v15426_v14 = vpop.f32.mrf.mxu1  ;;  %v1557_v4 = vpop.f32.mrf.mxu0 }
 0x1fa   : > { %v1558_v12 = vadd.f32 %v1557_v4, %v15398_v23  ;;  %v15500_v4 = vrot.slane %v15337_v15, %v20139_v61 }
 0x1fb   : > { %v15434_v21 = vpop.f32.mrf.mxu1  ;;  %v1559_v16 = vpop.f32.mrf.mxu0 }
 0x1fc   : > { %v1560_v25 = vadd.f32 %v1559_v16, %v15402_v17  ;;  %v1809_v26 = vmax.f32 %v1558_v12, 0.0  ;;  %v1601_v12 = vadd.f32 %v15414_v56, %v15500_v4  ;;  %v14896_v16 = vmov 1983009808  }
 0x1fd   : > { %v15436_v54 = vpop.f32.mrf.mxu1  ;;  %v1561_v13 = vpop.f32.mrf.mxu0  ;;  %v1607_v11 = vadd.f32 %v15434_v21, %v15503_v10 }
 0x1fe   : > { %v1562_v24 = vadd.f32 %v1561_v13, %v15404_v30  ;;  %v1810_v38 = vmax.f32 %v1560_v25, 0.0  ;;  %v1933_v25 = vunpack.c.l.s4 %v14896_v16 }
 0x1ff   : > { %v15443_v42 = vpop.f32.mrf.mxu1  ;;  %v1563_v44 = vpop.f32.mrf.mxu0 }
 0x200   : > { %v1813_v34 = vmax.f32 %v1562_v24, 0.0  ;;  %v1564_v27 = vadd.f32 %v1563_v44, %v1491_v39  ;;  %v1603_v39 = vadd.f32 %v15421_v6, %v15503_v10  ;;  %v1934_v15 = vunpack.c.0.s8 %v1933_v25 }
 0x201   : > { %v15448_v55 = vpop.f32.mrf.mxu1  ;;  %v1613_v25 = vadd.f32 %v15443_v42, %v15503_v10 }
 0x202   : > { %v15477_v40 = vmax.f32 %v1809_v26, %v1813_v34  ;;  %v1814_v17 = vmax.f32 %v1564_v27, 0.0  ;;  %v1605_v34 = vadd.f32 %v15426_v14, %v15500_v4  ;;  %v15514_v50 = vsub.s32 %v1934_v15, %v15333_v20  ;;  %v14186_v20 = vld [vmem:[#allocation8 + $0x8] ss:$12 sps:$4 sm:$0xff]  }
 0x203   : > { %v15456_v49 = vpop.f32.mrf.mxu1  ;;  %v1611_v14 = vadd.f32 %v15436_v54, %v15500_v4 }
 0x204   : > { %20407 = vst [vmem:[#allocation37_spill] sm:$0xff] %v15477_v40  ;;  %v15481_v31 = vmax.f32 %v1810_v38, %v1814_v17  ;;  %20409 = vst [vmem:[#allocation39_spill] sm:$0xff] %v15514_v50  ;;  %v14166_v40 = vld [vmem:[#allocation8 + $0x80] ss:$12 sps:$4 sm:$0xff]  }
 0x205   : > { %v15458_v59 = vpop.f32.mrf.mxu1 }
 0x206   : > { %20408 = vst [vmem:[#allocation38_spill] sm:$0xff] %v15481_v31 }
 0x207   : > { %v15464_v22 = vpop.f32.mrf.mxu1 }
 0x209   : > { %v15475_v23 = vpop.f32.mrf.mxu1 }
 0x20b   : > { %v15479_v32 = vpop.f32.mrf.mxu1 }
 0x20d   : > { %v15487_v47 = vpop.f32.mrf.mxu1 }
 0x20f   : > { %v15489_v46 = vpop.f32.mrf.mxu1 }
 0x211   : > { %v15491_v53 = vpop.f32.mrf.mxu1 }
 0x213   : > { %v15493_v51 = vpop.f32.mrf.mxu1 }
 0x215   : > { %v1746_v57 = vpop.f32.mrf.mxu1 }
 0x217   : > { %v1748_v60 = vpop.f32.mrf.mxu1 }
 0x219   : > { %v1750_v7 = vpop.f32.mrf.mxu1 }
 0x21b   : > { %v1752_v26 = vpop.f32.mrf.mxu1 }
 0x21d   : > { %v1756_v45 = vpop.f32.mrf.mxu1 }
 0x222   : > { %v1673_v13 = vpop.f32.mrf.mxu0 }
 0x223   : > { %v1674_v24 = vadd.f32 %v1673_v13, %v1601_v12 }
 0x224   : > { %v1675_v44 = vpop.f32.mrf.mxu0 }
 0x225   : > { %v1747_v27 = vadd.f32 %v1746_v57, %v1674_v24  ;;  %v1676_v38 = vadd.f32 %v1675_v44, %v1603_v39  ;;  %v1758_v44 = vpop.f32.mrf.mxu1 }
 0x226   : > { %v1677_v17 = vpop.f32.mrf.mxu0 }
 0x227   : > { %v1787_v56 = vmax.f32 %v1747_v27, 0.0  ;;  %v1749_v63 = vadd.f32 %v1748_v60, %v1676_v38  ;;  %v1678_v16 = vadd.f32 %v1677_v17, %v1605_v34  ;;  %v1615_v60 = vadd.f32 %v15448_v55, %v15500_v4 }
 0x228   : > { %v1679_v30 = vpop.f32.mrf.mxu0 }
 0x229   : > { %v1833_v29 = vrot.slane %v1787_v56, 7  ;;  %v1788_v6 = vmax.f32 %v1749_v63, 0.0  ;;  %v1751_v12 = vadd.f32 %v1750_v7, %v1678_v16  ;;  %v1680_v13 = vadd.f32 %v1679_v30, %v1607_v11 }
 0x22a   : > { %v1683_v57 = vpop.f32.mrf.mxu0  ;;  %v1617_v63 = vadd.f32 %v15456_v49, %v15503_v10  ;;  %v15530_v49 = vadd.f32 %v15458_v59, %v15500_v4 }
 0x22b   : > { %v1834_v21 = vrot.slane %v1788_v6, 7  ;;  %v1791_v39 = vmax.f32 %v1751_v12, 0.0  ;;  %v1753_v7 = vadd.f32 %v1752_v26, %v1680_v13  ;;  %v1684_v30 = vadd.f32 %v1683_v57, %v1611_v14  ;;  %v1760_v57 = vpop.f32.mrf.mxu1 }
 0x22c   : > { %v1685_v24 = vpop.f32.mrf.mxu0  ;;  %v1866_v34 = vsel %vm1865_vm0, 0.0, %v1833_v29  ;;  %v15534_v26 = vadd.f32 %v15464_v22, %v15503_v10  ;;  %v15538_v6 = vadd.f32 %v15475_v23, %v15500_v4  ;;  %v1882_v12 = vsel %vm1865_vm0, %v1833_v29, 0.0 }
 0x22d   : > { %v1867_v54 = vsel %vm1865_vm0, 0.0, %v1834_v21  ;;  %v1835_v27 = vrot.slane %v1791_v39, 7  ;;  %v1686_v38 = vadd.f32 %v1685_v24, %v1613_v25  ;;  %6815 = vrot.lane.b32.xlu0 %v1834_v21, %s14897_s16  ;;  %v1883_v42 = vsel %vm1865_vm0, %v1834_v21, 0.0 }
 0x22e   : > { %v1930_v15 = vcombine.low %v1866_v34, %v1867_v54  ;;  %v1931_v55 = vcombine.high %v1866_v34, %v1867_v54  ;;  %v1792_v17 = vmax.f32 %v1753_v7, 0.0  ;;  %v1687_v11 = vpop.f32.mrf.mxu0  ;;  %v1757_v56 = vadd.f32 %v1756_v45, %v1684_v30 }
 0x22f   : > { %v1759_v16 = vadd.f32 %v1758_v44, %v1686_v38  ;;  %v1948_v59 = vcombine.low %v1882_v12, %v1883_v42  ;;  %v1868_v21 = vsel %vm1865_vm0, 0.0, %v1835_v27  ;;  %v15548_v29 = vadd.f32 %v15479_v32, %v15503_v10 }
 0x230   : > { %v1938_v13 = vrot.slane %v1930_v15, %v15514_v50  ;;  %v1836_v14 = vrot.slane %v1792_v17, 7  ;;  %v1945_v25 = vrot.slane %v1931_v55, %v15514_v50  ;;  %v1795_v39 = vmax.f32 %v1757_v56, 0.0  ;;  %v1689_v22 = vpop.f32.mrf.mxu0  ;;  %v1762_v55 = vpop.f32.mrf.mxu1 }
 0x231   : > { %v1796_v24 = vmax.f32 %v1759_v16, 0.0  ;;  %v1688_v42 = vadd.f32 %v1687_v11, %v1615_v60  ;;  %v1690_v15 = vadd.f32 %v1689_v22, %v1617_v63  ;;  %v15553_v17 = vadd.f32 %v15487_v47, %v15500_v4 }
 0x232   : > { %v1946_v7 = vcombine.high %v1938_v13, %v1938_v13  ;;  %v2138_v45 = vcombine.low %v1938_v13, %v1938_v13  ;;  %v1869_v30 = vsel %vm1865_vm0, 0.0, %v1836_v14  ;;  %6817 = vrot.lane.b32.xlu0 %v1836_v14, %s14897_s16  ;;  %v1837_v34 = vrot.slane %v1795_v39, 7  ;;  %v1693_v12 = vpop.f32.mrf.mxu0 }
 0x233   : > { %v1956_v23 = vcombine.low %v1868_v21, %v1869_v30  ;;  %v1957_v44 = vcombine.high %v1868_v21, %v1869_v30  ;;  %v1885_v38 = vsel %vm1865_vm0, %v1836_v14, 0.0  ;;  %v1884_v56 = vsel %vm1865_vm0, %v1835_v27, 0.0 }
 0x234   : > { %v2139_v54 = vcombine.low %v1946_v7, %v1945_v25  ;;  %v1947_v13 = vcombine.high %v1945_v25, %v1945_v25  ;;  %v1955_v21 = vrot.slane %v1948_v59, %v15514_v50  ;;  %v2146_v14 = vrot.slane %v2138_v45, %v15514_v50 }
 0x235   : > { %v1964_v16 = vrot.slane %v1956_v23, %v15514_v50  ;;  %v1971_v32 = vrot.slane %v1957_v44, %v15514_v50  ;;  %v1838_v60 = vrot.slane %v1796_v24, 7  ;;  %v1974_v11 = vcombine.low %v1884_v56, %v1885_v38  ;;  %v1766_v23 = vpop.f32.mrf.mxu1  ;;  %v1695_v44 = vpop.f32.mrf.mxu0 }
 0x236   : > { %v2153_v63 = vrot.slane %v2139_v54, %v15514_v50  ;;  %v1870_v47 = vsel %vm1865_vm0, 0.0, %v1837_v34  ;;  %v1886_v39 = vsel %vm1865_vm0, %v1837_v34, 0.0  ;;  %v1761_v7 = vadd.f32 %v1760_v57, %v1688_v42 }
 0x237   : > { %v1871_v27 = vsel %vm1865_vm0, 0.0, %v1838_v60  ;;  %v1887_v22 = vsel %vm1865_vm0, %v1838_v60, 0.0  ;;  %v1763_v30 = vadd.f32 %v1762_v55, %v1690_v15  ;;  %6819 = vrot.lane.b32.xlu1 %v1838_v60, %s14897_s16  ;;  %v1972_v25 = vcombine.high %v1964_v16, %v1964_v16  ;;  %v1768_v48 = vpop.f32.mrf.mxu1 }
 0x238   : > { %v1973_v59 = vcombine.high %v1971_v32, %v1971_v32  ;;  %v1982_v45 = vcombine.low %v1870_v47, %v1871_v27  ;;  %v1983_v24 = vcombine.high %v1870_v47, %v1871_v27  ;;  %v15568_v54 = vadd.f32 %v15489_v46, %v15503_v10 }
 0x239   : > { %v15572_v34 = vadd.f32 %v15491_v53, %v15500_v4  ;;  %v15576_v57 = vadd.f32 %v15493_v51, %v15503_v10  ;;  %v2000_v38 = vcombine.low %v1886_v39, %v1887_v22  ;;  %v15578_v42 = vcombine.low %v2146_v14, %v2153_v63  ;;  %v1697_v51 = vpop.f32.mrf.mxu0 }
 0x23a   : > { %v2156_v15 = vcombine.low %v1947_v13, %v1955_v21  ;;  %v1981_v55 = vrot.slane %v1974_v11, %v15514_v50  ;;  %v1990_v56 = vrot.slane %v1982_v45, %v15514_v50  ;;  %v2155_v60 = vcombine.high %v2146_v14, %v2153_v63 }
 0x23b   : > { %v1997_v46 = vrot.slane %v1983_v24, %v15514_v50  ;;  %v1799_v47 = vmax.f32 %v1761_v7, 0.0  ;;  %v1800_v27 = vmax.f32 %v1763_v30, 0.0  ;;  %v2157_v53 = vcombine.low %v1964_v16, %v1972_v25  ;;  %v1770_v25 = vpop.f32.mrf.mxu1 }
 0x23c   : > { %v2174_v4 = vcombine.low %v1971_v32, %v1973_v59  ;;  %v1998_v2 = vcombine.high %v1990_v56, %v1990_v56  ;;  %v2175_v18 = vcombine.low %v1981_v55, %v1990_v56  ;;  %v2007_v39 = vrot.slane %v2000_v38, %v15514_v50 }
 0x23d   : > { %v1999_v10 = vcombine.high %v1997_v46, %v1997_v46  ;;  %v1839_v22 = vrot.slane %v1799_v47, 7  ;;  %v1840_v13 = vrot.slane %v1800_v27, 7  ;;  %v1694_v14 = vadd.f32 %v1693_v12, %v15530_v49  ;;  %v1699_v12 = vpop.f32.mrf.mxu0  ;;  %v1772_v27 = vpop.f32.mrf.mxu1 }
 0x23e   : > { %v15585_v21 = vrot.slane %v2175_v18, %v15514_v50  ;;  %v2192_v11 = vcombine.low %v1998_v2, %v1997_v46  ;;  %v1696_v63 = vadd.f32 %v1695_v44, %v15534_v26  ;;  %v2164_v7 = vrot.slane %v2156_v15, %v15514_v50 }
 0x23f   : > { %v15592_v16 = vsel %vm2348_vm4, 0.0, %v15578_v42  ;;  %v2193_v32 = vcombine.low %v1999_v10, %v2007_v39  ;;  %v1873_v30 = vsel %vm1865_vm0, 0.0, %v1840_v13  ;;  %6821 = vrot.lane.b32.xlu1 %v1840_v13, %s14897_s16  ;;  %v2182_v18 = vrot.slane %v2174_v4, %v15514_v50  ;;  %v1703_v39 = vpop.f32.mrf.mxu0 }
 0x240   : > { %v15598_v2 = vrot.slane %v2192_v11, %v15514_v50  ;;  %v1872_v49 = vsel %vm1865_vm0, 0.0, %v1839_v22  ;;  %v1698_v26 = vadd.f32 %v1697_v51, %v15538_v6  ;;  %v15603_v59 = vsel %vm2348_vm4, 0.0, %v2155_v60 }
 0x241   : > { %v15606_v45 = vrot.slane %v2193_v32, %v15514_v50  ;;  %v2008_v24 = vcombine.low %v1872_v49, %v1873_v30  ;;  %v2009_v44 = vcombine.high %v1872_v49, %v1873_v30  ;;  %v2171_v38 = vrot.slane %v2157_v53, %v15514_v50 }
 0x242   : > { %v15610_v15 = vcombine.low %v2182_v18, %v15585_v21  ;;  %v1767_v55 = vadd.f32 %v1766_v23, %v1694_v14  ;;  %v1769_v56 = vadd.f32 %v1768_v48, %v1696_v63  ;;  %v1889_v6 = vsel %vm1865_vm0, %v1840_v13, 0.0 }
 0x243   : > { %v15614_v46 = vcombine.low %v15598_v2, %v15606_v45  ;;  %v2016_v60 = vrot.slane %v2008_v24, %v15514_v50  ;;  %v2023_v47 = vrot.slane %v2009_v44, %v15514_v50  ;;  %v1888_v4 = vsel %vm1865_vm0, %v1839_v22, 0.0 }
 0x244   : > { %v1803_v51 = vmax.f32 %v1767_v55, 0.0  ;;  %v1804_v53 = vmax.f32 %v1769_v56, 0.0  ;;  %v1771_v10 = vadd.f32 %v1770_v25, %v1698_v26  ;;  %v1700_v14 = vadd.f32 %v1699_v12, %v15548_v29  ;;  %v1776_v55 = vpop.f32.mrf.mxu1 }
 0x245   : > { %v15622_v48 = vpack.c.bf16 %v15614_v46, %v15610_v15  ;;  %v2024_v23 = vcombine.high %v2016_v60, %v2016_v60  ;;  %v2025_v11 = vcombine.high %v2023_v47, %v2023_v47  ;;  %v2026_v13 = vcombine.low %v1888_v4, %v1889_v6 }
 0x246   : > { %v1841_v63 = vrot.slane %v1803_v51, 7  ;;  %v1842_v32 = vrot.slane %v1804_v53, 7  ;;  %v1807_v30 = vmax.f32 %v1771_v10, 0.0  ;;  %v1773_v44 = vadd.f32 %v1772_v27, %v1700_v14  ;;  %v1778_v14 = vpop.f32.mrf.mxu1 }
 0x247   : > { %v2210_v49 = vcombine.low %v2016_v60, %v2024_v23  ;;  %v2211_v24 = vcombine.low %v2023_v47, %v2025_v11  ;;  %v1704_v22 = vadd.f32 %v1703_v39, %v15553_v17  ;;  %v1705_v47 = vpop.f32.mrf.mxu0  ;;  %v20143_v27 = vmov 0.0  }
 0x248   : > { %v1874_v25 = vsel %vm1865_vm0, 0.0, %v1841_v63  ;;  %v1890_v26 = vsel %vm1865_vm0, %v1841_v63, 0.0  ;;  %v1875_v56 = vsel %vm1865_vm0, 0.0, %v1842_v32  ;;  %v1891_v1 = vsel %vm1865_vm0, %v1842_v32, 0.0  ;;  %6823 = vrot.lane.b32.xlu0 %v1842_v32, %s14897_s16 }
 0x249   : > { %v2218_v29 = vrot.slane %v2210_v49, %v15514_v50  ;;  %v2225_v12 = vrot.slane %v2211_v24, %v15514_v50  ;;  %v2034_v6 = vcombine.low %v1874_v25, %v1875_v56  ;;  %v2035_v60 = vcombine.high %v1874_v25, %v1875_v56 }
 0x24a   : > { %v15635_v17 = vpack.c.bf16 %v15603_v59, %v20143_v27  ;;  %v2052_v4 = vcombine.low %v1890_v26, %v1891_v1  ;;  %v1843_v51 = vrot.slane %v1807_v30, 7  ;;  %v1808_v53 = vmax.f32 %v1773_v44, 0.0  ;;  %v1707_v26 = vpop.f32.mrf.mxu0 }
 0x24b   : > { %v15637_v10 = vcombine.low %v2164_v7, %v2171_v38  ;;  %v2042_v39 = vrot.slane %v2034_v6, %v15514_v50  ;;  %v2049_v23 = vrot.slane %v2035_v60, %v15514_v50  ;;  %v1777_v11 = vadd.f32 %v1776_v55, %v1704_v22  ;;  %v1780_v6 = vpop.f32.mrf.mxu1 }
 0x24c   : > { %v15641_v63 = vcombine.high %v2164_v7, %v2171_v38  ;;  %v15644_v32 = vcombine.high %v2182_v18, %v15585_v21  ;;  %v2033_v49 = vrot.slane %v2026_v13, %v15514_v50  ;;  %v1844_v24 = vrot.slane %v1808_v53, 7 }
 0x24d   : > { %v15647_v25 = vcombine.low %v2218_v29, %v2225_v12  ;;  %v2050_v1 = vcombine.high %v2042_v39, %v2042_v39  ;;  %v2051_v30 = vcombine.high %v2049_v23, %v2049_v23  ;;  %v1706_v44 = vadd.f32 %v1705_v47, %v15568_v54 }
 0x24e   : > { %v2059_v56 = vrot.slane %v2052_v4, %v15514_v50  ;;  %v1876_v22 = vsel %vm1865_vm0, 0.0, %v1843_v51  ;;  %v1877_v7 = vsel %vm1865_vm0, 0.0, %v1844_v24  ;;  %v1893_v38 = vsel %vm1865_vm0, %v1844_v24, 0.0  ;;  %6825 = vrot.lane.b32.xlu1 %v1844_v24, %s14897_s16  ;;  %v1709_v24 = vpop.f32.mrf.mxu0 }
 0x24f   : > { %v2228_v21 = vcombine.low %v2033_v49, %v2042_v39  ;;  %v2060_v18 = vcombine.low %v1876_v22, %v1877_v7  ;;  %v2061_v13 = vcombine.high %v1876_v22, %v1877_v7  ;;  %v1811_v55 = vmax.f32 %v1777_v11, 0.0 }
 0x250   : > { %v15657_v60 = vpack.c.bf16 %v15610_v15, %v15637_v10  ;;  %v2229_v54 = vcombine.low %v2050_v1, %v2049_v23  ;;  %v1892_v47 = vsel %vm1865_vm0, %v1843_v51, 0.0  ;;  %v1708_v4 = vadd.f32 %v1707_v26, %v15572_v34 }
 0x251   : > { %v15663_v53 = vpack.c.bf16 %v15644_v32, %v15641_v63  ;;  %v2246_v61 = vcombine.low %v2051_v30, %v2059_v56  ;;  %v2068_v39 = vrot.slane %v2060_v18, %v15514_v50  ;;  %v2078_v49 = vcombine.low %v1892_v47, %v1893_v38  ;;  %v1782_v56 = vpop.f32.mrf.mxu1 }
 0x252   : > { %20410 = vst [vmem:[#allocation40_spill] sm:$0xff] %v15657_v60  ;;  %v15668_v11 = vcombine.high %v15598_v2, %v15606_v45  ;;  %v15670_v15 = vcombine.high %v2218_v29, %v2225_v12  ;;  %v15674_v51 = vpack.c.bf16 %v15647_v25, %v15614_v46  ;;  %v1779_v34 = vadd.f32 %v1778_v14, %v1706_v44 }
 0x253   : > { %20411 = vst [vmem:[#allocation41_spill] sm:$0xff] %v15663_v53  ;;  %v15677_v23 = vrot.slane %v2228_v21, %v15514_v50  ;;  %v2075_v1 = vrot.slane %v2061_v13, %v15514_v50  ;;  %v2076_v30 = vcombine.high %v2068_v39, %v2068_v39  ;;  %v1845_v26 = vrot.slane %v1811_v55, 7 }
 0x254   : > { %20412 = vst [vmem:[#allocation42_spill] sm:$0xff] %v15674_v51  ;;  %v2243_v22 = vrot.slane %v2229_v54, %v15514_v50  ;;  %v1812_v2 = vmax.f32 %v1779_v34, 0.0  ;;  %v1710_v45 = vadd.f32 %v1709_v24, %v15576_v57  ;;  %v1781_v29 = vadd.f32 %v1780_v6, %v1708_v4 }
 0x255   : > { %v2254_v46 = vrot.slane %v2246_v61, %v15514_v50  ;;  %v2085_v12 = vrot.slane %v2078_v49, %v15514_v50  ;;  %v2247_v14 = vcombine.low %v2068_v39, %v2076_v30  ;;  %v2462_v44 = vshll.u32 %v15635_v17, 16 }
 0x256   : > { %v1846_v7 = vrot.slane %v1812_v2, 7  ;;  %v1815_v38 = vmax.f32 %v1781_v29, 0.0  ;;  %v1783_v21 = vadd.f32 %v1782_v56, %v1710_v45  ;;  %v20142_v18 = vshll.u32 %v15663_v53, 16 }
 0x257   : > { %v2077_v13 = vcombine.high %v2075_v1, %v2075_v1  ;;  %v1878_v55 = vsel %vm1865_vm0, 0.0, %v1845_v26  ;;  %v1894_v54 = vsel %vm1865_vm0, %v1845_v26, 0.0  ;;  %v2464_v57 = vrot.slane %v2462_v44, 1 }
 0x258   : > { %v1879_v6 = vsel %vm1865_vm0, 0.0, %v1846_v7  ;;  %v1895_v61 = vsel %vm1865_vm0, %v1846_v7, 0.0  ;;  %v1847_v47 = vrot.slane %v1815_v38, 7  ;;  %v1816_v4 = vmax.f32 %v1783_v21, 0.0  ;;  %6827 = vrot.lane.b32.xlu0 %v1846_v7, %s14897_s16 }
 0x259   : > { %v2086_v39 = vcombine.low %v1878_v55, %v1879_v6  ;;  %v2087_v49 = vcombine.high %v1878_v55, %v1879_v6  ;;  %v2460_v24 = vshrl.u32 %v15635_v17, 16  ;;  %v15694_v34 = vpack.c.bf16 %v15592_v16, %v20143_v27 }
 0x25a   : > { %v2261_v30 = vrot.slane %v2247_v14, %v15514_v50  ;;  %v2104_v26 = vcombine.low %v1894_v54, %v1895_v61  ;;  %v1848_v56 = vrot.slane %v1816_v4, 7  ;;  %v15699_v2 = vrot.slane %v20142_v18, 1 }
 0x25b   : > { %v2094_v45 = vrot.slane %v2086_v39, %v15514_v50  ;;  %v2101_v29 = vrot.slane %v2087_v49, %v15514_v50  ;;  %v1880_v44 = vsel %vm1865_vm0, 0.0, %v1847_v47  ;;  %v1896_v7 = vsel %vm1865_vm0, %v1847_v47, 0.0 }
 0x25c   : > { %v2111_v38 = vrot.slane %v2104_v26, %v15514_v50  ;;  %v1881_v21 = vsel %vm1865_vm0, 0.0, %v1848_v56  ;;  %v1897_v14 = vsel %vm1865_vm0, %v1848_v56, 0.0  ;;  %v2465_v55 = vor.u32 %v2464_v57, %v2460_v24  ;;  %6829 = vrot.lane.b32.xlu1 %v1848_v56, %s14897_s16 }
 0x25d   : > { %v2102_v54 = vcombine.high %v2094_v45, %v2094_v45  ;;  %v2103_v6 = vcombine.high %v2101_v29, %v2101_v29  ;;  %v2265_v61 = vcombine.low %v2085_v12, %v2094_v45  ;;  %v2112_v4 = vcombine.low %v1880_v44, %v1881_v21 }
 0x25e   : > { %v2264_v39 = vcombine.low %v2075_v1, %v2077_v13  ;;  %v2113_v0 = vcombine.high %v1880_v44, %v1881_v21  ;;  %v2130_v49 = vcombine.low %v1896_v7, %v1897_v14  ;;  %v2470_v36 = vsel %vm2446_vm5, %v2465_v55, %v15699_v2 }
 0x25f   : > { %v15711_v47 = vcombine.low %v2254_v46, %v2261_v30  ;;  %v2282_v26 = vcombine.low %v2102_v54, %v2101_v29  ;;  %v2283_v33 = vcombine.low %v2103_v6, %v2111_v38  ;;  %v2120_v18 = vrot.slane %v2112_v4, %v15514_v50  ;;  %12902 = vmatprep.mubr.msk.bf16.mxu0 %vm2700_vm6, %v2470_v36  ;;  %v14155_v6 = vld [vmem:[#allocation8 + $0xa8] ss:$12 sps:$4 sm:$0xff]  }
 0x260   : > { %v15715_v57 = vcombine.high %v2254_v46, %v2261_v30  ;;  %v2127_v24 = vrot.slane %v2113_v0, %v15514_v50  ;;  %12907 = vmatprep.mubr.msk.bf16.mxu1 %vm2700_vm6, %v2470_v36  ;;  %v2450_v1 = vshll.u32 %v15694_v34, 16  ;;  %v2455_v12 = vshll.u32 %v15657_v60, 16 }
 0x261   : > { %v15722_v13 = vcombine.low %v15677_v23, %v2243_v22  ;;  %v2279_v56 = vrot.slane %v2265_v61, %v15514_v50  ;;  %v2290_v45 = vrot.slane %v2282_v26, %v15514_v50  ;;  %v2297_v29 = vrot.slane %v2283_v33, %v15514_v50  ;;  %v14158_v61 = vld [vmem:[#allocation8 + $0xb0] ss:$12 sps:$4 sm:$0xff]  }
 0x262   : > { %v15728_v46 = vcombine.high %v15677_v23, %v2243_v22  ;;  %v2128_v30 = vcombine.high %v2120_v18, %v2120_v18  ;;  %v2129_v0 = vcombine.high %v2127_v24, %v2127_v24  ;;  %v2452_v44 = vrot.slane %v2450_v1, 1  ;;  %v14161_v1 = vld [vmem:[#allocation8 + $0x94] ss:$12 sps:$4 sm:$0xff]  }
 0x263   : > { %v15732_v36 = vpack.c.bf16 %v15670_v15, %v15668_v11  ;;  %v2272_v7 = vrot.slane %v2264_v39, %v15514_v50  ;;  %v2448_v38 = vshrl.u32 %v15694_v34, 16  ;;  %v2457_v21 = vrot.slane %v2455_v12, 1 }
 0x264   : > { %v15738_v14 = vpack.c.bf16 %v15711_v47, %v15722_v13  ;;  %v15742_v33 = vpack.c.bf16 %v15715_v57, %v15728_v46  ;;  %v15746_v22 = vcombine.high %v2290_v45, %v2297_v29  ;;  %v2137_v55 = vrot.slane %v2130_v49, %v15514_v50 }
 0x265   : > { %20413 = vst [vmem:[#allocation43_spill] sm:$0xff] %v15732_v36  ;;  %v15744_v23 = vcombine.high %v2272_v7, %v2279_v56  ;;  %v2453_v54 = vor.u32 %v2452_v44, %v2448_v38  ;;  %v15749_v4 = vcombine.low %v2290_v45, %v2297_v29  ;;  %v2300_v39 = vcombine.low %v2120_v18, %v2128_v30  ;;  %v14159_v29 = vld [vmem:[#allocation8 + $0x90] ss:$12 sps:$4 sm:$0xff]  }
 0x266   : > { %20414 = vst [vmem:[#allocation44_spill] sm:$0xff] %v15738_v14  ;;  %20415 = vst [vmem:[#allocation45_spill] sm:$0xff] %v15742_v33  ;;  %v2301_v26 = vcombine.low %v2127_v24, %v2129_v0  ;;  %v20155_v27 = vshrl.u32 %v15663_v53, 16  ;;  %v20154_v3 = vshll.u32 %v15732_v36, 16  ;;  %v2471_v58 = vshrl.u32 %v15657_v60, 16 }
 0x267   : > { %v2458_v37 = vsel %vm2446_vm5, %v2453_v54, %v2457_v21  ;;  %v2475_v5 = vshll.u32 %v15674_v51, 16  ;;  %v15756_v31 = vcombine.low %v2272_v7, %v2279_v56  ;;  %v15758_v49 = vrot.slane %v2455_v12, 3  ;;  %v14162_v12 = vld [vmem:[#allocation8 + $0x98] ss:$12 sps:$4 sm:$0xff]   ;;  %v14165_v54 = vld [vmem:[#allocation8 + $0x7c] ss:$12 sps:$4 sm:$0xff]  }
 0x268   : > { %2749 = vmatmul.mubr.bf16.vlgmr.msra.gmra.mxu0 %v2458_v37  ;;  %2832 = vmatmul.mubr.bf16.vlgmr.msra.gmra.mxu1 %v2458_v37  ;;  %v20161_v18 = vshll.u32 %v15742_v33, 16  ;;  %v20156_v24 = vshrl.u32 %v15674_v51, 16  ;;  %v15764_v45 = vpack.c.bf16 %v15746_v22, %v15744_v23  ;;  %v2481_v56 = vor.u32 %v20155_v27, %v15699_v2 }
 0x269   : > { %3043 = vmatpush1.bf16.msra.mxu0 %v14155_v6  ;;  %3126 = vmatpush1.bf16.msra.mxu1 %v14158_v61  ;;  %v2485_v37 = vrot.slane %v20154_v3, 1  ;;  %v15771_v30 = vrot.slane %v2471_v58, 2  ;;  %v2308_v0 = vrot.slane %v2300_v39, %v15514_v50  ;;  %v2315_v44 = vrot.slane %v2301_v26, %v15514_v50 }
 0x26a   : > { %20416 = vst [vmem:[#allocation46_spill] sm:$0xff] %v15764_v45  ;;  %3044 = vmatprep.subr.bf16.mxu0 %v14161_v1  ;;  %v20417_v7 = vmov 0   ;;  %v5517_v38 = vrot.slane %v2475_v5, 3  ;;  %v5516_v6 = vrot.slane %v20156_v24, 2  ;;  %v15780_v2 = vpack.c.bf16 %v15749_v4, %v15756_v31 }
 0x26b   : > { %3127 = vmatprep.subr.bf16.mxu1 %v20417_v7  ;;  %v2486_v61 = vsel %vm2446_vm5, %v2481_v56, %v2485_v37  ;;  %v2477_v3 = vrot.slane %v2475_v5, 1  ;;  %v20163_v26 = vshrl.u32 %v15732_v36, 16  ;;  %v2501_v1 = vrot.slane %v20161_v18, 1  ;;  %v14163_v5 = vld [vmem:[#allocation8 + $0x78] ss:$12 sps:$4 sm:$0xff]  }
 0x26c   : > { %20418 = vst [vmem:[#allocation47_spill] sm:$0xff] %v15780_v2  ;;  %12903 = vmatprep.mubr.msk.bf16.mxu0 %vm2700_vm6, %v2486_v61  ;;  %12908 = vmatprep.mubr.msk.bf16.mxu1 %vm2700_vm6, %v2486_v61  ;;  %v15790_v27 = vor.u32 %v5517_v38, %v5516_v6  ;;  %v2324_v24 = vrot.slane %v2137_v55, %v15514_v50  ;;  %v20162_v39 = vshll.u32 %v15738_v14, 16  ;;  %v14169_v61 = vld [vmem:[#allocation8 + $0x64] ss:$12 sps:$4 sm:$0xff]   ;;  %v20164_v18 = vshll.u32 %v15764_v45, 16 }
 0x26d   : > { %3045 = vmatpush1.bf16.msra.mxu0 %v14159_v29  ;;  %3128 = vmatpush1.bf16.msra.mxu1 %v14162_v12  ;;  %v2473_v56 = vor.u32 %v2471_v58, %v2457_v21  ;;  %v2497_v62 = vor.u32 %v20163_v26, %v2485_v37  ;;  %v15798_v38 = vcombine.high %v2308_v0, %v2315_v44  ;;  %v20171_v29 = vshll.u32 %v15780_v2, 16  ;;  %v14170_v6 = vld [vmem:[#allocation8 + $0x68] ss:$12 sps:$4 sm:$0xff]  }
 0x26e   : > { %3046 = vmatprep.subr.bf16.mxu0 %v14165_v54  ;;  %3129 = vmatprep.subr.bf16.mxu1 %v20417_v7  ;;  %v15802_v58 = vcombine.low %v2308_v0, %v2315_v44  ;;  %v15810_v37 = vsel %vm2348_vm4, %v2324_v24, 0.0  ;;  %v14167_v54 = vld [vmem:[#allocation8 + $0x60] ss:$12 sps:$4 sm:$0xff]   ;;  %v2517_v44 = vrot.slane %v20164_v18, 1  ;;  %v20179_v19 = vshrl.u32 %v15764_v45, 16 }
 0x26f   : > { %v2478_v55 = vsel %vm2446_vm5, %v2473_v56, %v2477_v3  ;;  %v2502_v21 = vsel %vm2446_vm5, %v2497_v62, %v2501_v1  ;;  %v15807_v12 = vpack.c.bf16 %v15798_v38, %v15798_v38  ;;  %v2493_v56 = vrot.slane %v20162_v39, 1  ;;  %v14173_v0 = vld [vmem:[#allocation8 + $0x4c] ss:$12 sps:$4 sm:$0xff]  }
 0x270   : > { %2759 = vmatmul.mubr.bf16.gmra.mxu0 %v2478_v55  ;;  %2840 = vmatmul.mubr.bf16.gmra.mxu1 %v2478_v55  ;;  %v20176_v62 = vshrl.u32 %v15742_v33, 16  ;;  %v2509_v39 = vrot.slane %v20171_v29, 1  ;;  %v15830_v26 = vpack.c.bf16 %v15810_v37, %v15810_v37  ;;  %v20178_v29 = vshrl.u32 %v15780_v2, 16 }
 0x271   : > { %3047 = vmatpush1.bf16.msra.mxu0 %v14163_v5  ;;  %3130 = vmatpush1.bf16.msra.mxu1 %v14166_v40  ;;  %v2531_v55 = vshll.u32 %v15807_v12, 16  ;;  %v15821_v5 = vpack.c.bf16 %v15802_v58, %v15802_v58  ;;  %v2325_v40 = vcombine.high %v2324_v24, %v2324_v24  ;;  %v20419_v24 = vshrl.u32 %v15674_v51, 16 }
 0x272   : > { %3048 = vmatprep.subr.bf16.mxu0 %v14169_v61  ;;  %3131 = vmatprep.subr.bf16.mxu1 %v20417_v7  ;;  %v20177_v61 = vshrl.u32 %v15738_v14, 16  ;;  %v2513_v18 = vor.u32 %v20176_v62, %v2501_v1  ;;  %v14174_v62 = vld [vmem:[#allocation8 + $0x50] ss:$12 sps:$4 sm:$0xff]   ;;  %v4144_v28 = vshrl.u32 %v15622_v48, 16 }
 0x273   : > { %12904 = vmatprep.mubr.msk.bf16.mxu0 %vm2700_vm6, %v2502_v21  ;;  %12909 = vmatprep.mubr.msk.bf16.mxu1 %vm2700_vm6, %v2502_v21  ;;  %v2533_v43 = vrot.slane %v2531_v55, 1  ;;  %v2489_v21 = vor.u32 %v20419_v24, %v2477_v3  ;;  %v2523_v9 = vshll.u32 %v15821_v5, 16  ;;  %v14177_v3 = vld [vmem:[#allocation8 + $0x34] ss:$12 sps:$4 sm:$0xff]   ;;  %v15849_v24 = vor.u32 %v20178_v29, %v2509_v39 }
 0x274   : > { %v2505_v35 = vor.u32 %v20177_v61, %v2493_v56  ;;  %v2518_v1 = vsel %vm2446_vm5, %v2513_v18, %v2517_v44  ;;  %v15852_v61 = vsel %vm2348_vm4, %v2325_v40, 0.0  ;;  %v15891_v40 = vpack.c.bf16 %v15756_v31, %v15711_v47 }
 0x275   : > { %3049 = vmatpush1.bf16.msra.mxu0 %v14167_v54  ;;  %3132 = vmatpush1.bf16.msra.mxu1 %v14170_v6  ;;  %v2529_v54 = vor.u32 %v20179_v19, %v2517_v44  ;;  %v2494_v6 = vsel %vm2446_vm5, %v2489_v21, %v2493_v56  ;;  %v15861_v56 = vpack.c.bf16 %v15668_v11, %v15644_v32  ;;  %v3723_v44 = vrot.slane %v15830_v26, 1 }
 0x276   : > { %3050 = vmatprep.subr.bf16.mxu0 %v14173_v0  ;;  %3133 = vmatprep.subr.bf16.mxu1 %v20417_v7  ;;  %v2510_v55 = vsel %vm2446_vm5, %v2505_v35, %v2509_v39  ;;  %v15857_v0 = vpack.c.bf16 %v15641_v63, %v15603_v59  ;;  %v15865_v35 = vrot.slane %v2523_v9, 1  ;;  %v15869_v39 = vpack.c.bf16 %v15637_v10, %v15592_v16  ;;  %v14175_v59 = vld [vmem:[#allocation8 + $0x30] ss:$12 sps:$4 sm:$0xff]   ;;  %v14178_v63 = vld [vmem:[#allocation8 + $0x38] ss:$12 sps:$4 sm:$0xff]  }
 0x277   : > { %v2534_v18 = vsel %vm2446_vm5, %v2529_v54, %v2533_v43  ;;  %v3706_v43 = vrot.slane %v15622_v48, 1  ;;  %v3709_v11 = vrot.slane %v15861_v56, 1  ;;  %v15877_v9 = vpack.c.bf16 %v15728_v46, %v15670_v15 }
 0x278   : > { %2769 = vmatmul.mubr.bf16.gmra.mxu0 %v2494_v6  ;;  %2848 = vmatmul.mubr.bf16.gmra.mxu1 %v2494_v6  ;;  %v3708_v32 = vrot.slane %v15857_v0, 1  ;;  %v15881_v16 = vpack.c.bf16 %v15722_v13, %v15647_v25  ;;  %v3705_v10 = vrot.slane %v15869_v39, 1  ;;  %v15895_v15 = vpack.c.bf16 %v15798_v38, %v15746_v22  ;;  %v14179_v22 = vld [vmem:[#allocation8 + $0x18] ss:$12 sps:$4 sm:$0xff]  }
 0x279   : > { %12905 = vmatprep.mubr.msk.bf16.mxu0 %vm2700_vm6, %v2518_v1  ;;  %12910 = vmatprep.mubr.msk.bf16.mxu1 %vm2700_vm6, %v2518_v1  ;;  %v3713_v13 = vrot.slane %v15877_v9, 1  ;;  %v15904_v21 = vpack.c.bf16 %v15802_v58, %v15749_v4  ;;  %v3715_v47 = vrot.slane %v15891_v40, 1  ;;  %v14182_v1 = vld [vmem:[#allocation8 + $0x20] ss:$12 sps:$4 sm:$0xff]   ;;  %v4161_v19 = vshrl.u32 %v15861_v56, 16 }
 0x27a   : > { %3051 = vmatpush1.bf16.msra.mxu0 %v14171_v8  ;;  %3134 = vmatpush1.bf16.msra.mxu1 %v14174_v62  ;;  %v14181_v8 = vld [vmem:[#allocation8 + $0x1c] ss:$12 sps:$4 sm:$0xff]   ;;  %v15887_v62 = vpack.c.bf16 %v15744_v23, %v15715_v57  ;;  %v15898_v25 = vsel %vm3251_vm1, %v3708_v32, %v3709_v11  ;;  %v3711_v46 = vrot.slane %v15881_v16, 1  ;;  %v15907_v57 = vsel %vm3251_vm1, %v3705_v10, %v3706_v43  ;;  %v14185_v32 = vld [vmem:[#allocation8 + $0x4] ss:$12 sps:$4 sm:$0xff]  }
 0x27b   : > { %3052 = vmatprep.subr.bf16.mxu0 %v14177_v3  ;;  %3135 = vmatprep.subr.bf16.mxu1 %v20417_v7  ;;  %v3721_v23 = vrot.slane %v15895_v15, 1  ;;  %v15913_v54 = vsel %vm3251_vm1, %v3709_v11, %v3713_v13  ;;  %v3719_v6 = vrot.slane %v15904_v21, 1  ;;  %v15921_v3 = vpack.c.bf16 %v15852_v61, %v15852_v61 }
 0x27c   : > { %v3717_v31 = vrot.slane %v15887_v62, 1  ;;  %v15916_v4 = vsel %vm3251_vm1, %v3706_v43, %v3711_v46  ;;  %v4153_v43 = vshrl.u32 %v15857_v0, 16  ;;  %v4139_v41 = vshll.u32 %v15869_v39, 16 }
 0x27d   : > { %v15935_v10 = vsel %vm3251_vm1, %v3715_v47, %v3719_v6  ;;  %v15939_v29 = vsel %vm3251_vm1, %v3719_v6, %v3723_v44 }
 0x27e   : > { %3053 = vmatpush1.bf16.msra.mxu0 %v14175_v59  ;;  %3136 = vmatpush1.bf16.msra.mxu1 %v14178_v63  ;;  %v15925_v59 = vsel %vm3251_vm1, %v3713_v13, %v3717_v31  ;;  %v15928_v63 = vsel %vm3251_vm1, %v3711_v46, %v3715_v47  ;;  %v15931_v11 = vsel %vm3251_vm1, %v3717_v31, %v3721_v23  ;;  %v4156_v13 = vshll.u32 %v15857_v0, 16  ;;  %v14183_v46 = vld [vmem:[#allocation8] ss:$12 sps:$4 sm:$0xff]  }
 0x27f   : > { %3054 = vmatprep.subr.bf16.mxu0 %v14181_v8  ;;  %3137 = vmatprep.subr.bf16.mxu1 %v20417_v7  ;;  %20420 = vst [vmem:[#allocation48_spill] sm:$0xff] %v15935_v10  ;;  %v3725_v8 = vrot.slane %v15921_v3, 1  ;;  %20421 = vst [vmem:[#allocation49_spill] sm:$0xff] %v15939_v29  ;;  %v4155_v31 = vrot.slane %v4153_v43, 1  ;;  %v4136_v47 = vshrl.u32 %v15869_v39, 16  ;;  %v4163_v43 = vrot.slane %v4161_v19, 1 }
 0x280   : > { %2779 = vmatmul.mubr.bf16.gmra.mxu0 %v2510_v55  ;;  %2856 = vmatmul.mubr.bf16.gmra.mxu1 %v2510_v55  ;;  %v4164_v55 = vshll.u32 %v15861_v56, 16  ;;  %v4158_v6 = vrot.slane %v4156_v13, 2  ;;  %v15955_v29 = vpack.c.bf16 %v15852_v61, %v15798_v38  ;;  %v4146_v10 = vrot.slane %v4144_v28, 1 }
 0x281   : > { %12906 = vmatprep.mubr.msk.bf16.mxu0 %vm2700_vm6, %v2534_v18  ;;  %12911 = vmatprep.mubr.msk.bf16.mxu1 %vm2700_vm6, %v2534_v18  ;;  %v15948_v44 = vsel %vm3251_vm1, %v3721_v23, %v3725_v8  ;;  %v14189_v18 = vld [vmem:[#allocation8 + $0xdc] ss:$12 sps:$4 sm:$0xff]   ;;  %v2526_v23 = vsel %vm2446_vm5, %v15849_v24, %v15865_v35  ;;  %v4141_v8 = vrot.slane %v4139_v41, 2  ;;  %v20425_v19 = vor.u32 %v15758_v49, %v15771_v30 }
 0x282   : > { %3055 = vmatpush1.bf16.msra.mxu0 %v14179_v22  ;;  %3138 = vmatpush1.bf16.msra.mxu1 %v14182_v1  ;;  %20422 = vst [vmem:[#allocation50_spill] sm:$0xff] %v15948_v44  ;;  %v4166_v52 = vrot.slane %v4164_v55, 2  ;;  %20423 = vst [vmem:[#allocation51_spill] sm:$0xff] %v15955_v29  ;;  %v15959_v22 = vpack.c.bf16 %v15810_v37, %v15802_v58  ;;  %v4138_v1 = vrot.slane %v4136_v47, 1  ;;  %v14190_v58 = vld [vmem:[#allocation8 + $0xe0] ss:$12 sps:$4 sm:$0xff]  }
 0x283   : > { %3056 = vmatprep.subr.bf16.mxu0 %v14185_v32  ;;  %3139 = vmatprep.subr.bf16.mxu1 %v20417_v7  ;;  %v14187_v32 = vld [vmem:[#allocation8 + $0xd8] ss:$12 sps:$4 sm:$0xff]   ;;  %v4159_v13 = vor.u32 %v4158_v6, %v4155_v31  ;;  %v15969_v38 = vsel %vm5512_vm7, %v20425_v19, %v15790_v27  ;;  %v4147_v61 = vshll.u32 %v15622_v48, 16  ;;  %v4179_v24 = vshrl.u32 %v15877_v9, 16 }
 0x284   : > { %20424 = vst [vmem:[#allocation52_spill] sm:$0xff] %v15959_v22  ;;  %v4167_v44 = vor.u32 %v4166_v52, %v4163_v43  ;;  %20426 = vst [vmem:[#allocation53_spill] sm:$0xff] %v15969_v38  ;;  %v4142_v37 = vor.u32 %v4141_v8, %v4138_v1  ;;  %v4182_v41 = vshll.u32 %v15877_v9, 16  ;;  %v14193_v52 = vld [vmem:[#allocation8 + $0xc4] ss:$12 sps:$4 sm:$0xff]   ;;  %v4170_v49 = vshrl.u32 %v15881_v16, 16 }
 0x285   : > { %v4173_v30 = vshll.u32 %v15881_v16, 16  ;;  %v4149_v35 = vrot.slane %v4147_v61, 2  ;;  %v4200_v55 = vshll.u32 %v15887_v62, 16  ;;  %v4188_v43 = vshrl.u32 %v15891_v40, 16  ;;  %v14191_v1 = vld [vmem:[#allocation8 + $0xc0] ss:$12 sps:$4 sm:$0xff]  }
 0x286   : > { %3057 = vmatpush1.bf16.msra.mxu0 %v14183_v46  ;;  %3140 = vmatpush1.bf16.msra.mxu1 %v14186_v20  ;;  %v15976_v28 = vsel %vm4134_vm8, %v4159_v13, %v4167_v44  ;;  %v4197_v20 = vshrl.u32 %v15887_v62, 16  ;;  %v4181_v46 = vrot.slane %v4179_v24, 1  ;;  %v4184_v31 = vrot.slane %v4182_v41, 2  ;;  %v14197_v41 = vld [vmem:[#allocation8 + $0x28c] ss:$12 sps:$4 sm:$0xff]  }
 0x287   : > { %3070 = vmatprep.subr.bf16.mxu0 %v14189_v18  ;;  %3153 = vmatprep.subr.bf16.mxu1 %v20417_v7  ;;  %v4172_v47 = vrot.slane %v4170_v49, 1  ;;  %v4175_v6 = vrot.slane %v4173_v30, 2  ;;  %v4150_v8 = vor.u32 %v4149_v35, %v4146_v10  ;;  %v4202_v19 = vrot.slane %v4200_v55, 2  ;;  %v14201_v24 = vld [vmem:[#allocation8 + $0x274] ss:$12 sps:$4 sm:$0xff]  }
 0x288   : > { %2789 = vmatmul.mubr.bf16.gmra.mxu0 %v2526_v23  ;;  %2864 = vmatmul.mubr.bf16.gmra.mxu1 %v2526_v23  ;;  %v4199_v18 = vrot.slane %v4197_v20, 1  ;;  %v14194_v23 = vld [vmem:[#allocation8 + $0xc8] ss:$12 sps:$4 sm:$0xff]   ;;  %v4185_v13 = vor.u32 %v4184_v31, %v4181_v46  ;;  %v4191_v61 = vshll.u32 %v15891_v40, 16  ;;  %v4190_v30 = vrot.slane %v4188_v43, 1 }
 0x289   : > { %12942 = vmatprep.mubr.msk.bf16.mxu0 %vm2700_vm6, %v15635_v17  ;;  %12951 = vmatprep.mubr.msk.bf16.mxu1 %vm2700_vm6, %v15635_v17  ;;  %v4176_v49 = vor.u32 %v4175_v6, %v4172_v47  ;;  %v15997_v10 = vsel %vm4134_vm8, %v4142_v37, %v4150_v8  ;;  %v4206_v47 = vshrl.u32 %v15904_v21, 16  ;;  %v20429_v6 = vmov 0.0   ;;  %v14195_v37 = vld [vmem:[#allocation8 + $0x288] ss:$12 sps:$4 sm:$0xff]  }
 0x28a   : > { %3071 = vmatpush2.bf16.msra.mxu0 %v14187_v32  ;;  %3154 = vmatpush2.bf16.msra.mxu1 %v14190_v58  ;;  %v4215_v32 = vshrl.u32 %v15895_v15, 16  ;;  %v4218_v58 = vshll.u32 %v15895_v15, 16  ;;  %v16000_v20 = vsel %vm4134_vm8, %v4167_v44, %v4185_v13  ;;  %v4193_v35 = vrot.slane %v4191_v61, 2 }
 0x28b   : > { %3072 = vmatprep.subr.bf16.mxu0 %v14193_v52  ;;  %3155 = vmatprep.subr.bf16.mxu1 %v20417_v7  ;;  %v4203_v52 = vor.u32 %v4202_v19, %v4199_v18  ;;  %v16003_v46 = vsel %vm4134_vm8, %v4150_v8, %v4176_v49  ;;  %v12945_v43 = vpack.c.bf16 %v15578_v42, %v20429_v6  ;;  %v14198_v19 = vld [vmem:[#allocation8 + $0x290] ss:$12 sps:$4 sm:$0xff]   ;;  %v4208_v42 = vrot.slane %v4206_v47, 1 }
 0x28c   : > { %v4217_v31 = vrot.slane %v4215_v32, 1  ;;  %v4220_v55 = vrot.slane %v4218_v58, 2  ;;  %v4194_v8 = vor.u32 %v4193_v35, %v4190_v30  ;;  %v4236_v58 = vshll.u32 %v15921_v3, 16 }
 0x28d   : > { %v16015_v18 = vsel %vm4134_vm8, %v4185_v13, %v4203_v52  ;;  %v4224_v13 = vshrl.u32 %v15830_v26, 16  ;;  %v4227_v30 = vshll.u32 %v15830_v26, 16  ;;  %v4653_v44 = vrot.slane %v15861_v56, 2 }
 0x28e   : > { %3073 = vmatpush2.bf16.msra.mxu0 %v14191_v1  ;;  %3156 = vmatpush2.bf16.msra.mxu1 %v14194_v23  ;;  %v4221_v61 = vor.u32 %v4220_v55, %v4217_v31  ;;  %v4209_v1 = vshll.u32 %v15904_v21, 16  ;;  %v4233_v23 = vshrl.u32 %v15921_v3, 16  ;;  %v16021_v32 = vsel %vm4134_vm8, %v4176_v49, %v4194_v8  ;;  %v14199_v55 = vld [vmem:[#allocation8 + $0x270] ss:$12 sps:$4 sm:$0xff]  }
 0x28f   : > { %3454 = vmatprep.subr.bf16.mxu0 %v14197_v41  ;;  %3537 = vmatprep.subr.bf16.mxu1 %v20417_v7  ;;  %20432 = vst [vmem:[#allocation54_spill] sm:$0xff] %v16021_v32  ;;  %v4652_v49 = vrot.slane %v15857_v0, 2  ;;  %v4238_v47 = vrot.slane %v4236_v58, 2  ;;  %v4226_v6 = vrot.slane %v4224_v13, 1  ;;  %v4229_v38 = vrot.slane %v4227_v30, 2 }
 0x290   : > { %v16031_v41 = vsel %vm4134_vm8, %v4203_v52, %v4221_v61  ;;  %v4211_v35 = vrot.slane %v4209_v1, 2  ;;  %v4235_v31 = vrot.slane %v4233_v23, 1  ;;  %v14202_v52 = vld [vmem:[#allocation8 + $0x278] ss:$12 sps:$4 sm:$0xff]   ;;  %v4649_v1 = vrot.slane %v15869_v39, 2 }
 0x291   : > { %12946 = vmatmul.mubr.msk.bf16.vlgmr.msra.gmra.mxu0 %vm16010_vm11, %v12945_v43  ;;  %12955 = vmatmul.mubr.msk.bf16.vlgmr.msra.gmra.mxu1 %vm16010_vm11, %v12945_v43  ;;  %20433 = vst [vmem:[#allocation55_spill] sm:$0xff] %v16031_v41  ;;  %v4650_v0 = vrot.slane %v15622_v48, 2  ;;  %v4657_v23 = vrot.slane %v15877_v9, 2  ;;  %v14205_v41 = vld [vmem:[#allocation8 + $0x25c] ss:$12 sps:$4 sm:$0xff]   ;;  %v4230_v58 = vor.u32 %v4229_v38, %v4226_v6  ;;  %v16044_v13 = vsel %vm4648_vm2, %v4652_v49, %v4653_v44 }
 0x292   : > { %12947 = vmatprep.mubr.msk.bf16.mxu0 %vm2700_vm6, %v15663_v53  ;;  %12956 = vmatprep.mubr.msk.bf16.mxu1 %vm2700_vm6, %v15663_v53  ;;  %v4212_v43 = vor.u32 %v4211_v35, %v4208_v42  ;;  %v4239_v32 = vor.u32 %v4238_v47, %v4235_v31  ;;  %v4655_v56 = vrot.slane %v15881_v16, 2  ;;  %v4661_v9 = vrot.slane %v15887_v62, 2  ;;  %v14206_v6 = vld [vmem:[#allocation8 + $0x260] ss:$12 sps:$4 sm:$0xff]   ;;  %v14214_v47 = vld [vmem:[#allocation8 + $0x230] ss:$12 sps:$4 sm:$0xff]  }
 0x293   : > { %3455 = vmatpush1.bf16.msra.mxu0 %v14195_v37  ;;  %3538 = vmatpush1.bf16.msra.mxu1 %v14198_v19  ;;  %v16051_v39 = vsel %vm4648_vm2, %v4649_v1, %v4650_v0  ;;  %v16054_v48 = vsel %vm4648_vm2, %v4653_v44, %v4657_v23  ;;  %v14203_v19 = vld [vmem:[#allocation8 + $0x258] ss:$12 sps:$4 sm:$0xff]   ;;  %v4665_v62 = vrot.slane %v15895_v15, 2  ;;  %v4663_v30 = vrot.slane %v15904_v21, 2  ;;  %v14217_v44 = vld [vmem:[#allocation8 + $0x214] ss:$12 sps:$4 sm:$0xff]  }
 0x294   : > { %3456 = vmatprep.subr.bf16.mxu0 %v14201_v24  ;;  %3539 = vmatprep.subr.bf16.mxu1 %v20417_v7  ;;  %v16048_v37 = vsel %vm4134_vm8, %v4194_v8, %v4212_v43  ;;  %v16058_v42 = vsel %vm4134_vm8, %v4221_v61, %v4239_v32  ;;  %v16061_v38 = vsel %vm4134_vm8, %v4212_v43, %v4230_v58  ;;  %v4659_v24 = vrot.slane %v15891_v40, 2  ;;  %v14209_v61 = vld [vmem:[#allocation8 + $0x244] ss:$12 sps:$4 sm:$0xff]   ;;  %v14213_v49 = vld [vmem:[#allocation8 + $0x22c] ss:$12 sps:$4 sm:$0xff]  }
 0x295   : > { %v16064_v16 = vsel %vm4648_vm2, %v4650_v0, %v4655_v56  ;;  %v16067_v8 = vsel %vm4648_vm2, %v4657_v23, %v4661_v9  ;;  %v4669_v32 = vrot.slane %v15921_v3, 2  ;;  %v4667_v35 = vrot.slane %v15830_v26, 2  ;;  %v14207_v3 = vld [vmem:[#allocation8 + $0x240] ss:$12 sps:$4 sm:$0xff]  }
 0x296   : > { %v16078_v31 = vsel %vm4648_vm2, %v4655_v56, %v4659_v24  ;;  %v16081_v40 = vsel %vm4648_vm2, %v4661_v9, %v4665_v62  ;;  %v16084_v15 = vsel %vm4648_vm2, %v4659_v24, %v4663_v30  ;;  %v20437_v1 = vshll.u32 %v15663_v53, 16 }
 0x297   : > { %3457 = vmatpush1.bf16.msra.mxu0 %v14199_v55  ;;  %3540 = vmatpush1.bf16.msra.mxu1 %v14202_v52  ;;  %v16091_v26 = vsel %vm4648_vm2, %v4665_v62, %v4669_v32  ;;  %v16094_v21 = vsel %vm4648_vm2, %v4663_v30, %v4667_v35  ;;  %v14211_v55 = vld [vmem:[#allocation8 + $0x228] ss:$12 sps:$4 sm:$0xff]   ;;  %v20436_v52 = vshrl.u32 %v15663_v53, 16  ;;  %v20438_v23 = vshrl.u32 %v15732_v36, 16  ;;  %v14215_v30 = vld [vmem:[#allocation8 + $0x210] ss:$12 sps:$4 sm:$0xff]  }
 0x298   : > { %3458 = vmatprep.subr.bf16.mxu0 %v14205_v41  ;;  %3541 = vmatprep.subr.bf16.mxu1 %v20417_v7  ;;  %20434 = vst [vmem:[#allocation56_spill] sm:$0xff] %v16091_v26  ;;  %20435 = vst [vmem:[#allocation57_spill] sm:$0xff] %v16094_v21  ;;  %v14210_v41 = vld [vmem:[#allocation8 + $0x248] ss:$12 sps:$4 sm:$0xff]   ;;  %v5521_v0 = vrot.slane %v20437_v1, 3  ;;  %v20439_v56 = vshll.u32 %v15732_v36, 16 }
 0x299   : > { %3085 = vmatmul.mubr.bf16.gmra.mxu0 %v15657_v60  ;;  %3166 = vmatmul.mubr.bf16.gmra.mxu1 %v15657_v60  ;;  %v5520_v43 = vrot.slane %v20436_v52, 2  ;;  %v5523_v58 = vrot.slane %v20438_v23, 2  ;;  %v20441_v24 = vshll.u32 %v15742_v33, 16  ;;  %v14221_v32 = vld [vmem:[#allocation8 + $0x1fc] ss:$12 sps:$4 sm:$0xff]   ;;  %v5556_v21 = vshll.u32 %v15955_v29, 16 }
 0x29a   : > { %12948 = vmatprep.mubr.msk.bf16.mxu0 %vm2700_vm6, %v15732_v36  ;;  %12957 = vmatprep.mubr.msk.bf16.mxu1 %vm2700_vm6, %v15732_v36  ;;  %v5524_v9 = vrot.slane %v20439_v56, 3  ;;  %v14219_v1 = vld [vmem:[#allocation8 + $0x1f8] ss:$12 sps:$4 sm:$0xff]   ;;  %v14222_v23 = vld [vmem:[#allocation8 + $0x200] ss:$12 sps:$4 sm:$0xff]  }
 0x29b   : > { %3459 = vmatpush1.bf16.msra.mxu0 %v14203_v19  ;;  %3542 = vmatpush1.bf16.msra.mxu1 %v14206_v6  ;;  %v20440_v19 = vshrl.u32 %v15742_v33, 16  ;;  %v5532_v62 = vrot.slane %v20441_v24, 3  ;;  %v5522_v35 = vor.u32 %v5521_v0, %v5520_v43  ;;  %v14270_v26 = vld [vmem:[#allocation8 + $0x3b0] ss:$12 sps:$4 sm:$0xff]  }
 0x29c   : > { %3460 = vmatprep.subr.bf16.mxu0 %v14209_v61  ;;  %3543 = vmatprep.subr.bf16.mxu1 %v20417_v7  ;;  %v14218_v61 = vld [vmem:[#allocation8 + $0x218] ss:$12 sps:$4 sm:$0xff]  }
 0x29d   : > { %v5531_v6 = vrot.slane %v20440_v19, 2 }
 0x29f   : > { %3461 = vmatpush1.bf16.msra.mxu0 %v14207_v3  ;;  %3544 = vmatpush1.bf16.msra.mxu1 %v14210_v41  ;;  %v5525_v3 = vor.u32 %v5524_v9, %v5523_v58  ;;  %v20442_v41 = vshrl.u32 %v15738_v14, 16  ;;  %v5533_v52 = vor.u32 %v5532_v62, %v5531_v6  ;;  %v20446_v9 = vshrl.u32 %v15764_v45, 16 }
 0x2a0   : > { %3462 = vmatprep.subr.bf16.mxu0 %v14213_v49  ;;  %3545 = vmatprep.subr.bf16.mxu1 %v20417_v7  ;;  %v20447_v6 = vshll.u32 %v15764_v45, 16  ;;  %v20448_v62 = vshrl.u32 %v15780_v2, 16 }
 0x2a1   : > { %3095 = vmatmul.mubr.bf16.gmra.mxu0 %v15674_v51  ;;  %3174 = vmatmul.mubr.bf16.gmra.mxu1 %v15674_v51  ;;  %v5527_v49 = vrot.slane %v20442_v41, 2  ;;  %v16120_v56 = vsel %vm5512_vm7, %v5522_v35, %v5525_v3  ;;  %v16126_v43 = vsel %vm5512_vm7, %v5525_v3, %v5533_v52  ;;  %v5539_v19 = vrot.slane %v20446_v9, 2 }
 0x2a2   : > { %12949 = vmatprep.mubr.msk.bf16.mxu0 %vm2700_vm6, %v15742_v33  ;;  %12958 = vmatprep.mubr.msk.bf16.mxu1 %vm2700_vm6, %v15742_v33  ;;  %20443 = vst [vmem:[#allocation58_spill] sm:$0xff] %v16120_v56  ;;  %20445 = vst [vmem:[#allocation59_spill] sm:$0xff] %v16126_v43  ;;  %v5540_v24 = vrot.slane %v20447_v6, 3  ;;  %v20449_v3 = vshll.u32 %v15780_v2, 16 }
 0x2a3   : > { %3463 = vmatpush1.bf16.msra.mxu0 %v14211_v55  ;;  %3546 = vmatpush1.bf16.msra.mxu1 %v14214_v47  ;;  %v20444_v55 = vshll.u32 %v15738_v14, 16 }
 0x2a4   : > { %3464 = vmatprep.subr.bf16.mxu0 %v14217_v44  ;;  %3547 = vmatprep.subr.bf16.mxu1 %v20417_v7  ;;  %v14225_v44 = vld [vmem:[#allocation8 + $0x1e4] ss:$12 sps:$4 sm:$0xff]   ;;  %v5536_v41 = vrot.slane %v20449_v3, 3  ;;  %v3255_v3 = vrot.slane %v15635_v17, 1 }
 0x2a5   : > { %v5528_v47 = vrot.slane %v20444_v55, 3  ;;  %v5553_v55 = vshrl.u32 %v15955_v29, 16 }
 0x2a7   : > { %3465 = vmatpush1.bf16.msra.mxu0 %v14215_v30  ;;  %3548 = vmatpush1.bf16.msra.mxu1 %v14218_v61  ;;  %v5529_v58 = vor.u32 %v5528_v47, %v5527_v49  ;;  %v5535_v30 = vrot.slane %v20448_v62, 2  ;;  %v14223_v61 = vld [vmem:[#allocation8 + $0x1e0] ss:$12 sps:$4 sm:$0xff]   ;;  %v14229_v49 = vld [vmem:[#allocation8 + $0x2bc] ss:$12 sps:$4 sm:$0xff]   ;;  %v20196_v47 = vrot.slane %v15663_v53, 1 }
 0x2a8   : > { %3466 = vmatprep.subr.bf16.mxu0 %v14221_v32  ;;  %3549 = vmatprep.subr.bf16.mxu1 %v20417_v7  ;;  %v14226_v32 = vld [vmem:[#allocation8 + $0x1e8] ss:$12 sps:$4 sm:$0xff]   ;;  %v5555_v56 = vrot.slane %v5553_v55, 2 }
 0x2a9   : > { %3105 = vmatmul.mubr.bf16.gmra.mxu0 %v15738_v14  ;;  %3182 = vmatmul.mubr.bf16.gmra.mxu1 %v15738_v14  ;;  %v6820_v0 = vpop.permute.xlu1 %6819  ;;  %v16148_v9 = vsel %vm5512_vm7, %v15790_v27, %v5529_v58  ;;  %v5537_v62 = vor.u32 %v5536_v41, %v5535_v30  ;;  %v14233_v27 = vld [vmem:[#allocation8 + $0x2a4] ss:$12 sps:$4 sm:$0xff]   ;;  %v3257_v17 = vsel %vm3251_vm1, %v3255_v3, %v20196_v47  ;;  %v5558_v30 = vrot.slane %v5556_v21, 3  ;;  %v14234_v55 = vld [vmem:[#allocation8 + $0x2a8] ss:$12 sps:$4 sm:$0xff]  }
 0x2aa   : > { %12950 = vmatprep.mubr.msk.bf16.mxu0 %vm2700_vm6, %v15764_v45  ;;  %12959 = vmatprep.mubr.msk.bf16.mxu1 %vm2700_vm6, %v15764_v45  ;;  %v6841_v35 = vsel %vm1865_vm0, 0.0, %v6820_v0  ;;  %20450 = vst [vmem:[#allocation60_spill] sm:$0xff] %v16148_v9  ;;  %v3253_v21 = vrot.slane %v15657_v60, 1 }
 0x2ab   : > { %3467 = vmatpush1.bf16.msra.mxu0 %v14219_v1  ;;  %3550 = vmatpush1.bf16.msra.mxu1 %v14222_v23  ;;  %v5541_v1 = vor.u32 %v5540_v24, %v5539_v19  ;;  %v14227_v23 = vld [vmem:[#allocation8 + $0x2b8] ss:$12 sps:$4 sm:$0xff]   ;;  %v6919_v6 = vcombine.high %v6841_v35, %v6841_v35  ;;  %v5544_v19 = vshrl.u32 %v15959_v22, 16  ;;  %v16174_v47 = vor.u32 %v5558_v30, %v5555_v56 }
 0x2ac   : > { %3468 = vmatprep.subr.bf16.mxu0 %v14225_v44  ;;  %3551 = vmatprep.subr.bf16.mxu1 %v20417_v7  ;;  %v14230_v44 = vld [vmem:[#allocation8 + $0x2c0] ss:$12 sps:$4 sm:$0xff]   ;;  %v3260_v30 = vrot.slane %v15732_v36, 1  ;;  %v14267_v36 = vld [vmem:[#allocation8 + $0x3a8] ss:$12 sps:$4 sm:$0xff]  }
 0x2ad   : > { %v16152_v43 = vsel %vm5512_vm7, %v5533_v52, %v5541_v1  ;;  %v16165_v52 = vsel %vm5512_vm7, %v5529_v58, %v5537_v62  ;;  %20453 = vst [vmem:[#allocation63_spill] sm:$0xff] %v16174_v47  ;;  %v16187_v56 = vsel %vm5512_vm7, %v5541_v1, %v16174_v47  ;;  %v14241_v47 = vld [vmem:[#allocation8 + $0x364] ss:$12 sps:$4 sm:$0xff]  }
 0x2ae   : > { %20451 = vst [vmem:[#allocation61_spill] sm:$0xff] %v16152_v43  ;;  %20452 = vst [vmem:[#allocation62_spill] sm:$0xff] %v16165_v52  ;;  %v16178_v52 = vpop.permute.xlu0 %6815 }
 0x2af   : > { %3469 = vmatpush1.bf16.msra.mxu0 %v14223_v61  ;;  %3552 = vmatpush1.bf16.msra.mxu1 %v14226_v32  ;;  %v5547_v61 = vshll.u32 %v15959_v22, 16  ;;  %v6933_v32 = vrot.slane %v6919_v6, %v15514_v50  ;;  %v16181_v6 = vrot.slane %v6841_v35, %v15514_v50  ;;  %20454 = vst [vmem:[#allocation64_spill] sm:$0xff] %v16187_v56  ;;  %v3252_v22 = vrot.slane %v15694_v34, 1 }
 0x2b0   : > { %3482 = vmatprep.subr.bf16.mxu0 %v14229_v49  ;;  %3565 = vmatprep.subr.bf16.mxu1 %v20417_v7  ;;  %v14231_v49 = vld [vmem:[#allocation8 + $0x2a0] ss:$12 sps:$4 sm:$0xff]  }
 0x2b1   : > { %3115 = vmatmul.mubr.bf16.gmra.mxu0 %v15780_v2  ;;  %3190 = vmatmul.mubr.bf16.gmra.mxu1 %v15780_v2  ;;  %v16162_v24 = vpop.permute.xlu1 %6821  ;;  %v6934_v1 = vcombine.high %v16181_v6, %v16181_v6 }
 0x2b2   : > { %12990 = vmatprep.mubr.msk.bf16.mxu0 %vm2700_vm6, %v3257_v17  ;;  %12995 = vmatprep.mubr.msk.bf16.mxu1 %vm2700_vm6, %v3257_v17  ;;  %v6842_v41 = vsel %vm1865_vm0, 0.0, %v16162_v24  ;;  %v14237_v17 = vld [vmem:[#allocation8 + $0x37c] ss:$12 sps:$4 sm:$0xff]  }
 0x2b3   : > { %3483 = vmatpush2.bf16.msra.mxu0 %v14227_v23  ;;  %3566 = vmatpush2.bf16.msra.mxu1 %v14230_v44  ;;  %v6943_v3 = vcombine.high %v6842_v41, %v6842_v41  ;;  %v6950_v58 = vrot.slane %v6842_v41, %v15514_v50  ;;  %v5546_v23 = vrot.slane %v5544_v19, 2  ;;  %v6849_v44 = vsel %vm1865_vm0, %v6820_v0, 0.0  ;;  %v14235_v19 = vld [vmem:[#allocation8 + $0x378] ss:$12 sps:$4 sm:$0xff]   ;;  %v14238_v0 = vld [vmem:[#allocation8 + $0x380] ss:$12 sps:$4 sm:$0xff]  }
 0x2b4   : > { %3484 = vmatprep.subr.bf16.mxu0 %v14233_v27  ;;  %3567 = vmatprep.subr.bf16.mxu1 %v20417_v7  ;;  %v5549_v27 = vrot.slane %v5547_v61, 3  ;;  %v6935_v41 = vcombine.high %v6933_v32, %v6933_v32  ;;  %v6942_v61 = vrot.slane %v6849_v44, %v15514_v50 }
 0x2b5   : > { %v6957_v43 = vrot.slane %v6943_v3, %v15514_v50  ;;  %v6958_v9 = vcombine.high %v6950_v58, %v6950_v58  ;;  %v3254_v3 = vsel %vm3251_vm1, %v3252_v22, %v3253_v21  ;;  %v14239_v22 = vld [vmem:[#allocation8 + $0x360] ss:$12 sps:$4 sm:$0xff]  }
 0x2b6   : > { %v16191_v29 = vor.u32 %v5549_v27, %v5546_v23  ;;  %v16205_v23 = vpop.permute.xlu0 %6817  ;;  %v7115_v27 = vcombine.low %v6935_v41, %v6942_v61 }
 0x2b7   : > { %3485 = vmatpush2.bf16.msra.mxu0 %v14231_v49  ;;  %3568 = vmatpush2.bf16.msra.mxu1 %v14234_v55  ;;  %v6959_v35 = vcombine.high %v6957_v43, %v6957_v43  ;;  %v20457_v55 = vrot.slane %v15663_v53, 1  ;;  %v7131_v56 = vcombine.low %v6950_v58, %v6958_v9  ;;  %v6840_v9 = vsel %vm1865_vm0, 0.0, %v16205_v23 }
 0x2b8   : > { %20455 = vst [vmem:[#allocation65_spill] sm:$0xff] %v16191_v29  ;;  %3907 = vmatprep.subr.bf16.mxu0 %v14237_v17  ;;  %3990 = vmatprep.subr.bf16.mxu1 %v20417_v7  ;;  %v16200_v34 = vsel %vm5512_vm7, %v5537_v62, %v16191_v29  ;;  %v7114_v62 = vcombine.low %v6934_v1, %v6933_v32  ;;  %v3264_v58 = vrot.slane %v15742_v33, 1  ;;  %v16219_v32 = vsel %vm1865_vm0, 0.0, %v16178_v52  ;;  %v14261_v33 = vld [vmem:[#allocation8 + $0x2ec] ss:$12 sps:$4 sm:$0xff]  }
 0x2b9   : > { %v7132_v49 = vcombine.low %v6957_v43, %v6959_v35  ;;  %20456 = vst [vmem:[#allocation66_spill] sm:$0xff] %v16200_v34  ;;  %v3261_v17 = vsel %vm3251_vm1, %v20457_v55, %v3260_v30  ;;  %v14242_v43 = vld [vmem:[#allocation8 + $0x368] ss:$12 sps:$4 sm:$0xff]   ;;  %v3258_v35 = vrot.slane %v15674_v51, 1  ;;  %v7129_v41 = vrot.slane %v7115_v27, %v15514_v50  ;;  %20458 = vst [vmem:[#allocation67_spill] sm:$0xff] %v16219_v32 }
 0x2ba   : > { %3487 = vmatmul.mubr.bf16.vlgmr.msra.gmra.mxu0 %v3254_v3  ;;  %3570 = vmatmul.mubr.bf16.vlgmr.msra.gmra.mxu1 %v3254_v3  ;;  %v14245_v3 = vld [vmem:[#allocation8 + $0x34c] ss:$12 sps:$4 sm:$0xff]   ;;  %v6895_v1 = vcombine.high %v6840_v9, %v6840_v9  ;;  %v7122_v61 = vrot.slane %v7114_v62, %v15514_v50  ;;  %v3265_v27 = vsel %vm3251_vm1, %v3260_v30, %v3264_v58  ;;  %v14247_v62 = vld [vmem:[#allocation8 + $0x330] ss:$12 sps:$4 sm:$0xff]   ;;  %v3262_v30 = vrot.slane %v15738_v14, 1 }
 0x2bb   : > { %12991 = vmatprep.mubr.msk.bf16.mxu0 %vm2700_vm6, %v3261_v17  ;;  %12996 = vmatprep.mubr.msk.bf16.mxu1 %vm2700_vm6, %v3261_v17  ;;  %v7146_v44 = vrot.slane %v7132_v49, %v15514_v50  ;;  %v3259_v55 = vsel %vm3251_vm1, %v3253_v21, %v3258_v35  ;;  %v14249_v17 = vld [vmem:[#allocation8 + $0x334] ss:$12 sps:$4 sm:$0xff]   ;;  %v6902_v21 = vrot.slane %v6840_v9, %v15514_v50  ;;  %v16245_v9 = vpop.permute.xlu0 %6823  ;;  %v3272_v29 = vrot.slane %v15807_v12, 1 }
 0x2bc   : > { %3908 = vmatpush1.bf16.msra.mxu0 %v14235_v19  ;;  %3991 = vmatpush1.bf16.msra.mxu1 %v14238_v0  ;;  %v7139_v19 = vrot.slane %v7131_v56, %v15514_v50  ;;  %v14246_v0 = vld [vmem:[#allocation8 + $0x350] ss:$12 sps:$4 sm:$0xff]   ;;  %v6871_v56 = vcombine.high %v16219_v32, %v16219_v32  ;;  %v3270_v34 = vrot.slane %v15821_v5, 1  ;;  %v6843_v12 = vsel %vm1865_vm0, 0.0, %v16245_v9 }
 0x2bd   : > { %3909 = vmatprep.subr.bf16.mxu0 %v14241_v47  ;;  %3992 = vmatprep.subr.bf16.mxu1 %v20417_v7  ;;  %v14243_v47 = vld [vmem:[#allocation8 + $0x348] ss:$12 sps:$4 sm:$0xff]   ;;  %v14257_v32 = vld [vmem:[#allocation8 + $0x304] ss:$12 sps:$4 sm:$0xff]  }
 0x2be   : > { %v16222_v49 = vcombine.low %v7139_v19, %v7146_v44  ;;  %v14250_v44 = vld [vmem:[#allocation8 + $0x338] ss:$12 sps:$4 sm:$0xff]   ;;  %v16242_v19 = vrot.slane %v6871_v56, %v15514_v50  ;;  %v3263_v56 = vsel %vm3251_vm1, %v3258_v35, %v3262_v30 }
 0x2c0   : > { %3910 = vmatpush1.bf16.msra.mxu0 %v14239_v22  ;;  %3993 = vmatpush1.bf16.msra.mxu1 %v14242_v43  ;;  %20459 = vst [vmem:[#allocation68_spill] sm:$0xff] %v16222_v49  ;;  %v16229_v22 = vcombine.low %v7122_v61, %v7129_v41  ;;  %v6909_v43 = vrot.slane %v6895_v1, %v15514_v50  ;;  %v14253_v41 = vld [vmem:[#allocation8 + $0x31c] ss:$12 sps:$4 sm:$0xff]   ;;  %20462 = vst [vmem:[#allocation71_spill] sm:$0xff] %v16242_v19 }
 0x2c1   : > { %3911 = vmatprep.subr.bf16.mxu0 %v14245_v3  ;;  %3994 = vmatprep.subr.bf16.mxu1 %v20417_v7  ;;  %v6910_v1 = vcombine.high %v6902_v21, %v6902_v21 }
 0x2c2   : > { %3497 = vmatmul.mubr.bf16.gmra.mxu0 %v3259_v55  ;;  %3578 = vmatmul.mubr.bf16.gmra.mxu1 %v3259_v55  ;;  %20460 = vst [vmem:[#allocation69_spill] sm:$0xff] %v16229_v22  ;;  %v16237_v3 = vpack.c.bf16 %v16222_v49, %v16229_v22  ;;  %v6911_v61 = vcombine.high %v6909_v43, %v6909_v43  ;;  %v14251_v55 = vld [vmem:[#allocation8 + $0x318] ss:$12 sps:$4 sm:$0xff]   ;;  %v6848_v49 = vsel %vm1865_vm0, %v16205_v23, 0.0 }
 0x2c3   : > { %12992 = vmatprep.mubr.msk.bf16.mxu0 %vm2700_vm6, %v3265_v27  ;;  %12997 = vmatprep.mubr.msk.bf16.mxu1 %vm2700_vm6, %v3265_v27  ;;  %v16248_v27 = vpop.permute.xlu1 %6825  ;;  %v16275_v22 = vcombine.low %v6902_v21, %v6910_v1  ;;  %v6918_v1 = vrot.slane %v6848_v49, %v15514_v50 }
 0x2c4   : > { %3912 = vmatpush1.bf16.msra.mxu0 %v14243_v47  ;;  %3995 = vmatpush1.bf16.msra.mxu1 %v14246_v0  ;;  %20461 = vst [vmem:[#allocation70_spill] sm:$0xff] %v16237_v3  ;;  %v3268_v47 = vrot.slane %v15764_v45, 1  ;;  %v3266_v0 = vrot.slane %v15780_v2, 1  ;;  %v6844_v5 = vsel %vm1865_vm0, 0.0, %v16248_v27  ;;  %v20463_v23 = vshll.u32 %v16237_v3, 16 }
 0x2c5   : > { %3913 = vmatprep.subr.bf16.mxu0 %v14249_v17  ;;  %3996 = vmatprep.subr.bf16.mxu1 %v20417_v7  ;;  %v14254_v17 = vld [vmem:[#allocation8 + $0x320] ss:$12 sps:$4 sm:$0xff]   ;;  %v20464_v45 = vshrl.u32 %v16237_v3, 16  ;;  %v16300_v49 = vcombine.low %v6918_v1, %v16181_v6 }
 0x2c6   : > { %v3269_v35 = vsel %vm3251_vm1, %v3264_v58, %v3268_v47  ;;  %v16277_v58 = vcombine.low %v6909_v43, %v6911_v61  ;;  %v3267_v2 = vsel %vm3251_vm1, %v3262_v30, %v3266_v0  ;;  %v3273_v21 = vsel %vm3251_vm1, %v3268_v47, %v3272_v29  ;;  %v14259_v47 = vld [vmem:[#allocation8 + $0x2e8] ss:$12 sps:$4 sm:$0xff]  }
 0x2c7   : > { %v8206_v14 = vrot.slane %v20464_v45, 2  ;;  %v16286_v43 = vsel %vm3251_vm1, %v3266_v0, %v3270_v34  ;;  %v6967_v61 = vcombine.high %v6843_v12, %v6843_v12  ;;  %v6998_v45 = vrot.slane %v6844_v5, %v15514_v50 }
 0x2c8   : > { %3914 = vmatpush1.bf16.msra.mxu0 %v14247_v62  ;;  %3997 = vmatpush1.bf16.msra.mxu1 %v14250_v44  ;;  %v6847_v62 = vsel %vm1865_vm0, %v16178_v52, 0.0  ;;  %v6887_v44 = vcombine.high %v16242_v19, %v16242_v19  ;;  %v14255_v19 = vld [vmem:[#allocation8 + $0x300] ss:$12 sps:$4 sm:$0xff]   ;;  %v6974_v0 = vrot.slane %v6843_v12, %v15514_v50  ;;  %v6850_v29 = vsel %vm1865_vm0, %v16162_v24, 0.0 }
 0x2c9   : > { %3915 = vmatprep.subr.bf16.mxu0 %v14253_v41  ;;  %3998 = vmatprep.subr.bf16.mxu1 %v20417_v7  ;;  %v6894_v60 = vrot.slane %v6847_v62, %v15514_v50  ;;  %v6981_v6 = vrot.slane %v6967_v61, %v15514_v50  ;;  %v7112_v24 = vrot.slane %v16300_v49, %v15514_v50  ;;  %v14266_v61 = vld [vmem:[#allocation8 + $0x2d8] ss:$12 sps:$4 sm:$0xff]  }
 0x2ca   : > { %3507 = vmatmul.mubr.bf16.gmra.mxu0 %v3263_v56  ;;  %3586 = vmatmul.mubr.bf16.gmra.mxu1 %v3263_v56  ;;  %v16263_v41 = vpop.permute.xlu0 %6827  ;;  %v8207_v56 = vrot.slane %v20463_v23, 3  ;;  %v6966_v49 = vrot.slane %v6850_v29, %v15514_v50 }
 0x2cb   : > { %12993 = vmatprep.mubr.msk.bf16.mxu0 %vm2700_vm6, %v3269_v35  ;;  %12998 = vmatprep.mubr.msk.bf16.mxu1 %vm2700_vm6, %v3269_v35  ;;  %v6845_v52 = vsel %vm1865_vm0, 0.0, %v16263_v41  ;;  %v14258_v35 = vld [vmem:[#allocation8 + $0x308] ss:$12 sps:$4 sm:$0xff]   ;;  %v16289_v23 = vcombine.low %v6887_v44, %v6894_v60  ;;  %v14262_v60 = vld [vmem:[#allocation8 + $0x2f0] ss:$12 sps:$4 sm:$0xff]  }
 0x2cc   : > { %3916 = vmatpush1.bf16.msra.mxu0 %v14251_v55  ;;  %3999 = vmatpush1.bf16.msra.mxu1 %v14254_v17  ;;  %v6991_v55 = vcombine.high %v6844_v5, %v6844_v5  ;;  %v7015_v17 = vcombine.high %v6845_v52, %v6845_v52  ;;  %v16293_v62 = vor.u32 %v8207_v56, %v8206_v14  ;;  %v14265_v14 = vld [vmem:[#allocation8 + $0x2d4] ss:$12 sps:$4 sm:$0xff]  }
 0x2cd   : > { %3917 = vmatprep.subr.bf16.mxu0 %v14257_v32  ;;  %4000 = vmatprep.subr.bf16.mxu1 %v20417_v7 }
 0x2ce   : > { %v6830_v30 = vpop.permute.xlu1 %6829  ;;  %v7029_v12 = vrot.slane %v7015_v17, %v15514_v50 }
 0x2cf   : > { %v6846_v32 = vsel %vm1865_vm0, 0.0, %v6830_v30  ;;  %v6854_v44 = vsel %vm1865_vm0, %v6830_v30, 0.0 }
 0x2d0   : > { %3918 = vmatpush1.bf16.msra.mxu0 %v14255_v19  ;;  %4001 = vmatpush1.bf16.msra.mxu1 %v14258_v35  ;;  %v7039_v5 = vcombine.high %v6846_v32, %v6846_v32  ;;  %v7046_v56 = vrot.slane %v6846_v32, %v15514_v50  ;;  %v7005_v19 = vrot.slane %v6991_v55, %v15514_v50  ;;  %v14269_v32 = vld [vmem:[#allocation8 + $0x3ac] ss:$12 sps:$4 sm:$0xff]  }
 0x2d1   : > { %3919 = vmatprep.subr.bf16.mxu0 %v14261_v33  ;;  %4002 = vmatprep.subr.bf16.mxu1 %v20417_v7  ;;  %v6851_v33 = vsel %vm1865_vm0, %v16245_v9, 0.0  ;;  %v7006_v35 = vcombine.high %v6998_v45, %v6998_v45  ;;  %v7022_v55 = vrot.slane %v6845_v52, %v15514_v50  ;;  %v7062_v17 = vrot.slane %v6854_v44, %v15514_v50 }
 0x2d2   : > { %3517 = vmatmul.mubr.bf16.gmra.mxu0 %v3267_v2  ;;  %3594 = vmatmul.mubr.bf16.gmra.mxu1 %v3267_v2  ;;  %v7053_v1 = vrot.slane %v7039_v5, %v15514_v50  ;;  %v7054_v30 = vcombine.high %v7046_v56, %v7046_v56  ;;  %v14263_v2 = vld [vmem:[#allocation8 + $0x2d0] ss:$12 sps:$4 sm:$0xff]   ;;  %v6982_v9 = vcombine.high %v6974_v0, %v6974_v0  ;;  %v6852_v52 = vsel %vm1865_vm0, %v16248_v27, 0.0 }
 0x2d3   : > { %12994 = vmatprep.mubr.msk.bf16.mxu0 %vm2700_vm6, %v3273_v21  ;;  %12999 = vmatprep.mubr.msk.bf16.mxu1 %vm2700_vm6, %v3273_v21  ;;  %v6853_v21 = vsel %vm1865_vm0, %v16263_v41, 0.0  ;;  %v7031_v3 = vcombine.high %v7029_v12, %v7029_v12  ;;  %v7007_v44 = vcombine.high %v7005_v19, %v7005_v19  ;;  %v7166_v51 = vcombine.low %v6998_v45, %v7006_v35 }
 0x2d4   : > { %3920 = vmatpush1.bf16.msra.mxu0 %v14259_v47  ;;  %4003 = vmatpush1.bf16.msra.mxu1 %v14262_v60  ;;  %v7055_v5 = vcombine.high %v7053_v1, %v7053_v1  ;;  %v7216_v34 = vcombine.low %v7046_v56, %v7054_v30  ;;  %v6983_v47 = vcombine.high %v6981_v6, %v6981_v6  ;;  %v14273_v30 = vld [vmem:[#allocation8 + $0x394] ss:$12 sps:$4 sm:$0xff]  }
 0x2d5   : > { %3921 = vmatprep.subr.bf16.mxu0 %v14265_v14  ;;  %4004 = vmatprep.subr.bf16.mxu1 %v20417_v7  ;;  %v6990_v60 = vrot.slane %v6851_v33, %v15514_v50  ;;  %v7030_v53 = vcombine.high %v7022_v55, %v7022_v55  ;;  %v7038_v41 = vrot.slane %v6853_v21, %v15514_v50 }
 0x2d6   : > { %v7217_v14 = vcombine.low %v7053_v1, %v7055_v5  ;;  %v7239_v56 = vrot.slane %v7062_v17, %v15514_v50  ;;  %v7149_v29 = vcombine.low %v6982_v9, %v6981_v6  ;;  %v7224_v33 = vrot.slane %v7216_v34, %v15514_v50 }
 0x2d7   : > { %v7165_v45 = vcombine.low %v6983_v47, %v6990_v60  ;;  %v7014_v35 = vrot.slane %v6852_v52, %v15514_v50  ;;  %v7200_v1 = vcombine.low %v7031_v3, %v7038_v41  ;;  %v7180_v6 = vrot.slane %v7166_v51, %v15514_v50  ;;  %v14275_v60 = vld [vmem:[#allocation8 + $0x468] ss:$12 sps:$4 sm:$0xff]  }
 0x2d8   : > { %3922 = vmatpush1.bf16.msra.mxu0 %v14263_v2  ;;  %4005 = vmatpush1.bf16.msra.mxu1 %v14266_v61  ;;  %v7231_v27 = vrot.slane %v7217_v14, %v15514_v50  ;;  %v7148_v2 = vcombine.low %v6966_v49, %v6974_v0  ;;  %v7182_v61 = vcombine.low %v7005_v19, %v7007_v44  ;;  %v16343_v3 = vsel %vm2348_vm4, %v7239_v56, 0.0  ;;  %v14274_v0 = vld [vmem:[#allocation8 + $0x398] ss:$12 sps:$4 sm:$0xff]   ;;  %v14281_v14 = vld [vmem:[#allocation8 + $0x454] ss:$12 sps:$4 sm:$0xff]  }
 0x2d9   : > { %3935 = vmatprep.subr.bf16.mxu0 %v14269_v32  ;;  %4018 = vmatprep.subr.bf16.mxu1 %v20417_v7  ;;  %v7183_v17 = vcombine.low %v7014_v35, %v7022_v55  ;;  %v7199_v9 = vcombine.low %v7030_v53, %v7029_v12  ;;  %20466 = vst [vmem:[#allocation73_spill] sm:$0xff] %v16343_v3  ;;  %v14277_v53 = vld [vmem:[#allocation8 + $0x46c] ss:$12 sps:$4 sm:$0xff]  }
 0x2da   : > { %3527 = vmatmul.mubr.bf16.gmra.mxu0 %v16286_v43  ;;  %3602 = vmatmul.mubr.bf16.gmra.mxu1 %v16286_v43  ;;  %v16339_v34 = vcombine.low %v7224_v33, %v7231_v27  ;;  %v14271_v43 = vld [vmem:[#allocation8 + $0x390] ss:$12 sps:$4 sm:$0xff]   ;;  %v7088_v19 = vrot.slane %v16289_v23, %v15514_v50  ;;  %v20467_v21 = vrot.slane %v16277_v58, %v15514_v50  ;;  %v14282_v33 = vld [vmem:[#allocation8 + $0x458] ss:$12 sps:$4 sm:$0xff]  }
 0x2db   : > { %13030 = vmatprep.mubr.msk.bf16.mxu0 %vm2700_vm6, %v15898_v25  ;;  %13035 = vmatprep.mubr.msk.bf16.mxu1 %vm2700_vm6, %v15898_v25  ;;  %v7214_v12 = vrot.slane %v7200_v1, %v15514_v50  ;;  %v20470_v23 = vrot.slane %v16275_v22, %v15514_v50  ;;  %v7190_v55 = vrot.slane %v7182_v61, %v15514_v50  ;;  %v14278_v22 = vld [vmem:[#allocation8 + $0x470] ss:$12 sps:$4 sm:$0xff]   ;;  %v14283_v1 = vld [vmem:[#allocation8 + $0x438] ss:$12 sps:$4 sm:$0xff]  }
 0x2dc   : > { %20465 = vst [vmem:[#allocation72_spill] sm:$0xff] %v16339_v34  ;;  %3936 = vmatpush2.bf16.msra.mxu0 %v14267_v36  ;;  %4019 = vmatpush2.bf16.msra.mxu1 %v14270_v26  ;;  %v16350_v25 = vcombine.low %v20467_v21, %v7112_v24  ;;  %v16354_v51 = vpack.c.bf16 %v16343_v3, %v16339_v34  ;;  %v14290_v21 = vld [vmem:[#allocation8 + $0x428] ss:$12 sps:$4 sm:$0xff]  }
 0x2dd   : > { %3937 = vmatprep.subr.bf16.mxu0 %v14273_v30  ;;  %4020 = vmatprep.subr.bf16.mxu1 %v20417_v7  ;;  %v7163_v36 = vrot.slane %v7149_v29, %v15514_v50  ;;  %v7173_v26 = vrot.slane %v7165_v45, %v15514_v50  ;;  %v16363_v58 = vcombine.low %v7088_v19, %v20470_v23  ;;  %v14279_v29 = vld [vmem:[#allocation8 + $0x450] ss:$12 sps:$4 sm:$0xff]  }
 0x2de   : > { %20468 = vst [vmem:[#allocation74_spill] sm:$0xff] %v16350_v25  ;;  %20469 = vst [vmem:[#allocation75_spill] sm:$0xff] %v16354_v51  ;;  %v7156_v24 = vrot.slane %v7148_v2, %v15514_v50  ;;  %v7197_v5 = vrot.slane %v7183_v17, %v15514_v50  ;;  %v7207_v49 = vrot.slane %v7199_v9, %v15514_v50  ;;  %v14285_v30 = vld [vmem:[#allocation8 + $0x43c] ss:$12 sps:$4 sm:$0xff]   ;;  %v14286_v2 = vld [vmem:[#allocation8 + $0x440] ss:$12 sps:$4 sm:$0xff]  }
 0x2df   : > { %20471 = vst [vmem:[#allocation76_spill] sm:$0xff] %v16363_v58  ;;  %v16367_v32 = vcombine.low %v7173_v26, %v7180_v6  ;;  %v16373_v47 = vpack.c.bf16 %v16350_v25, %v16363_v58  ;;  %v14289_v6 = vld [vmem:[#allocation8 + $0x424] ss:$12 sps:$4 sm:$0xff]  }
 0x2e0   : > { %3938 = vmatpush2.bf16.msra.mxu0 %v14271_v43  ;;  %4021 = vmatpush2.bf16.msra.mxu1 %v14274_v0  ;;  %v16376_v52 = vcombine.low %v7156_v24, %v7163_v36  ;;  %v16378_v44 = vcombine.low %v7207_v49, %v7214_v12  ;;  %v16386_v56 = vcombine.low %v7190_v55, %v7197_v5  ;;  %v14293_v36 = vld [vmem:[#allocation8 + $0x40c] ss:$12 sps:$4 sm:$0xff]   ;;  %v14291_v24 = vld [vmem:[#allocation8 + $0x408] ss:$12 sps:$4 sm:$0xff]   ;;  %v5564_v55 = vrot.slane %v20417_v7, 2 }
 0x2e1   : > { %20472 = vst [vmem:[#allocation77_spill] sm:$0xff] %v16367_v32  ;;  %20473 = vst [vmem:[#allocation78_spill] sm:$0xff] %v16373_v47  ;;  %4421 = vmatprep.subr.bf16.mxu0 %v14277_v53  ;;  %4504 = vmatprep.subr.bf16.mxu1 %v20417_v7  ;;  %v20235_v27 = vshrl.u32 %v16373_v47, 16  ;;  %v20236_v45 = vshll.u32 %v16373_v47, 16  ;;  %v14294_v49 = vld [vmem:[#allocation8 + $0x410] ss:$12 sps:$4 sm:$0xff]  }
 0x2e2   : > { %20474 = vst [vmem:[#allocation79_spill] sm:$0xff] %v16376_v52  ;;  %20475 = vst [vmem:[#allocation80_spill] sm:$0xff] %v16378_v44  ;;  %v16384_v41 = vpack.c.bf16 %v16367_v32, %v16376_v52 }
 0x2e3   : > { %3940 = vmatmul.mubr.bf16.vlgmr.msra.gmra.mxu0 %v15907_v57  ;;  %4023 = vmatmul.mubr.bf16.vlgmr.msra.gmra.mxu1 %v15907_v57  ;;  %20477 = vst [vmem:[#allocation82_spill] sm:$0xff] %v16386_v56  ;;  %v16395_v57 = vpack.c.bf16 %v16378_v44, %v16386_v56  ;;  %v8203_v61 = vrot.slane %v20235_v27, 2  ;;  %v8204_v43 = vrot.slane %v20236_v45, 3  ;;  %v14390_v45 = vld [vmem:[#allocation8 + $0x680] ss:$12 sps:$4 sm:$0xff]  }
 0x2e4   : > { %20476 = vst [vmem:[#allocation81_spill] sm:$0xff] %v16384_v41  ;;  %13031 = vmatprep.mubr.msk.bf16.mxu0 %vm2700_vm6, %v15913_v54  ;;  %13036 = vmatprep.mubr.msk.bf16.mxu1 %vm2700_vm6, %v15913_v54  ;;  %v20234_v35 = vshll.u32 %v16384_v41, 16  ;;  %v20232_v54 = vshrl.u32 %v16384_v41, 16 }
 0x2e5   : > { %4422 = vmatpush1.bf16.msra.mxu0 %v14275_v60  ;;  %4505 = vmatpush1.bf16.msra.mxu1 %v14278_v22  ;;  %20478 = vst [vmem:[#allocation83_spill] sm:$0xff] %v16395_v57  ;;  %v20231_v17 = vshrl.u32 %v16395_v57, 16  ;;  %v20233_v9 = vshll.u32 %v16395_v57, 16  ;;  %v8205_v53 = vor.u32 %v8204_v43, %v8203_v61  ;;  %v5567_v60 = vrot.slane %v20417_v7, 3  ;;  %v14298_v61 = vld [vmem:[#allocation8 + $0x3f8] ss:$12 sps:$4 sm:$0xff]  }
 0x2e6   : > { %4423 = vmatprep.subr.bf16.mxu0 %v14281_v14  ;;  %4506 = vmatprep.subr.bf16.mxu1 %v20417_v7  ;;  %v8210_v0 = vrot.slane %v20232_v54, 2  ;;  %v8211_v19 = vrot.slane %v20234_v35, 3  ;;  %v8219_v14 = vshrl.u32 %v16354_v51, 16 }
 0x2e7   : > { %v8214_v12 = vrot.slane %v20231_v17, 2  ;;  %v8215_v23 = vrot.slane %v20233_v9, 3  ;;  %v14389_v17 = vld [vmem:[#allocation8 + $0x67c] ss:$12 sps:$4 sm:$0xff]  }
 0x2e8   : > { %v8212_v26 = vor.u32 %v8211_v19, %v8210_v0 }
 0x2e9   : > { %4424 = vmatpush1.bf16.msra.mxu0 %v14279_v29  ;;  %4507 = vmatpush1.bf16.msra.mxu1 %v14282_v33  ;;  %v8216_v22 = vor.u32 %v8215_v23, %v8214_v12  ;;  %v8222_v29 = vshll.u32 %v16354_v51, 16  ;;  %v14297_v33 = vld [vmem:[#allocation8 + $0x3f4] ss:$12 sps:$4 sm:$0xff]   ;;  %v14309_v23 = vld [vmem:[#allocation8 + $0x49c] ss:$12 sps:$4 sm:$0xff]  }
 0x2ea   : > { %4425 = vmatprep.subr.bf16.mxu0 %v14285_v30  ;;  %4508 = vmatprep.subr.bf16.mxu1 %v20417_v7  ;;  %v16430_v5 = vsel %vm5512_vm7, %v16293_v62, %v8212_v26  ;;  %v8221_v30 = vrot.slane %v8219_v14, 2  ;;  %v14306_v12 = vld [vmem:[#allocation8 + $0x3c8] ss:$12 sps:$4 sm:$0xff]   ;;  %v14393_v51 = vld [vmem:[#allocation8 + $0x664] ss:$12 sps:$4 sm:$0xff]  }
 0x2eb   : > { %3950 = vmatmul.mubr.bf16.gmra.mxu0 %v15916_v4  ;;  %4031 = vmatmul.mubr.bf16.gmra.mxu1 %v15916_v4  ;;  %v14287_v4 = vld [vmem:[#allocation8 + $0x420] ss:$12 sps:$4 sm:$0xff]   ;;  %20480 = vst [vmem:[#allocation85_spill] sm:$0xff] %v16430_v5  ;;  %v14314_v14 = vld [vmem:[#allocation8 + $0x488] ss:$12 sps:$4 sm:$0xff]  }
 0x2ec   : > { %13032 = vmatprep.mubr.msk.bf16.mxu0 %vm2700_vm6, %v15925_v59  ;;  %13037 = vmatprep.mubr.msk.bf16.mxu1 %vm2700_vm6, %v15925_v59  ;;  %v16423_v59 = vsel %vm5512_vm7, %v8205_v53, %v16293_v62  ;;  %v16439_v62 = vsel %vm5512_vm7, %v8212_v26, %v8216_v22  ;;  %v20484_v53 = vld [vmem:[#allocation48_spill] sm:$0xff]  ;;  %v14303_v26 = vld [vmem:[#allocation8 + $0x3c0] ss:$12 sps:$4 sm:$0xff]  }
 0x2ed   : > { %4426 = vmatpush1.bf16.msra.mxu0 %v14283_v1  ;;  %4509 = vmatpush1.bf16.msra.mxu1 %v14286_v2  ;;  %20479 = vst [vmem:[#allocation84_spill] sm:$0xff] %v16423_v59  ;;  %20481 = vst [vmem:[#allocation86_spill] sm:$0xff] %v16439_v62  ;;  %v8224_v1 = vrot.slane %v8222_v29, 3  ;;  %v14295_v2 = vld [vmem:[#allocation8 + $0x3f0] ss:$12 sps:$4 sm:$0xff]  }
 0x2ee   : > { %4427 = vmatprep.subr.bf16.mxu0 %v14289_v6  ;;  %4510 = vmatprep.subr.bf16.mxu1 %v20417_v7  ;;  %v16445_v6 = vor.u32 %v5567_v60, %v5564_v55  ;;  %v14310_v55 = vld [vmem:[#allocation8 + $0x4a0] ss:$12 sps:$4 sm:$0xff]   ;;  %v20486_v60 = vld [vmem:[#allocation49_spill] sm:$0xff] }
 0x2ef   : > { %v8225_v43 = vor.u32 %v8224_v1, %v8221_v30  ;;  %v14317_v29 = vld [vmem:[#allocation8 + $0x55c] ss:$12 sps:$4 sm:$0xff]   ;;  %v14318_v30 = vld [vmem:[#allocation8 + $0x560] ss:$12 sps:$4 sm:$0xff]   ;;  %v14321_v1 = vld [vmem:[#allocation8 + $0x544] ss:$12 sps:$4 sm:$0xff]  }
 0x2f0   : > { %v14398_v59 = vld [vmem:[#allocation8 + $0x740] ss:$12 sps:$4 sm:$0xff]  }
 0x2f1   : > { %4428 = vmatpush1.bf16.msra.mxu0 %v14287_v4  ;;  %4511 = vmatpush1.bf16.msra.mxu1 %v14290_v21  ;;  %v16449_v0 = vsel %vm5512_vm7, %v8216_v22, %v8225_v43  ;;  %v16453_v19 = vsel %vm5512_vm7, %v8225_v43, %v16445_v6  ;;  %v14302_v4 = vld [vmem:[#allocation8 + $0x3e0] ss:$12 sps:$4 sm:$0xff]   ;;  %v14305_v21 = vld [vmem:[#allocation8 + $0x3c4] ss:$12 sps:$4 sm:$0xff]   ;;  %v14323_v43 = vld [vmem:[#allocation8 + $0x528] ss:$12 sps:$4 sm:$0xff]  }
 0x2f2   : > { %4429 = vmatprep.subr.bf16.mxu0 %v14293_v36  ;;  %4512 = vmatprep.subr.bf16.mxu1 %v20417_v7  ;;  %20482 = vst [vmem:[#allocation87_spill] sm:$0xff] %v16449_v0  ;;  %20483 = vst [vmem:[#allocation88_spill] sm:$0xff] %v16453_v19  ;;  %v20485_v36 = vld [vmem:[#allocation50_spill] sm:$0xff] }
 0x2f3   : > { %3960 = vmatmul.mubr.bf16.gmra.mxu0 %v15928_v63  ;;  %4039 = vmatmul.mubr.bf16.gmra.mxu1 %v15928_v63  ;;  %v14301_v63 = vld [vmem:[#allocation8 + $0x3dc] ss:$12 sps:$4 sm:$0xff]   ;;  %v14311_v22 = vld [vmem:[#allocation8 + $0x480] ss:$12 sps:$4 sm:$0xff]  }
 0x2f4   : > { %13033 = vmatprep.mubr.msk.bf16.mxu0 %vm2700_vm6, %v15931_v11  ;;  %13038 = vmatprep.mubr.msk.bf16.mxu1 %vm2700_vm6, %v15931_v11  ;;  %v14299_v11 = vld [vmem:[#allocation8 + $0x3d8] ss:$12 sps:$4 sm:$0xff]  }
 0x2f5   : > { %4430 = vmatpush1.bf16.msra.mxu0 %v14291_v24  ;;  %4513 = vmatpush1.bf16.msra.mxu1 %v14294_v49  ;;  %v14307_v24 = vld [vmem:[#allocation8 + $0x498] ss:$12 sps:$4 sm:$0xff]  }
 0x2f6   : > { %4431 = vmatprep.subr.bf16.mxu0 %v14297_v33  ;;  %4514 = vmatprep.subr.bf16.mxu1 %v20417_v7  ;;  %v14313_v49 = vld [vmem:[#allocation8 + $0x484] ss:$12 sps:$4 sm:$0xff]  }
 0x2f7   : > { %v14315_v33 = vld [vmem:[#allocation8 + $0x558] ss:$12 sps:$4 sm:$0xff]  }
 0x2f9   : > { %4432 = vmatpush1.bf16.msra.mxu0 %v14295_v2  ;;  %4515 = vmatpush1.bf16.msra.mxu1 %v14298_v61  ;;  %v14322_v2 = vld [vmem:[#allocation8 + $0x548] ss:$12 sps:$4 sm:$0xff]   ;;  %v14325_v61 = vld [vmem:[#allocation8 + $0x52c] ss:$12 sps:$4 sm:$0xff]  }
 0x2fa   : > { %4433 = vmatprep.subr.bf16.mxu0 %v14301_v63  ;;  %4516 = vmatprep.subr.bf16.mxu1 %v20417_v7  ;;  %v14326_v63 = vld [vmem:[#allocation8 + $0x530] ss:$12 sps:$4 sm:$0xff]  }
 0x2fb   : > { %3970 = vmatmul.mubr.bf16.gmra.mxu0 %v20484_v53  ;;  %4047 = vmatmul.mubr.bf16.gmra.mxu1 %v20484_v53  ;;  %v14334_v53 = vld [vmem:[#allocation8 + $0x500] ss:$12 sps:$4 sm:$0xff]  }
 0x2fc   : > { %13034 = vmatprep.mubr.msk.bf16.mxu0 %vm2700_vm6, %v20485_v36  ;;  %13039 = vmatprep.mubr.msk.bf16.mxu1 %vm2700_vm6, %v20485_v36  ;;  %v20487_v36 = vld [vmem:[#allocation54_spill] sm:$0xff] }
 0x2fd   : > { %4434 = vmatpush1.bf16.msra.mxu0 %v14299_v11  ;;  %4517 = vmatpush1.bf16.msra.mxu1 %v14302_v4  ;;  %v14330_v11 = vld [vmem:[#allocation8 + $0x518] ss:$12 sps:$4 sm:$0xff]   ;;  %v14333_v4 = vld [vmem:[#allocation8 + $0x4fc] ss:$12 sps:$4 sm:$0xff]  }
 0x2fe   : > { %4435 = vmatprep.subr.bf16.mxu0 %v14305_v21  ;;  %4518 = vmatprep.subr.bf16.mxu1 %v20417_v7  ;;  %v14331_v21 = vld [vmem:[#allocation8 + $0x4f8] ss:$12 sps:$4 sm:$0xff]  }
 0x301   : > { %4436 = vmatpush1.bf16.msra.mxu0 %v14303_v26  ;;  %4519 = vmatpush1.bf16.msra.mxu1 %v14306_v12  ;;  %v14335_v26 = vld [vmem:[#allocation8 + $0x4e0] ss:$12 sps:$4 sm:$0xff]   ;;  %v14338_v12 = vld [vmem:[#allocation8 + $0x4e8] ss:$12 sps:$4 sm:$0xff]  }
 0x302   : > { %4449 = vmatprep.subr.bf16.mxu0 %v14309_v23  ;;  %4532 = vmatprep.subr.bf16.mxu1 %v20417_v7  ;;  %v14341_v23 = vld [vmem:[#allocation8 + $0x4cc] ss:$12 sps:$4 sm:$0xff]  }
 0x303   : > { %3980 = vmatmul.mubr.bf16.gmra.mxu0 %v20486_v60  ;;  %4055 = vmatmul.mubr.bf16.gmra.mxu1 %v20486_v60  ;;  %v14343_v60 = vld [vmem:[#allocation8 + $0x4b0] ss:$12 sps:$4 sm:$0xff]  }
 0x304   : > { %13070 = vmatprep.mubr.msk.bf16.mxu0 %vm2700_vm6, %v15976_v28  ;;  %13075 = vmatprep.mubr.msk.bf16.mxu1 %vm2700_vm6, %v15976_v28  ;;  %v14319_v28 = vld [vmem:[#allocation8 + $0x540] ss:$12 sps:$4 sm:$0xff]  }
 0x305   : > { %4450 = vmatpush2.bf16.msra.mxu0 %v14307_v24  ;;  %4533 = vmatpush2.bf16.msra.mxu1 %v14310_v55  ;;  %v14339_v24 = vld [vmem:[#allocation8 + $0x4c8] ss:$12 sps:$4 sm:$0xff]   ;;  %v14342_v55 = vld [vmem:[#allocation8 + $0x4d0] ss:$12 sps:$4 sm:$0xff]  }
 0x306   : > { %4451 = vmatprep.subr.bf16.mxu0 %v14313_v49  ;;  %4534 = vmatprep.subr.bf16.mxu1 %v20417_v7  ;;  %v14345_v49 = vld [vmem:[#allocation8 + $0x4b4] ss:$12 sps:$4 sm:$0xff]  }
 0x309   : > { %4452 = vmatpush2.bf16.msra.mxu0 %v14311_v22  ;;  %4535 = vmatpush2.bf16.msra.mxu1 %v14314_v14  ;;  %v14346_v22 = vld [vmem:[#allocation8 + $0x4b8] ss:$12 sps:$4 sm:$0xff]  }
 0x30a   : > { %4851 = vmatprep.subr.bf16.mxu0 %v14317_v29  ;;  %4934 = vmatprep.subr.bf16.mxu1 %v20417_v7  ;;  %v14349_v14 = vld [vmem:[#allocation8 + $0x58c] ss:$12 sps:$4 sm:$0xff]  }
 0x30c   : > { %4454 = vmatmul.mubr.bf16.vlgmr.msra.gmra.mxu0 %v15997_v10  ;;  %4537 = vmatmul.mubr.bf16.vlgmr.msra.gmra.mxu1 %v15997_v10  ;;  %v14329_v10 = vld [vmem:[#allocation8 + $0x514] ss:$12 sps:$4 sm:$0xff]  }
 0x30d   : > { %13071 = vmatprep.mubr.msk.bf16.mxu0 %vm2700_vm6, %v16000_v20  ;;  %13076 = vmatprep.mubr.msk.bf16.mxu1 %vm2700_vm6, %v16000_v20  ;;  %v14327_v20 = vld [vmem:[#allocation8 + $0x510] ss:$12 sps:$4 sm:$0xff]  }
 0x30e   : > { %4852 = vmatpush1.bf16.msra.mxu0 %v14315_v33  ;;  %4935 = vmatpush1.bf16.msra.mxu1 %v14318_v30  ;;  %v14350_v30 = vld [vmem:[#allocation8 + $0x590] ss:$12 sps:$4 sm:$0xff]  }
 0x30f   : > { %4853 = vmatprep.subr.bf16.mxu0 %v14321_v1  ;;  %4936 = vmatprep.subr.bf16.mxu1 %v20417_v7 }
 0x312   : > { %4854 = vmatpush1.bf16.msra.mxu0 %v14319_v28  ;;  %4937 = vmatpush1.bf16.msra.mxu1 %v14322_v2 }
 0x313   : > { %4855 = vmatprep.subr.bf16.mxu0 %v14325_v61  ;;  %4938 = vmatprep.subr.bf16.mxu1 %v20417_v7 }
 0x314   : > { %4464 = vmatmul.mubr.bf16.gmra.mxu0 %v16003_v46  ;;  %4545 = vmatmul.mubr.bf16.gmra.mxu1 %v16003_v46  ;;  %v14337_v46 = vld [vmem:[#allocation8 + $0x4e4] ss:$12 sps:$4 sm:$0xff]  }
 0x315   : > { %13072 = vmatprep.mubr.msk.bf16.mxu0 %vm2700_vm6, %v16015_v18  ;;  %13077 = vmatprep.mubr.msk.bf16.mxu1 %vm2700_vm6, %v16015_v18  ;;  %v20488_v18 = vld [vmem:[#allocation55_spill] sm:$0xff] }
 0x316   : > { %4856 = vmatpush1.bf16.msra.mxu0 %v14323_v43  ;;  %4939 = vmatpush1.bf16.msra.mxu1 %v14326_v63  ;;  %v14351_v43 = vld [vmem:[#allocation8 + $0x570] ss:$12 sps:$4 sm:$0xff]   ;;  %v14354_v63 = vld [vmem:[#allocation8 + $0x578] ss:$12 sps:$4 sm:$0xff]  }
 0x317   : > { %4857 = vmatprep.subr.bf16.mxu0 %v14329_v10  ;;  %4940 = vmatprep.subr.bf16.mxu1 %v20417_v7 }
 0x31a   : > { %4858 = vmatpush1.bf16.msra.mxu0 %v14327_v20  ;;  %4941 = vmatpush1.bf16.msra.mxu1 %v14330_v11 }
 0x31b   : > { %4859 = vmatprep.subr.bf16.mxu0 %v14333_v4  ;;  %4942 = vmatprep.subr.bf16.mxu1 %v20417_v7 }
 0x31c   : > { %4474 = vmatmul.mubr.bf16.gmra.mxu0 %v20487_v36  ;;  %4553 = vmatmul.mubr.bf16.gmra.mxu1 %v20487_v36 }
 0x31d   : > { %13073 = vmatprep.mubr.msk.bf16.mxu0 %vm2700_vm6, %v20488_v18  ;;  %13078 = vmatprep.mubr.msk.bf16.mxu1 %vm2700_vm6, %v20488_v18 }
 0x31e   : > { %4860 = vmatpush1.bf16.msra.mxu0 %v14331_v21  ;;  %4943 = vmatpush1.bf16.msra.mxu1 %v14334_v53  ;;  %v14355_v53 = vld [vmem:[#allocation8 + $0x648] ss:$12 sps:$4 sm:$0xff]  }
 0x31f   : > { %4861 = vmatprep.subr.bf16.mxu0 %v14337_v46  ;;  %4944 = vmatprep.subr.bf16.mxu1 %v20417_v7  ;;  %v14358_v46 = vld [vmem:[#allocation8 + $0x650] ss:$12 sps:$4 sm:$0xff]  }
 0x322   : > { %4862 = vmatpush1.bf16.msra.mxu0 %v14335_v26  ;;  %4945 = vmatpush1.bf16.msra.mxu1 %v14338_v12  ;;  %v14361_v26 = vld [vmem:[#allocation8 + $0x634] ss:$12 sps:$4 sm:$0xff]  }
 0x323   : > { %4863 = vmatprep.subr.bf16.mxu0 %v14341_v23  ;;  %4946 = vmatprep.subr.bf16.mxu1 %v20417_v7 }
 0x324   : > { %4484 = vmatmul.mubr.bf16.gmra.mxu0 %v16048_v37  ;;  %4561 = vmatmul.mubr.bf16.gmra.mxu1 %v16048_v37  ;;  %v14347_v37 = vld [vmem:[#allocation8 + $0x588] ss:$12 sps:$4 sm:$0xff]  }
 0x325   : > { %13074 = vmatprep.mubr.msk.bf16.mxu0 %vm2700_vm6, %v16058_v42  ;;  %13079 = vmatprep.mubr.msk.bf16.mxu1 %vm2700_vm6, %v16058_v42  ;;  %v14353_v42 = vld [vmem:[#allocation8 + $0x574] ss:$12 sps:$4 sm:$0xff]  }
 0x326   : > { %4864 = vmatpush1.bf16.msra.mxu0 %v14339_v24  ;;  %4947 = vmatpush1.bf16.msra.mxu1 %v14342_v55  ;;  %v14359_v24 = vld [vmem:[#allocation8 + $0x630] ss:$12 sps:$4 sm:$0xff]   ;;  %v14362_v55 = vld [vmem:[#allocation8 + $0x638] ss:$12 sps:$4 sm:$0xff]  }
 0x327   : > { %4865 = vmatprep.subr.bf16.mxu0 %v14345_v49  ;;  %4948 = vmatprep.subr.bf16.mxu1 %v20417_v7 }
 0x328   : > { %v16503_v29 = vpop.f32.mrf.mxu0  ;;  %v16505_v33 = vpop.f32.mrf.mxu1 }
 0x32a   : > { %4866 = vmatpush1.bf16.msra.mxu0 %v14343_v60  ;;  %4949 = vmatpush1.bf16.msra.mxu1 %v14346_v22  ;;  %v16507_v1 = vpop.f32.mrf.mxu0  ;;  %v2835_v28 = vpop.f32.mrf.mxu1 }
 0x32b   : > { %4879 = vmatprep.subr.bf16.mxu0 %v14349_v14  ;;  %4962 = vmatprep.subr.bf16.mxu1 %v20417_v7 }
 0x32c   : > { %4494 = vmatmul.mubr.bf16.gmra.mxu0 %v16061_v38  ;;  %4569 = vmatmul.mubr.bf16.gmra.mxu1 %v16061_v38  ;;  %v16512_v2 = vpop.f32.mrf.mxu0  ;;  %v16514_v61 = vpop.f32.mrf.mxu1  ;;  %v14357_v38 = vld [vmem:[#allocation8 + $0x64c] ss:$12 sps:$4 sm:$0xff]  }
 0x32d   : > { %13110 = vmatprep.mubr.msk.bf16.mxu0 %vm2700_vm6, %v16044_v13  ;;  %13115 = vmatprep.mubr.msk.bf16.mxu1 %vm2700_vm6, %v16044_v13 }
 0x32e   : > { %4880 = vmatpush2.bf16.msra.mxu0 %v14347_v37  ;;  %4963 = vmatpush2.bf16.msra.mxu1 %v14350_v30  ;;  %v16520_v10 = vpop.f32.mrf.mxu0  ;;  %v2838_v20 = vpop.f32.mrf.mxu1  ;;  %v14366_v37 = vld [vmem:[#allocation8 + $0x620] ss:$12 sps:$4 sm:$0xff]  }
 0x32f   : > { %4881 = vmatprep.subr.bf16.mxu0 %v14353_v42  ;;  %4964 = vmatprep.subr.bf16.mxu1 %v20417_v7  ;;  %v14369_v42 = vld [vmem:[#allocation8 + $0x604] ss:$12 sps:$4 sm:$0xff]   ;;  %v14367_v20 = vld [vmem:[#allocation8 + $0x600] ss:$12 sps:$4 sm:$0xff]  }
 0x330   : > { %v16523_v11 = vpop.f32.mrf.mxu0  ;;  %v16525_v4 = vpop.f32.mrf.mxu1 }
 0x332   : > { %4882 = vmatpush2.bf16.msra.mxu0 %v14351_v43  ;;  %4965 = vmatpush2.bf16.msra.mxu1 %v14354_v63  ;;  %v16527_v21 = vpop.f32.mrf.mxu0  ;;  %v2843_v13 = vpop.f32.mrf.mxu1 }
 0x333   : > { %5285 = vmatprep.subr.bf16.mxu0 %v14357_v38  ;;  %5368 = vmatprep.subr.bf16.mxu1 %v20417_v7  ;;  %v14370_v38 = vld [vmem:[#allocation8 + $0x608] ss:$12 sps:$4 sm:$0xff]  }
 0x334   : > { %v16530_v36 = vpop.f32.mrf.mxu0  ;;  %v16532_v18 = vpop.f32.mrf.mxu1 }
 0x335   : > { %4884 = vmatmul.mubr.bf16.vlgmr.msra.gmra.mxu0 %v16051_v39  ;;  %4967 = vmatmul.mubr.bf16.vlgmr.msra.gmra.mxu1 %v16051_v39  ;;  %v14365_v39 = vld [vmem:[#allocation8 + $0x61c] ss:$12 sps:$4 sm:$0xff]  }
 0x336   : > { %13111 = vmatprep.mubr.msk.bf16.mxu0 %vm2700_vm6, %v16054_v48  ;;  %13116 = vmatprep.mubr.msk.bf16.mxu1 %vm2700_vm6, %v16054_v48  ;;  %v16540_v12 = vpop.f32.mrf.mxu0  ;;  %v2846_v23 = vpop.f32.mrf.mxu1  ;;  %v14363_v48 = vld [vmem:[#allocation8 + $0x618] ss:$12 sps:$4 sm:$0xff]  }
 0x337   : > { %5286 = vmatpush1.bf16.msra.mxu0 %v14355_v53  ;;  %5369 = vmatpush1.bf16.msra.mxu1 %v14358_v46  ;;  %v14374_v23 = vld [vmem:[#allocation8 + $0x5f0] ss:$12 sps:$4 sm:$0xff]  }
 0x338   : > { %5287 = vmatprep.subr.bf16.mxu0 %v14361_v26  ;;  %5370 = vmatprep.subr.bf16.mxu1 %v20417_v7  ;;  %v16543_v49 = vpop.f32.mrf.mxu0  ;;  %v16545_v60 = vpop.f32.mrf.mxu1 }
 0x33a   : > { %v16547_v22 = vpop.f32.mrf.mxu0  ;;  %v2851_v14 = vpop.f32.mrf.mxu1 }
 0x33b   : > { %5288 = vmatpush1.bf16.msra.mxu0 %v14359_v24  ;;  %5371 = vmatpush1.bf16.msra.mxu1 %v14362_v55 }
 0x33c   : > { %5289 = vmatprep.subr.bf16.mxu0 %v14365_v39  ;;  %5372 = vmatprep.subr.bf16.mxu1 %v20417_v7  ;;  %v16550_v30 = vpop.f32.mrf.mxu0  ;;  %v16552_v28 = vpop.f32.mrf.mxu1  ;;  %v14377_v39 = vld [vmem:[#allocation8 + $0x5d4] ss:$12 sps:$4 sm:$0xff]  }
 0x33d   : > { %4894 = vmatmul.mubr.bf16.gmra.mxu0 %v16064_v16  ;;  %4975 = vmatmul.mubr.bf16.gmra.mxu1 %v16064_v16  ;;  %v14373_v16 = vld [vmem:[#allocation8 + $0x5ec] ss:$12 sps:$4 sm:$0xff]  }
 0x33e   : > { %13112 = vmatprep.mubr.msk.bf16.mxu0 %vm2700_vm6, %v16067_v8  ;;  %13117 = vmatprep.mubr.msk.bf16.mxu1 %vm2700_vm6, %v16067_v8  ;;  %v16560_v43 = vpop.f32.mrf.mxu0  ;;  %v2854_v63 = vpop.f32.mrf.mxu1  ;;  %v14371_v8 = vld [vmem:[#allocation8 + $0x5e8] ss:$12 sps:$4 sm:$0xff]  }
 0x33f   : > { %5290 = vmatpush1.bf16.msra.mxu0 %v14363_v48  ;;  %5373 = vmatpush1.bf16.msra.mxu1 %v14366_v37  ;;  %v14375_v37 = vld [vmem:[#allocation8 + $0x5d0] ss:$12 sps:$4 sm:$0xff]  }
 0x340   : > { %5291 = vmatprep.subr.bf16.mxu0 %v14369_v42  ;;  %5374 = vmatprep.subr.bf16.mxu1 %v20417_v7  ;;  %v16563_v13 = vpop.f32.mrf.mxu0  ;;  %v16565_v53 = vpop.f32.mrf.mxu1  ;;  %v14378_v42 = vld [vmem:[#allocation8 + $0x5d8] ss:$12 sps:$4 sm:$0xff]  }
 0x342   : > { %v16567_v46 = vpop.f32.mrf.mxu0  ;;  %v2859_v26 = vpop.f32.mrf.mxu1 }
 0x343   : > { %5292 = vmatpush1.bf16.msra.mxu0 %v14367_v20  ;;  %5375 = vmatpush1.bf16.msra.mxu1 %v14370_v38  ;;  %v14382_v26 = vld [vmem:[#allocation8 + $0x5c0] ss:$12 sps:$4 sm:$0xff]  }
 0x344   : > { %5293 = vmatprep.subr.bf16.mxu0 %v14373_v16  ;;  %5376 = vmatprep.subr.bf16.mxu1 %v20417_v7  ;;  %v16570_v24 = vpop.f32.mrf.mxu0  ;;  %v16572_v55 = vpop.f32.mrf.mxu1 }
 0x345   : > { %4904 = vmatmul.mubr.bf16.gmra.mxu0 %v16078_v31  ;;  %4983 = vmatmul.mubr.bf16.gmra.mxu1 %v16078_v31  ;;  %v14381_v31 = vld [vmem:[#allocation8 + $0x5bc] ss:$12 sps:$4 sm:$0xff]  }
 0x346   : > { %13113 = vmatprep.mubr.msk.bf16.mxu0 %vm2700_vm6, %v16081_v40  ;;  %13118 = vmatprep.mubr.msk.bf16.mxu1 %vm2700_vm6, %v16081_v40  ;;  %v16580_v14 = vpop.f32.mrf.mxu0  ;;  %v2862_v48 = vpop.f32.mrf.mxu1  ;;  %v14379_v40 = vld [vmem:[#allocation8 + $0x5b8] ss:$12 sps:$4 sm:$0xff]  }
 0x347   : > { %5294 = vmatpush1.bf16.msra.mxu0 %v14371_v8  ;;  %5377 = vmatpush1.bf16.msra.mxu1 %v14374_v23  ;;  %v20489_v48 = vld [vmem:[#allocation56_spill] sm:$0xff] }
 0x348   : > { %5295 = vmatprep.subr.bf16.mxu0 %v14377_v39  ;;  %5378 = vmatprep.subr.bf16.mxu1 %v20417_v7  ;;  %v16583_v63 = vpop.f32.mrf.mxu0  ;;  %v16585_v20 = vpop.f32.mrf.mxu1  ;;  %v14385_v39 = vld [vmem:[#allocation8 + $0x5a4] ss:$12 sps:$4 sm:$0xff]  }
 0x34a   : > { %v16587_v38 = vpop.f32.mrf.mxu0  ;;  %v2867_v16 = vpop.f32.mrf.mxu1 }
 0x34b   : > { %5296 = vmatpush1.bf16.msra.mxu0 %v14375_v37  ;;  %5379 = vmatpush1.bf16.msra.mxu1 %v14378_v42  ;;  %v14386_v16 = vld [vmem:[#allocation8 + $0x5a8] ss:$12 sps:$4 sm:$0xff]  }
 0x34c   : > { %5297 = vmatprep.subr.bf16.mxu0 %v14381_v31  ;;  %5380 = vmatprep.subr.bf16.mxu1 %v20417_v7  ;;  %v16590_v8 = vpop.f32.mrf.mxu0  ;;  %v16592_v23 = vpop.f32.mrf.mxu1  ;;  %v14383_v31 = vld [vmem:[#allocation8 + $0x5a0] ss:$12 sps:$4 sm:$0xff]  }
 0x34d   : > { %4914 = vmatmul.mubr.bf16.gmra.mxu0 %v16084_v15  ;;  %4991 = vmatmul.mubr.bf16.gmra.mxu1 %v16084_v15  ;;  %v20490_v15 = vld [vmem:[#allocation43_spill] sm:$0xff] }
 0x34e   : > { %13114 = vmatprep.mubr.msk.bf16.mxu0 %vm2700_vm6, %v20489_v48  ;;  %13119 = vmatprep.mubr.msk.bf16.mxu1 %vm2700_vm6, %v20489_v48  ;;  %v16600_v37 = vpop.f32.mrf.mxu0  ;;  %v2870_v42 = vpop.f32.mrf.mxu1  ;;  %v5088_v35 = vrot.slane %v20490_v15, 2 }
 0x34f   : > { %5298 = vmatpush1.bf16.msra.mxu0 %v14379_v40  ;;  %5381 = vmatpush1.bf16.msra.mxu1 %v14382_v26  ;;  %v14387_v40 = vld [vmem:[#allocation8 + $0x678] ss:$12 sps:$4 sm:$0xff]  }
 0x350   : > { %5299 = vmatprep.subr.bf16.mxu0 %v14385_v39  ;;  %5382 = vmatprep.subr.bf16.mxu1 %v20417_v7  ;;  %v20491_v26 = vld [vmem:[#allocation41_spill] sm:$0xff] }
 0x351   : > { %v3076_v54 = vpop.f32.mrf.mxu0  ;;  %v3159_v9 = vpop.f32.mrf.mxu1  ;;  %v5087_v42 = vrot.slane %v20491_v26, 2 }
 0x352   : > { %v16605_v27 = vadd.f32 %v3076_v54, %v16503_v29  ;;  %v16608_v48 = vadd.f32 %v3159_v9, %v16505_v33  ;;  %v20492_v54 = vld [vmem:[#allocation57_spill] sm:$0xff] }
 0x353   : > { %5300 = vmatpush1.bf16.msra.mxu0 %v14383_v31  ;;  %5383 = vmatpush1.bf16.msra.mxu1 %v14386_v16  ;;  %v3078_v39 = vpop.f32.mrf.mxu0  ;;  %v3161_v19 = vpop.f32.mrf.mxu1  ;;  %v5089_v9 = vsel %vm4648_vm2, %v5087_v42, %v5088_v35  ;;  %v14394_v31 = vld [vmem:[#allocation8 + $0x668] ss:$12 sps:$4 sm:$0xff]  }
 0x354   : > { %5313 = vmatprep.subr.bf16.mxu0 %v14389_v17  ;;  %5396 = vmatprep.subr.bf16.mxu1 %v20417_v7  ;;  %v16613_v0 = vadd.f32 %v3078_v39, %v16507_v1  ;;  %v14391_v1 = vld [vmem:[#allocation8 + $0x660] ss:$12 sps:$4 sm:$0xff]  }
 0x355   : > { %4924 = vmatmul.mubr.bf16.gmra.mxu0 %v20492_v54  ;;  %4999 = vmatmul.mubr.bf16.gmra.mxu1 %v20492_v54  ;;  %v3080_v29 = vpop.f32.mrf.mxu0  ;;  %v3162_v33 = vpop.f32.mrf.mxu1  ;;  %v14397_v54 = vld [vmem:[#allocation8 + $0x73c] ss:$12 sps:$4 sm:$0xff]  }
 0x356   : > { %13150 = vmatprep.mubr.msk.bf16.mxu0 %vm2700_vm6, %v5089_v9  ;;  %13155 = vmatprep.mubr.msk.bf16.mxu1 %vm2700_vm6, %v5089_v9  ;;  %v16621_v17 = vadd.f32 %v3080_v29, %v16512_v2  ;;  %v16624_v19 = vadd.f32 %v3162_v33, %v16514_v61  ;;  %v20493_v2 = vld [vmem:[#allocation42_spill] sm:$0xff] }
 0x357   : > { %5314 = vmatpush2.bf16.msra.mxu0 %v14387_v40  ;;  %5397 = vmatpush2.bf16.msra.mxu1 %v14390_v45  ;;  %v3082_v16 = vpop.f32.mrf.mxu0  ;;  %v3164_v39 = vpop.f32.mrf.mxu1  ;;  %v5085_v29 = vrot.slane %v20493_v2, 2  ;;  %v20494_v40 = vld [vmem:[#allocation45_spill] sm:$0xff] }
 0x358   : > { %5315 = vmatprep.subr.bf16.mxu0 %v14393_v51  ;;  %5398 = vmatprep.subr.bf16.mxu1 %v20417_v7  ;;  %v16628_v42 = vadd.f32 %v3082_v16, %v16520_v10  ;;  %v5092_v33 = vrot.slane %v20494_v40, 2  ;;  %v20495_v51 = vld [vmem:[#allocation40_spill] sm:$0xff]  ;;  %v14395_v16 = vld [vmem:[#allocation8 + $0x738] ss:$12 sps:$4 sm:$0xff]  }
 0x359   : > { %v3086_v9 = vpop.f32.mrf.mxu0  ;;  %v3167_v62 = vpop.f32.mrf.mxu1  ;;  %v5084_v39 = vrot.slane %v20495_v51, 2 }
 0x35a   : > { %v16632_v61 = vadd.f32 %v3086_v9, %v16523_v11  ;;  %v16635_v45 = vadd.f32 %v3167_v62, %v16525_v4  ;;  %v14401_v9 = vld [vmem:[#allocation8 + $0x724] ss:$12 sps:$4 sm:$0xff]  }
 0x35b   : > { %5316 = vmatpush2.bf16.msra.mxu0 %v14391_v1  ;;  %5399 = vmatpush2.bf16.msra.mxu1 %v14394_v31  ;;  %v3088_v5 = vpop.f32.mrf.mxu0  ;;  %v3169_v10 = vpop.f32.mrf.mxu1  ;;  %v5086_v11 = vsel %vm4648_vm2, %v5084_v39, %v5085_v29  ;;  %v5093_v1 = vsel %vm4648_vm2, %v5088_v35, %v5092_v33  ;;  %v14399_v39 = vld [vmem:[#allocation8 + $0x720] ss:$12 sps:$4 sm:$0xff]  }
 0x35c   : > { %5751 = vmatprep.subr.bf16.mxu0 %v14397_v54  ;;  %5834 = vmatprep.subr.bf16.mxu1 %v20417_v7  ;;  %v16641_v3 = vadd.f32 %v3088_v5, %v16527_v21  ;;  %v14402_v10 = vld [vmem:[#allocation8 + $0x728] ss:$12 sps:$4 sm:$0xff]  }
 0x35d   : > { %v3090_v62 = vpop.f32.mrf.mxu0  ;;  %v3170_v4 = vpop.f32.mrf.mxu1 }
 0x35e   : > { %5318 = vmatmul.mubr.bf16.vlgmr.msra.gmra.mxu0 %v5086_v11  ;;  %5401 = vmatmul.mubr.bf16.vlgmr.msra.gmra.mxu1 %v5086_v11  ;;  %v16646_v31 = vadd.f32 %v3090_v62, %v16530_v36  ;;  %v16649_v54 = vadd.f32 %v3170_v4, %v16532_v18  ;;  %v20496_v18 = vld [vmem:[#allocation44_spill] sm:$0xff]  ;;  %v14405_v4 = vld [vmem:[#allocation8 + $0x70c] ss:$12 sps:$4 sm:$0xff]  }
 0x35f   : > { %13151 = vmatprep.mubr.msk.bf16.mxu0 %vm2700_vm6, %v5093_v1  ;;  %13156 = vmatprep.mubr.msk.bf16.mxu1 %vm2700_vm6, %v5093_v1  ;;  %v3092_v5 = vpop.f32.mrf.mxu0  ;;  %v3172_v21 = vpop.f32.mrf.mxu1  ;;  %v5090_v62 = vrot.slane %v20496_v18, 2 }
 0x360   : > { %5752 = vmatpush1.bf16.msra.mxu0 %v14395_v16  ;;  %5835 = vmatpush1.bf16.msra.mxu1 %v14398_v59  ;;  %v16654_v11 = vadd.f32 %v3092_v5, %v16540_v12  ;;  %v20497_v59 = vld [vmem:[#allocation46_spill] sm:$0xff]  ;;  %v14403_v12 = vld [vmem:[#allocation8 + $0x708] ss:$12 sps:$4 sm:$0xff]  }
 0x361   : > { %5753 = vmatprep.subr.bf16.mxu0 %v14401_v9  ;;  %5836 = vmatprep.subr.bf16.mxu1 %v20417_v7  ;;  %v3096_v35 = vpop.f32.mrf.mxu0  ;;  %v3175_v36 = vpop.f32.mrf.mxu1  ;;  %v5096_v16 = vrot.slane %v20497_v59, 2  ;;  %v14406_v9 = vld [vmem:[#allocation8 + $0x710] ss:$12 sps:$4 sm:$0xff]   ;;  %v5091_v32 = vsel %vm4648_vm2, %v5085_v29, %v5090_v62 }
 0x362   : > { %v16659_v44 = vadd.f32 %v3096_v35, %v16543_v49  ;;  %v16662_v1 = vadd.f32 %v3175_v36, %v16545_v60  ;;  %v14409_v60 = vld [vmem:[#allocation8 + $0x6f4] ss:$12 sps:$4 sm:$0xff]  }
 0x363   : > { %v3098_v21 = vpop.f32.mrf.mxu0  ;;  %v3177_v56 = vpop.f32.mrf.mxu1  ;;  %v5097_v36 = vsel %vm4648_vm2, %v5092_v33, %v5096_v16 }
 0x364   : > { %5754 = vmatpush1.bf16.msra.mxu0 %v14399_v39  ;;  %5837 = vmatpush1.bf16.msra.mxu1 %v14402_v10  ;;  %v16666_v5 = vadd.f32 %v3098_v21, %v16547_v22  ;;  %v14407_v10 = vld [vmem:[#allocation8 + $0x6f0] ss:$12 sps:$4 sm:$0xff]  }
 0x365   : > { %5755 = vmatprep.subr.bf16.mxu0 %v14405_v4  ;;  %5838 = vmatprep.subr.bf16.mxu1 %v20417_v7  ;;  %v3100_v49 = vpop.f32.mrf.mxu0  ;;  %v3178_v35 = vpop.f32.mrf.mxu1  ;;  %v14410_v4 = vld [vmem:[#allocation8 + $0x6f8] ss:$12 sps:$4 sm:$0xff]  }
 0x366   : > { %5328 = vmatmul.mubr.bf16.gmra.mxu0 %v5091_v32  ;;  %5409 = vmatmul.mubr.bf16.gmra.mxu1 %v5091_v32  ;;  %v16672_v56 = vadd.f32 %v3100_v49, %v16550_v30  ;;  %v16675_v39 = vadd.f32 %v3178_v35, %v16552_v28  ;;  %v20498_v28 = vld [vmem:[#allocation47_spill] sm:$0xff] }
 0x367   : > { %13152 = vmatprep.mubr.msk.bf16.mxu0 %vm2700_vm6, %v5097_v36  ;;  %13157 = vmatprep.mubr.msk.bf16.mxu1 %vm2700_vm6, %v5097_v36  ;;  %v3102_v22 = vpop.f32.mrf.mxu0  ;;  %v3180_v29 = vpop.f32.mrf.mxu1  ;;  %v5094_v21 = vrot.slane %v20498_v28, 2  ;;  %v14413_v49 = vld [vmem:[#allocation8 + $0x6dc] ss:$12 sps:$4 sm:$0xff]  }
 0x368   : > { %5756 = vmatpush1.bf16.msra.mxu0 %v14403_v12  ;;  %5839 = vmatpush1.bf16.msra.mxu1 %v14406_v9  ;;  %v16680_v32 = vadd.f32 %v3102_v22, %v16560_v43  ;;  %v20499_v12 = vld [vmem:[#allocation51_spill] sm:$0xff]  ;;  %v14411_v43 = vld [vmem:[#allocation8 + $0x6d8] ss:$12 sps:$4 sm:$0xff]  }
 0x369   : > { %5757 = vmatprep.subr.bf16.mxu0 %v14409_v60  ;;  %5840 = vmatprep.subr.bf16.mxu1 %v20417_v7  ;;  %v3106_v30 = vpop.f32.mrf.mxu0  ;;  %v3183_v33 = vpop.f32.mrf.mxu1  ;;  %v5100_v9 = vrot.slane %v20499_v12, 2  ;;  %v14414_v60 = vld [vmem:[#allocation8 + $0x6e0] ss:$12 sps:$4 sm:$0xff]   ;;  %v5095_v58 = vsel %vm4648_vm2, %v5090_v62, %v5094_v21 }
 0x36a   : > { %v16685_v35 = vadd.f32 %v3106_v30, %v16563_v13  ;;  %v16688_v36 = vadd.f32 %v3183_v33, %v16565_v53  ;;  %v14417_v53 = vld [vmem:[#allocation8 + $0x6c4] ss:$12 sps:$4 sm:$0xff]  }
 0x36b   : > { %v3108_v29 = vpop.f32.mrf.mxu0  ;;  %v3185_v52 = vpop.f32.mrf.mxu1  ;;  %v5101_v33 = vsel %vm4648_vm2, %v5096_v16, %v5100_v9 }
 0x36c   : > { %5758 = vmatpush1.bf16.msra.mxu0 %v14407_v10  ;;  %5841 = vmatpush1.bf16.msra.mxu1 %v14410_v4  ;;  %v16692_v22 = vadd.f32 %v3108_v29, %v16567_v46  ;;  %v14415_v4 = vld [vmem:[#allocation8 + $0x6c0] ss:$12 sps:$4 sm:$0xff]  }
 0x36d   : > { %5759 = vmatprep.subr.bf16.mxu0 %v14413_v49  ;;  %5842 = vmatprep.subr.bf16.mxu1 %v20417_v7  ;;  %v3110_v13 = vpop.f32.mrf.mxu0  ;;  %v3186_v30 = vpop.f32.mrf.mxu1  ;;  %v14418_v49 = vld [vmem:[#allocation8 + $0x6c8] ss:$12 sps:$4 sm:$0xff]  }
 0x36e   : > { %5338 = vmatmul.mubr.bf16.gmra.mxu0 %v5095_v58  ;;  %5417 = vmatmul.mubr.bf16.gmra.mxu1 %v5095_v58  ;;  %v16698_v52 = vadd.f32 %v3110_v13, %v16570_v24  ;;  %v16701_v10 = vadd.f32 %v3186_v30, %v16572_v55  ;;  %v20500_v55 = vld [vmem:[#allocation52_spill] sm:$0xff]  ;;  %v14421_v13 = vld [vmem:[#allocation8 + $0x6ac] ss:$12 sps:$4 sm:$0xff]  }
 0x36f   : > { %13153 = vmatprep.mubr.msk.bf16.mxu0 %vm2700_vm6, %v5101_v33  ;;  %13158 = vmatprep.mubr.msk.bf16.mxu1 %vm2700_vm6, %v5101_v33  ;;  %v3112_v46 = vpop.f32.mrf.mxu0  ;;  %v3188_v62 = vpop.f32.mrf.mxu1  ;;  %v5098_v29 = vrot.slane %v20500_v55, 2 }
 0x370   : > { %5760 = vmatpush1.bf16.msra.mxu0 %v14411_v43  ;;  %5843 = vmatpush1.bf16.msra.mxu1 %v14414_v60  ;;  %v16706_v58 = vadd.f32 %v3112_v46, %v16580_v14  ;;  %v14900_v43 = vmov 0.0|0.0   ;;  %v14422_v62 = vld [vmem:[#allocation8 + $0x6b0] ss:$12 sps:$4 sm:$0xff]  }
 0x371   : > { %5761 = vmatprep.subr.bf16.mxu0 %v14417_v53  ;;  %5844 = vmatprep.subr.bf16.mxu1 %v20417_v7  ;;  %v3116_v24 = vpop.f32.mrf.mxu0  ;;  %v3191_v16 = vpop.f32.mrf.mxu1  ;;  %v16717_v60 = vrot.slane %v14900_v43, 2  ;;  %v14419_v53 = vld [vmem:[#allocation8 + $0x6a8] ss:$12 sps:$4 sm:$0xff]   ;;  %v5099_v34 = vsel %vm4648_vm2, %v5094_v21, %v5098_v29 }
 0x372   : > { %v16711_v30 = vadd.f32 %v3116_v24, %v16583_v63  ;;  %v16714_v33 = vadd.f32 %v3191_v16, %v16585_v20  ;;  %v14425_v24 = vld [vmem:[#allocation8 + $0x694] ss:$12 sps:$4 sm:$0xff]  }
 0x373   : > { %20501 = vst [vmem:[#allocation48_spill] sm:$0xff] %v16717_v60  ;;  %v3118_v14 = vpop.f32.mrf.mxu0  ;;  %v3193_v46 = vpop.f32.mrf.mxu1  ;;  %v5104_v16 = vsel %vm4648_vm2, %v5100_v9, %v16717_v60 }
 0x374   : > { %5762 = vmatpush1.bf16.msra.mxu0 %v14415_v4  ;;  %5845 = vmatpush1.bf16.msra.mxu1 %v14418_v49  ;;  %v16720_v25 = vadd.f32 %v3118_v14, %v16587_v38  ;;  %v14426_v14 = vld [vmem:[#allocation8 + $0x698] ss:$12 sps:$4 sm:$0xff]  }
 0x375   : > { %5763 = vmatprep.subr.bf16.mxu0 %v14421_v13  ;;  %5846 = vmatprep.subr.bf16.mxu1 %v20417_v7  ;;  %v3120_v63 = vpop.f32.mrf.mxu0  ;;  %v3194_v20 = vpop.f32.mrf.mxu1  ;;  %v14423_v13 = vld [vmem:[#allocation8 + $0x690] ss:$12 sps:$4 sm:$0xff]  }
 0x376   : > { %5348 = vmatmul.mubr.bf16.gmra.mxu0 %v5099_v34  ;;  %5425 = vmatmul.mubr.bf16.gmra.mxu1 %v5099_v34  ;;  %v16727_v4 = vadd.f32 %v3120_v63, %v16590_v8  ;;  %v16730_v49 = vadd.f32 %v3194_v20, %v16592_v23  ;;  %v14429_v8 = vld [vmem:[#allocation8 + $0x76c] ss:$12 sps:$4 sm:$0xff]  }
 0x377   : > { %13154 = vmatprep.mubr.msk.bf16.mxu0 %vm2700_vm6, %v5104_v16  ;;  %13159 = vmatprep.mubr.msk.bf16.mxu1 %vm2700_vm6, %v5104_v16  ;;  %v3122_v38 = vpop.f32.mrf.mxu0  ;;  %v3196_v21 = vpop.f32.mrf.mxu1 }
 0x378   : > { %5764 = vmatpush1.bf16.msra.mxu0 %v14419_v53  ;;  %5847 = vmatpush1.bf16.msra.mxu1 %v14422_v62  ;;  %v16735_v34 = vadd.f32 %v3122_v38, %v16600_v37  ;;  %v14427_v53 = vld [vmem:[#allocation8 + $0x768] ss:$12 sps:$4 sm:$0xff]   ;;  %v14430_v62 = vld [vmem:[#allocation8 + $0x770] ss:$12 sps:$4 sm:$0xff]   ;;  %v5103_v37 = vsel %vm4648_vm2, %v5098_v29, %v16717_v60  ;;  %v20502_v21 = vld [vmem:[#allocation58_spill] sm:$0xff] }
 0x379   : > { %5765 = vmatprep.subr.bf16.mxu0 %v14425_v24  ;;  %5848 = vmatprep.subr.bf16.mxu1 %v20417_v7 }
 0x37a   : > { %v3488_v9 = vpop.f32.mrf.mxu0  ;;  %v3571_v23 = vpop.f32.mrf.mxu1 }
 0x37b   : > { %v16739_v46 = vadd.f32 %v3488_v9, %v16605_v27  ;;  %v16742_v63 = vadd.f32 %v3571_v23, %v16608_v48  ;;  %v14433_v27 = vld [vmem:[#allocation8 + $0x754] ss:$12 sps:$4 sm:$0xff]  }
 0x37c   : > { %5766 = vmatpush1.bf16.msra.mxu0 %v14423_v13  ;;  %5849 = vmatpush1.bf16.msra.mxu1 %v14426_v14  ;;  %v3490_v20 = vpop.f32.mrf.mxu0  ;;  %v3573_v16 = vpop.f32.mrf.mxu1  ;;  %v14434_v14 = vld [vmem:[#allocation8 + $0x758] ss:$12 sps:$4 sm:$0xff]  }
 0x37d   : > { %5779 = vmatprep.subr.bf16.mxu0 %v14429_v8  ;;  %5862 = vmatprep.subr.bf16.mxu1 %v20417_v7  ;;  %v16748_v24 = vadd.f32 %v3490_v20, %v16613_v0  ;;  %v14431_v0 = vld [vmem:[#allocation8 + $0x750] ss:$12 sps:$4 sm:$0xff]   ;;  %v14437_v20 = vld [vmem:[#allocation8 + $0x82c] ss:$12 sps:$4 sm:$0xff]  }
 0x37e   : > { %5358 = vmatmul.mubr.bf16.gmra.mxu0 %v5103_v37  ;;  %5433 = vmatmul.mubr.bf16.gmra.mxu1 %v5103_v37  ;;  %v3492_v48 = vpop.f32.mrf.mxu0  ;;  %v3574_v38 = vpop.f32.mrf.mxu1 }
 0x37f   : > { %13190 = vmatprep.mubr.msk.bf16.mxu0 %vm2700_vm6, %v20502_v21  ;;  %13195 = vmatprep.mubr.msk.bf16.mxu1 %vm2700_vm6, %v20502_v21  ;;  %v16755_v13 = vadd.f32 %v3492_v48, %v16621_v17  ;;  %v16758_v29 = vadd.f32 %v3574_v38, %v16624_v19  ;;  %v14435_v48 = vld [vmem:[#allocation8 + $0x828] ss:$12 sps:$4 sm:$0xff]  }
 0x380   : > { %5780 = vmatpush2.bf16.msra.mxu0 %v14427_v53  ;;  %5863 = vmatpush2.bf16.msra.mxu1 %v14430_v62  ;;  %v3494_v8 = vpop.f32.mrf.mxu0  ;;  %v3576_v9 = vpop.f32.mrf.mxu1 }
 0x381   : > { %5781 = vmatprep.subr.bf16.mxu0 %v14433_v27  ;;  %5864 = vmatprep.subr.bf16.mxu1 %v20417_v7  ;;  %v16762_v23 = vadd.f32 %v3494_v8, %v16628_v42  ;;  %v14438_v27 = vld [vmem:[#allocation8 + $0x830] ss:$12 sps:$4 sm:$0xff]   ;;  %v14441_v8 = vld [vmem:[#allocation8 + $0x814] ss:$12 sps:$4 sm:$0xff]  }
 0x382   : > { %v3498_v16 = vpop.f32.mrf.mxu0  ;;  %v3579_v37 = vpop.f32.mrf.mxu1 }
 0x383   : > { %v16765_v17 = vadd.f32 %v3498_v16, %v16632_v61  ;;  %v16768_v19 = vadd.f32 %v3579_v37, %v16635_v45  ;;  %v20503_v61 = vld [vmem:[#allocation53_spill] sm:$0xff] }
 0x384   : > { %5782 = vmatpush2.bf16.msra.mxu0 %v14431_v0  ;;  %5865 = vmatpush2.bf16.msra.mxu1 %v14434_v14  ;;  %v3500_v53 = vpop.f32.mrf.mxu0  ;;  %v3581_v62 = vpop.f32.mrf.mxu1  ;;  %v20504_v14 = vld [vmem:[#allocation59_spill] sm:$0xff]  ;;  %v14442_v16 = vld [vmem:[#allocation8 + $0x818] ss:$12 sps:$4 sm:$0xff]  }
 0x385   : > { %6180 = vmatprep.subr.bf16.mxu0 %v14437_v20  ;;  %6263 = vmatprep.subr.bf16.mxu1 %v20417_v7  ;;  %v16772_v42 = vadd.f32 %v3500_v53, %v16641_v3  ;;  %v14439_v20 = vld [vmem:[#allocation8 + $0x810] ss:$12 sps:$4 sm:$0xff]  }
 0x386   : > { %v3502_v38 = vpop.f32.mrf.mxu0  ;;  %v3582_v21 = vpop.f32.mrf.mxu1  ;;  %v14445_v53 = vld [vmem:[#allocation8 + $0x7fc] ss:$12 sps:$4 sm:$0xff]  }
 0x387   : > { %5784 = vmatmul.mubr.bf16.vlgmr.msra.gmra.mxu0 %v20503_v61  ;;  %5867 = vmatmul.mubr.bf16.vlgmr.msra.gmra.mxu1 %v20503_v61  ;;  %v16777_v45 = vadd.f32 %v3502_v38, %v16646_v31  ;;  %v16780_v0 = vadd.f32 %v3582_v21, %v16649_v54  ;;  %v14446_v61 = vld [vmem:[#allocation8 + $0x800] ss:$12 sps:$4 sm:$0xff]  }
 0x388   : > { %13191 = vmatprep.mubr.msk.bf16.mxu0 %vm2700_vm6, %v20504_v14  ;;  %13196 = vmatprep.mubr.msk.bf16.mxu1 %vm2700_vm6, %v20504_v14  ;;  %v3504_v3 = vpop.f32.mrf.mxu0  ;;  %v3584_v9 = vpop.f32.mrf.mxu1 }
 0x389   : > { %6181 = vmatpush1.bf16.msra.mxu0 %v14435_v48  ;;  %6264 = vmatpush1.bf16.msra.mxu1 %v14438_v27  ;;  %v16787_v37 = vadd.f32 %v3504_v3, %v16654_v11  ;;  %v14443_v27 = vld [vmem:[#allocation8 + $0x7f8] ss:$12 sps:$4 sm:$0xff]  }
 0x38a   : > { %6182 = vmatprep.subr.bf16.mxu0 %v14441_v8  ;;  %6265 = vmatprep.subr.bf16.mxu1 %v20417_v7  ;;  %v3508_v31 = vpop.f32.mrf.mxu0  ;;  %v3587_v54 = vpop.f32.mrf.mxu1  ;;  %v14449_v3 = vld [vmem:[#allocation8 + $0x7e4] ss:$12 sps:$4 sm:$0xff]  }
 0x38b   : > { %v16791_v62 = vadd.f32 %v3508_v31, %v16659_v44  ;;  %v16794_v38 = vadd.f32 %v3587_v54, %v16662_v1  ;;  %v20505_v44 = vld [vmem:[#allocation60_spill] sm:$0xff]  ;;  %v14447_v31 = vld [vmem:[#allocation8 + $0x7e0] ss:$12 sps:$4 sm:$0xff]  }
 0x38c   : > { %v3510_v21 = vpop.f32.mrf.mxu0  ;;  %v3589_v48 = vpop.f32.mrf.mxu1  ;;  %v14450_v54 = vld [vmem:[#allocation8 + $0x7e8] ss:$12 sps:$4 sm:$0xff]  }
 0x38d   : > { %6183 = vmatpush1.bf16.msra.mxu0 %v14439_v20  ;;  %6266 = vmatpush1.bf16.msra.mxu1 %v14442_v16  ;;  %v16797_v11 = vadd.f32 %v3510_v21, %v16666_v5  ;;  %v20506_v20 = vld [vmem:[#allocation61_spill] sm:$0xff] }
 0x38e   : > { %6184 = vmatprep.subr.bf16.mxu0 %v14445_v53  ;;  %6267 = vmatprep.subr.bf16.mxu1 %v20417_v7  ;;  %v3512_v8 = vpop.f32.mrf.mxu0  ;;  %v3590_v14 = vpop.f32.mrf.mxu1  ;;  %v14453_v21 = vld [vmem:[#allocation8 + $0x7cc] ss:$12 sps:$4 sm:$0xff]  }
 0x38f   : > { %5794 = vmatmul.mubr.bf16.gmra.mxu0 %v20505_v44  ;;  %5875 = vmatmul.mubr.bf16.gmra.mxu1 %v20505_v44  ;;  %v16803_v1 = vadd.f32 %v3512_v8, %v16672_v56  ;;  %v16806_v9 = vadd.f32 %v3590_v14, %v16675_v39  ;;  %v14454_v44 = vld [vmem:[#allocation8 + $0x7d0] ss:$12 sps:$4 sm:$0xff]  }
 0x390   : > { %13192 = vmatprep.mubr.msk.bf16.mxu0 %vm2700_vm6, %v20506_v20  ;;  %13197 = vmatprep.mubr.msk.bf16.mxu1 %vm2700_vm6, %v20506_v20  ;;  %v3514_v5 = vpop.f32.mrf.mxu0  ;;  %v3592_v16 = vpop.f32.mrf.mxu1 }
 0x391   : > { %6185 = vmatpush1.bf16.msra.mxu0 %v14443_v27  ;;  %6268 = vmatpush1.bf16.msra.mxu1 %v14446_v61  ;;  %v16813_v53 = vadd.f32 %v3514_v5, %v16680_v32  ;;  %v14451_v61 = vld [vmem:[#allocation8 + $0x7c8] ss:$12 sps:$4 sm:$0xff]  }
 0x392   : > { %6186 = vmatprep.subr.bf16.mxu0 %v14449_v3  ;;  %6269 = vmatprep.subr.bf16.mxu1 %v20417_v7  ;;  %v3518_v56 = vpop.f32.mrf.mxu0  ;;  %v3595_v39 = vpop.f32.mrf.mxu1  ;;  %v14457_v5 = vld [vmem:[#allocation8 + $0x7b4] ss:$12 sps:$4 sm:$0xff]  }
 0x393   : > { %v16817_v48 = vadd.f32 %v3518_v56, %v16685_v35  ;;  %v16820_v8 = vadd.f32 %v3595_v39, %v16688_v36  ;;  %v20507_v35 = vld [vmem:[#allocation62_spill] sm:$0xff]  ;;  %v14455_v56 = vld [vmem:[#allocation8 + $0x7b0] ss:$12 sps:$4 sm:$0xff]  }
 0x394   : > { %v3520_v14 = vpop.f32.mrf.mxu0  ;;  %v3597_v27 = vpop.f32.mrf.mxu1  ;;  %v14458_v39 = vld [vmem:[#allocation8 + $0x7b8] ss:$12 sps:$4 sm:$0xff]  }
 0x395   : > { %6187 = vmatpush1.bf16.msra.mxu0 %v14447_v31  ;;  %6270 = vmatpush1.bf16.msra.mxu1 %v14450_v54  ;;  %v16823_v32 = vadd.f32 %v3520_v14, %v16692_v22  ;;  %v20508_v31 = vld [vmem:[#allocation64_spill] sm:$0xff]  ;;  %v14461_v14 = vld [vmem:[#allocation8 + $0x79c] ss:$12 sps:$4 sm:$0xff]  }
 0x396   : > { %6188 = vmatprep.subr.bf16.mxu0 %v14453_v21  ;;  %6271 = vmatprep.subr.bf16.mxu1 %v20417_v7  ;;  %v3522_v3 = vpop.f32.mrf.mxu0  ;;  %v3598_v20 = vpop.f32.mrf.mxu1 }
 0x397   : > { %5804 = vmatmul.mubr.bf16.gmra.mxu0 %v20507_v35  ;;  %5883 = vmatmul.mubr.bf16.gmra.mxu1 %v20507_v35  ;;  %v16829_v36 = vadd.f32 %v3522_v3, %v16698_v52  ;;  %v16832_v16 = vadd.f32 %v3598_v20, %v16701_v10  ;;  %v14462_v35 = vld [vmem:[#allocation8 + $0x7a0] ss:$12 sps:$4 sm:$0xff]  }
 0x398   : > { %13193 = vmatprep.mubr.msk.bf16.mxu0 %vm2700_vm6, %v20508_v31  ;;  %13198 = vmatprep.mubr.msk.bf16.mxu1 %vm2700_vm6, %v20508_v31  ;;  %v3524_v22 = vpop.f32.mrf.mxu0  ;;  %v3600_v54 = vpop.f32.mrf.mxu1 }
 0x399   : > { %6189 = vmatpush1.bf16.msra.mxu0 %v14451_v61  ;;  %6272 = vmatpush1.bf16.msra.mxu1 %v14454_v44  ;;  %v16839_v21 = vadd.f32 %v3524_v22, %v16706_v58  ;;  %v14459_v44 = vld [vmem:[#allocation8 + $0x798] ss:$12 sps:$4 sm:$0xff]  }
 0x39a   : > { %6190 = vmatprep.subr.bf16.mxu0 %v14457_v5  ;;  %6273 = vmatprep.subr.bf16.mxu1 %v20417_v7  ;;  %v3528_v52 = vpop.f32.mrf.mxu0  ;;  %v3603_v10 = vpop.f32.mrf.mxu1  ;;  %v14465_v22 = vld [vmem:[#allocation8 + $0x784] ss:$12 sps:$4 sm:$0xff]  }
 0x39b   : > { %v16843_v27 = vadd.f32 %v3528_v52, %v16711_v30  ;;  %v16846_v3 = vadd.f32 %v3603_v10, %v16714_v33  ;;  %v20509_v30 = vld [vmem:[#allocation66_spill] sm:$0xff]  ;;  %v20510_v33 = vld [vmem:[#allocation63_spill] sm:$0xff] }
 0x39c   : > { %v3530_v20 = vpop.f32.mrf.mxu0  ;;  %v3605_v61 = vpop.f32.mrf.mxu1  ;;  %v5570_v54 = vsel %vm5512_vm7, %v20510_v33, %v16445_v6  ;;  %v14463_v10 = vld [vmem:[#allocation8 + $0x780] ss:$12 sps:$4 sm:$0xff]  }
 0x39d   : > { %6191 = vmatpush1.bf16.msra.mxu0 %v14455_v56  ;;  %6274 = vmatpush1.bf16.msra.mxu1 %v14458_v39  ;;  %v16849_v58 = vadd.f32 %v3530_v20, %v16720_v25 }
 0x39e   : > { %6192 = vmatprep.subr.bf16.mxu0 %v14461_v14  ;;  %6275 = vmatprep.subr.bf16.mxu1 %v20417_v7  ;;  %v3532_v5 = vpop.f32.mrf.mxu0  ;;  %v3606_v31 = vpop.f32.mrf.mxu1  ;;  %v14466_v14 = vld [vmem:[#allocation8 + $0x788] ss:$12 sps:$4 sm:$0xff]  }
 0x39f   : > { %5814 = vmatmul.mubr.bf16.gmra.mxu0 %v20509_v30  ;;  %5891 = vmatmul.mubr.bf16.gmra.mxu1 %v20509_v30  ;;  %v16858_v56 = vadd.f32 %v3532_v5, %v16727_v4  ;;  %v16861_v25 = vadd.f32 %v3606_v31, %v16730_v49  ;;  %v14469_v4 = vld [vmem:[#allocation8 + $0x85c] ss:$12 sps:$4 sm:$0xff]   ;;  %v5983_v5 = vrot.slane %v20490_v15, 3 }
 0x3a0   : > { %13194 = vmatprep.mubr.msk.bf16.mxu0 %vm2700_vm6, %v5570_v54  ;;  %13199 = vmatprep.mubr.msk.bf16.mxu1 %vm2700_vm6, %v5570_v54  ;;  %v3534_v39 = vpop.f32.mrf.mxu0  ;;  %v3608_v52 = vpop.f32.mrf.mxu1  ;;  %v20511_v54 = vld [vmem:[#allocation65_spill] sm:$0xff] }
 0x3a1   : > { %6193 = vmatpush1.bf16.msra.mxu0 %v14459_v44  ;;  %6276 = vmatpush1.bf16.msra.mxu1 %v14462_v35  ;;  %v16866_v20 = vadd.f32 %v3534_v39, %v16735_v34  ;;  %v14467_v44 = vld [vmem:[#allocation8 + $0x858] ss:$12 sps:$4 sm:$0xff]   ;;  %v5982_v34 = vrot.slane %v20491_v26, 3  ;;  %v14470_v35 = vld [vmem:[#allocation8 + $0x860] ss:$12 sps:$4 sm:$0xff]   ;;  %v5569_v39 = vsel %vm5512_vm7, %v20511_v54, %v16445_v6  ;;  %vm12376_vm7 = vcmask 1043459  }
 0x3a2   : > { %6194 = vmatprep.subr.bf16.mxu0 %v14465_v22  ;;  %6277 = vmatprep.subr.bf16.mxu1 %v20417_v7 }
 0x3a3   : > { %v3941_v61 = vpop.f32.mrf.mxu0  ;;  %v4024_v49 = vpop.f32.mrf.mxu1 }
 0x3a4   : > { %v16871_v31 = vadd.f32 %v3941_v61, %v16739_v46  ;;  %v16874_v30 = vadd.f32 %v4024_v49, %v16742_v63  ;;  %v14473_v46 = vld [vmem:[#allocation8 + $0x844] ss:$12 sps:$4 sm:$0xff]   ;;  %v5984_v63 = vsel %vm5978_vm12, %v5982_v34, %v5983_v5 }
 0x3a5   : > { %6195 = vmatpush1.bf16.msra.mxu0 %v14463_v10  ;;  %6278 = vmatpush1.bf16.msra.mxu1 %v14466_v14  ;;  %v3943_v22 = vpop.f32.mrf.mxu0  ;;  %v4026_v33 = vpop.f32.mrf.mxu1  ;;  %v14474_v14 = vld [vmem:[#allocation8 + $0x848] ss:$12 sps:$4 sm:$0xff]  }
 0x3a6   : > { %6208 = vmatprep.subr.bf16.mxu0 %v14469_v4  ;;  %6291 = vmatprep.subr.bf16.mxu1 %v20417_v7  ;;  %v16882_v15 = vadd.f32 %v3943_v22, %v16748_v24  ;;  %v14471_v24 = vld [vmem:[#allocation8 + $0x840] ss:$12 sps:$4 sm:$0xff]  }
 0x3a7   : > { %5824 = vmatmul.mubr.bf16.gmra.mxu0 %v5569_v39  ;;  %5899 = vmatmul.mubr.bf16.gmra.mxu1 %v5569_v39  ;;  %v3945_v52 = vpop.f32.mrf.mxu0  ;;  %v4027_v26 = vpop.f32.mrf.mxu1  ;;  %v14475_v39 = vld [vmem:[#allocation11 + $0x8] sm:$0xff]  }
 0x3a8   : > { %13230 = vmatprep.mubr.msk.bf16.mxu0 %vm2700_vm6, %v5984_v63  ;;  %13235 = vmatprep.mubr.msk.bf16.mxu1 %vm2700_vm6, %v5984_v63  ;;  %v16888_v10 = vadd.f32 %v3945_v52, %v16755_v13  ;;  %v16891_v6 = vadd.f32 %v4027_v26, %v16758_v29  ;;  %v5980_v13 = vrot.slane %v20493_v2, 3  ;;  %v14476_v2 = vld [vmem:[#allocation11 + $0x18] sm:$0xff]  }
 0x3a9   : > { %6209 = vmatpush2.bf16.msra.mxu0 %v14467_v44  ;;  %6292 = vmatpush2.bf16.msra.mxu1 %v14470_v35  ;;  %v3947_v4 = vpop.f32.mrf.mxu0  ;;  %v4029_v61 = vpop.f32.mrf.mxu1  ;;  %v5987_v44 = vrot.slane %v20494_v40, 3  ;;  %v5979_v35 = vrot.slane %v20495_v51, 3 }
 0x3aa   : > { %6210 = vmatprep.subr.bf16.mxu0 %v14473_v46  ;;  %6293 = vmatprep.subr.bf16.mxu1 %v20417_v7  ;;  %v16895_v49 = vadd.f32 %v3947_v4, %v16762_v23  ;;  %v20512_v23 = vmov 0.0  }
 0x3ab   : > { %v3951_v34 = vpop.f32.mrf.mxu0  ;;  %v4032_v22 = vpop.f32.mrf.mxu1  ;;  %v5988_v40 = vsel %vm5978_vm12, %v5983_v5, %v5987_v44  ;;  %v14477_v5 = vld [vmem:[#allocation11] sm:$0xff]  }
 0x3ac   : > { %v16899_v33 = vadd.f32 %v3951_v34, %v16765_v17  ;;  %v16902_v29 = vadd.f32 %v4032_v22, %v16768_v19  ;;  %v5981_v17 = vsel %vm5978_vm12, %v5979_v35, %v5980_v13 }
 0x3ad   : > { %6211 = vmatpush2.bf16.msra.mxu0 %v14471_v24  ;;  %6294 = vmatpush2.bf16.msra.mxu1 %v14474_v14  ;;  %v3953_v7 = vpop.f32.mrf.mxu0  ;;  %v4034_v54 = vpop.f32.mrf.mxu1  ;;  %v20513_v24 = vld [vmem:[#allocation67_spill] sm:$0xff] }
 0x3ae   : > { %13565 = vmatprep.subr.bf16.mxu1 %v20512_v23  ;;  %v16908_v46 = vadd.f32 %v3953_v7, %v16772_v42  ;;  %13541 = vmatprep.subr.bf16.mxu0 %v20512_v23  ;;  %v6878_v14 = vrot.slane %v20513_v24, %v15514_v50  ;;  %v5991_v7 = vrot.slane %v20497_v59, 3 }
 0x3af   : > { %v3955_v19 = vpop.f32.mrf.mxu0  ;;  %v4035_v63 = vpop.f32.mrf.mxu1 }
 0x3b0   : > { %6213 = vmatmul.mubr.bf16.vlgmr.msra.gmra.mxu0 %v5981_v17  ;;  %6296 = vmatmul.mubr.bf16.vlgmr.msra.gmra.mxu1 %v5981_v17  ;;  %v16914_v51 = vadd.f32 %v3955_v19, %v16777_v45  ;;  %v16917_v52 = vadd.f32 %v4035_v63, %v16780_v0  ;;  %v14478_v45 = vld [vmem:[#allocation11 + $0x10] sm:$0xff]   ;;  %v5985_v0 = vrot.slane %v20496_v18, 3  ;;  %v5992_v59 = vsel %vm5978_vm12, %v5987_v44, %v5991_v7 }
 0x3b1   : > { %13231 = vmatprep.mubr.msk.bf16.mxu0 %vm2700_vm6, %v5988_v40  ;;  %13236 = vmatprep.mubr.msk.bf16.mxu1 %vm2700_vm6, %v5988_v40  ;;  %v3957_v42 = vpop.f32.mrf.mxu0  ;;  %v4037_v26 = vpop.f32.mrf.mxu1  ;;  %v20514_v63 = vld [vmem:[#allocation71_spill] sm:$0xff] }
 0x3b2   : > { %13566 = vmatpush3.bf16.msra.mxu1 %v14475_v39  ;;  %13542 = vmatpush3.bf16.msra.mxu0 %v14476_v2  ;;  %v16924_v4 = vadd.f32 %v3957_v42, %v16787_v37  ;;  %v6886_v39 = vcombine.high %v6878_v14, %v6878_v14  ;;  %v5986_v18 = vsel %vm5978_vm12, %v5980_v13, %v5985_v0 }
 0x3b3   : > { %v3961_v61 = vpop.f32.mrf.mxu0  ;;  %v4040_v34 = vpop.f32.mrf.mxu1  ;;  %13567 = vmatprep.subr.bf16.mxu1 %v20512_v23  ;;  %13543 = vmatprep.subr.bf16.mxu0 %v20512_v23  ;;  %v7063_v26 = vcombine.low %v6878_v14, %v6878_v14 }
 0x3b4   : > { %v16930_v22 = vadd.f32 %v3961_v61, %v16791_v62  ;;  %v16933_v35 = vadd.f32 %v4040_v34, %v16794_v38  ;;  %v7064_v40 = vcombine.low %v6886_v39, %v20514_v63 }
 0x3b5   : > { %v3963_v37 = vpop.f32.mrf.mxu0  ;;  %v4042_v54 = vpop.f32.mrf.mxu1  ;;  %v7071_v14 = vrot.slane %v7063_v26, %v15514_v50 }
 0x3b6   : > { %v16937_v2 = vadd.f32 %v3963_v37, %v16797_v11  ;;  %13568 = vmatpush3.bf16.msra.mxu1 %v14477_v5  ;;  %13544 = vmatpush3.bf16.msra.mxu0 %v14478_v45  ;;  %v5995_v45 = vrot.slane %v20499_v12, 3  ;;  %v7078_v37 = vrot.slane %v7064_v40, %v15514_v50 }
 0x3b7   : > { %v3965_v17 = vpop.f32.mrf.mxu0  ;;  %v4043_v19 = vpop.f32.mrf.mxu1  ;;  %13613 = vmatprep.subr.bf16.mxu1 %v20512_v23  ;;  %13589 = vmatprep.subr.bf16.mxu0 %v20512_v23 }
 0x3b8   : > { %6223 = vmatmul.mubr.bf16.gmra.mxu0 %v5986_v18  ;;  %6304 = vmatmul.mubr.bf16.gmra.mxu1 %v5986_v18  ;;  %v16944_v62 = vadd.f32 %v3965_v17, %v16803_v1  ;;  %v16947_v38 = vadd.f32 %v4043_v19, %v16806_v9  ;;  %v5989_v1 = vrot.slane %v20498_v28, 3  ;;  %v7079_v17 = vcombine.low %v7071_v14, %v7078_v37 }
 0x3b9   : > { %13232 = vmatprep.mubr.msk.bf16.mxu0 %vm2700_vm6, %v5992_v59  ;;  %13237 = vmatprep.mubr.msk.bf16.mxu1 %vm2700_vm6, %v5992_v59  ;;  %v3967_v11 = vpop.f32.mrf.mxu0  ;;  %v4045_v13 = vpop.f32.mrf.mxu1 }
 0x3ba   : > { %v16953_v42 = vadd.f32 %v3967_v11, %v16813_v53  ;;  %v5990_v54 = vsel %vm5978_vm12, %v5985_v0, %v5989_v1  ;;  %v16989_v11 = vrot.slane %v14900_v43, 3  ;;  %v16992_v40 = vsel %vm2348_vm4, 0.0, %v7079_v17 }
 0x3bb   : > { %v3971_v24 = vpop.f32.mrf.mxu0  ;;  %v4048_v44 = vpop.f32.mrf.mxu1 }
 0x3bc   : > { %v16957_v5 = vadd.f32 %v3971_v24, %v16817_v48  ;;  %v16960_v9 = vadd.f32 %v4048_v44, %v16820_v8  ;;  %v5996_v48 = vsel %vm5978_vm12, %v5991_v7, %v5995_v45  ;;  %v5993_v7 = vrot.slane %v20500_v55, 3  ;;  %20515 = vst [vmem:[#allocation50_spill] sm:$0xff] %v16989_v11 }
 0x3bd   : > { %v3973_v61 = vpop.f32.mrf.mxu0  ;;  %v4050_v34 = vpop.f32.mrf.mxu1  ;;  %v17008_v44 = vpack.c.bf16 %v16992_v40, %v20512_v23 }
 0x3be   : > { %v16965_v53 = vadd.f32 %v3973_v61, %v16823_v32  ;;  %v5994_v26 = vsel %vm5978_vm12, %v5989_v1, %v5993_v7 }
 0x3bf   : > { %v3975_v28 = vpop.f32.mrf.mxu0  ;;  %v4051_v39 = vpop.f32.mrf.mxu1  ;;  %v7271_v37 = vshll.u32 %v17008_v44, 16 }
 0x3c0   : > { %6233 = vmatmul.mubr.bf16.gmra.mxu0 %v5990_v54  ;;  %6312 = vmatmul.mubr.bf16.gmra.mxu1 %v5990_v54  ;;  %v16971_v8 = vadd.f32 %v3975_v28, %v16829_v36  ;;  %v16974_v12 = vadd.f32 %v4051_v39, %v16832_v16  ;;  %v5998_v28 = vsel %vm5978_vm12, %v5993_v7, %v16989_v11 }
 0x3c1   : > { %13233 = vmatprep.mubr.msk.bf16.mxu0 %vm2700_vm6, %v5996_v48  ;;  %13238 = vmatprep.mubr.msk.bf16.mxu1 %vm2700_vm6, %v5996_v48  ;;  %v3977_v32 = vpop.f32.mrf.mxu0  ;;  %v4053_v18 = vpop.f32.mrf.mxu1 }
 0x3c2   : > { %v16979_v0 = vadd.f32 %v3977_v32, %v16839_v21  ;;  %v7273_v32 = vrot.slane %v7271_v37, 1  ;;  %v14481_v37 = vld [vmem:[#allocation11 + $0x30] sm:$0xff]  }
 0x3c3   : > { %v3981_v19 = vpop.f32.mrf.mxu0  ;;  %v4056_v59 = vpop.f32.mrf.mxu1 }
 0x3c4   : > { %v16983_v36 = vadd.f32 %v3981_v19, %v16843_v27  ;;  %v16986_v16 = vadd.f32 %v4056_v59, %v16846_v3  ;;  %v5999_v27 = vsel %vm5978_vm12, %v5995_v45, %v16989_v11  ;;  %v7269_v19 = vshrl.u32 %v17008_v44, 16  ;;  %v20530_v11 = vld [vmem:[#allocation69_spill] sm:$0xff] }
 0x3c5   : > { %v3983_v13 = vpop.f32.mrf.mxu0  ;;  %v4058_v63 = vpop.f32.mrf.mxu1 }
 0x3c6   : > { %v16995_v21 = vadd.f32 %v3983_v13, %v16849_v58 }
 0x3c7   : > { %v3985_v55 = vpop.f32.mrf.mxu0  ;;  %v4059_v24 = vpop.f32.mrf.mxu1 }
 0x3c8   : > { %6243 = vmatmul.mubr.bf16.gmra.mxu0 %v5994_v26  ;;  %6320 = vmatmul.mubr.bf16.gmra.mxu1 %v5994_v26  ;;  %v17001_v43 = vadd.f32 %v3985_v55, %v16858_v56  ;;  %v17004_v3 = vadd.f32 %v4059_v24, %v16861_v25  ;;  %v7274_v26 = vor.u32 %v7273_v32, %v7269_v19  ;;  %v14479_v55 = vld [vmem:[#allocation11 + $0x38] sm:$0xff]   ;;  %v14480_v24 = vld [vmem:[#allocation11 + $0x28] sm:$0xff]   ;;  %v20519_v19 = vshrl.u32 %v16373_v47, 16 }
 0x3c9   : > { %13234 = vmatprep.mubr.msk.bf16.mxu0 %vm2700_vm6, %v5999_v27  ;;  %13239 = vmatprep.mubr.msk.bf16.mxu1 %vm2700_vm6, %v5999_v27  ;;  %v3987_v58 = vpop.f32.mrf.mxu0  ;;  %v4061_v1 = vpop.f32.mrf.mxu1 }
 0x3ca   : > { %v17013_v61 = vadd.f32 %v3987_v58, %v16866_v20 }
 0x3cc   : > { %v4455_v45 = vpop.f32.mrf.mxu0  ;;  %v4538_v34 = vpop.f32.mrf.mxu1 }
 0x3cd   : > { %v17016_v56 = vadd.f32 %v4455_v45, %v16871_v31  ;;  %v17019_v25 = vadd.f32 %v4538_v34, %v16874_v30 }
 0x3ce   : > { %v4457_v14 = vpop.f32.mrf.mxu0  ;;  %v4540_v54 = vpop.f32.mrf.mxu1 }
 0x3cf   : > { %v17025_v39 = vadd.f32 %v4457_v14, %v16882_v15  ;;  %v14482_v14 = vld [vmem:[#allocation11 + $0x20] sm:$0xff]  }
 0x3d0   : > { %6253 = vmatmul.mubr.bf16.gmra.mxu0 %v5998_v28  ;;  %6328 = vmatmul.mubr.bf16.gmra.mxu1 %v5998_v28  ;;  %v4459_v20 = vpop.f32.mrf.mxu0  ;;  %v4541_v48 = vpop.f32.mrf.mxu1 }
 0x3d1   : > { %v17028_v31 = vadd.f32 %v4459_v20, %v16888_v10  ;;  %v17031_v30 = vadd.f32 %v4541_v48, %v16891_v6  ;;  %13545 = vmatprep.mubr.msk.bf16.mxu0 %vm14901_vm13, %v20512_v23  ;;  %13569 = vmatprep.mubr.msk.bf16.mxu1 %vm14901_vm13, %v20512_v23  ;;  %v20516_v10 = vshll.u32 %v16373_v47, 16  ;;  %v20517_v20 = vld [vmem:[#allocation70_spill] sm:$0xff] }
 0x3d2   : > { %v4461_v15 = vpop.f32.mrf.mxu0  ;;  %v4543_v18 = vpop.f32.mrf.mxu1 }
 0x3d3   : > { %v17038_v17 = vadd.f32 %v4461_v15, %v16895_v49  ;;  %v7278_v59 = vrot.slane %v20516_v10, 1 }
 0x3d4   : > { %v4465_v6 = vpop.f32.mrf.mxu0  ;;  %v4546_v7 = vpop.f32.mrf.mxu1 }
 0x3d5   : > { %v17044_v13 = vadd.f32 %v4465_v6, %v16899_v33  ;;  %v17047_v63 = vadd.f32 %v4546_v7, %v16902_v29  ;;  %v7279_v49 = vsel %vm2446_vm5, %v7274_v26, %v7278_v59  ;;  %v7282_v10 = vor.u32 %v20519_v19, %v7278_v59 }
 0x3d6   : > { %v4467_v27 = vpop.f32.mrf.mxu0  ;;  %v4548_v58 = vpop.f32.mrf.mxu1 }
 0x3d7   : > { %v17051_v1 = vadd.f32 %v4467_v27, %v16908_v46  ;;  %v20520_v58 = vshll.u32 %v16384_v41, 16 }
 0x3d8   : > { %13546 = vmatmul.mubr.msk.bf16.vlgmr.msra.gmra.mxu0 %vm2700_vm6, %v7279_v49  ;;  %13570 = vmatmul.mubr.msk.bf16.vlgmr.msra.gmra.mxu1 %vm2700_vm6, %v17008_v44  ;;  %v4469_v33 = vpop.f32.mrf.mxu0  ;;  %v4549_v45 = vpop.f32.mrf.mxu1 }
 0x3d9   : > { %13614 = vmatpush3.bf16.msra.mxu1 %v14479_v55  ;;  %v17057_v29 = vadd.f32 %v4469_v33, %v16914_v51  ;;  %v17060_v34 = vadd.f32 %v4549_v45, %v16917_v52  ;;  %13590 = vmatpush3.bf16.msra.mxu0 %v14480_v24  ;;  %v20518_v51 = vshll.u32 %v20517_v20, 16  ;;  %v7294_v49 = vrot.slane %v20520_v58, 1 }
 0x3da   : > { %v4471_v54 = vpop.f32.mrf.mxu0  ;;  %v4551_v46 = vpop.f32.mrf.mxu1  ;;  %13549 = vmatprep.mubr.msk.bf16.mxu0 %vm14901_vm13, %v20512_v23  ;;  %13573 = vmatprep.mubr.msk.bf16.mxu1 %vm14901_vm13, %v20512_v23 }
 0x3db   : > { %v17067_v28 = vadd.f32 %v4471_v54, %v16924_v4  ;;  %v7286_v48 = vrot.slane %v20518_v51, 1  ;;  %13615 = vmatprep.subr.bf16.mxu1 %v20512_v23  ;;  %13591 = vmatprep.subr.bf16.mxu0 %v20512_v23 }
 0x3dc   : > { %v4475_v52 = vpop.f32.mrf.mxu0  ;;  %v4554_v32 = vpop.f32.mrf.mxu1 }
 0x3dd   : > { %v17074_v15 = vadd.f32 %v4475_v52, %v16930_v22  ;;  %v17077_v18 = vadd.f32 %v4554_v32, %v16933_v35  ;;  %13616 = vmatpush3.bf16.msra.mxu1 %v14481_v37  ;;  %13592 = vmatpush3.bf16.msra.mxu0 %v14482_v14  ;;  %v7287_v7 = vsel %vm2446_vm5, %v7282_v10, %v7286_v48  ;;  %v20521_v37 = vshrl.u32 %v20517_v20, 16 }
 0x3de   : > { %v4477_v4 = vpop.f32.mrf.mxu0  ;;  %v4556_v6 = vpop.f32.mrf.mxu1  ;;  %13661 = vmatprep.subr.bf16.mxu1 %v20512_v23  ;;  %13637 = vmatprep.subr.bf16.mxu0 %v20512_v23  ;;  %v20522_v10 = vshll.u32 %v16395_v57, 16 }
 0x3df   : > { %v17085_v26 = vadd.f32 %v4477_v4, %v16937_v2  ;;  %v7290_v14 = vor.u32 %v20521_v37, %v7286_v48 }
 0x3e0   : > { %13550 = vmatmul.mubr.msk.bf16.gmra.mxu0 %vm2700_vm6, %v7287_v7  ;;  %13574 = vmatmul.mubr.msk.bf16.gmra.mxu1 %vm2700_vm6, %v16373_v47  ;;  %v4479_v22 = vpop.f32.mrf.mxu0  ;;  %v4557_v35 = vpop.f32.mrf.mxu1  ;;  %v7302_v4 = vrot.slane %v20522_v10, 1 }
 0x3e1   : > { %v17091_v59 = vadd.f32 %v4479_v22, %v16944_v62  ;;  %v17094_v55 = vadd.f32 %v4557_v35, %v16947_v38  ;;  %13553 = vmatprep.mubr.msk.bf16.mxu0 %vm14901_vm13, %v20512_v23  ;;  %13577 = vmatprep.mubr.msk.bf16.mxu1 %vm14901_vm13, %v20512_v23  ;;  %v7295_v51 = vsel %vm2446_vm5, %v7290_v14, %v7294_v49  ;;  %v14526_v22 = vld [vmem:[%s15139_s14 + $0x8] sm:$0xff] }
 0x3e2   : > { %v4481_v2 = vpop.f32.mrf.mxu0  ;;  %v4559_v24 = vpop.f32.mrf.mxu1  ;;  %v8707_v35 = vrot.slane %v14526_v22, 7 }
 0x3e3   : > { %v17101_v27 = vadd.f32 %v4481_v2, %v16953_v42 }
 0x3e4   : > { %v4485_v33 = vpop.f32.mrf.mxu0  ;;  %v4562_v62 = vpop.f32.mrf.mxu1 }
 0x3e5   : > { %v17106_v45 = vadd.f32 %v4485_v33, %v16957_v5  ;;  %v17109_v38 = vadd.f32 %v4562_v62, %v16960_v9 }
 0x3e6   : > { %v4487_v54 = vpop.f32.mrf.mxu0  ;;  %v4564_v46 = vpop.f32.mrf.mxu1 }
 0x3e7   : > { %v17115_v42 = vadd.f32 %v4487_v54, %v16965_v53  ;;  %v14527_v46 = vld [vmem:[%s15139_s14 + $0x30] sm:$0xff] }
 0x3e8   : > { %13554 = vmatmul.mubr.msk.bf16.gmra.mxu0 %vm2700_vm6, %v7295_v51  ;;  %13578 = vmatmul.mubr.msk.bf16.gmra.mxu1 %vm2700_vm6, %v20517_v20  ;;  %v4489_v5 = vpop.f32.mrf.mxu0  ;;  %v4565_v52 = vpop.f32.mrf.mxu1  ;;  %v8712_v51 = vrot.slane %v14527_v46, 7 }
 0x3e9   : > { %v17121_v9 = vadd.f32 %v4489_v5, %v16971_v8  ;;  %v17124_v48 = vadd.f32 %v4565_v52, %v16974_v12  ;;  %13557 = vmatprep.mubr.msk.bf16.mxu0 %vm14901_vm13, %v20512_v23  ;;  %13581 = vmatprep.mubr.msk.bf16.mxu1 %vm14901_vm13, %v20512_v23  ;;  %v20523_v8 = vld [vmem:[#allocation72_spill] sm:$0xff]  ;;  %v17161_v5 = vsel %vm1865_vm0, %v8707_v35, -inf }
 0x3ea   : > { %v4491_v53 = vpop.f32.mrf.mxu0  ;;  %v4567_v32 = vpop.f32.mrf.mxu1  ;;  %v17137_v6 = vpack.c.bf16 %v20523_v8, %v20523_v8  ;;  %v8951_v22 = vrot.slane %v17161_v5, 1 }
 0x3eb   : > { %v17131_v19 = vadd.f32 %v4491_v53, %v16979_v0  ;;  %v20524_v0 = vshrl.u32 %v16384_v41, 16 }
 0x3ec   : > { %v4495_v12 = vpop.f32.mrf.mxu0  ;;  %v4570_v7 = vpop.f32.mrf.mxu1  ;;  %v7308_v54 = vshll.u32 %v17137_v6, 16 }
 0x3ed   : > { %v17141_v2 = vadd.f32 %v4495_v12, %v16983_v36  ;;  %v17144_v24 = vadd.f32 %v4570_v7, %v16986_v16  ;;  %v7298_v58 = vor.u32 %v20524_v0, %v7294_v49  ;;  %v17158_v49 = vsel %vm1865_vm0, -inf, %v8707_v35  ;;  %v14528_v35 = vld [vmem:[%s15139_s14 + $0x58] sm:$0xff] }
 0x3ee   : > { %v4497_v33 = vpop.f32.mrf.mxu0  ;;  %v4572_v62 = vpop.f32.mrf.mxu1  ;;  %v7310_v12 = vrot.slane %v7308_v54, 1  ;;  %v8950_v7 = vrot.slane %v17158_v49, 1  ;;  %v8717_v0 = vrot.slane %v14528_v35, 7  ;;  %v14530_v54 = vld [vmem:[%s15139_s14 + $0x40] sm:$0xff] }
 0x3ef   : > { %v7303_v37 = vsel %vm2446_vm5, %v7298_v58, %v7302_v4  ;;  %v17150_v14 = vadd.f32 %v4497_v33, %v16995_v21  ;;  %v20526_v62 = vshrl.u32 %v16395_v57, 16  ;;  %v20529_v35 = vld [vmem:[#allocation74_spill] sm:$0xff] }
 0x3f0   : > { %13558 = vmatmul.mubr.msk.bf16.gmra.mxu0 %vm2700_vm6, %v7303_v37  ;;  %13582 = vmatmul.mubr.msk.bf16.gmra.mxu1 %vm2700_vm6, %v16384_v41  ;;  %v4499_v36 = vpop.f32.mrf.mxu0  ;;  %v4573_v16 = vpop.f32.mrf.mxu1  ;;  %v17199_v50 = vpack.c.bf16 %v20530_v11, %v20529_v35 }
 0x3f1   : > { %v17164_v21 = vadd.f32 %v4499_v36, %v17001_v43  ;;  %v17167_v52 = vadd.f32 %v4573_v16, %v17004_v3  ;;  %13561 = vmatprep.mubr.msk.bf16.mxu0 %vm14901_vm13, %v20512_v23  ;;  %13585 = vmatprep.mubr.msk.bf16.mxu1 %vm14901_vm13, %v20512_v23  ;;  %v17177_v43 = vsel %vm1865_vm0, -inf, %v8712_v51  ;;  %v17180_v3 = vsel %vm1865_vm0, %v8712_v51, -inf }
 0x3f2   : > { %v4501_v53 = vpop.f32.mrf.mxu0  ;;  %v4575_v32 = vpop.f32.mrf.mxu1  ;;  %v7306_v37 = vor.u32 %v20526_v62, %v7302_v4  ;;  %v8714_v36 = vrot.slane %v14530_v54, 7  ;;  %v17203_v54 = vsel %vm3251_vm1, %v8950_v7, %v8951_v22  ;;  %v20532_v7 = vld [vmem:[#allocation76_spill] sm:$0xff] }
 0x3f3   : > { %v17174_v10 = vadd.f32 %v4501_v53, %v17013_v61  ;;  %v14529_v61 = vld [vmem:[%s15139_s14 + $0x18] sm:$0xff]  ;;  %v8965_v53 = vrot.slane %v17177_v43, 1  ;;  %v8966_v32 = vrot.slane %v17180_v3, 1  ;;  %v17220_v22 = vpack.c.bf16 %v20532_v7, %v16992_v40 }
 0x3f4   : > { %v8709_v46 = vrot.slane %v14529_v61, 7  ;;  %v7311_v4 = vsel %vm2446_vm5, %v7306_v37, %v7310_v12  ;;  %v17242_v7 = vsel %vm1865_vm0, -inf, %v8714_v36  ;;  %vm12371_vm5 = vcmask 1042434  }
 0x3f5   : > { %20525 = vst [vmem:[#allocation49_spill] sm:$0xff] %v17174_v10  ;;  %v4885_v58 = vpop.f32.mrf.mxu0  ;;  %v4968_v33 = vpop.f32.mrf.mxu1  ;;  %20533 = vst [vmem:[#allocation43_spill] sm:$0xff] %v17220_v22  ;;  %v14486_v10 = vld [vmem:[#allocation11 + $0x40] sm:$0xff]  }
 0x3f6   : > { %v17190_v16 = vadd.f32 %v4885_v58, %v17016_v56  ;;  %v17193_v51 = vadd.f32 %v4968_v33, %v17019_v25  ;;  %v17216_v33 = vsel %vm1865_vm0, -inf, %v8717_v0  ;;  %20537 = vst [vmem:[#allocation45_spill] sm:$0xff] %v17242_v7  ;;  %v7518_v25 = vrot.slane %v17008_v44, 1 }
 0x3f7   : > { %v4887_v62 = vpop.f32.mrf.mxu0  ;;  %v4970_v61 = vpop.f32.mrf.mxu1 }
 0x3f8   : > { %20527 = vst [vmem:[#allocation54_spill] sm:$0xff] %v17190_v16  ;;  %20528 = vst [vmem:[#allocation55_spill] sm:$0xff] %v17193_v51  ;;  %13562 = vmatmul.mubr.msk.bf16.gmra.mxu0 %vm2700_vm6, %v7311_v4  ;;  %13586 = vmatmul.mubr.msk.bf16.gmra.mxu1 %vm2700_vm6, %v16395_v57  ;;  %v17211_v58 = vadd.f32 %v4887_v62, %v17025_v39  ;;  %v17227_v39 = vsel %vm1865_vm0, -inf, %v8709_v46  ;;  %v17230_v4 = vsel %vm1865_vm0, %v8717_v0, -inf  ;;  %v17247_v0 = vsel %vm1865_vm0, %v8709_v46, -inf }
 0x3f9   : > { %v4889_v37 = vpop.f32.mrf.mxu0  ;;  %v4971_v35 = vpop.f32.mrf.mxu1  ;;  %13593 = vmatprep.mubr.msk.bf16.mxu0 %vm14901_vm13, %v20512_v23  ;;  %13617 = vmatprep.mubr.msk.bf16.mxu1 %vm14901_vm13, %v20512_v23  ;;  %20534 = vst [vmem:[#allocation41_spill] sm:$0xff] %v17227_v39  ;;  %v17239_v61 = vsel %vm3251_vm1, %v8965_v53, %v8966_v32  ;;  %20538 = vst [vmem:[#allocation40_spill] sm:$0xff] %v17247_v0  ;;  %v8981_v32 = vrot.slane %v17230_v4, 1  ;;  %v7656_v46 = vrot.slane %v17220_v22, 1  ;;  %v8956_v44 = vrot.slane %v17227_v39, 1 }
 0x3fa   : > { %20531 = vst [vmem:[#allocation56_spill] sm:$0xff] %v17211_v58  ;;  %v17233_v62 = vadd.f32 %v4889_v37, %v17028_v31  ;;  %v17236_v40 = vadd.f32 %v4971_v35, %v17031_v30  ;;  %v17250_v31 = vsel %vm1865_vm0, %v8714_v36, -inf  ;;  %v8980_v30 = vrot.slane %v17216_v33, 1  ;;  %v20541_v37 = vld [vmem:[#allocation68_spill] sm:$0xff]  ;;  %v20542_v35 = vld [vmem:[#allocation79_spill] sm:$0xff] }
 0x3fb   : > { %v4891_v11 = vpop.f32.mrf.mxu0  ;;  %v4973_v12 = vpop.f32.mrf.mxu1  ;;  %20539 = vst [vmem:[#allocation44_spill] sm:$0xff] %v17250_v31  ;;  %v14483_v36 = vld [vmem:[#allocation11 + $0x58] sm:$0xff]  }
 0x3fc   : > { %20535 = vst [vmem:[#allocation57_spill] sm:$0xff] %v17233_v62  ;;  %20536 = vst [vmem:[#allocation42_spill] sm:$0xff] %v17236_v40  ;;  %v17254_v53 = vadd.f32 %v4891_v11, %v17038_v17  ;;  %v17259_v12 = vpack.c.bf16 %v20542_v35, %v20541_v37  ;;  %v14484_v40 = vld [vmem:[#allocation11 + $0x48] sm:$0xff]   ;;  %v8957_v35 = vrot.slane %v17247_v0, 1  ;;  %v20546_v62 = vrot.slane %v17199_v50, 1 }
 0x3fd   : > { %v4895_v56 = vpop.f32.mrf.mxu0  ;;  %v4976_v60 = vpop.f32.mrf.mxu1 }
 0x3fe   : > { %20540 = vst [vmem:[#allocation46_spill] sm:$0xff] %v17254_v53  ;;  %v17268_v11 = vadd.f32 %v4895_v56, %v17044_v13  ;;  %v17271_v37 = vadd.f32 %v4976_v60, %v17047_v63  ;;  %v20545_v53 = vrot.slane %v16373_v47, 1  ;;  %v7658_v51 = vsel %vm3251_vm1, %v7656_v46, %v20546_v62  ;;  %v14531_v60 = vld [vmem:[%s15139_s14 + $0x80] sm:$0xff] }
 0x3ff   : > { %v4897_v17 = vpop.f32.mrf.mxu0  ;;  %v4978_v16 = vpop.f32.mrf.mxu1  ;;  %v8971_v13 = vrot.slane %v17242_v7, 1  ;;  %v8972_v56 = vrot.slane %v17250_v31, 1  ;;  %v8722_v63 = vrot.slane %v14531_v60, 7  ;;  %v20255_v46 = vrot.slane %v20517_v20, 1  ;;  %v14485_v60 = vld [vmem:[#allocation11 + $0x50] sm:$0xff]  }
 0x400   : > { %20543 = vst [vmem:[#allocation47_spill] sm:$0xff] %v17268_v11  ;;  %20544 = vst [vmem:[#allocation51_spill] sm:$0xff] %v17271_v37  ;;  %v7520_v58 = vsel %vm3251_vm1, %v7518_v25, %v20545_v53  ;;  %13618 = vmatmul.mubr.msk.bf16.vlgmr.msra.gmra.mxu1 %vm2700_vm6, %v7658_v51  ;;  %v17287_v37 = vadd.f32 %v4897_v17, %v17051_v1  ;;  %v8982_v25 = vsel %vm3251_vm1, %v8980_v30, %v8981_v32  ;;  %v14532_v53 = vld [vmem:[%s15139_s14 + $0x78] sm:$0xff] }
 0x401   : > { %13594 = vmatmul.mubr.msk.bf16.vlgmr.msra.gmra.mxu0 %vm2700_vm6, %v7520_v58  ;;  %v8721_v11 = vrot.slane %v14532_v53, 7  ;;  %13662 = vmatpush3.bf16.msra.mxu1 %v14483_v36  ;;  %v4899_v62 = vpop.f32.mrf.mxu0  ;;  %v4979_v16 = vpop.f32.mrf.mxu1  ;;  %v20254_v22 = vrot.slane %v17259_v12, 1  ;;  %v9181_v36 = vrot.slane %v17216_v33, 2  ;;  %v9182_v17 = vrot.slane %v17230_v4, 2  ;;  %v20549_v4 = vld [vmem:[#allocation77_spill] sm:$0xff] }
 0x402   : > { %13638 = vmatpush3.bf16.msra.mxu0 %v14484_v40  ;;  %v17296_v1 = vadd.f32 %v4899_v62, %v17057_v29  ;;  %v17299_v30 = vadd.f32 %v4979_v16, %v17060_v34  ;;  %13597 = vmatprep.mubr.msk.bf16.mxu0 %vm14901_vm13, %v20512_v23  ;;  %v17306_v40 = vsel %vm3251_vm1, %v8956_v44, %v8957_v35  ;;  %v17317_v62 = vsel %vm1865_vm0, -inf, %v8722_v63 }
 0x403   : > { %13621 = vmatprep.mubr.msk.bf16.mxu1 %vm14901_vm13, %v20512_v23  ;;  %20547 = vst [vmem:[#allocation52_spill] sm:$0xff] %v17306_v40  ;;  %v4901_v29 = vpop.f32.mrf.mxu0  ;;  %v4981_v53 = vpop.f32.mrf.mxu1  ;;  %13663 = vmatprep.subr.bf16.mxu1 %v20512_v23  ;;  %v17314_v34 = vsel %vm3251_vm1, %v8971_v13, %v8972_v56  ;;  %v9118_v44 = vmax.f32 %v17216_v33, %v8982_v25  ;;  %v17324_v16 = vsel %vm1865_vm0, -inf, %v8721_v11  ;;  %v20551_v13 = vrot.slane %v16373_v47, 1 }
 0x404   : > { %13639 = vmatprep.subr.bf16.mxu0 %v20512_v23  ;;  %20548 = vst [vmem:[#allocation58_spill] sm:$0xff] %v17314_v34  ;;  %v17321_v35 = vadd.f32 %v4901_v29, %v17067_v28  ;;  %v20550_v53 = vld [vmem:[#allocation82_spill] sm:$0xff]  ;;  %v20552_v28 = vrot.slane %v17199_v50, 1  ;;  %v17341_v25 = vsel %vm1865_vm0, %v8721_v11, -inf  ;;  %v20568_v34 = vrot.slane %v20517_v20, 1 }
 0x405   : > { %v17328_v32 = vpack.c.bf16 %v20550_v53, %v20549_v4  ;;  %v4905_v58 = vpop.f32.mrf.mxu0  ;;  %v4984_v51 = vpop.f32.mrf.mxu1  ;;  %v7522_v56 = vsel %vm3251_vm1, %v20551_v13, %v20255_v46  ;;  %13664 = vmatpush3.bf16.msra.mxu1 %v14485_v60  ;;  %v20553_v53 = vrot.slane %v17161_v5, 2  ;;  %v20554_v13 = vrot.slane %v17158_v49, 2  ;;  %v20558_v5 = vld [vmem:[#allocation25_spill] sm:$0xff]  ;;  %v20559_v46 = vld [vmem:[#allocation28_spill] sm:$0xff] }
 0x406   : > { %v7660_v33 = vsel %vm3251_vm1, %v20552_v28, %v20254_v22  ;;  %13640 = vmatpush3.bf16.msra.mxu0 %v14486_v10  ;;  %v17344_v29 = vadd.f32 %v4905_v58, %v17074_v15  ;;  %v17347_v4 = vadd.f32 %v4984_v51, %v17077_v18  ;;  %13709 = vmatprep.subr.bf16.mxu1 %v20512_v23  ;;  %v20555_v28 = vrot.slane %v17180_v3, 2 }
 0x407   : > { %13685 = vmatprep.subr.bf16.mxu0 %v20512_v23  ;;  %v9153_v60 = vsel %vm4648_vm2, %v20554_v13, %v20553_v53  ;;  %v4907_v10 = vpop.f32.mrf.mxu0  ;;  %v4986_v11 = vpop.f32.mrf.mxu1  ;;  %v20556_v15 = vrot.slane %v17177_v43, 2  ;;  %v9183_v58 = vsel %vm4648_vm2, %v9181_v36, %v9182_v17  ;;  %v20557_v51 = vmax.f32 %v17158_v49, %v17203_v54 }
 0x408   : > { %v20560_v0 = vmax.f32 %v20558_v5, %v20559_v46  ;;  %v17372_v13 = vsel %vm1865_vm0, %v8722_v63, -inf  ;;  %13622 = vmatmul.mubr.msk.bf16.gmra.mxu1 %vm2700_vm6, %v7660_v33  ;;  %v17377_v3 = vadd.f32 %v4907_v10, %v17085_v26  ;;  %v20562_v49 = vmax.f32 %v17177_v43, %v17239_v61 }
 0x409   : > { %v9168_v18 = vsel %vm4648_vm2, %v20556_v15, %v20555_v28  ;;  %v9309_v22 = vmax.f32 %v20557_v51, %v9153_v60  ;;  %13598 = vmatmul.mubr.msk.bf16.gmra.mxu0 %vm2700_vm6, %v7522_v56  ;;  %v17384_v36 = vmax.f32 %v9118_v44, %v9183_v58  ;;  %v8992_v63 = vrot.slane %v17324_v16, 1  ;;  %v14533_v56 = vld [vmem:[%s15139_s14 + $0x68] sm:$0xff]  ;;  %v4909_v33 = vpop.f32.mrf.mxu0  ;;  %v4987_v11 = vpop.f32.mrf.mxu1  ;;  %13625 = vmatprep.mubr.msk.bf16.mxu1 %vm14901_vm13, %v20512_v23 }
 0x40a   : > { %v17369_v53 = vpack.c.bf16 %v20560_v0, %v20558_v5  ;;  %v17382_v54 = vmax.f32 %v20562_v49, %v9168_v18  ;;  %v8993_v17 = vrot.slane %v17341_v25, 1  ;;  %v8719_v60 = vrot.slane %v14533_v56, 7  ;;  %13601 = vmatprep.mubr.msk.bf16.mxu0 %vm14901_vm13, %v20512_v23  ;;  %v14534_v56 = vld [vmem:[%s15139_s14 + $0x90] sm:$0xff]  ;;  %v14535_v51 = vld [vmem:[%s15139_s14 + $0x88] sm:$0xff] }
 0x40b   : > { %v17398_v43 = vadd.f32 %v4909_v33, %v17091_v59  ;;  %v17401_v61 = vadd.f32 %v4987_v11, %v17094_v55  ;;  %v8995_v10 = vrot.slane %v17317_v62, 1  ;;  %v8996_v28 = vrot.slane %v17372_v13, 1  ;;  %v4911_v15 = vpop.f32.mrf.mxu0  ;;  %v4989_v18 = vpop.f32.mrf.mxu1 }
 0x40c   : > { %20561 = vst [vmem:[#allocation53_spill] sm:$0xff] %v17369_v53  ;;  %v9349_v44 = vmax.f32 %v9309_v22, %v17382_v54  ;;  %v9193_v5 = vrot.slane %v17324_v16, 2  ;;  %v9194_v59 = vrot.slane %v17341_v25, 2  ;;  %v17411_v55 = vadd.f32 %v4911_v15, %v17101_v27 }
 0x40d   : > { %v8994_v49 = vsel %vm3251_vm1, %v8992_v63, %v8993_v17  ;;  %v8724_v33 = vrot.slane %v14534_v56, 7  ;;  %v17417_v11 = vsel %vm1865_vm0, -inf, %v8719_v60  ;;  %v17420_v18 = vsel %vm1865_vm0, %v8719_v60, -inf  ;;  %v4915_v26 = vpop.f32.mrf.mxu0  ;;  %v4992_v0 = vpop.f32.mrf.mxu1  ;;  %v20566_v17 = vld [vmem:[#allocation80_spill] sm:$0xff] }
 0x40e   : > { %v9384_v22 = vmax.f32 %v9349_v44, %v17384_v36  ;;  %20563 = vst [vmem:[#allocation59_spill] sm:$0xff] %v17417_v11  ;;  %20564 = vst [vmem:[#allocation60_spill] sm:$0xff] %v17420_v18  ;;  %v8723_v58 = vrot.slane %v14535_v51, 7  ;;  %v17424_v25 = vadd.f32 %v4915_v26, %v17106_v45  ;;  %v17427_v27 = vadd.f32 %v4992_v0, %v17109_v38 }
 0x40f   : > { %v17432_v63 = vsel %vm3251_vm1, %v8995_v10, %v8996_v28  ;;  %v17436_v56 = vpack.c.bf16 %v20523_v8, %v20566_v17  ;;  %v20567_v60 = vrot.slane %v16384_v41, 1  ;;  %v20569_v45 = vrot.slane %v17328_v32, 1  ;;  %v4917_v26 = vpop.f32.mrf.mxu0 }
 0x410   : > { %v17429_v15 = vpack.c.bf16 %v9384_v22, %v9349_v44  ;;  %v20570_v38 = vrot.slane %v17259_v12, 1  ;;  %v4994_v44 = vpop.f32.mrf.mxu1  ;;  %v9122_v28 = vmax.f32 %v17324_v16, %v8994_v49  ;;  %v9195_v8 = vsel %vm4648_vm2, %v9193_v5, %v9194_v59 }
 0x411   : > { %v7524_v51 = vsel %vm3251_vm1, %v20568_v34, %v20567_v60  ;;  %v17454_v34 = vadd.f32 %v4917_v26, %v17115_v42  ;;  %v17457_v22 = vsel %vm1865_vm0, -inf, %v8724_v33  ;;  %v17460_v17 = vsel %vm1865_vm0, %v8724_v33, -inf  ;;  %v4919_v16 = vpop.f32.mrf.mxu0 }
 0x412   : > { %20565 = vst [vmem:[#allocation61_spill] sm:$0xff] %v17429_v15  ;;  %v7662_v0 = vsel %vm3251_vm1, %v20570_v38, %v20569_v45  ;;  %13602 = vmatmul.mubr.msk.bf16.gmra.mxu0 %vm2700_vm6, %v7524_v51  ;;  %20571 = vst [vmem:[#allocation62_spill] sm:$0xff] %v17457_v22  ;;  %v8986_v60 = vrot.slane %v17417_v11, 1  ;;  %v8987_v45 = vrot.slane %v17420_v18, 1  ;;  %v4995_v49 = vpop.f32.mrf.mxu1  ;;  %v17469_v42 = vsel %vm1865_vm0, -inf, %v8723_v58  ;;  %v20584_v11 = vld [vmem:[#allocation54_spill] sm:$0xff] }
 0x413   : > { %13626 = vmatmul.mubr.msk.bf16.gmra.mxu1 %vm2700_vm6, %v7662_v0  ;;  %20572 = vst [vmem:[#allocation64_spill] sm:$0xff] %v17460_v17  ;;  %13605 = vmatprep.mubr.msk.bf16.mxu0 %vm14901_vm13, %v20512_v23  ;;  %v17472_v5 = vsel %vm1865_vm0, %v8723_v58, -inf  ;;  %v17475_v59 = vadd.f32 %v4919_v16, %v17121_v9  ;;  %v17478_v33 = vadd.f32 %v4995_v49, %v17124_v48  ;;  %v4921_v0 = vpop.f32.mrf.mxu0  ;;  %v7525_v44 = vrot.slane %v16395_v57, 1  ;;  %v20586_v18 = vld [vmem:[#allocation55_spill] sm:$0xff] }
 0x414   : > { %13629 = vmatprep.mubr.msk.bf16.mxu1 %vm14901_vm13, %v20512_v23  ;;  %v4997_v26 = vpop.f32.mrf.mxu1  ;;  %v9001_v9 = vrot.slane %v17457_v22, 1  ;;  %v9002_v16 = vrot.slane %v17460_v17, 1  ;;  %v17489_v48 = vadd.f32 %v4921_v0, %v17131_v19  ;;  %v17491_v49 = vmax.f32 %v9122_v28, %v9195_v8  ;;  %v14536_v8 = vld [vmem:[%s15139_s14 + $0xa8] sm:$0xff] }
 0x415   : > { %v8998_v26 = vrot.slane %v17469_v42, 1  ;;  %v8999_v38 = vrot.slane %v17472_v5, 1  ;;  %v4925_v10 = vpop.f32.mrf.mxu0  ;;  %v17497_v58 = vsel %vm3251_vm1, %v8986_v60, %v8987_v45  ;;  %v8727_v0 = vrot.slane %v14536_v8, 7  ;;  %v20583_v22 = vld [vmem:[#allocation43_spill] sm:$0xff] }
 0x416   : > { %v5000_v40 = vpop.f32.mrf.mxu1  ;;  %20573 = vst [vmem:[#allocation66_spill] sm:$0xff] %v17497_v58  ;;  %v17501_v31 = vadd.f32 %v4925_v10, %v17141_v2  ;;  %v20574_v51 = vrot.slane %v16384_v41, 1  ;;  %v20575_v53 = vrot.slane %v17436_v56, 1  ;;  %v20576_v60 = vrot.slane %v17328_v32, 1 }
 0x417   : > { %v17504_v19 = vadd.f32 %v5000_v40, %v17144_v24  ;;  %v4927_v7 = vpop.f32.mrf.mxu0  ;;  %v17517_v10 = vsel %vm3251_vm1, %v9001_v9, %v9002_v16  ;;  %v14537_v40 = vld [vmem:[%s15139_s14 + $0xd0] sm:$0xff]  ;;  %v9000_v8 = vsel %vm3251_vm1, %v8998_v26, %v8999_v38  ;;  %v7786_v17 = vshll.u32 %v20583_v22, 16 }
 0x418   : > { %v7526_v39 = vsel %vm3251_vm1, %v20574_v51, %v7525_v44  ;;  %v7664_v45 = vsel %vm3251_vm1, %v20576_v60, %v20575_v53  ;;  %v5002_v2 = vpop.f32.mrf.mxu1  ;;  %20577 = vst [vmem:[#allocation63_spill] sm:$0xff] %v17517_v10  ;;  %v8732_v28 = vrot.slane %v14537_v40, 7  ;;  %v17524_v51 = vadd.f32 %v4927_v7, %v17150_v14 }
 0x419   : > { %v9199_v53 = vrot.slane %v17469_v42, 2  ;;  %v9200_v60 = vrot.slane %v17472_v5, 2  ;;  %v20578_v2 = vld [vmem:[#allocation73_spill] sm:$0xff]  ;;  %v4929_v16 = vpop.f32.mrf.mxu0  ;;  %v7527_v7 = vrot.slane %v17137_v6, 1  ;;  %v7791_v5 = vshrl.u32 %v17199_v50, 16 }
 0x41a   : > { %13606 = vmatmul.mubr.msk.bf16.gmra.mxu0 %vm2700_vm6, %v7526_v39  ;;  %v17531_v9 = vpack.c.bf16 %v20578_v2, %v20578_v2  ;;  %v5003_v24 = vpop.f32.mrf.mxu1  ;;  %v17538_v14 = vadd.f32 %v4929_v16, %v17164_v21  ;;  %v7794_v21 = vshll.u32 %v17199_v50, 16  ;;  %v17558_v6 = vsel %vm1865_vm0, %v8727_v0, -inf  ;;  %v20581_v16 = vld [vmem:[#allocation49_spill] sm:$0xff] }
 0x41b   : > { %13630 = vmatmul.mubr.msk.bf16.gmra.mxu1 %vm2700_vm6, %v7664_v45  ;;  %13609 = vmatprep.mubr.msk.bf16.mxu0 %vm14901_vm13, %v20512_v23  ;;  %v17541_v39 = vadd.f32 %v5003_v24, %v17167_v52  ;;  %v17550_v45 = vsel %vm1865_vm0, -inf, %v8727_v0  ;;  %v4931_v40 = vpop.f32.mrf.mxu0  ;;  %v9124_v52 = vmax.f32 %v17469_v42, %v9000_v8  ;;  %v17555_v24 = vsel %vm1865_vm0, -inf, %v8732_v28 }
 0x41c   : > { %13633 = vmatprep.mubr.msk.bf16.mxu1 %vm14901_vm13, %v20512_v23  ;;  %v5005_v2 = vpop.f32.mrf.mxu1  ;;  %20580 = vst [vmem:[#allocation67_spill] sm:$0xff] %v17555_v24  ;;  %v17561_v38 = vadd.f32 %v4931_v40, %v20581_v16  ;;  %v17564_v26 = vsel %vm1865_vm0, %v8732_v28, -inf  ;;  %v7665_v10 = vrot.slane %v17531_v9, 1  ;;  %v9201_v42 = vsel %vm4648_vm2, %v9199_v53, %v9200_v60 }
 0x41d   : > { %20579 = vst [vmem:[#allocation65_spill] sm:$0xff] %v17541_v39  ;;  %v7783_v2 = vshrl.u32 %v20583_v22, 16  ;;  %v9010_v8 = vrot.slane %v17550_v45, 1  ;;  %v7528_v40 = vsel %vm3251_vm1, %v7525_v44, %v7527_v7  ;;  %v7793_v16 = vrot.slane %v7791_v5, 1  ;;  %v20589_v5 = vld [vmem:[#allocation56_spill] sm:$0xff] }
 0x41e   : > { %20582 = vst [vmem:[#allocation71_spill] sm:$0xff] %v17561_v38  ;;  %v5319_v58 = vpop.f32.mrf.mxu0  ;;  %v5402_v0 = vpop.f32.mrf.mxu1  ;;  %v20588_v57 = vrot.slane %v17436_v56, 1  ;;  %v7796_v47 = vrot.slane %v7794_v21, 2  ;;  %v9011_v53 = vrot.slane %v17558_v6, 1  ;;  %v9025_v60 = vrot.slane %v17555_v24, 1  ;;  %v14538_v38 = vld [vmem:[%s15139_s14 + $0xa0] sm:$0xff] }
 0x41f   : > { %v17573_v28 = vadd.f32 %v5319_v58, %v20584_v11  ;;  %v17576_v15 = vadd.f32 %v5402_v0, %v20586_v18  ;;  %v9026_v20 = vrot.slane %v17564_v26, 1  ;;  %v8726_v44 = vrot.slane %v14538_v38, 7  ;;  %v14539_v58 = vld [vmem:[%s15139_s14 + $0xc8] sm:$0xff] }
 0x420   : > { %v7666_v41 = vsel %vm3251_vm1, %v20588_v57, %v7665_v10  ;;  %v5321_v11 = vpop.f32.mrf.mxu0  ;;  %v5404_v18 = vpop.f32.mrf.mxu1  ;;  %v8731_v7 = vrot.slane %v14539_v58, 7  ;;  %v7785_v57 = vrot.slane %v7783_v2, 1  ;;  %v7788_v10 = vrot.slane %v7786_v17, 2 }
 0x421   : > { %20585 = vst [vmem:[#allocation72_spill] sm:$0xff] %v17573_v28  ;;  %20587 = vst [vmem:[#allocation74_spill] sm:$0xff] %v17576_v15  ;;  %v17589_v0 = vadd.f32 %v5321_v11, %v20589_v5  ;;  %v17595_v38 = vmax.f32 %v9124_v52, %v9201_v42  ;;  %v7800_v58 = vshrl.u32 %v17259_v12, 16  ;;  %v20592_v11 = vld [vmem:[#allocation57_spill] sm:$0xff]  ;;  %v17606_v15 = vor.u32 %v7796_v47, %v7793_v16  ;;  %v20597_v16 = vld [vmem:[#allocation46_spill] sm:$0xff] }
 0x422   : > { %13610 = vmatmul.mubr.msk.bf16.gmra.mxu0 %vm2700_vm6, %v7528_v40  ;;  %v5405_v40 = vpop.f32.mrf.mxu1  ;;  %v7803_v17 = vshll.u32 %v17259_v12, 16  ;;  %v17610_v52 = vsel %vm3251_vm1, %v9010_v8, %v9011_v53  ;;  %v17613_v2 = vsel %vm3251_vm1, %v9025_v60, %v9026_v20  ;;  %v17621_v47 = vsel %vm1865_vm0, -inf, %v8731_v7  ;;  %v14487_v53 = vld [vmem:[#allocation11 + $0x78] sm:$0xff]   ;;  %v14488_v20 = vld [vmem:[#allocation11 + $0x68] sm:$0xff]  }
 0x423   : > { %13634 = vmatmul.mubr.msk.bf16.gmra.mxu1 %vm2700_vm6, %v7666_v41  ;;  %20590 = vst [vmem:[#allocation69_spill] sm:$0xff] %v17589_v0  ;;  %13641 = vmatprep.mubr.msk.bf16.mxu0 %vm14901_vm13, %v20512_v23  ;;  %20591 = vst [vmem:[#allocation76_spill] sm:$0xff] %v17595_v38  ;;  %v5323_v41 = vpop.f32.mrf.mxu0  ;;  %v20594_v0 = vld [vmem:[#allocation42_spill] sm:$0xff]  ;;  %v7789_v8 = vor.u32 %v7788_v10, %v7785_v57  ;;  %v17627_v60 = vsel %vm1865_vm0, %v8726_v44, -inf  ;;  %v20599_v42 = vrot.slane %v17199_v50, 2  ;;  %v20602_v57 = vld [vmem:[#allocation51_spill] sm:$0xff] }
 0x424   : > { %13665 = vmatprep.mubr.msk.bf16.mxu1 %vm14901_vm13, %v20512_v23  ;;  %v17601_v5 = vadd.f32 %v5323_v41, %v20592_v11  ;;  %v17604_v28 = vadd.f32 %v5405_v40, %v20594_v0  ;;  %20596 = vst [vmem:[#allocation77_spill] sm:$0xff] %v17613_v2  ;;  %v5407_v18 = vpop.f32.mrf.mxu1  ;;  %v7950_v41 = vrot.slane %v20583_v22, 2  ;;  %v17618_v11 = vsel %vm1865_vm0, -inf, %v8726_v44 }
 0x425   : > { %v5325_v21 = vpop.f32.mrf.mxu0  ;;  %v17630_v40 = vsel %vm1865_vm0, %v8731_v7, -inf  ;;  %v7798_v44 = vsel %vm4134_vm8, %v7789_v8, %v17606_v15  ;;  %v9007_v39 = vrot.slane %v17618_v11, 1  ;;  %v9223_v2 = vrot.slane %v17621_v47, 2 }
 0x426   : > { %20593 = vst [vmem:[#allocation68_spill] sm:$0xff] %v17601_v5  ;;  %20595 = vst [vmem:[#allocation79_spill] sm:$0xff] %v17604_v28  ;;  %v17624_v0 = vadd.f32 %v5325_v21, %v20597_v16  ;;  %v5410_v18 = vpop.f32.mrf.mxu1  ;;  %v7952_v38 = vsel %vm4648_vm2, %v7950_v41, %v20599_v42  ;;  %v7802_v28 = vrot.slane %v7800_v58, 1  ;;  %v20600_v5 = vld [vmem:[#allocation47_spill] sm:$0xff]  ;;  %v7805_v16 = vrot.slane %v7803_v17, 2  ;;  %v14540_v42 = vld [vmem:[%s15139_s14 + $0xb8] sm:$0xff] }
 0x427   : > { %v5329_v22 = vpop.f32.mrf.mxu0  ;;  %v17639_v10 = vadd.f32 %v5410_v18, %v20602_v57  ;;  %v8729_v58 = vrot.slane %v14540_v42, 7  ;;  %v9022_v17 = vrot.slane %v17621_v47, 1  ;;  %v9023_v8 = vrot.slane %v17630_v40, 1  ;;  %v14489_v57 = vld [vmem:[#allocation11 + $0x70] sm:$0xff]   ;;  %v14541_v42 = vld [vmem:[%s15139_s14 + $0xe0] sm:$0xff] }
 0x428   : > { %20598 = vst [vmem:[#allocation82_spill] sm:$0xff] %v17624_v0  ;;  %v17636_v21 = vadd.f32 %v5329_v22, %v20600_v5  ;;  %v5412_v41 = vpop.f32.mrf.mxu1  ;;  %v9008_v22 = vrot.slane %v17627_v60, 1  ;;  %v14490_v0 = vld [vmem:[#allocation11 + $0x60] sm:$0xff]  }
 0x429   : > { %v5331_v5 = vpop.f32.mrf.mxu0 }
 0x42a   : > { %20601 = vst [vmem:[#allocation25_spill] sm:$0xff] %v17636_v21  ;;  %13642 = vmatmul.mubr.msk.bf16.vlgmr.msra.gmra.mxu0 %vm2700_vm6, %v7798_v44  ;;  %v17654_v18 = vadd.f32 %v5331_v5, %v17287_v37  ;;  %v5413_v41 = vpop.f32.mrf.mxu1  ;;  %v7809_v37 = vshrl.u32 %v17328_v32, 16  ;;  %v9208_v21 = vrot.slane %v17618_v11, 2 }
 0x42b   : > { %13666 = vmatmul.mubr.msk.bf16.vlgmr.msra.gmra.mxu1 %vm2700_vm6, %v7952_v38  ;;  %13686 = vmatpush3.bf16.msra.mxu0 %v14488_v20  ;;  %v8734_v38 = vrot.slane %v14541_v42, 7  ;;  %v5333_v7 = vpop.f32.mrf.mxu0  ;;  %v14491_v20 = vld [vmem:[#allocation14 + $0x78] sm:$0xff]   ;;  %v17669_v44 = vadd.f32 %v5413_v41, %v17299_v30  ;;  %v17671_v42 = vor.u32 %v7805_v16, %v7802_v28  ;;  %v9009_v30 = vsel %vm3251_vm1, %v9007_v39, %v9008_v22 }
 0x42c   : > { %13710 = vmatpush3.bf16.msra.mxu1 %v14487_v53  ;;  %20603 = vst [vmem:[#allocation28_spill] sm:$0xff] %v17654_v18  ;;  %13645 = vmatprep.mubr.msk.bf16.mxu0 %vm14901_vm13, %v20512_v23  ;;  %v17666_v5 = vadd.f32 %v5333_v7, %v17296_v1  ;;  %v7812_v18 = vshll.u32 %v17328_v32, 16  ;;  %v9209_v53 = vrot.slane %v17627_v60, 2  ;;  %v9224_v1 = vrot.slane %v17630_v40, 2  ;;  %v5415_v24 = vpop.f32.mrf.mxu1 }
 0x42d   : > { %13669 = vmatprep.mubr.msk.bf16.mxu1 %vm14901_vm13, %v20512_v23  ;;  %20604 = vst [vmem:[#allocation80_spill] sm:$0xff] %v17669_v44  ;;  %13711 = vmatprep.subr.bf16.mxu1 %v20512_v23  ;;  %v5335_v7 = vpop.f32.mrf.mxu0  ;;  %v9024_v28 = vsel %vm3251_vm1, %v9022_v17, %v9023_v8  ;;  %v17683_v16 = vsel %vm1865_vm0, -inf, %v8729_v58  ;;  %v17689_v60 = vsel %vm1865_vm0, -inf, %v8734_v38  ;;  %v17692_v44 = vsel %vm1865_vm0, %v8729_v58, -inf }
 0x42e   : > { %13687 = vmatprep.subr.bf16.mxu0 %v20512_v23  ;;  %20605 = vst [vmem:[#allocation73_spill] sm:$0xff] %v17683_v16  ;;  %v17686_v41 = vadd.f32 %v5335_v7, %v17321_v35  ;;  %20606 = vst [vmem:[#allocation49_spill] sm:$0xff] %v17689_v60  ;;  %v5418_v24 = vpop.f32.mrf.mxu1  ;;  %v20608_v39 = vrot.slane %v17259_v12, 2  ;;  %v20609_v22 = vrot.slane %v17199_v50, 2  ;;  %v7811_v8 = vrot.slane %v7809_v37, 1 }
 0x42f   : > { %13688 = vmatpush3.bf16.msra.mxu0 %v14490_v0  ;;  %20607 = vst [vmem:[#allocation43_spill] sm:$0xff] %v17692_v44  ;;  %v5339_v40 = vpop.f32.mrf.mxu0  ;;  %v17704_v0 = vadd.f32 %v5418_v24, %v17347_v4  ;;  %v7807_v58 = vsel %vm4134_vm8, %v17606_v15, %v17671_v42  ;;  %v9127_v50 = vmax.f32 %v17618_v11, %v9009_v30  ;;  %v7818_v15 = vshrl.u32 %v17436_v56, 16 }
 0x430   : > { %13712 = vmatpush3.bf16.msra.mxu1 %v14489_v57  ;;  %v7954_v17 = vsel %vm4648_vm2, %v20609_v22, %v20608_v39  ;;  %13733 = vmatprep.subr.bf16.mxu0 %v20512_v23  ;;  %v17701_v35 = vadd.f32 %v5339_v40, %v17344_v29  ;;  %v7814_v57 = vrot.slane %v7812_v18, 2  ;;  %v9132_v37 = vmax.f32 %v17621_v47, %v9024_v28  ;;  %v5420_v4 = vpop.f32.mrf.mxu1 }
 0x431   : > { %13456 = vmatprep.subr.bf16.mxu1 %v14491_v20  ;;  %20610 = vst [vmem:[#allocation54_spill] sm:$0xff] %v17704_v0  ;;  %v9210_v20 = vsel %vm4648_vm2, %v9208_v21, %v9209_v53  ;;  %v5341_v29 = vpop.f32.mrf.mxu0  ;;  %v9225_v40 = vsel %vm4648_vm2, %v9223_v2, %v9224_v1  ;;  %v7821_v11 = vshll.u32 %v17436_v56, 16  ;;  %v17726_v47 = vsel %vm1865_vm0, %v8734_v38, -inf }
 0x432   : > { %13646 = vmatmul.mubr.msk.bf16.gmra.mxu0 %vm2700_vm6, %v7807_v58  ;;  %v17717_v24 = vadd.f32 %v5341_v29, %v17377_v3  ;;  %20612 = vst [vmem:[#allocation56_spill] sm:$0xff] %v17726_v47  ;;  %v9016_v2 = vrot.slane %v17683_v16, 1  ;;  %v9017_v3 = vrot.slane %v17692_v44, 1  ;;  %v9031_v21 = vrot.slane %v17689_v60, 1  ;;  %v5421_v53 = vpop.f32.mrf.mxu1  ;;  %v14543_v29 = vld [vmem:[%s15139_s14 + $0xd8] sm:$0xff] }
 0x433   : > { %13670 = vmatmul.mubr.msk.bf16.gmra.mxu1 %vm2700_vm6, %v7954_v17  ;;  %13649 = vmatprep.mubr.msk.bf16.mxu0 %vm14901_vm13, %v20512_v23  ;;  %v5343_v18 = vpop.f32.mrf.mxu0  ;;  %v17735_v30 = vadd.f32 %v5421_v53, %v17401_v61  ;;  %v7815_v28 = vor.u32 %v7814_v57, %v7811_v8  ;;  %v7955_v39 = vrot.slane %v17328_v32, 2  ;;  %v17738_v22 = vmax.f32 %v9127_v50, %v9210_v20  ;;  %v14542_v17 = vld [vmem:[%s15139_s14 + $0xb0] sm:$0xff] }
 0x434   : > { %20611 = vst [vmem:[#allocation55_spill] sm:$0xff] %v17717_v24  ;;  %13673 = vmatprep.mubr.msk.bf16.mxu1 %vm14901_vm13, %v20512_v23  ;;  %v17732_v1 = vadd.f32 %v5343_v18, %v17398_v43  ;;  %v17740_v38 = vmax.f32 %v9132_v37, %v9225_v40  ;;  %v8728_v58 = vrot.slane %v14542_v17, 7  ;;  %v8733_v4 = vrot.slane %v14543_v29, 7  ;;  %v5423_v24 = vpop.f32.mrf.mxu1 }
 0x435   : > { %v5345_v7 = vpop.f32.mrf.mxu0  ;;  %v9032_v0 = vrot.slane %v17726_v47, 1  ;;  %v7820_v61 = vrot.slane %v7818_v15, 1  ;;  %v7823_v18 = vrot.slane %v7821_v11, 2  ;;  %v17749_v8 = vsel %vm3251_vm1, %v9016_v2, %v9017_v3 }
 0x436   : > { %20613 = vst [vmem:[#allocation57_spill] sm:$0xff] %v17740_v38  ;;  %v17746_v43 = vadd.f32 %v5345_v7, %v17411_v55  ;;  %20614 = vst [vmem:[#allocation42_spill] sm:$0xff] %v17749_v8  ;;  %v5426_v20 = vpop.f32.mrf.mxu1  ;;  %v7816_v55 = vsel %vm4134_vm8, %v17671_v42, %v7815_v28  ;;  %v20615_v7 = vrot.slane %v17259_v12, 2  ;;  %v17767_v2 = vsel %vm1865_vm0, -inf, %v8728_v58 }
 0x437   : > { %v5349_v37 = vpop.f32.mrf.mxu0  ;;  %v17758_v24 = vadd.f32 %v5426_v20, %v17427_v27  ;;  %v17770_v3 = vsel %vm1865_vm0, -inf, %v8733_v4  ;;  %v17778_v42 = vsel %vm1865_vm0, %v8733_v4, -inf  ;;  %v17787_v17 = vor.u32 %v7823_v18, %v7820_v61  ;;  %v17800_v20 = vld [vmem:[%s15139_s14 + $0x120] sm:$0xff] }
 0x438   : > { %v17755_v40 = vadd.f32 %v5349_v37, %v17424_v25  ;;  %v7956_v15 = vsel %vm4648_vm2, %v20615_v7, %v7955_v39  ;;  %v17773_v25 = vsel %vm1865_vm0, %v8728_v58, -inf  ;;  %v5428_v27 = vpop.f32.mrf.mxu1  ;;  %v20285_v58 = vrot.slane %v17436_v56, 2  ;;  %v17796_v37 = vld [vmem:[%s15139_s14 + $0xf8] sm:$0xff] }
 0x439   : > { %v5351_v12 = vpop.f32.mrf.mxu0  ;;  %v17791_v29 = vsel %vm3251_vm1, %v9031_v21, %v9032_v0  ;;  %v9013_v61 = vrot.slane %v17767_v2, 1  ;;  %v9014_v18 = vrot.slane %v17773_v25, 1  ;;  %v9029_v27 = vrot.slane %v17778_v42, 1 }
 0x43a   : > { %13650 = vmatmul.mubr.msk.bf16.gmra.mxu0 %vm2700_vm6, %v7816_v55  ;;  %v17781_v53 = vadd.f32 %v5351_v12, %v17454_v34  ;;  %20616 = vst [vmem:[#allocation46_spill] sm:$0xff] %v17791_v29  ;;  %v9028_v12 = vrot.slane %v17770_v3, 1  ;;  %v9214_v50 = vrot.slane %v17767_v2, 2  ;;  %v7827_v32 = vshrl.u32 %v17531_v9, 16  ;;  %v20643_v29 = vld [vmem:[#allocation78_spill] sm:$0xff] }
 0x43b   : > { %13674 = vmatmul.mubr.msk.bf16.gmra.mxu1 %vm2700_vm6, %v7956_v15  ;;  %13653 = vmatprep.mubr.msk.bf16.mxu0 %vm14901_vm13, %v20512_v23  ;;  %v5353_v7 = vpop.f32.mrf.mxu0  ;;  %v5429_v15 = vpop.f32.mrf.mxu1  ;;  %v20617_v34 = vrot.slane %v17372_v13, 2  ;;  %v9354_v8 = vmax.f32 %v17382_v54, %v17384_v36  ;;  %v9215_v54 = vrot.slane %v17773_v25, 2  ;;  %v9229_v25 = vrot.slane %v17770_v3, 2 }
 0x43c   : > { %13677 = vmatprep.mubr.msk.bf16.mxu1 %vm14901_vm13, %v20512_v23  ;;  %v17806_v0 = vadd.f32 %v5353_v7, %v17475_v59  ;;  %v17809_v21 = vadd.f32 %v5429_v15, %v17478_v33  ;;  %v7825_v59 = vsel %vm4134_vm8, %v7815_v28, %v17787_v17  ;;  %v7958_v33 = vsel %vm4648_vm2, %v7955_v39, %v20285_v58  ;;  %v20621_v39 = vld [vmem:[#allocation24_spill] sm:$0xff] }
 0x43d   : > { %v5355_v11 = vpop.f32.mrf.mxu0  ;;  %v5431_v4 = vpop.f32.mrf.mxu1  ;;  %v7830_v7 = vshll.u32 %v17531_v9, 16  ;;  %v9353_v58 = vmax.f32 %v20621_v39, %v20559_v46 }
 0x43e   : > { %v17816_v57 = vadd.f32 %v5355_v11, %v17489_v48  ;;  %v20618_v4 = vrot.slane %v17317_v62, 2  ;;  %v20619_v48 = vrot.slane %v17558_v6, 2  ;;  %v20620_v11 = vrot.slane %v17550_v45, 2 }
 0x43f   : > { %v5359_v15 = vpop.f32.mrf.mxu0  ;;  %v5434_v55 = vpop.f32.mrf.mxu1 }
 0x440   : > { %v9198_v47 = vsel %vm4648_vm2, %v20618_v4, %v20617_v34  ;;  %v9213_v28 = vsel %vm4648_vm2, %v20620_v11, %v20619_v48  ;;  %v17839_v16 = vadd.f32 %v5359_v15, %v17501_v31  ;;  %v17842_v13 = vadd.f32 %v5434_v55, %v17504_v19 }
 0x441   : > { %v20622_v34 = vmax.f32 %v17317_v62, %v17432_v63  ;;  %v20623_v4 = vmax.f32 %v17550_v45, %v17610_v52  ;;  %v5361_v31 = vpop.f32.mrf.mxu0  ;;  %v5436_v19 = vpop.f32.mrf.mxu1  ;;  %v7829_v55 = vrot.slane %v7827_v32, 1  ;;  %v9358_v62 = vmax.f32 %v20559_v46, %v17491_v49 }
 0x442   : > { %13654 = vmatmul.mubr.msk.bf16.gmra.mxu0 %vm2700_vm6, %v7825_v59  ;;  %v17860_v63 = vmax.f32 %v9353_v58, %v17491_v49  ;;  %v17863_v45 = vadd.f32 %v5361_v31, %v17524_v51  ;;  %v7832_v52 = vrot.slane %v7830_v7, 2  ;;  %v9015_v46 = vsel %vm3251_vm1, %v9013_v61, %v9014_v18  ;;  %v14546_v51 = vld [vmem:[%s15139_s14 + $0xf0] sm:$0xff] }
 0x443   : > { %v17847_v6 = vmax.f32 %v20622_v34, %v9198_v47  ;;  %v17852_v48 = vmax.f32 %v20623_v4, %v9213_v28  ;;  %13678 = vmatmul.mubr.msk.bf16.gmra.mxu1 %vm2700_vm6, %v7958_v33  ;;  %13657 = vmatprep.mubr.msk.bf16.mxu0 %vm14901_vm13, %v20512_v23  ;;  %v8736_v58 = vrot.slane %v14546_v51, 7  ;;  %v5363_v59 = vpop.f32.mrf.mxu0  ;;  %v5437_v33 = vpop.f32.mrf.mxu1  ;;  %v17878_v15 = vmax.f32 %v9358_v62, %v17738_v22  ;;  %v14547_v34 = vld [vmem:[%s15139_s14 + $0x118] sm:$0xff]  ;;  %v20630_v19 = vld [vmem:[#allocation71_spill] sm:$0xff] }
 0x444   : > { %20624 = vst [vmem:[#allocation47_spill] sm:$0xff] %v17860_v63  ;;  %13681 = vmatprep.mubr.msk.bf16.mxu1 %vm14901_vm13, %v20512_v23  ;;  %v9230_v7 = vrot.slane %v17778_v42, 2  ;;  %v17882_v11 = vadd.f32 %v5363_v59, %v17538_v14  ;;  %v9030_v61 = vsel %vm3251_vm1, %v9028_v12, %v9029_v27  ;;  %v20629_v18 = vrot.slane %v17796_v37, 7  ;;  %v14549_v14 = vld [vmem:[%s15139_s14 + $0x130] sm:$0xff] }
 0x445   : > { %v9359_v47 = vmax.f32 %v17384_v36, %v17847_v6  ;;  %v17872_v32 = vmax.f32 %v9354_v8, %v17847_v6  ;;  %20626 = vst [vmem:[#allocation24_spill] sm:$0xff] %v17878_v15  ;;  %v20627_v36 = vld [vmem:[#allocation65_spill] sm:$0xff]  ;;  %v8741_v4 = vrot.slane %v14547_v34, 7  ;;  %v5365_v31 = vpop.f32.mrf.mxu0  ;;  %v5439_v42 = vpop.f32.mrf.mxu1  ;;  %v7833_v51 = vor.u32 %v7832_v52, %v7829_v55 }
 0x446   : > { %v17885_v28 = vadd.f32 %v5437_v33, %v20627_v36  ;;  %v17894_v39 = vsel %vm1865_vm0, -inf, %v20629_v18  ;;  %v17900_v62 = vadd.f32 %v5365_v31, %v20630_v19  ;;  %v9129_v27 = vmax.f32 %v17767_v2, %v9015_v46  ;;  %v20637_v31 = vld [vmem:[#allocation74_spill] sm:$0xff] }
 0x447   : > { %20625 = vst [vmem:[#allocation51_spill] sm:$0xff] %v17872_v32  ;;  %v17888_v8 = vmax.f32 %v9359_v47, %v17852_v48  ;;  %v7959_v47 = vrot.slane %v17531_v9, 2  ;;  %v9216_v59 = vsel %vm4648_vm2, %v9214_v50, %v9215_v54  ;;  %v17908_v33 = vsel %vm1865_vm0, -inf, %v8736_v58  ;;  %v17919_v9 = vpop.f32.mrf.mxu0  ;;  %v5868_v52 = vpop.f32.mrf.mxu1 }
 0x448   : > { %v17911_v36 = vsel %vm1865_vm0, %v8736_v58, -inf  ;;  %v9134_v18 = vmax.f32 %v17770_v3, %v9030_v61  ;;  %v20631_v34 = vrot.slane %v17796_v37, 7  ;;  %v7834_v2 = vsel %vm4134_vm8, %v17787_v17, %v7833_v51  ;;  %v14493_v51 = vld [vmem:[#allocation11 + $0x88] sm:$0xff]  }
 0x449   : > { %20628 = vst [vmem:[#allocation65_spill] sm:$0xff] %v17888_v8  ;;  %v20632_v50 = vrot.slane %v17436_v56, 2  ;;  %v9231_v46 = vsel %vm4648_vm2, %v9229_v25, %v9230_v7  ;;  %v20633_v58 = vrot.slane %v17800_v20, 7  ;;  %v17938_v42 = vadd.f32 %v5868_v52, %v20637_v31  ;;  %v17950_v7 = vpop.f32.mrf.mxu0  ;;  %v5870_v19 = vpop.f32.mrf.mxu1  ;;  %v20642_v31 = vld [vmem:[#allocation70_spill] sm:$0xff] }
 0x44a   : > { %v17917_v55 = vsel %vm1865_vm0, %v20631_v34, -inf  ;;  %13658 = vmatmul.mubr.msk.bf16.gmra.mxu0 %vm2700_vm6, %v7834_v2  ;;  %v17943_v56 = vsel %vm1865_vm0, -inf, %v8741_v4  ;;  %v17946_v17 = vsel %vm1865_vm0, %v8741_v4, -inf  ;;  %v9037_v25 = vrot.slane %v17908_v33, 1 }
 0x44b   : > { %v7960_v54 = vsel %vm4648_vm2, %v20632_v50, %v7959_v47  ;;  %v17930_v3 = vsel %vm1865_vm0, -inf, %v20633_v58  ;;  %v20635_v37 = vmov %v20633_v58  ;;  %20638 = vst [vmem:[#allocation74_spill] sm:$0xff] %v17943_v56  ;;  %20639 = vst [vmem:[#allocation90_spill] sm:$0xff] %v17946_v17  ;;  %v9038_v20 = vrot.slane %v17911_v36, 1  ;;  %13689 = vmatprep.mubr.msk.bf16.mxu0 %vm14901_vm13, %v20512_v23  ;;  %v14548_v50 = vld [vmem:[%s15139_s14 + $0x108] sm:$0xff]  ;;  %v17966_v58 = vpop.f32.mrf.mxu0 }
 0x44c   : > { %20634 = vst [vmem:[#allocation71_spill] sm:$0xff] %v17930_v3  ;;  %v17935_v61 = vsel %vm1865_vm0, %v20635_v37, -inf  ;;  %13682 = vmatmul.mubr.msk.bf16.gmra.mxu1 %vm2700_vm6, %v7960_v54  ;;  %v17958_v47 = vmax.f32 %v9129_v27, %v9216_v59  ;;  %v9040_v4 = vrot.slane %v17894_v39, 1  ;;  %v9041_v34 = vrot.slane %v17917_v55, 1  ;;  %v17968_v37 = vpop.f32.mrf.mxu1  ;;  %v14551_v3 = vld [vmem:[%s15139_s14 + $0x128] sm:$0xff] }
 0x44d   : > { %20636 = vst [vmem:[#allocation89_spill] sm:$0xff] %v17935_v61  ;;  %13713 = vmatprep.mubr.msk.bf16.mxu1 %vm14901_vm13, %v20512_v23  ;;  %v17962_v52 = vmax.f32 %v9134_v18, %v9231_v46  ;;  %v8739_v54 = vrot.slane %v14548_v50, 7  ;;  %v9052_v27 = vrot.slane %v17943_v56, 1  ;;  %v9053_v59 = vrot.slane %v17946_v17, 1  ;;  %v17978_v2 = vpop.f32.mrf.mxu0  ;;  %v20666_v17 = vld [vmem:[#allocation77_spill] sm:$0xff] }
 0x44e   : > { %20640 = vst [vmem:[#allocation91_spill] sm:$0xff] %v17958_v47  ;;  %v8744_v12 = vrot.slane %v14549_v14, 7  ;;  %v9039_v18 = vsel %vm3251_vm1, %v9037_v25, %v9038_v20  ;;  %v9238_v46 = vrot.slane %v17908_v33, 2  ;;  %v9239_v50 = vrot.slane %v17911_v36, 2  ;;  %v14492_v47 = vld [vmem:[#allocation14 + $0x38] sm:$0xff]   ;;  %v14494_v20 = vld [vmem:[#allocation14 + $0x70] sm:$0xff]  }
 0x44f   : > { %20641 = vst [vmem:[#allocation92_spill] sm:$0xff] %v17962_v52  ;;  %v5873_v52 = vpop.f32.mrf.mxu1  ;;  %v8078_v19 = vrot.slane %v20643_v29, 2  ;;  %v17982_v60 = vsel %vm3251_vm1, %v9040_v4, %v9041_v34  ;;  %v17988_v63 = vsel %vm1865_vm0, -inf, %v8739_v54  ;;  %v17991_v36 = vsel %vm1865_vm0, %v8739_v54, -inf  ;;  %v17994_v32 = vpop.f32.mrf.mxu0 }
 0x450   : > { %20644 = vst [vmem:[#allocation70_spill] sm:$0xff] %v17988_v63  ;;  %20645 = vst [vmem:[#allocation78_spill] sm:$0xff] %v17991_v36  ;;  %v14550_v52 = vld [vmem:[%s15139_s14 + $0x100] sm:$0xff]  ;;  %v20646_v4 = vrot.slane %v20642_v31, 2  ;;  %v18000_v44 = vsel %vm3251_vm1, %v9052_v27, %v9053_v59  ;;  %v9137_v25 = vmax.f32 %v17908_v33, %v9039_v18  ;;  %v18004_v14 = vsel %vm1865_vm0, -inf, %v8744_v12 }
 0x451   : > { %v8738_v15 = vrot.slane %v14550_v52, 7  ;;  %v5876_v8 = vpop.f32.mrf.mxu1  ;;  %20647 = vst [vmem:[#allocation93_spill] sm:$0xff] %v18000_v44  ;;  %20648 = vst [vmem:[#allocation94_spill] sm:$0xff] %v18004_v14  ;;  %v20650_v52 = vld [vmem:[#allocation84_spill] sm:$0xff]  ;;  %v9240_v59 = vsel %vm4648_vm2, %v9238_v46, %v9239_v50  ;;  %v18017_v18 = vpop.f32.mrf.mxu0  ;;  %v8743_v27 = vrot.slane %v14551_v3, 7  ;;  %v18027_v46 = vld [vmem:[#allocation14 + $0x100] sm:$0xff]  }
 0x452   : > { %v8080_v34 = vsel %vm4648_vm2, %v8078_v19, %v20646_v4  ;;  %v18007_v54 = vadd.f32 %v5876_v8, %v17639_v10  ;;  %20651 = vst [vmem:[#allocation84_spill] sm:$0xff] %v18017_v18  ;;  %v14495_v8 = vld [vmem:[#allocation14 + $0x30] sm:$0xff]   ;;  %v9047_v19 = vrot.slane %v17991_v36, 1  ;;  %v18037_v61 = vmax.f32 %v9137_v25, %v9240_v59  ;;  %v14497_v18 = vld [vmem:[#allocation14 + $0x28] sm:$0xff]  }
 0x453   : > { %13690 = vmatmul.mubr.msk.bf16.vlgmr.msra.gmra.mxu0 %vm2700_vm6, %v8080_v34  ;;  %v5878_v10 = vpop.f32.mrf.mxu1  ;;  %v14502_v4 = vld [vmem:[#allocation11 + $0x80] sm:$0xff]   ;;  %v18020_v34 = vsel %vm1865_vm0, %v8744_v12, -inf  ;;  %v20661_v12 = vld [vmem:[#allocation67_spill] sm:$0xff]  ;;  %vm12378_vm8 = vcmask 1047559  }
 0x454   : > { %20649 = vst [vmem:[#allocation95_spill] sm:$0xff] %v18007_v54  ;;  %13714 = vmatmul.mubr.msk.bf16.vlgmr.msra.gmra.mxu1 %vm2700_vm6, %v20650_v52  ;;  %13734 = vmatpush3.bf16.msra.mxu0 %v14493_v51  ;;  %20652 = vst [vmem:[#allocation96_spill] sm:$0xff] %v18020_v34  ;;  %v9046_v52 = vrot.slane %v17988_v63, 1  ;;  %v5799_v10 = vpop.f32.mrf.mxu0  ;;  %v20653_v3 = vld [vmem:[#allocation81_spill] sm:$0xff]  ;;  %v18040_v54 = vsel %vm1865_vm0, -inf, %v8738_v15  ;;  %v20655_v50 = vld [vmem:[#allocation80_spill] sm:$0xff] }
 0x455   : > { %13457 = vmatpush3.bf16.msra.mxu1 %v14492_v47  ;;  %13693 = vmatprep.mubr.msk.bf16.mxu0 %vm14901_vm13, %v20512_v23  ;;  %v14496_v47 = vld [vmem:[#allocation14 + $0x68] sm:$0xff]   ;;  %v5879_v33 = vpop.f32.mrf.mxu1  ;;  %20654 = vst [vmem:[#allocation81_spill] sm:$0xff] %v18037_v61  ;;  %v18043_v51 = vadd.f32 %v5799_v10, %v17666_v5  ;;  %v14498_v10 = vld [vmem:[#allocation14 + $0x60] sm:$0xff]  }
 0x456   : > { %13458 = vmatprep.subr.bf16.mxu1 %v14494_v20  ;;  %13717 = vmatprep.mubr.msk.bf16.mxu1 %vm14901_vm13, %v20512_v23  ;;  %v18046_v44 = vadd.f32 %v5879_v33, %v20655_v50  ;;  %v18052_v20 = vsel %vm1865_vm0, %v8738_v15, -inf  ;;  %v5801_v25 = vpop.f32.mrf.mxu0  ;;  %v18055_v5 = vsel %vm3251_vm1, %v9046_v52, %v9047_v19  ;;  %v18058_v33 = vsel %vm1865_vm0, -inf, %v8743_v27  ;;  %v20685_v34 = vld [vmem:[#allocation86_spill] sm:$0xff] }
 0x457   : > { %13735 = vmatprep.subr.bf16.mxu0 %v20512_v23  ;;  %v5881_v59 = vpop.f32.mrf.mxu1  ;;  %20657 = vst [vmem:[#allocation97_spill] sm:$0xff] %v18055_v5  ;;  %20658 = vst [vmem:[#allocation98_spill] sm:$0xff] %v18058_v33  ;;  %v18061_v50 = vadd.f32 %v5801_v25, %v17686_v41  ;;  %v20660_v15 = vrot.slane %v17564_v26, 2  ;;  %v9043_v19 = vrot.slane %v18040_v54, 1  ;;  %v20664_v41 = vrot.slane %v20653_v3, 2 }
 0x458   : > { %20656 = vst [vmem:[#allocation80_spill] sm:$0xff] %v18046_v44  ;;  %13736 = vmatpush3.bf16.msra.mxu0 %v14502_v4  ;;  %v20662_v59 = vrot.slane %v20661_v12, 2  ;;  %v18070_v4 = vsel %vm1865_vm0, %v8743_v27, -inf  ;;  %v5805_v52 = vpop.f32.mrf.mxu0  ;;  %v20667_v26 = vmax.f32 %v20661_v12, %v20666_v17  ;;  %v20672_v44 = vld [vmem:[#allocation85_spill] sm:$0xff]  ;;  %v20674_v17 = vrot.slane %v17894_v39, 2 }
 0x459   : > { %13459 = vmatpush3.bf16.msra.mxu1 %v14495_v8  ;;  %20659 = vst [vmem:[#allocation99_spill] sm:$0xff] %v18061_v50  ;;  %13757 = vmatprep.subr.bf16.mxu0 %v18027_v46  ;;  %20663 = vst [vmem:[#allocation67_spill] sm:$0xff] %v18070_v4  ;;  %v5884_v56 = vpop.f32.mrf.mxu1  ;;  %v18085_v27 = vadd.f32 %v5805_v52, %v17701_v35  ;;  %v20675_v52 = vmax.f32 %v17894_v39, %v17982_v60  ;;  %v14500_v60 = vld [vmem:[#allocation14 + $0x58] sm:$0xff]  }
 0x45a   : > { %13460 = vmatprep.subr.bf16.mxu1 %v14496_v47  ;;  %v9228_v8 = vsel %vm4648_vm2, %v20662_v59, %v20660_v15  ;;  %v20665_v47 = vrot.slane %v20642_v31, 2  ;;  %v9044_v15 = vrot.slane %v18052_v20, 1  ;;  %v20670_v59 = vld [vmem:[#allocation54_spill] sm:$0xff] }
 0x45b   : > { %v18081_v36 = vmax.f32 %v20667_v26, %v9228_v8  ;;  %20669 = vst [vmem:[#allocation100_spill] sm:$0xff] %v18085_v27  ;;  %v18088_v50 = vadd.f32 %v5884_v56, %v20670_v59  ;;  %v5886_v35 = vpop.f32.mrf.mxu1  ;;  %v14499_v56 = vld [vmem:[#allocation14 + $0x20] sm:$0xff]   ;;  %v9058_v26 = vrot.slane %v18058_v33, 1  ;;  %v9059_v59 = vrot.slane %v18070_v4, 1 }
 0x45c   : > { %v8082_v25 = vsel %vm4648_vm2, %v20665_v47, %v20664_v41  ;;  %13718 = vmatmul.mubr.msk.bf16.gmra.mxu1 %vm2700_vm6, %v20672_v44  ;;  %v20673_v41 = vrot.slane %v17917_v55, 2  ;;  %v5807_v47 = vpop.f32.mrf.mxu0  ;;  %v9364_v44 = vmax.f32 %v17847_v6, %v17852_v48  ;;  %v9244_v6 = vrot.slane %v18040_v54, 2  ;;  %v14507_v33 = vld [vmem:[#allocation14 + $0x40] sm:$0xff]  }
 0x45d   : > { %20668 = vst [vmem:[#allocation77_spill] sm:$0xff] %v18081_v36  ;;  %20671 = vst [vmem:[#allocation54_spill] sm:$0xff] %v18088_v50  ;;  %13694 = vmatmul.mubr.msk.bf16.gmra.mxu0 %vm2700_vm6, %v8082_v25  ;;  %13461 = vmatpush3.bf16.msra.mxu1 %v14497_v18  ;;  %v9369_v55 = vmax.f32 %v17852_v48, %v18081_v36  ;;  %v14552_v18 = vld [vmem:[%s15139_s14 + $0x70] sm:$0xff] }
 0x45e   : > { %v9243_v12 = vsel %vm4648_vm2, %v20674_v17, %v20673_v41  ;;  %13697 = vmatprep.mubr.msk.bf16.mxu0 %vm14901_vm13, %v20512_v23  ;;  %v8720_v41 = vrot.slane %v14552_v18, 7  ;;  %v20677_v17 = vld [vmem:[#allocation55_spill] sm:$0xff]  ;;  %13721 = vmatprep.mubr.msk.bf16.mxu1 %vm14901_vm13, %v20512_v23  ;;  %v5809_v39 = vpop.f32.mrf.mxu0  ;;  %v18121_v8 = vmax.f32 %v9364_v44, %v18081_v36  ;;  %v9245_v18 = vrot.slane %v18052_v20, 2  ;;  %v14501_v44 = vld [vmem:[#allocation14 + $0x18] sm:$0xff]  }
 0x45f   : > { %v18104_v25 = vmax.f32 %v20675_v52, %v9243_v12  ;;  %v18114_v35 = vadd.f32 %v5807_v47, %v20677_v17  ;;  %13462 = vmatprep.subr.bf16.mxu1 %v14498_v10  ;;  %v5887_v12 = vpop.f32.mrf.mxu1  ;;  %v20679_v48 = vld [vmem:[#allocation83_spill] sm:$0xff]  ;;  %v9045_v47 = vsel %vm3251_vm1, %v9043_v19, %v9044_v15  ;;  %v18129_v17 = vadd.f32 %v5809_v39, %v17732_v1 }
 0x460   : > { %v18132_v10 = vadd.f32 %v5887_v12, %v17735_v30  ;;  %v5811_v27 = vpop.f32.mrf.mxu0  ;;  %v9363_v19 = vmax.f32 %v17491_v49, %v17738_v22  ;;  %v9368_v1 = vmax.f32 %v17738_v22, %v17740_v38  ;;  %v18143_v30 = vsel %vm3251_vm1, %v9058_v26, %v9059_v59 }
 0x461   : > { %20676 = vst [vmem:[#allocation85_spill] sm:$0xff] %v18104_v25  ;;  %20678 = vst [vmem:[#allocation55_spill] sm:$0xff] %v18114_v35  ;;  %v18124_v14 = vmax.f32 %v9369_v55, %v18104_v25  ;;  %v14553_v35 = vld [vmem:[%s15139_s14 + $0x98] sm:$0xff]  ;;  %v5889_v52 = vpop.f32.mrf.mxu1  ;;  %13463 = vmatpush3.bf16.msra.mxu1 %v14499_v56  ;;  %v18146_v15 = vsel %vm1865_vm0, -inf, %v8720_v41  ;;  %v18149_v56 = vadd.f32 %v5811_v27, %v17746_v43  ;;  %v18152_v39 = vsel %vm1865_vm0, %v8720_v41, -inf }
 0x462   : > { %v8725_v50 = vrot.slane %v14553_v35, 7  ;;  %20680 = vst [vmem:[#allocation83_spill] sm:$0xff] %v18143_v30  ;;  %20681 = vst [vmem:[#allocation101_spill] sm:$0xff] %v18146_v15  ;;  %13464 = vmatprep.subr.bf16.mxu1 %v14500_v60  ;;  %v14503_v35 = vld [vmem:[#allocation14 + $0x50] sm:$0xff]   ;;  %v5815_v49 = vpop.f32.mrf.mxu0  ;;  %v20683_v22 = vrot.slane %v20679_v48, 2  ;;  %v20684_v52 = vrot.slane %v20653_v3, 2  ;;  %v18160_v59 = vmax.f32 %v9363_v19, %v17740_v38 }
 0x463   : > { %20682 = vst [vmem:[#allocation102_spill] sm:$0xff] %v18152_v39  ;;  %v5892_v12 = vpop.f32.mrf.mxu1  ;;  %v18163_v43 = vmax.f32 %v9368_v1, %v18037_v61  ;;  %v9139_v27 = vmax.f32 %v18040_v54, %v9045_v47  ;;  %v14554_v60 = vld [vmem:[%s15139_s14 + $0xc0] sm:$0xff]  ;;  %v18168_v41 = vadd.f32 %v5815_v49, %v17755_v40  ;;  %v9246_v19 = vsel %vm4648_vm2, %v9244_v6, %v9245_v18  ;;  %v14557_v61 = vld [vmem:[%s15139_s14 + $0x138] sm:$0xff] }
 0x464   : > { %v8084_v26 = vsel %vm4648_vm2, %v20684_v52, %v20683_v22  ;;  %v8730_v20 = vrot.slane %v14554_v60, 7  ;;  %v18171_v55 = vadd.f32 %v5892_v12, %v17758_v24  ;;  %13722 = vmatmul.mubr.msk.bf16.gmra.mxu1 %vm2700_vm6, %v20685_v34  ;;  %v18178_v1 = vsel %vm1865_vm0, -inf, %v8725_v50  ;;  %v14555_v22 = vld [vmem:[%s15139_s14 + $0xe8] sm:$0xff]  ;;  %v5817_v47 = vpop.f32.mrf.mxu0  ;;  %v14504_v40 = vld [vmem:[#allocation14 + $0x10] sm:$0xff]  }
 0x465   : > { %13698 = vmatmul.mubr.msk.bf16.gmra.mxu0 %vm2700_vm6, %v8084_v26  ;;  %v8735_v54 = vrot.slane %v14555_v22, 7  ;;  %v5894_v52 = vpop.f32.mrf.mxu1  ;;  %13465 = vmatpush3.bf16.msra.mxu1 %v14501_v44  ;;  %v18186_v49 = vsel %vm1865_vm0, %v8725_v50, -inf  ;;  %v8989_v34 = vrot.slane %v18146_v15, 1  ;;  %v8990_v6 = vrot.slane %v18152_v39, 1  ;;  %v14505_v44 = vld [vmem:[#allocation14 + $0x48] sm:$0xff]  }
 0x466   : > { %13701 = vmatprep.mubr.msk.bf16.mxu0 %vm14901_vm13, %v20512_v23  ;;  %v18191_v18 = vadd.f32 %v5817_v47, %v17781_v53  ;;  %13725 = vmatprep.mubr.msk.bf16.mxu1 %vm14901_vm13, %v20512_v23  ;;  %v5819_v60 = vpop.f32.mrf.mxu0  ;;  %v20686_v52 = vld [vmem:[#allocation75_spill] sm:$0xff]  ;;  %v18201_v38 = vsel %vm1865_vm0, -inf, %v8730_v20  ;;  %v18204_v53 = vsel %vm1865_vm0, %v8730_v20, -inf  ;;  %v18214_v50 = vmax.f32 %v9139_v27, %v9246_v19 }
 0x467   : > { %13466 = vmatprep.subr.bf16.mxu1 %v14503_v35  ;;  %v5895_v22 = vpop.f32.mrf.mxu1  ;;  %v18207_v35 = vadd.f32 %v5819_v60, %v17806_v0  ;;  %v9004_v12 = vrot.slane %v18178_v1, 1  ;;  %v9005_v24 = vrot.slane %v18186_v49, 1  ;;  %v18219_v20 = vsel %vm3251_vm1, %v8989_v34, %v8990_v6  ;;  %v14506_v27 = vld [vmem:[#allocation14 + $0x8] sm:$0xff]  }
 0x468   : > { %v18210_v47 = vadd.f32 %v5895_v22, %v17809_v21  ;;  %20688 = vst [vmem:[#allocation75_spill] sm:$0xff] %v18214_v50  ;;  %v5821_v4 = vpop.f32.mrf.mxu0  ;;  %20689 = vst [vmem:[#allocation103_spill] sm:$0xff] %v18219_v20  ;;  %v18222_v0 = vsel %vm1865_vm0, -inf, %v8735_v54  ;;  %v18225_v21 = vsel %vm1865_vm0, %v8735_v54, -inf  ;;  %v9019_v19 = vrot.slane %v18201_v38, 1 }
 0x469   : > { %v5897_v5 = vpop.f32.mrf.mxu1  ;;  %13467 = vmatpush3.bf16.msra.mxu1 %v14504_v40  ;;  %20690 = vst [vmem:[#allocation104_spill] sm:$0xff] %v18222_v0  ;;  %20691 = vst [vmem:[#allocation105_spill] sm:$0xff] %v18225_v21  ;;  %v18228_v60 = vadd.f32 %v5821_v4, %v17816_v57  ;;  %v9020_v22 = vrot.slane %v18204_v53, 1  ;;  %v20693_v26 = vrot.slane %v20686_v52, 2  ;;  %v20694_v30 = vrot.slane %v20679_v48, 2 }
 0x46a   : > { %20687 = vst [vmem:[#allocation86_spill] sm:$0xff] %v18210_v47  ;;  %13468 = vmatprep.subr.bf16.mxu1 %v14505_v44  ;;  %v14556_v5 = vld [vmem:[%s15139_s14 + $0x110] sm:$0xff]  ;;  %v5825_v34 = vpop.f32.mrf.mxu0  ;;  %v9205_v57 = vrot.slane %v18178_v1, 2  ;;  %v9206_v4 = vrot.slane %v18186_v49, 2  ;;  %v9006_v63 = vsel %vm3251_vm1, %v9004_v12, %v9005_v24  ;;  %v8745_v36 = vrot.slane %v14557_v61, 7 }
 0x46b   : > { %20692 = vst [vmem:[#allocation106_spill] sm:$0xff] %v18228_v60  ;;  %v8740_v40 = vrot.slane %v14556_v5, 7  ;;  %v5900_v6 = vpop.f32.mrf.mxu1  ;;  %v8086_v54 = vsel %vm4648_vm2, %v20694_v30, %v20693_v26  ;;  %v18241_v44 = vadd.f32 %v5825_v34, %v17839_v16  ;;  %v20697_v5 = vld [vmem:[#allocation87_spill] sm:$0xff]  ;;  %v9034_v30 = vrot.slane %v18222_v0, 1  ;;  %v20745_v0 = vld [vmem:[#allocation100_spill] sm:$0xff] }
 0x46c   : > { %v18244_v50 = vadd.f32 %v5900_v6, %v17842_v13  ;;  %13726 = vmatmul.mubr.msk.bf16.gmra.mxu1 %vm2700_vm6, %v20697_v5  ;;  %v9035_v26 = vrot.slane %v18225_v21, 1  ;;  %v5827_v49 = vpop.f32.mrf.mxu0  ;;  %v9220_v24 = vrot.slane %v18201_v38, 2  ;;  %v14508_v34 = vld [vmem:[#allocation14] sm:$0xff]   ;;  %v9021_v61 = vsel %vm3251_vm1, %v9019_v19, %v9020_v22  ;;  %v14509_v13 = vld [vmem:[#allocation14 + $0xf8] sm:$0xff]  }
 0x46d   : > { %20695 = vst [vmem:[#allocation107_spill] sm:$0xff] %v18241_v44  ;;  %13702 = vmatmul.mubr.msk.bf16.gmra.mxu0 %vm2700_vm6, %v8086_v54  ;;  %v5902_v25 = vpop.f32.mrf.mxu1  ;;  %13729 = vmatprep.mubr.msk.bf16.mxu1 %vm14901_vm13, %v20512_v23  ;;  %v18261_v12 = vadd.f32 %v5827_v49, %v17863_v45  ;;  %v18266_v6 = vsel %vm1865_vm0, -inf, %v8740_v40  ;;  %v18269_v54 = vsel %vm1865_vm0, %v8740_v40, -inf  ;;  %v6366_v49 = vld [vmem:[#allocation10] sm:$0x7]  ;;  %v9207_v22 = vsel %vm4648_vm2, %v9205_v57, %v9206_v4 }
 0x46e   : > { %20696 = vst [vmem:[#allocation108_spill] sm:$0xff] %v18244_v50  ;;  %13705 = vmatprep.mubr.msk.bf16.mxu0 %vm14901_vm13, %v20512_v23  ;;  %13469 = vmatpush3.bf16.msra.mxu1 %v14506_v27  ;;  %v9221_v25 = vrot.slane %v18204_v53, 2  ;;  %20699 = vst [vmem:[#allocation109_spill] sm:$0xff] %v18266_v6  ;;  %v5829_v5 = vpop.f32.mrf.mxu0  ;;  %v9126_v27 = vmax.f32 %v18178_v1, %v9006_v63  ;;  %v18282_v40 = vsel %vm3251_vm1, %v9034_v30, %v9035_v26  ;;  %v20705_v4 = vld [vmem:[#allocation72_spill] sm:$0xff]  ;;  %v20706_v26 = vld [vmem:[#allocation30_spill] sm:$0xff] }
 0x46f   : > { %20698 = vst [vmem:[#allocation87_spill] sm:$0xff] %v18261_v12  ;;  %20700 = vst [vmem:[#allocation110_spill] sm:$0xff] %v18269_v54  ;;  %v5903_v16 = vpop.f32.mrf.mxu1  ;;  %13470 = vmatprep.subr.bf16.mxu1 %v14507_v33  ;;  %v18275_v19 = vadd.f32 %v5829_v5, %v17882_v11  ;;  %v18285_v33 = vsel %vm1865_vm0, -inf, %v8745_v36  ;;  %v18288_v39 = vsel %vm1865_vm0, %v8745_v36, -inf  ;;  %v9131_v1 = vmax.f32 %v18201_v38, %v9021_v61 }
 0x470   : > { %v18278_v53 = vadd.f32 %v5903_v16, %v17885_v28  ;;  %20703 = vst [vmem:[#allocation113_spill] sm:$0xff] %v18282_v40  ;;  %v5831_v45 = vpop.f32.mrf.mxu0  ;;  %v9049_v11 = vrot.slane %v18266_v6, 1  ;;  %v9050_v28 = vrot.slane %v18269_v54, 1  ;;  %v9222_v57 = vsel %vm4648_vm2, %v9220_v24, %v9221_v25  ;;  %v20739_v6 = vld [vmem:[#allocation47_spill] sm:$0xff] }
 0x471   : > { %20701 = vst [vmem:[#allocation111_spill] sm:$0xff] %v18275_v19  ;;  %v5905_v63 = vpop.f32.mrf.mxu1  ;;  %v18294_v16 = vadd.f32 %v5831_v45, %v17900_v62  ;;  %v5907_v30 = vadd.f32 %v17919_v9, %v20705_v4  ;;  %v20707_v36 = vsub.s32 0, %v20706_v26  ;;  %v20709_v38 = vrot.slane %v20686_v52, 2  ;;  %v20712_v4 = vld [vmem:[#allocation88_spill] sm:$0xff] }
 0x472   : > { %20702 = vst [vmem:[#allocation112_spill] sm:$0xff] %v18278_v53  ;;  %13471 = vmatpush3.bf16.msra.mxu1 %v14508_v34  ;;  %v20708_v63 = vld [vmem:[#allocation48_spill] sm:$0xff]  ;;  %v18307_v20 = vmax.f32 %v9126_v27, %v9207_v22  ;;  %v9064_v62 = vrot.slane %v18285_v33, 1  ;;  %v9065_v34 = vrot.slane %v18288_v39, 1  ;;  %v20711_v24 = vsub.s32 1, %v20706_v26  ;;  %v6214_v9 = vpop.f32.mrf.mxu0 }
 0x473   : > { %20704 = vst [vmem:[#allocation114_spill] sm:$0xff] %v18294_v16  ;;  %v18301_v5 = vrot.slane %v6366_v49, %v20707_v36  ;;  %v8087_v61 = vsel %vm4648_vm2, %v20709_v38, %v20708_v63  ;;  %13496 = vmatprep.subr.bf16.mxu1 %v14509_v13  ;;  %v6297_v45 = vpop.f32.mrf.mxu1  ;;  %v20713_v13 = vld [vmem:[#allocation69_spill] sm:$0xff]  ;;  %v6336_v22 = vadd.f32 %v6214_v9, %v5907_v30  ;;  %v20718_v9 = vld [vmem:[#allocation68_spill] sm:$0xff]  ;;  %v20329_v40 = vrot.slane %v20653_v3, 3 }
 0x474   : > { %20710 = vst [vmem:[#allocation72_spill] sm:$0xff] %v18307_v20  ;;  %v18313_v25 = vrot.slane %v6366_v49, %v20711_v24  ;;  %13730 = vmatmul.mubr.msk.bf16.gmra.mxu1 %vm2700_vm6, %v20712_v4  ;;  %v5908_v27 = vadd.f32 %v17950_v7, %v20713_v13  ;;  %v18322_v63 = vadd.f32 %v6297_v45, %v17938_v42  ;;  %v20715_v38 = vld [vmem:[#allocation61_spill] sm:$0xff]  ;;  %v6216_v7 = vpop.f32.mrf.mxu0 }
 0x475   : > { %13706 = vmatmul.mubr.msk.bf16.gmra.mxu0 %vm2700_vm6, %v8087_v61  ;;  %9748 = vmatprep.mubr.bf16.mxu1 %v20715_v38  ;;  %v18330_v4 = vmax.f32 %v9131_v1, %v9222_v57  ;;  %v18333_v36 = vsel %vm3251_vm1, %v9049_v11, %v9050_v28  ;;  %v6299_v30 = vpop.f32.mrf.mxu1  ;;  %v5910_v42 = vadd.f32 %v17966_v58, %v20718_v9  ;;  %v8344_v38 = vrot.slane %v20642_v31, 3  ;;  %v20719_v57 = vld [vmem:[#allocation79_spill] sm:$0xff]  ;;  %v14511_v1 = vld [vmem:[#allocation14 + $0xf0] sm:$0xff]  }
 0x476   : > { %20714 = vst [vmem:[#allocation30_spill] sm:$0xff] %v18322_v63  ;;  %13737 = vmatprep.mubr.msk.bf16.mxu0 %vm14901_vm13, %v20512_v23  ;;  %20717 = vst [vmem:[#allocation88_spill] sm:$0xff] %v18333_v36  ;;  %v6383_v45 = vadd.f32 %v18301_v5, %v6336_v22  ;;  %v6337_v13 = vadd.f32 %v6216_v7, %v5908_v27  ;;  %v18340_v63 = vsel %vm3251_vm1, %v9064_v62, %v9065_v34  ;;  %v6218_v28 = vpop.f32.mrf.mxu0  ;;  %v14510_v7 = vld [vmem:[#allocation14 + $0xb8] sm:$0xff]  }
 0x477   : > { %20716 = vst [vmem:[#allocation48_spill] sm:$0xff] %v18330_v4  ;;  %v5912_v11 = vadd.f32 %v17968_v37, %v20719_v57  ;;  %v6300_v30 = vpop.f32.mrf.mxu1  ;;  %v6339_v27 = vadd.f32 %v6218_v28, %v5910_v42  ;;  %v8343_v31 = vrot.slane %v20643_v29, 3  ;;  %v20720_v62 = vld [vmem:[#allocation82_spill] sm:$0xff]  ;;  %v20721_v9 = vsub.s32 2, %v20706_v26  ;;  %v20723_v58 = vld [vmem:[#allocation25_spill] sm:$0xff] }
 0x478   : > { %v6384_v22 = vadd.f32 %v18313_v25, %v6337_v13  ;;  %v5911_v34 = vadd.f32 %v17978_v2, %v20720_v62  ;;  %v6220_v37 = vpop.f32.mrf.mxu0  ;;  %v5913_v13 = vadd.f32 %v17994_v32, %v20723_v58  ;;  %v6413_v42 = vmax.f32 %v6383_v45, 0.0  ;;  %v20724_v62 = vld [vmem:[#allocation53_spill] sm:$0xff]  ;;  %v20725_v45 = vld [vmem:[#allocation28_spill] sm:$0xff]  ;;  %v20727_v32 = vld [vmem:[#allocation39_spill] sm:$0xff] }
 0x479   : > { %v18354_v61 = vrot.slane %v6366_v49, %v20721_v9  ;;  %v6341_v24 = vadd.f32 %v6300_v30, %v5912_v11  ;;  %v6302_v57 = vpop.f32.mrf.mxu1  ;;  %v8345_v29 = vsel %vm5978_vm12, %v8343_v31, %v8344_v38  ;;  %v9266_v36 = vrot.slane %v18288_v39, 2  ;;  %v20726_v58 = vld [vmem:[#allocation84_spill] sm:$0xff] }
 0x47a   : > { %v6414_v28 = vmax.f32 %v6384_v22, 0.0  ;;  %v6386_v2 = vadd.f32 %v18301_v5, %v6339_v27  ;;  %v6340_v26 = vadd.f32 %v6220_v37, %v5911_v34  ;;  %v6224_v11 = vpop.f32.mrf.mxu0  ;;  %v5914_v22 = vadd.f32 %v20726_v58, %v20725_v45  ;;  %v14513_v39 = vld [vmem:[#allocation14 + $0xb0] sm:$0xff]  }
 0x47b   : > { %20722 = vst [vmem:[#allocation69_spill] sm:$0xff] %v18354_v61  ;;  %v6388_v49 = vadd.f32 %v18354_v61, %v6341_v24  ;;  %v6305_v30 = vpop.f32.mrf.mxu1  ;;  %v6342_v34 = vadd.f32 %v6224_v11, %v5913_v13 }
 0x47c   : > { %9749 = vmatmul.mubr.bf16.vlgmr.msra.gmra.mxu1 %v20724_v62  ;;  %v6473_v31 = vcombine.low %v6413_v42, %v6414_v28  ;;  %v6474_v9 = vcombine.high %v6413_v42, %v6414_v28  ;;  %v6387_v24 = vadd.f32 %v18313_v25, %v6340_v26  ;;  %v6226_v37 = vpop.f32.mrf.mxu0  ;;  %v14514_v62 = vld [vmem:[#allocation14 + $0xe8] sm:$0xff]   ;;  %v6416_v13 = vmax.f32 %v6386_v2, 0.0 }
 0x47d   : > { %13738 = vmatmul.mubr.msk.bf16.vlgmr.msra.gmra.mxu0 %vm2700_vm6, %v8345_v29  ;;  %13497 = vmatpush3.bf16.msra.mxu1 %v14510_v7  ;;  %v6418_v27 = vmax.f32 %v6388_v49, 0.0  ;;  %v6307_v57 = vpop.f32.mrf.mxu1  ;;  %v8347_v29 = vsel %vm5978_vm12, %v8344_v38, %v20329_v40  ;;  %v20728_v7 = vld [vmem:[#allocation95_spill] sm:$0xff]  ;;  %v6343_v49 = vadd.f32 %v6226_v37, %v5914_v22 }
 0x47e   : > { %13498 = vmatprep.subr.bf16.mxu1 %v14511_v1  ;;  %13758 = vmatpush3.bf16.msra.mxu0 %v18027_v46  ;;  %v6482_v45 = vrot.slane %v6473_v31, %v20727_v32  ;;  %v6489_v42 = vrot.slane %v6474_v9, %v20727_v32  ;;  %v6344_v28 = vadd.f32 %v6305_v30, %v20728_v7  ;;  %v6417_v1 = vmax.f32 %v6387_v24, 0.0  ;;  %v6228_v11 = vpop.f32.mrf.mxu0  ;;  %v20729_v57 = vld [vmem:[#allocation65_spill] sm:$0xff]  ;;  %v20730_v38 = vld [vmem:[#allocation51_spill] sm:$0xff] }
 0x47f   : > { %13741 = vmatprep.mubr.msk.bf16.mxu0 %vm14901_vm13, %v20512_v23  ;;  %v6510_v26 = vcombine.high %v6418_v27, %v6418_v27  ;;  %v6389_v46 = vadd.f32 %v18301_v5, %v6342_v34  ;;  %v6308_v58 = vpop.f32.mrf.mxu1  ;;  %v20731_v40 = vpack.c.bf16 %v20729_v57, %v20730_v38  ;;  %v6390_v2 = vadd.f32 %v18313_v25, %v6343_v49 }
 0x480   : > { %v18384_v31 = vrot.slane %v6482_v45, %v20727_v32  ;;  %v18387_v30 = vrot.slane %v6489_v42, %v20727_v32  ;;  %v6391_v22 = vadd.f32 %v18354_v61, %v6344_v28  ;;  %v18392_v9 = vrot.slane %v6418_v27, %v20727_v32  ;;  %v6230_v7 = vpop.f32.mrf.mxu0 }
 0x481   : > { %9756 = vmatprep.mubr.bf16.mxu1 %v20731_v40  ;;  %13499 = vmatpush3.bf16.msra.mxu1 %v14513_v39  ;;  %v6508_v24 = vcombine.low %v6416_v13, %v6417_v1  ;;  %v6509_v34 = vcombine.high %v6416_v13, %v6417_v1  ;;  %v6419_v37 = vmax.f32 %v6389_v46, 0.0  ;;  %v6310_v57 = vpop.f32.mrf.mxu1  ;;  %v14515_v40 = vld [vmem:[#allocation14 + $0xa8] sm:$0xff]   ;;  %v6420_v49 = vmax.f32 %v6390_v2, 0.0  ;;  %v14516_v39 = vld [vmem:[#allocation14 + $0xe0] sm:$0xff]  }
 0x482   : > { %20732 = vst [vmem:[#allocation61_spill] sm:$0xff] %v18392_v9  ;;  %13500 = vmatprep.subr.bf16.mxu1 %v14514_v62  ;;  %v18398_v28 = vmax.f32 %v6391_v22, 0.0  ;;  %v6345_v13 = vadd.f32 %v6228_v11, %v18043_v51  ;;  %v20735_v1 = vld [vmem:[#allocation80_spill] sm:$0xff]  ;;  %v6234_v46 = vpop.f32.mrf.mxu0  ;;  %v20736_v45 = vrot.slane %v18285_v33, 2  ;;  %v18413_v2 = vrot.slane %v6510_v26, %v20727_v32 }
 0x483   : > { %v6517_v27 = vrot.slane %v6508_v24, %v20727_v32  ;;  %v18402_v38 = vrot.slane %v6509_v34, %v20727_v32  ;;  %v6347_v62 = vadd.f32 %v6308_v58, %v20735_v1  ;;  %v6313_v57 = vpop.f32.mrf.mxu1  ;;  %v6542_v24 = vcombine.low %v6419_v37, %v6420_v49  ;;  %v20738_v34 = vld [vmem:[#allocation24_spill] sm:$0xff] }
 0x484   : > { %20733 = vst [vmem:[#allocation68_spill] sm:$0xff] %v18398_v28  ;;  %v18410_v22 = vsel %vm4648_vm2, %v20736_v45, %v9266_v36  ;;  %20737 = vst [vmem:[#allocation82_spill] sm:$0xff] %v18413_v2  ;;  %v18415_v42 = vcombine.high %v6419_v37, %v6420_v49  ;;  %v20740_v51 = vpack.c.bf16 %v20738_v34, %v20739_v6  ;;  %v6236_v1 = vpop.f32.mrf.mxu0  ;;  %v14517_v45 = vld [vmem:[#allocation14 + $0xa0] sm:$0xff]   ;;  %v8348_v26 = vrot.slane %v20679_v48, 3 }
 0x485   : > { %20734 = vst [vmem:[#allocation79_spill] sm:$0xff] %v18402_v38  ;;  %13742 = vmatmul.mubr.msk.bf16.gmra.mxu0 %vm2700_vm6, %v8347_v29  ;;  %v6539_v11 = vcombine.high %v6517_v27, %v18392_v9  ;;  %v6392_v58 = vadd.f32 %v18301_v5, %v6345_v13  ;;  %v6394_v29 = vadd.f32 %v18354_v61, %v6347_v62  ;;  %v6315_v36 = vpop.f32.mrf.mxu1  ;;  %v20741_v34 = vld [vmem:[#allocation99_spill] sm:$0xff]  ;;  %v14518_v13 = vld [vmem:[#allocation14 + $0xd8] sm:$0xff]  }
 0x486   : > { %9757 = vmatmul.mubr.bf16.gmra.mxu1 %v20740_v51  ;;  %v6565_v37 = vrot.slane %v18398_v28, %v20727_v32  ;;  %v6541_v49 = vcombine.high %v18402_v38, %v18413_v2  ;;  %v6551_v6 = vrot.slane %v6542_v24, %v20727_v32  ;;  %v6346_v27 = vadd.f32 %v6230_v7, %v20741_v34  ;;  %v20743_v51 = vld [vmem:[#allocation32_spill] sm:$0xff]  ;;  %v6238_v62 = vpop.f32.mrf.mxu0 }
 0x487   : > { %13501 = vmatpush3.bf16.msra.mxu1 %v14515_v40  ;;  %v20742_v40 = vld [vmem:[#allocation31_spill] sm:$0xff]  ;;  %v13342_v48 = vcombine.low %v6539_v11, %v18402_v38  ;;  %v6348_v21 = vadd.f32 %v6234_v46, %v20745_v0  ;;  %v6316_v4 = vpop.f32.mrf.mxu1  ;;  %13745 = vmatprep.mubr.msk.bf16.mxu0 %vm14901_vm13, %v20512_v23  ;;  %v20746_v7 = vpack.c.bf16 %v18124_v14, %v18121_v8  ;;  %v6422_v38 = vmax.f32 %v6392_v58, 0.0  ;;  %v14519_v8 = vld [vmem:[#allocation14 + $0x98] sm:$0xff]  }
 0x488   : > { %13502 = vmatprep.subr.bf16.mxu1 %v14516_v39  ;;  %v20744_v36 = vcombine.low %v20742_v40, %v20743_v51  ;;  %v18444_v39 = vcombine.low %v6551_v6, %v6565_v37  ;;  %v13344_v24 = vcombine.low %v6541_v49, %v6551_v6  ;;  %v6393_v34 = vadd.f32 %v18313_v25, %v6346_v27  ;;  %v20750_v6 = vld [vmem:[#allocation54_spill] sm:$0xff] }
 0x489   : > { %9764 = vmatprep.mubr.bf16.mxu1 %v20746_v7  ;;  %v9964_v11 = vrot.slane %v13342_v48, %v20727_v32  ;;  %v18449_v0 = vmax.f32 %v6394_v29, 0.0  ;;  %v6318_v46 = vpop.f32.mrf.mxu1  ;;  %v20749_v2 = vrot.slane %v20653_v3, 3  ;;  %v6350_v27 = vadd.f32 %v6313_v57, %v20750_v6  ;;  %v20751_v7 = vld [vmem:[#allocation55_spill] sm:$0xff] }
 0x48a   : > { %v18435_v9 = vrot.slane %v20744_v36, %v20727_v32  ;;  %20747 = vst [vmem:[#allocation25_spill] sm:$0xff] %v18444_v39  ;;  %v9978_v37 = vrot.slane %v13344_v24, %v20727_v32  ;;  %v6423_v49 = vmax.f32 %v6393_v34, 0.0  ;;  %v6349_v39 = vadd.f32 %v6236_v1, %v20751_v7  ;;  %v14520_v36 = vld [vmem:[#allocation14 + $0xd0] sm:$0xff]  }
 0x48b   : > { %20748 = vst [vmem:[#allocation53_spill] sm:$0xff] %v18449_v0  ;;  %13503 = vmatpush3.bf16.msra.mxu1 %v14517_v45  ;;  %v8349_v14 = vsel %vm5978_vm12, %v20749_v2, %v8348_v26  ;;  %v20752_v58 = vcombine.high %v20742_v40, %v20743_v51  ;;  %v6558_v3 = vrot.slane %v18415_v42, %v20727_v32  ;;  %v18469_v48 = vpop.f32.mrf.mxu1  ;;  %v14521_v34 = vld [vmem:[#allocation14 + $0x90] sm:$0xff]  }
 0x48c   : > { %13504 = vmatprep.subr.bf16.mxu1 %v14518_v13  ;;  %v6395_v2 = vadd.f32 %v18301_v5, %v6348_v21  ;;  %v18467_v45 = vadd.f32 %v6238_v62, %v18129_v17  ;;  %v9986_v57 = vcombine.low %v9964_v11, %v9978_v37  ;;  %v9987_v1 = vcombine.high %v9964_v11, %v9978_v37 }
 0x48d   : > { %v18461_v29 = vrot.slane %v20752_v58, %v20727_v32  ;;  %13746 = vmatmul.mubr.msk.bf16.gmra.mxu0 %vm2700_vm6, %v8349_v14  ;;  %v6576_v13 = vcombine.low %v6422_v38, %v6423_v49  ;;  %v6577_v24 = vcombine.high %v6422_v38, %v6423_v49  ;;  %v20753_v40 = vpack.c.bf16 %v18163_v43, %v18160_v59  ;;  %v6323_v51 = vpop.f32.mrf.mxu1 }
 0x48e   : > { %v6578_v42 = vcombine.high %v18449_v0, %v18449_v0  ;;  %v6397_v21 = vadd.f32 %v18354_v61, %v6350_v27  ;;  %v6396_v17 = vadd.f32 %v18313_v25, %v6349_v39  ;;  %v18480_v62 = vadd.f32 %v6316_v4, %v18132_v10  ;;  %v14522_v10 = vld [vmem:[#allocation14 + $0xc8] sm:$0xff]   ;;  %13749 = vmatprep.mubr.msk.bf16.mxu0 %vm14901_vm13, %v20512_v23 }
 0x48f   : > { %9765 = vmatmul.mubr.bf16.gmra.mxu1 %v20753_v40  ;;  %v20755_v38 = vcombine.low %v18384_v31, %v18387_v30  ;;  %v20756_v59 = vcombine.high %v18384_v31, %v18387_v30  ;;  %v6585_v46 = vrot.slane %v6576_v13, %v20727_v32  ;;  %v20757_v14 = vrot.slane %v20686_v52, 3  ;;  %v18493_v6 = vpop.f32.mrf.mxu1  ;;  %v14525_v52 = vld [vmem:[#allocation14 + $0x80] sm:$0xff]  }
 0x490   : > { %20754 = vst [vmem:[#allocation28_spill] sm:$0xff] %v18480_v62  ;;  %13505 = vmatpush3.bf16.msra.mxu1 %v14519_v8  ;;  %v6592_v4 = vrot.slane %v6577_v24, %v20727_v32  ;;  %v6425_v8 = vmax.f32 %v6395_v2, 0.0  ;;  %v6427_v37 = vmax.f32 %v6397_v21, 0.0  ;;  %v6426_v49 = vmax.f32 %v6396_v17, 0.0  ;;  %20758 = vst [vmem:[#allocation84_spill] sm:$0xff] %v18493_v6  ;;  %v18512_v21 = vpop.f32.mrf.mxu0 }
 0x491   : > { %v10434_v11 = vmax.f32 %v20755_v38, %v9986_v57  ;;  %v10435_v43 = vmax.f32 %v20756_v59, %v9987_v1  ;;  %13506 = vmatprep.subr.bf16.mxu1 %v14520_v36  ;;  %v8351_v39 = vsel %vm5978_vm12, %v8348_v26, %v20757_v14  ;;  %v18498_v31 = vrot.slane %v6558_v3, %v20727_v32  ;;  %v6326_v57 = vpop.f32.mrf.mxu1  ;;  %v14523_v1 = vld [vmem:[#allocation14 + $0x88] sm:$0xff]  }
 0x492   : > { %v18501_v27 = vrot.slane %v6585_v46, %v20727_v32  ;;  %v18504_v26 = vrot.slane %v6578_v42, %v20727_v32  ;;  %v6612_v7 = vcombine.high %v6427_v37, %v6427_v37  ;;  %v6610_v58 = vcombine.low %v6425_v8, %v6426_v49  ;;  %v14524_v42 = vld [vmem:[#allocation14 + $0xc0] sm:$0xff]  }
 0x493   : > { %v10498_v30 = vcombine.low %v10434_v11, %v10435_v43  ;;  %v10499_v36 = vcombine.high %v10434_v11, %v10435_v43  ;;  %v6611_v2 = vcombine.high %v6425_v8, %v6426_v49  ;;  %v18518_v51 = vrot.slane %v6427_v37, %v20727_v32  ;;  %v18523_v38 = vpop.f32.mrf.mxu1  ;;  %v20763_v11 = vld [vmem:[#allocation50_spill] sm:$0xff] }
 0x494   : > { %20759 = vst [vmem:[#allocation95_spill] sm:$0xff] %v18504_v26  ;;  %13507 = vmatpush3.bf16.msra.mxu1 %v14521_v34  ;;  %v18515_v17 = vcombine.high %v6592_v4, %v18504_v26  ;;  %v18521_v34 = vrot.slane %v6612_v7, %v20727_v32  ;;  %20762 = vst [vmem:[#allocation80_spill] sm:$0xff] %v18523_v38  ;;  %v20764_v59 = vmov %v20757_v14 }
 0x495   : > { %v10520_v13 = vrot.slane %v10498_v30, %v20727_v32  ;;  %v10527_v24 = vrot.slane %v10499_v36, %v20727_v32  ;;  %13508 = vmatprep.subr.bf16.mxu1 %v14522_v10  ;;  %20760 = vst [vmem:[#allocation65_spill] sm:$0xff] %v18518_v51  ;;  %13750 = vmatmul.mubr.msk.bf16.gmra.mxu0 %vm2700_vm6, %v8351_v39  ;;  %v6331_v30 = vpop.f32.mrf.mxu1 }
 0x496   : > { %20761 = vst [vmem:[#allocation51_spill] sm:$0xff] %v18521_v34  ;;  %v8352_v43 = vsel %vm5978_vm12, %v20764_v59, %v20763_v11  ;;  %13753 = vmatprep.mubr.msk.bf16.mxu0 %vm14901_vm13, %v20512_v23 }
 0x497   : > { %v10528_v46 = vcombine.low %v18435_v9, %v10520_v13  ;;  %v10529_v14 = vcombine.high %v18435_v9, %v10520_v13  ;;  %v10530_v10 = vcombine.low %v18461_v29, %v10527_v24  ;;  %v10531_v4 = vcombine.high %v18461_v29, %v10527_v24  ;;  %v18544_v29 = vpop.f32.mrf.mxu0  ;;  %v18554_v11 = vpop.f32.mrf.mxu1 }
 0x498   : > { %v13358_v8 = vcombine.low %v10520_v13, %v10520_v13  ;;  %v13360_v37 = vcombine.high %v10520_v13, %v10520_v13  ;;  %v13362_v49 = vcombine.low %v10527_v24, %v10527_v24  ;;  %v13364_v39 = vcombine.high %v10527_v24, %v10527_v24  ;;  %13509 = vmatpush3.bf16.msra.mxu1 %v14523_v1 }
 0x499   : > { %v10787_v36 = vrot.slane %v10528_v46, %v20727_v32  ;;  %v10820_v7 = vrot.slane %v10529_v14, %v20727_v32  ;;  %v18539_v9 = vrot.slane %v10530_v10, %v20727_v32  ;;  %v18542_v57 = vrot.slane %v10531_v4, %v20727_v32  ;;  %13510 = vmatprep.subr.bf16.mxu1 %v14524_v42 }
 0x49a   : > { %v10794_v23 = vrot.slane %v13358_v8, %v20727_v32  ;;  %v10827_v13 = vrot.slane %v13360_v37, %v20727_v32  ;;  %v18549_v1 = vrot.slane %v6610_v58, %v20727_v32  ;;  %v18552_v24 = vrot.slane %v6611_v2, %v20727_v32  ;;  %20767 = vst [vmem:[#allocation99_spill] sm:$0xff] %v18554_v11  ;;  %v6334_v2 = vpop.f32.mrf.mxu1 }
 0x49b   : > { %v10795_v59 = vcombine.high %v10787_v36, %v10787_v36  ;;  %v10828_v46 = vcombine.high %v10820_v7, %v10820_v7  ;;  %v18557_v14 = vrot.slane %v13362_v49, %v20727_v32  ;;  %v18560_v10 = vrot.slane %v13364_v39, %v20727_v32  ;;  %v18570_v39 = vpop.f32.mrf.mxu0 }
 0x49c   : > { %20765 = vst [vmem:[#allocation24_spill] sm:$0xff] %v18549_v1  ;;  %20766 = vst [vmem:[#allocation47_spill] sm:$0xff] %v18552_v24  ;;  %v10796_v42 = vcombine.high %v10794_v23, %v10794_v23  ;;  %v10829_v4 = vcombine.high %v10827_v13, %v10827_v13  ;;  %13511 = vmatpush3.bf16.msra.mxu1 %v14525_v52  ;;  %v11420_v37 = vsel %vm2348_vm4, %v10787_v36, -inf  ;;  %v11434_v49 = vsel %vm2348_vm4, %v10794_v23, -inf }
 0x49d   : > { %v11427_v30 = vsel %vm2348_vm4, %v10795_v59, -inf  ;;  %v11470_v40 = vsel %vm2348_vm4, %v10820_v7, -inf  ;;  %v11421_v3 = vrot.slane %v11420_v37, 4  ;;  %v11435_v26 = vrot.slane %v11434_v49, 4  ;;  %13754 = vmatmul.mubr.msk.bf16.gmra.mxu0 %vm2700_vm6, %v8352_v43  ;;  %v18577_v16 = vpop.f32.mrf.mxu0 }
 0x49e   : > { %v11428_v62 = vrot.slane %v11427_v30, 4  ;;  %v11441_v8 = vsel %vm2348_vm4, %v10796_v42, -inf  ;;  %v11471_v52 = vrot.slane %v11470_v40, 4  ;;  %v11477_v2 = vsel %vm2348_vm4, %v10828_v46, -inf }
 0x49f   : > { %v11442_v58 = vrot.slane %v11441_v8, 4  ;;  %v11484_v36 = vsel %vm2348_vm4, %v10827_v13, -inf  ;;  %v11422_v59 = vmax.f32 %v11420_v37, %v11421_v3  ;;  %v11436_v23 = vmax.f32 %v11434_v49, %v11435_v26 }
 0x4a0   : > { %v11429_v0 = vmax.f32 %v11427_v30, %v11428_v62  ;;  %v11478_v54 = vrot.slane %v11477_v2, 4  ;;  %v11472_v20 = vmax.f32 %v11470_v40, %v11471_v52  ;;  %v11485_v15 = vrot.slane %v11484_v36, 4  ;;  %v18579_v30 = vpop.f32.mrf.mxu0 }
 0x4a1   : > { %v11443_v7 = vmax.f32 %v11441_v8, %v11442_v58  ;;  %v11491_v28 = vsel %vm2348_vm4, %v10829_v4, -inf  ;;  %v11423_v42 = vrot.slane %v11422_v59, 2  ;;  %v11437_v43 = vrot.slane %v11436_v23, 2  ;;  %20768 = vst [vmem:[#allocation31_spill] sm:$0xff] %v18579_v30 }
 0x4a2   : > { %v11430_v11 = vrot.slane %v11429_v0, 2  ;;  %v11479_v53 = vmax.f32 %v11477_v2, %v11478_v54  ;;  %v11473_v12 = vrot.slane %v11472_v20, 2  ;;  %v11486_v46 = vmax.f32 %v11484_v36, %v11485_v15  ;;  %v18595_v36 = vpop.f32.mrf.mxu0 }
 0x4a3   : > { %v11444_v19 = vrot.slane %v11443_v7, 2  ;;  %v11492_v38 = vrot.slane %v11491_v28, 4  ;;  %v11424_v13 = vmax.f32 %v11422_v59, %v11423_v42  ;;  %v11438_v62 = vmax.f32 %v11436_v23, %v11437_v43  ;;  %20769 = vst [vmem:[#allocation32_spill] sm:$0xff] %v18595_v36 }
 0x4a4   : > { %v11431_v3 = vmax.f32 %v11429_v0, %v11430_v11  ;;  %v11480_v26 = vrot.slane %v11479_v53, 2  ;;  %v11474_v8 = vmax.f32 %v11472_v20, %v11473_v12  ;;  %v11487_v40 = vrot.slane %v11486_v46, 2 }
 0x4a5   : > { %v11445_v37 = vmax.f32 %v11443_v7, %v11444_v19  ;;  %v11493_v58 = vmax.f32 %v11491_v28, %v11492_v38  ;;  %v11425_v4 = vrot.slane %v11424_v13, 1  ;;  %v11439_v52 = vrot.slane %v11438_v62, 1 }
 0x4a6   : > { %v11432_v49 = vrot.slane %v11431_v3, 1  ;;  %v11481_v50 = vmax.f32 %v11479_v53, %v11480_v26  ;;  %v11475_v54 = vrot.slane %v11474_v8, 1  ;;  %v18581_v2 = vmax.f32 %v11486_v46, %v11487_v40 }
 0x4a7   : > { %v11446_v44 = vrot.slane %v11445_v37, 1  ;;  %v11494_v15 = vrot.slane %v11493_v58, 2  ;;  %v10862_v0 = vcombine.high %v18557_v14, %v18557_v14  ;;  %v10895_v19 = vcombine.high %v18560_v10, %v18560_v10 }
 0x4a8   : > { %v18587_v20 = vmax.f32 %v11424_v13, %v11425_v4  ;;  %v11482_v12 = vrot.slane %v11481_v50, 1  ;;  %v18589_v28 = vmax.f32 %v11431_v3, %v11432_v49  ;;  %v18591_v38 = vmax.f32 %v11438_v62, %v11439_v52  ;;  %v18617_v4 = vpop.f32.mrf.mxu0 }
 0x4a9   : > { %v18593_v11 = vmax.f32 %v11445_v37, %v11446_v44  ;;  %v11495_v53 = vmax.f32 %v11493_v58, %v11494_v15  ;;  %v18597_v59 = vmax.f32 %v11474_v8, %v11475_v54  ;;  %v11519_v23 = vsel %vm2348_vm4, %v18539_v9, -inf  ;;  %20772 = vst [vmem:[#allocation100_spill] sm:$0xff] %v18617_v4 }
 0x4aa   : > { %v20770_v7 = vcombine.high %v18539_v9, %v18539_v9  ;;  %v11533_v43 = vsel %vm2348_vm4, %v18557_v14, -inf  ;;  %v18607_v46 = vmax.f32 %v11481_v50, %v11482_v12  ;;  %v11489_v44 = vrot.slane %v18581_v2, 1 }
 0x4ab   : > { %v11520_v13 = vrot.slane %v11519_v23, 4  ;;  %v11534_v62 = vrot.slane %v11533_v43, 4  ;;  %v11540_v26 = vsel %vm2348_vm4, %v10862_v0, -inf  ;;  %v11568_v37 = vsel %vm2348_vm4, %v18542_v57, -inf }
 0x4ac   : > { %v11526_v42 = vsel %vm2348_vm4, %v20770_v7, -inf  ;;  %v20771_v9 = vcombine.high %v18542_v57, %v18542_v57  ;;  %v11496_v40 = vrot.slane %v11495_v53, 1  ;;  %v11541_v50 = vrot.slane %v11540_v26, 4 }
 0x4ad   : > { %v11527_v3 = vrot.slane %v11526_v42, 4  ;;  %v11521_v58 = vmax.f32 %v11519_v23, %v11520_v13  ;;  %v11535_v49 = vmax.f32 %v11533_v43, %v11534_v62  ;;  %v11569_v52 = vrot.slane %v11568_v37, 4  ;;  %v18622_v43 = vpop.f32.mrf.mxu0 }
 0x4ae   : > { %v11575_v8 = vsel %vm2348_vm4, %v20771_v9, -inf  ;;  %v11582_v15 = vsel %vm2348_vm4, %v18560_v10, -inf  ;;  %v11542_v7 = vmax.f32 %v11540_v26, %v11541_v50  ;;  %v11589_v9 = vsel %vm2348_vm4, %v10895_v19, -inf  ;;  %20773 = vst [vmem:[#allocation54_spill] sm:$0xff] %v18622_v43 }
 0x4af   : > { %v11528_v14 = vmax.f32 %v11526_v42, %v11527_v3  ;;  %v11576_v54 = vrot.slane %v11575_v8, 4  ;;  %v11522_v0 = vrot.slane %v11521_v58, 2  ;;  %v11583_v36 = vrot.slane %v11582_v15, 4 }
 0x4b0   : > { %v11536_v30 = vrot.slane %v11535_v49, 2  ;;  %v11570_v57 = vmax.f32 %v11568_v37, %v11569_v52  ;;  %v11543_v13 = vrot.slane %v11542_v7, 2  ;;  %v11590_v10 = vrot.slane %v11589_v9, 4 }
 0x4b1   : > { %v11529_v12 = vrot.slane %v11528_v14, 2  ;;  %v11577_v60 = vmax.f32 %v11575_v8, %v11576_v54  ;;  %v11523_v23 = vmax.f32 %v11521_v58, %v11522_v0  ;;  %v11584_v3 = vmax.f32 %v11582_v15, %v11583_v36 }
 0x4b2   : > { %v11537_v62 = vmax.f32 %v11535_v49, %v11536_v30  ;;  %v11571_v4 = vrot.slane %v11570_v57, 2  ;;  %v11544_v50 = vmax.f32 %v11542_v7, %v11543_v13  ;;  %v11591_v58 = vmax.f32 %v11589_v9, %v11590_v10  ;;  %v18624_v30 = vpop.f32.mrf.mxu0 }
 0x4b3   : > { %v11530_v42 = vmax.f32 %v11528_v14, %v11529_v12  ;;  %v11578_v61 = vrot.slane %v11577_v60, 2  ;;  %v11524_v6 = vrot.slane %v11523_v23, 1  ;;  %v11585_v47 = vrot.slane %v11584_v3, 2 }
 0x4b4   : > { %v11538_v37 = vrot.slane %v11537_v62, 1  ;;  %v11572_v8 = vmax.f32 %v11570_v57, %v11571_v4  ;;  %vm12373_vm6 = vcmask 1046534   ;;  %v11497_v14 = vmax.f32 %v11495_v53, %v11496_v40  ;;  %v18631_v9 = vpop.f32.mrf.mxu0 }
 0x4b5   : > { %v11531_v26 = vrot.slane %v11530_v42, 1  ;;  %v11579_v19 = vmax.f32 %v11577_v60, %v11578_v61  ;;  %v11545_v52 = vrot.slane %v11544_v50, 1  ;;  %v11586_v54 = vmax.f32 %v11584_v3, %v11585_v47 }
 0x4b6   : > { %v11490_v49 = vmax.f32 %v18581_v2, %v11489_v44  ;;  %v11573_v15 = vrot.slane %v11572_v8, 1  ;;  %v11592_v12 = vrot.slane %v11591_v58, 2  ;;  %v11525_v7 = vmax.f32 %v11523_v23, %v11524_v6 }
 0x4b7   : > { %v11532_v36 = vmax.f32 %v11530_v42, %v11531_v26  ;;  %v11580_v0 = vrot.slane %v11579_v19, 1  ;;  %v11539_v13 = vmax.f32 %v11537_v62, %v11538_v37  ;;  %v11546_v43 = vmax.f32 %v11544_v50, %v11545_v52  ;;  %v18633_v42 = vpop.f32.mrf.mxu1 }
 0x4b8   : > { %v11587_v60 = vrot.slane %v11586_v54, 1  ;;  %v11574_v61 = vmax.f32 %v11572_v8, %v11573_v15  ;;  %v11593_v53 = vmax.f32 %v11591_v58, %v11592_v12  ;;  %v12320_v47 = vcombine.low %v18597_v59, %v18607_v46 }
 0x4b9   : > { %v11581_v4 = vmax.f32 %v11579_v19, %v11580_v0  ;;  %v12317_v40 = vcombine.low %v18587_v20, %v18589_v28  ;;  %v12321_v57 = vcombine.low %v11490_v49, %v11497_v14  ;;  %v12323_v2 = vcombine.low %v11525_v7, %v11532_v36  ;;  %v13547_v28 = vpop.f32.mrf.mxu0  ;;  %v13571_v46 = vpop.f32.mrf.mxu1 }
 0x4ba   : > { %v12324_v44 = vcombine.low %v11539_v13, %v11546_v43  ;;  %v11594_v6 = vrot.slane %v11593_v53, 1  ;;  %v12318_v23 = vcombine.low %v18591_v38, %v18593_v11  ;;  %v12365_v62 = vrot.slane %v12320_v47, 7 }
 0x4bb   : > { %v12326_v3 = vcombine.low %v11574_v61, %v11581_v4  ;;  %v11588_v10 = vmax.f32 %v11586_v54, %v11587_v60  ;;  %v12370_v26 = vrot.slane %v12323_v2, 6  ;;  %v12380_v59 = vrot.slane %v12321_v57, 7  ;;  %v18648_v14 = vpop.f32.mrf.mxu0  ;;  %v18650_v36 = vpop.f32.mrf.mxu1  ;;  %v20776_v57 = vld [vmem:[#allocation33_spill] sm:$0xff]  ;;  %v20777_v2 = vld [vmem:[#allocation34_spill] sm:$0xff] }
 0x4bc   : > { %v6642_v20 = vcombine.high %v18549_v1, %v18518_v51  ;;  %v11595_v43 = vmax.f32 %v11593_v53, %v11594_v6  ;;  %v12367_v50 = vsel %vm12366_vm14, %v12365_v62, %v12317_v40  ;;  %v12383_v37 = vrot.slane %v12324_v44, 6 }
 0x4bd   : > { %v12369_v38 = vsel %vm12368_vm15, %v12365_v62, %v12367_v50  ;;  %v12381_v11 = vsel %vm12366_vm14, %v12380_v59, %v12318_v23  ;;  %v13346_v19 = vcombine.low %v18515_v17, %v18549_v1  ;;  %v12375_v49 = vrot.slane %v12326_v3, 5  ;;  %v13548_v13 = vpop.f32.mrf.mxu0  ;;  %v13572_v60 = vpop.f32.mrf.mxu1 }
 0x4be   : > { %v13348_v58 = vcombine.low %v6642_v20, %v18552_v24  ;;  %v12327_v52 = vcombine.low %v11588_v10, %v11595_v43  ;;  %v12372_v54 = vsel %vm12371_vm5, %v12370_v26, %v12369_v38  ;;  %v12382_v15 = vsel %vm12368_vm15, %v12380_v59, %v12381_v11  ;;  %v20784_v38 = vld [vmem:[#allocation35_spill] sm:$0xff]  ;;  %v20785_v11 = vld [vmem:[#allocation36_spill] sm:$0xff] }
 0x4bf   : > { %v12374_v0 = vsel %vm12373_vm6, %v12370_v26, %v12372_v54  ;;  %v12384_v12 = vsel %vm12371_vm5, %v12383_v37, %v12382_v15  ;;  %v10034_v7 = vrot.slane %v13346_v19, %v20727_v32  ;;  %v20774_v61 = vmax.f32 %v18285_v33, %v18340_v63  ;;  %v20788_v15 = vld [vmem:[#allocation69_spill] sm:$0xff] }
 0x4c0   : > { %v10048_v17 = vrot.slane %v13348_v58, %v20727_v32  ;;  %v12377_v53 = vsel %vm12376_vm7, %v12375_v49, %v12374_v0  ;;  %v12385_v47 = vsel %vm12373_vm6, %v12383_v37, %v12384_v12  ;;  %v12386_v40 = vrot.slane %v12327_v52, 5 }
 0x4c1   : > { %v18662_v4 = vmax.f32 %v20774_v61, %v18410_v22  ;;  %v20778_v44 = vcombine.low %v20776_v57, %v20777_v2  ;;  %v12379_v23 = vsel %vm12378_vm8, %v12375_v49, %v12377_v53  ;;  %v6398_v33 = vadd.f32 %v18301_v5, %v18467_v45 }
 0x4c2   : > { %v10056_v3 = vcombine.low %v10034_v7, %v10048_v17  ;;  %v10057_v62 = vcombine.high %v10034_v7, %v10048_v17  ;;  %v12387_v10 = vsel %vm12376_vm7, %v12386_v40, %v12385_v47  ;;  %12531 = vst [vmem:[%s18674_s23] sm:$0xff] %v12379_v23  ;;  %v6352_v63 = vadd.f32 %v18512_v21, %v18149_v56 }
 0x4c3   : > { %20775 = vst [vmem:[#allocation55_spill] sm:$0xff] %v18662_v4  ;;  %v10577_v6 = vrot.slane %v20778_v44, %v20727_v32  ;;  %v6354_v22 = vadd.f32 %v18544_v29, %v18168_v41  ;;  %v12388_v26 = vsel %vm12378_vm8, %v12386_v40, %v12387_v10  ;;  %v20779_v59 = vcombine.low %v18498_v31, %v18501_v27 }
 0x4c4   : > { %v20780_v28 = vcombine.high %v18498_v31, %v18501_v27  ;;  %v6356_v43 = vadd.f32 %v18469_v48, %v18171_v55  ;;  %12532 = vst [vmem:[%s18674_s23 + $0x8] sm:$0xff] %v12388_v26  ;;  %v6399_v45 = vadd.f32 %v18313_v25, %v6352_v63  ;;  %v6355_v41 = vadd.f32 %v18570_v39, %v18191_v18  ;;  %v20782_v55 = vld [vmem:[#allocation86_spill] sm:$0xff]  ;;  %v20783_v48 = vld [vmem:[#allocation84_spill] sm:$0xff] }
 0x4c5   : > { %v10443_v20 = vmax.f32 %v20779_v59, %v10056_v3  ;;  %v18695_v56 = vadd.f32 %v18301_v5, %v6354_v22  ;;  %v6357_v21 = vadd.f32 %v18577_v16, %v18207_v35  ;;  %v20781_v31 = vcombine.high %v20776_v57, %v20777_v2 }
 0x4c6   : > { %v10444_v46 = vmax.f32 %v20780_v28, %v10057_v62  ;;  %v18707_v37 = vadd.f32 %v20783_v48, %v20782_v55  ;;  %v20786_v19 = vcombine.low %v20784_v38, %v20785_v11  ;;  %v20787_v18 = vcombine.high %v20784_v38, %v20785_v11 }
 0x4c7   : > { %v10584_v27 = vrot.slane %v20781_v31, %v20727_v32  ;;  %v6428_v16 = vmax.f32 %v6398_v33, 0.0  ;;  %v6429_v39 = vmax.f32 %v6399_v45, 0.0  ;;  %v6403_v0 = vadd.f32 %v20788_v15, %v6356_v43 }
 0x4c8   : > { %v10569_v29 = vcombine.low %v10443_v20, %v10444_v46  ;;  %v10570_v50 = vcombine.high %v10443_v20, %v10444_v46  ;;  %v18713_v58 = vrot.slane %v20786_v19, %v20727_v32  ;;  %v18719_v35 = vrot.slane %v20787_v18, %v20727_v32 }
 0x4c9   : > { %v18725_v12 = vcombine.low %v6428_v16, %v6429_v39  ;;  %v18727_v7 = vcombine.high %v6428_v16, %v6429_v39  ;;  %v18730_v17 = vadd.f32 %v18313_v25, %v6355_v41  ;;  %v18733_v13 = vadd.f32 %v18301_v5, %v6357_v21 }
 0x4ca   : > { %v10591_v52 = vrot.slane %v10569_v29, %v20727_v32  ;;  %v10598_v54 = vrot.slane %v10570_v50, %v20727_v32  ;;  %v18745_v63 = vmax.f32 %v6403_v0, 0.0 }
 0x4cc   : > { %v10599_v60 = vcombine.low %v10577_v6, %v10591_v52  ;;  %v10600_v61 = vcombine.high %v10577_v6, %v10591_v52  ;;  %v10601_v53 = vcombine.low %v10584_v27, %v10598_v54  ;;  %v10602_v47 = vcombine.high %v10584_v27, %v10598_v54 }
 0x4cd   : > { %v13366_v40 = vcombine.low %v10591_v52, %v10591_v52  ;;  %v13368_v57 = vcombine.high %v10591_v52, %v10591_v52  ;;  %v13370_v2 = vcombine.low %v10598_v54, %v10598_v54  ;;  %v13372_v44 = vcombine.high %v10598_v54, %v10598_v54 }
 0x4ce   : > { %v10919_v23 = vrot.slane %v10599_v60, %v20727_v32  ;;  %v10952_v3 = vrot.slane %v10600_v61, %v20727_v32  ;;  %v18738_v62 = vrot.slane %v10601_v53, %v20727_v32  ;;  %v18741_v10 = vrot.slane %v10602_v47, %v20727_v32 }
 0x4cf   : > { %v10926_v33 = vrot.slane %v13366_v40, %v20727_v32  ;;  %v10959_v6 = vrot.slane %v13368_v57, %v20727_v32  ;;  %v18749_v20 = vrot.slane %v13370_v2, %v20727_v32  ;;  %v18752_v28 = vrot.slane %v13372_v44, %v20727_v32 }
 0x4d0   : > { %v10927_v26 = vcombine.high %v10919_v23, %v10919_v23  ;;  %v10960_v59 = vcombine.high %v10952_v3, %v10952_v3  ;;  %v10993_v45 = vcombine.high %v18738_v62, %v18738_v62  ;;  %v11026_v41 = vcombine.high %v18741_v10, %v18741_v10 }
 0x4d1   : > { %v10928_v46 = vcombine.high %v10926_v33, %v10926_v33  ;;  %v10961_v43 = vcombine.high %v10959_v6, %v10959_v6  ;;  %v11617_v21 = vsel %vm2348_vm4, %v10919_v23, -inf  ;;  %v11631_v27 = vsel %vm2348_vm4, %v10926_v33, -inf }
 0x4d2   : > { %v11624_v31 = vsel %vm2348_vm4, %v10927_v26, -inf  ;;  %v11666_v29 = vsel %vm2348_vm4, %v10952_v3, -inf  ;;  %v11618_v50 = vrot.slane %v11617_v21, 4  ;;  %v11632_v48 = vrot.slane %v11631_v27, 4 }
 0x4d3   : > { %v11625_v55 = vrot.slane %v11624_v31, 4  ;;  %v11638_v38 = vsel %vm2348_vm4, %v10928_v46, -inf  ;;  %v11667_v19 = vrot.slane %v11666_v29, 4  ;;  %v11673_v18 = vsel %vm2348_vm4, %v10960_v59, -inf }
 0x4d4   : > { %v11639_v11 = vrot.slane %v11638_v38, 4  ;;  %v11680_v16 = vsel %vm2348_vm4, %v10959_v6, -inf  ;;  %v11619_v39 = vmax.f32 %v11617_v21, %v11618_v50  ;;  %v11633_v54 = vmax.f32 %v11631_v27, %v11632_v48 }
 0x4d5   : > { %v11626_v52 = vmax.f32 %v11624_v31, %v11625_v55  ;;  %v11674_v0 = vrot.slane %v11673_v18, 4  ;;  %v11668_v61 = vmax.f32 %v11666_v29, %v11667_v19  ;;  %v11681_v53 = vrot.slane %v11680_v16, 4 }
 0x4d6   : > { %v11640_v60 = vmax.f32 %v11638_v38, %v11639_v11  ;;  %v11687_v47 = vsel %vm2348_vm4, %v10961_v43, -inf  ;;  %v11620_v40 = vrot.slane %v11619_v39, 2  ;;  %v11634_v2 = vrot.slane %v11633_v54, 2 }
 0x4d7   : > { %v11627_v57 = vrot.slane %v11626_v52, 2  ;;  %v11675_v44 = vmax.f32 %v11673_v18, %v11674_v0  ;;  %v11669_v3 = vrot.slane %v11668_v61, 2  ;;  %v11682_v33 = vmax.f32 %v11680_v16, %v11681_v53 }
 0x4d8   : > { %v11641_v23 = vrot.slane %v11640_v60, 2  ;;  %v11688_v26 = vrot.slane %v11687_v47, 4  ;;  %v11621_v59 = vmax.f32 %v11619_v39, %v11620_v40  ;;  %v11635_v6 = vmax.f32 %v11633_v54, %v11634_v2 }
 0x4d9   : > { %v11628_v46 = vmax.f32 %v11626_v52, %v11627_v57  ;;  %v11676_v21 = vrot.slane %v11675_v44, 2  ;;  %v11670_v27 = vmax.f32 %v11668_v61, %v11669_v3  ;;  %v11683_v50 = vrot.slane %v11682_v33, 2 }
 0x4da   : > { %v11642_v31 = vmax.f32 %v11640_v60, %v11641_v23  ;;  %v11689_v55 = vmax.f32 %v11687_v47, %v11688_v26  ;;  %v11622_v29 = vrot.slane %v11621_v59, 1  ;;  %v11636_v38 = vrot.slane %v11635_v6, 1 }
 0x4db   : > { %v11629_v48 = vrot.slane %v11628_v46, 1  ;;  %v11677_v43 = vmax.f32 %v11675_v44, %v11676_v21  ;;  %v11671_v19 = vrot.slane %v11670_v27, 1  ;;  %v11684_v8 = vmax.f32 %v11682_v33, %v11683_v50 }
 0x4dc   : > { %v11643_v11 = vrot.slane %v11642_v31, 1  ;;  %v11690_v18 = vrot.slane %v11689_v55, 2  ;;  %v10994_v16 = vcombine.high %v18749_v20, %v18749_v20  ;;  %v11027_v39 = vcombine.high %v18752_v28, %v18752_v28 }
 0x4dd   : > { %v18770_v52 = vmax.f32 %v11621_v59, %v11622_v29  ;;  %v11678_v54 = vrot.slane %v11677_v43, 1  ;;  %v18772_v0 = vmax.f32 %v11628_v46, %v11629_v48  ;;  %v18774_v60 = vmax.f32 %v11635_v6, %v11636_v38 }
 0x4de   : > { %v18776_v61 = vmax.f32 %v11642_v31, %v11643_v11  ;;  %v11691_v53 = vmax.f32 %v11689_v55, %v11690_v18  ;;  %v18778_v47 = vmax.f32 %v11670_v27, %v11671_v19  ;;  %v11715_v40 = vsel %vm2348_vm4, %v18738_v62, -inf }
 0x4df   : > { %v11722_v57 = vsel %vm2348_vm4, %v10993_v45, -inf  ;;  %v11729_v2 = vsel %vm2348_vm4, %v18749_v20, -inf  ;;  %v11679_v44 = vmax.f32 %v11677_v43, %v11678_v54  ;;  %v11685_v23 = vrot.slane %v11684_v8, 1 }
 0x4e0   : > { %v11716_v3 = vrot.slane %v11715_v40, 4  ;;  %v11723_v33 = vrot.slane %v11722_v57, 4  ;;  %v11730_v26 = vrot.slane %v11729_v2, 4  ;;  %v11736_v59 = vsel %vm2348_vm4, %v10994_v16, -inf }
 0x4e1   : > { %v11764_v46 = vsel %vm2348_vm4, %v18741_v10, -inf  ;;  %v11771_v62 = vsel %vm2348_vm4, %v11026_v41, -inf  ;;  %v11692_v6 = vrot.slane %v11691_v53, 1  ;;  %v11737_v31 = vrot.slane %v11736_v59, 4 }
 0x4e2   : > { %v11717_v45 = vmax.f32 %v11715_v40, %v11716_v3  ;;  %v11724_v21 = vmax.f32 %v11722_v57, %v11723_v33  ;;  %v11731_v20 = vmax.f32 %v11729_v2, %v11730_v26  ;;  %v11765_v27 = vrot.slane %v11764_v46, 4 }
 0x4e3   : > { %v11772_v50 = vrot.slane %v11771_v62, 4  ;;  %v11778_v55 = vsel %vm2348_vm4, %v18752_v28, -inf  ;;  %v11738_v38 = vmax.f32 %v11736_v59, %v11737_v31  ;;  %v11785_v10 = vsel %vm2348_vm4, %v11027_v39, -inf }
 0x4e4   : > { %v11718_v29 = vrot.slane %v11717_v45, 2  ;;  %v11725_v48 = vrot.slane %v11724_v21, 2  ;;  %v11779_v43 = vrot.slane %v11778_v55, 4  ;;  %v11732_v11 = vrot.slane %v11731_v20, 2 }
 0x4e5   : > { %v11766_v19 = vmax.f32 %v11764_v46, %v11765_v27  ;;  %v11773_v18 = vmax.f32 %v11771_v62, %v11772_v50  ;;  %v11739_v54 = vrot.slane %v11738_v38, 2  ;;  %v11786_v33 = vrot.slane %v11785_v10, 4 }
 0x4e6   : > { %v11719_v41 = vmax.f32 %v11717_v45, %v11718_v29  ;;  %v11726_v16 = vmax.f32 %v11724_v21, %v11725_v48  ;;  %v11780_v40 = vmax.f32 %v11778_v55, %v11779_v43  ;;  %v11733_v57 = vmax.f32 %v11731_v20, %v11732_v11 }
 0x4e7   : > { %v11767_v2 = vrot.slane %v11766_v19, 2  ;;  %v11774_v3 = vrot.slane %v11773_v18, 2  ;;  %v11740_v28 = vmax.f32 %v11738_v38, %v11739_v54  ;;  %v11787_v24 = vmax.f32 %v11785_v10, %v11786_v33 }
 0x4e8   : > { %v11720_v26 = vrot.slane %v11719_v41, 1  ;;  %v11727_v49 = vrot.slane %v11726_v16, 1  ;;  %v11781_v22 = vrot.slane %v11780_v40, 2  ;;  %v11734_v34 = vrot.slane %v11733_v57, 1 }
 0x4e9   : > { %v11768_v59 = vmax.f32 %v11766_v19, %v11767_v2  ;;  %v11775_v31 = vmax.f32 %v11773_v18, %v11774_v3  ;;  %v11693_v46 = vmax.f32 %v11691_v53, %v11692_v6  ;;  %v11741_v27 = vrot.slane %v11740_v28, 1 }
 0x4ea   : > { %v11728_v62 = vmax.f32 %v11726_v16, %v11727_v49  ;;  %v11782_v39 = vmax.f32 %v11780_v40, %v11781_v22  ;;  %v11686_v45 = vmax.f32 %v11684_v8, %v11685_v23  ;;  %v11788_v55 = vrot.slane %v11787_v24, 2 }
 0x4eb   : > { %v11769_v21 = vrot.slane %v11768_v59, 1  ;;  %v11776_v50 = vrot.slane %v11775_v31, 1  ;;  %v11721_v20 = vmax.f32 %v11719_v41, %v11720_v26  ;;  %v11735_v29 = vmax.f32 %v11733_v57, %v11734_v34 }
 0x4ec   : > { %v11742_v48 = vmax.f32 %v11740_v28, %v11741_v27  ;;  %v11783_v43 = vrot.slane %v11782_v39, 1  ;;  %v11789_v38 = vmax.f32 %v11787_v24, %v11788_v55  ;;  %v12332_v54 = vcombine.low %v18778_v47, %v11679_v44  ;;  %v18821_v28 = vpop.f32.mrf.mxu0 }
 0x4ed   : > { %v11770_v11 = vmax.f32 %v11768_v59, %v11769_v21  ;;  %v11777_v1 = vmax.f32 %v11775_v31, %v11776_v50  ;;  %v12329_v19 = vcombine.low %v18770_v52, %v18772_v0  ;;  %v12333_v53 = vcombine.low %v11686_v45, %v11693_v46  ;;  %v18823_v59 = vpop.f32.mrf.mxu1 }
 0x4ee   : > { %v12335_v49 = vcombine.low %v11721_v20, %v11728_v62  ;;  %v12336_v6 = vcombine.low %v11735_v29, %v11742_v48  ;;  %v11790_v22 = vrot.slane %v11789_v38, 1  ;;  %v12407_v23 = vrot.slane %v12332_v54, 7 }
 0x4ef   : > { %v12338_v8 = vcombine.low %v11770_v11, %v11777_v1  ;;  %v6653_v18 = vrot.slane %v18725_v12, %v20727_v32  ;;  %v11784_v34 = vmax.f32 %v11782_v39, %v11783_v43  ;;  %v12330_v10 = vcombine.low %v18774_v60, %v18776_v61  ;;  %v13551_v43 = vpop.f32.mrf.mxu0  ;;  %v13575_v11 = vpop.f32.mrf.mxu1 }
 0x4f0   : > { %v12416_v41 = vrot.slane %v12333_v53, 7  ;;  %v6660_v24 = vrot.slane %v18727_v7, %v20727_v32  ;;  %v11791_v47 = vmax.f32 %v11789_v38, %v11790_v22  ;;  %v12408_v52 = vsel %vm12366_vm14, %v12407_v23, %v12329_v19  ;;  %v20794_v38 = vld [vmem:[#allocation38_spill] sm:$0xff] }
 0x4f1   : > { %v12410_v0 = vrot.slane %v12335_v49, 6  ;;  %v18806_v44 = vrot.slane %v6653_v18, %v20727_v32  ;;  %v12409_v1 = vsel %vm12368_vm15, %v12407_v23, %v12408_v52  ;;  %v12419_v12 = vrot.slane %v12336_v6, 6  ;;  %v20796_v49 = vld [vmem:[#allocation106_spill] sm:$0xff]  ;;  %v20797_v6 = vld [vmem:[#allocation31_spill] sm:$0xff] }
 0x4f2   : > { %v12417_v16 = vsel %vm12366_vm14, %v12416_v41, %v12330_v10  ;;  %v18811_v40 = vrot.slane %v6660_v24, %v20727_v32  ;;  %v12339_v60 = vcombine.low %v11784_v34, %v11791_v47  ;;  %v12413_v57 = vrot.slane %v12338_v8, 5  ;;  %v20798_v8 = vld [vmem:[#allocation89_spill] sm:$0xff]  ;;  %v20814_v11 = vld [vmem:[#allocation90_spill] sm:$0xff] }
 0x4f3   : > { %v12411_v61 = vsel %vm12371_vm5, %v12410_v0, %v12409_v1  ;;  %v12418_v7 = vsel %vm12368_vm15, %v12416_v41, %v12417_v16  ;;  %v6406_v27 = vadd.f32 %v20788_v15, %v18707_v37  ;;  %v6681_v45 = vcombine.high %v18745_v63, %v18745_v63  ;;  %v20793_v37 = vld [vmem:[#allocation37_spill] sm:$0xff]  ;;  %v18868_v1 = vpop.f32.mrf.mxu1 }
 0x4f4   : > { %v12412_v2 = vsel %vm12373_vm6, %v12410_v0, %v12411_v61  ;;  %v12420_v3 = vsel %vm12371_vm5, %v12419_v12, %v12418_v7  ;;  %v10091_v33 = vcombine.low %v18806_v44, %v18811_v40  ;;  %v10092_v26 = vcombine.high %v18806_v44, %v18811_v40  ;;  %v18866_v0 = vpop.f32.mrf.mxu0  ;;  %v20806_v61 = vld [vmem:[#allocation77_spill] sm:$0xff] }
 0x4f5   : > { %v12414_v31 = vsel %vm12376_vm7, %v12413_v57, %v12412_v2  ;;  %v12421_v46 = vsel %vm12373_vm6, %v12419_v12, %v12420_v3  ;;  %v12422_v62 = vrot.slane %v12339_v60, 5  ;;  %v20789_v21 = vmax.f32 %v18730_v17, 0.0  ;;  %v20800_v17 = vld [vmem:[#allocation71_spill] sm:$0xff]  ;;  %v20805_v60 = vld [vmem:[#allocation85_spill] sm:$0xff] }
 0x4f6   : > { %v12415_v39 = vsel %vm12378_vm8, %v12413_v57, %v12414_v31  ;;  %v20790_v50 = vmax.f32 %v18695_v56, 0.0  ;;  %v20795_v54 = vcombine.low %v20793_v37, %v20794_v38  ;;  %v6358_v22 = vadd.f32 %v20797_v6, %v20796_v49  ;;  %v20819_v6 = vld [vmem:[#allocation57_spill] sm:$0xff] }
 0x4f7   : > { %v20791_v20 = vmov %v20789_v21  ;;  %v12423_v53 = vsel %vm12376_vm7, %v12422_v62, %v12421_v46  ;;  %12536 = vst [vmem:[%s18674_s23 + $0x1c] sm:$0xff] %v12415_v39  ;;  %v20799_v23 = vrot.slane %v20798_v8, 1  ;;  %v20801_v18 = vrot.slane %v20800_v17, 1  ;;  %v13552_v46 = vpop.f32.mrf.mxu0 }
 0x4f8   : > { %v6679_v55 = vcombine.low %v20790_v50, %v20789_v21  ;;  %v20792_v29 = vmov %v20790_v50  ;;  %v18844_v19 = vrot.slane %v20795_v54, %v20727_v32  ;;  %v12424_v34 = vsel %vm12378_vm8, %v12422_v62, %v12423_v53  ;;  %v13576_v62 = vpop.f32.mrf.mxu1  ;;  %v20810_v21 = vld [vmem:[#allocation107_spill] sm:$0xff]  ;;  %v20811_v50 = vld [vmem:[#allocation32_spill] sm:$0xff] }
 0x4f9   : > { %v6680_v48 = vcombine.high %v20792_v29, %v20791_v20  ;;  %v9057_v56 = vsel %vm3251_vm1, %v20801_v18, %v20799_v23  ;;  %v18858_v10 = vrot.slane %v18745_v63, %v20727_v32  ;;  %v20803_v24 = vrot.slane %v20798_v8, 2  ;;  %12537 = vst [vmem:[%s18674_s23 + $0x24] sm:$0xff] %v12424_v34  ;;  %v20812_v20 = vld [vmem:[#allocation108_spill] sm:$0xff]  ;;  %v20820_v8 = vld [vmem:[#allocation87_spill] sm:$0xff]  ;;  %v18899_v18 = vpop.f32.mrf.mxu0 }
 0x4fa   : > { %v6688_v41 = vrot.slane %v6679_v55, %v20727_v32  ;;  %v20804_v47 = vrot.slane %v20800_v17, 2  ;;  %v6434_v16 = vmax.f32 %v18733_v13, 0.0  ;;  %v6405_v12 = vadd.f32 %v18313_v25, %v6358_v22  ;;  %v20813_v29 = vld [vmem:[#allocation80_spill] sm:$0xff] }
 0x4fb   : > { %20802 = vst [vmem:[#allocation50_spill] sm:$0xff] %v18858_v10  ;;  %v9143_v63 = vmax.f32 %v20800_v17, %v9057_v56  ;;  %v9374_v57 = vmax.f32 %v20806_v61, %v20805_v60  ;;  %v18877_v7 = vrot.slane %v6681_v45, %v20727_v32  ;;  %v18880_v2 = vrot.slane %v6680_v48, %v20727_v32  ;;  %v20816_v48 = vld [vmem:[#allocation74_spill] sm:$0xff]  ;;  %v20821_v23 = vld [vmem:[#allocation100_spill] sm:$0xff]  ;;  %v18901_v56 = vpop.f32.mrf.mxu1  ;;  %v20823_v61 = vld [vmem:[#allocation93_spill] sm:$0xff]  ;;  %v13555_v62 = vpop.f32.mrf.mxu0 }
 0x4fc   : > { %v9258_v52 = vsel %vm4648_vm2, %v20804_v47, %v20803_v24  ;;  %v6710_v3 = vcombine.high %v6688_v41, %v18858_v10  ;;  %v18883_v31 = vmax.f32 %v6406_v27, 0.0  ;;  %v6435_v13 = vmax.f32 %v6405_v12, 0.0  ;;  %v20818_v27 = vld [vmem:[#allocation81_spill] sm:$0xff]  ;;  %20822 = vst [vmem:[#allocation84_spill] sm:$0xff] %v18901_v56  ;;  %v20834_v62 = vld [vmem:[#allocation114_spill] sm:$0xff] }
 0x4fd   : > { %20807 = vst [vmem:[#allocation33_spill] sm:$0xff] %v18877_v7  ;;  %20808 = vst [vmem:[#allocation34_spill] sm:$0xff] %v18880_v2  ;;  %v9344_v39 = vmax.f32 %v9143_v63, %v9258_v52  ;;  %v6360_v55 = vadd.f32 %v20811_v50, %v20810_v21  ;;  %v6362_v43 = vadd.f32 %v20813_v29, %v20812_v20  ;;  %v20815_v54 = vrot.slane %v20814_v11, 2  ;;  %v13579_v21 = vpop.f32.mrf.mxu1  ;;  %v18919_v29 = vpop.f32.mrf.mxu0 }
 0x4fe   : > { %20809 = vst [vmem:[#allocation86_spill] sm:$0xff] %v18883_v31  ;;  %v13350_v45 = vcombine.low %v6710_v3, %v18880_v2  ;;  %v20817_v53 = vrot.slane %v20816_v48, 2  ;;  %v9373_v22 = vmax.f32 %v20819_v6, %v20818_v27  ;;  %v6361_v17 = vadd.f32 %v20821_v23, %v20820_v8  ;;  %20826 = vst [vmem:[#allocation36_spill] sm:$0xff] %v18919_v29  ;;  %v20829_v23 = vld [vmem:[#allocation111_spill] sm:$0xff] }
 0x4ff   : > { %v6713_v34 = vcombine.low %v6434_v16, %v6435_v13  ;;  %v6714_v41 = vcombine.high %v6434_v16, %v6435_v13  ;;  %v9379_v24 = vmax.f32 %v20805_v60, %v9344_v39  ;;  %v9409_v47 = vmax.f32 %v9374_v57, %v9344_v39 }
 0x500   : > { %v9255_v49 = vsel %vm4648_vm2, %v20817_v53, %v20815_v54  ;;  %v6736_v52 = vrot.slane %v18883_v31, %v20727_v32  ;;  %v6407_v12 = vadd.f32 %v18301_v5, %v6360_v55  ;;  %v6409_v63 = vadd.f32 %v20788_v15, %v6362_v43  ;;  %v18921_v43 = vpop.f32.mrf.mxu1 }
 0x501   : > { %v20824_v3 = vmax.f32 %v20816_v48, %v20823_v61  ;;  %v6712_v50 = vcombine.high %v18880_v2, %v18877_v7  ;;  %v6722_v16 = vrot.slane %v6713_v34, %v20727_v32  ;;  %v9429_v60 = vpack.c.bf16 %v9379_v24, %v9409_v47  ;;  %20827 = vst [vmem:[#allocation37_spill] sm:$0xff] %v18921_v43 }
 0x502   : > { %v6408_v57 = vadd.f32 %v18313_v25, %v6361_v17  ;;  %v6729_v13 = vrot.slane %v6714_v41, %v20727_v32  ;;  %v18916_v39 = vmax.f32 %v6409_v63, 0.0  ;;  %v6437_v48 = vmax.f32 %v6407_v12, 0.0  ;;  %v20830_v17 = vld [vmem:[#allocation54_spill] sm:$0xff]  ;;  %v13580_v34 = vpop.f32.mrf.mxu1  ;;  %v20832_v63 = vld [vmem:[#allocation99_spill] sm:$0xff] }
 0x503   : > { %v9343_v46 = vmax.f32 %v20824_v3, %v9255_v49  ;;  %v18923_v11 = vcombine.low %v6722_v16, %v6736_v52  ;;  %v13352_v54 = vcombine.low %v6712_v50, %v6722_v16  ;;  %9772 = vmatprep.mubr.bf16.mxu1 %v9429_v60  ;;  %v10104_v49 = vrot.slane %v13350_v45, %v20727_v32  ;;  %v20831_v52 = vld [vmem:[#allocation112_spill] sm:$0xff] }
 0x504   : > { %20825 = vst [vmem:[#allocation35_spill] sm:$0xff] %v18916_v39  ;;  %v6438_v53 = vmax.f32 %v6408_v57, 0.0  ;;  %v6749_v6 = vcombine.high %v18916_v39, %v18916_v39  ;;  %v6365_v61 = vadd.f32 %v20832_v63, %v20831_v52  ;;  %v20833_v45 = vcombine.high %v20793_v37, %v20794_v38  ;;  %v18947_v16 = vpop.f32.mrf.mxu1 }
 0x505   : > { %v9378_v55 = vmax.f32 %v20818_v27, %v9343_v46  ;;  %v9408_v20 = vmax.f32 %v9373_v22, %v9343_v46  ;;  %20828 = vst [vmem:[#allocation38_spill] sm:$0xff] %v18923_v11  ;;  %v6363_v27 = vadd.f32 %v20830_v17, %v20829_v23  ;;  %v13556_v22 = vpop.f32.mrf.mxu0  ;;  %v10118_v41 = vrot.slane %v13352_v54, %v20727_v32  ;;  %v20840_v23 = vld [vmem:[#allocation41_spill] sm:$0xff] }
 0x506   : > { %v6747_v24 = vcombine.low %v6437_v48, %v6438_v53  ;;  %v6748_v47 = vcombine.high %v6437_v48, %v6438_v53  ;;  %v18937_v12 = vrot.slane %v20833_v45, %v20727_v32  ;;  %v18940_v3 = vrot.slane %v6729_v13, %v20727_v32  ;;  %20836 = vst [vmem:[#allocation31_spill] sm:$0xff] %v18947_v16 }
 0x507   : > { %v9428_v8 = vpack.c.bf16 %v9378_v55, %v9408_v20  ;;  %v6410_v46 = vadd.f32 %v18301_v5, %v6363_v27  ;;  %v6364_v21 = vadd.f32 %v18624_v30, %v20834_v62  ;;  %v18945_v50 = vpop.f32.mrf.mxu0  ;;  %v10126_v60 = vcombine.low %v10104_v49, %v10118_v41  ;;  %v13583_v30 = vpop.f32.mrf.mxu1 }
 0x508   : > { %20835 = vst [vmem:[#allocation106_spill] sm:$0xff] %v18945_v50  ;;  %v10127_v57 = vcombine.high %v10104_v49, %v10118_v41  ;;  %v6756_v55 = vrot.slane %v6747_v24, %v20727_v32  ;;  %v6763_v37 = vrot.slane %v6748_v47, %v20727_v32  ;;  %v18952_v38 = vrot.slane %v6749_v6, %v20727_v32  ;;  %v20838_v6 = vld [vmem:[#allocation40_spill] sm:$0xff]  ;;  %v20844_v24 = vld [vmem:[#allocation45_spill] sm:$0xff] }
 0x509   : > { %9773 = vmatmul.mubr.bf16.gmra.mxu1 %v9428_v8  ;;  %v6440_v13 = vmax.f32 %v6410_v46, 0.0  ;;  %v6412_v20 = vadd.f32 %v20788_v15, %v6365_v61  ;;  %v6411_v5 = vadd.f32 %v18313_v25, %v6364_v21  ;;  %v13559_v54 = vpop.f32.mrf.mxu0  ;;  %v10452_v48 = vmax.f32 %v10091_v33, %v10126_v60  ;;  %v20842_v41 = vld [vmem:[#allocation44_spill] sm:$0xff] }
 0x50a   : > { %20837 = vst [vmem:[#allocation89_spill] sm:$0xff] %v18952_v38  ;;  %v10453_v53 = vmax.f32 %v10092_v26, %v10127_v57  ;;  %v18963_v49 = vrot.slane %v6756_v55, %v20727_v32  ;;  %v20839_v8 = vrot.slane %v20838_v6, 2  ;;  %v20841_v17 = vrot.slane %v20840_v23, 2  ;;  %v18980_v26 = vpop.f32.mrf.mxu1  ;;  %v20848_v60 = vld [vmem:[#allocation60_spill] sm:$0xff]  ;;  %v20850_v55 = vld [vmem:[#allocation59_spill] sm:$0xff] }
 0x50b   : > { %v18971_v25 = vcombine.high %v6763_v37, %v18952_v38  ;;  %v6442_v22 = vmax.f32 %v6412_v20, 0.0  ;;  %v6441_v34 = vmax.f32 %v6411_v5, 0.0  ;;  %v20843_v33 = vrot.slane %v20842_v41, 2  ;;  %v18978_v40 = vpop.f32.mrf.mxu0  ;;  %20847 = vst [vmem:[#allocation85_spill] sm:$0xff] %v18980_v26  ;;  %v20853_v6 = vld [vmem:[#allocation52_spill] sm:$0xff] }
 0x50c   : > { %v9159_v27 = vsel %vm4648_vm2, %v20841_v17, %v20839_v8  ;;  %v20845_v47 = vrot.slane %v20844_v24, 2  ;;  %20846 = vst [vmem:[#allocation71_spill] sm:$0xff] %v18978_v40  ;;  %v10640_v52 = vcombine.low %v10452_v48, %v10453_v53  ;;  %v10641_v63 = vcombine.high %v10452_v48, %v10453_v53  ;;  %v13584_v54 = vpop.f32.mrf.mxu1 }
 0x50d   : > { %v6783_v46 = vcombine.high %v6442_v22, %v6442_v22  ;;  %v6781_v62 = vcombine.low %v6440_v13, %v6441_v34  ;;  %v6782_v21 = vcombine.high %v6440_v13, %v6441_v34  ;;  %v20849_v57 = vrot.slane %v20848_v60, 2  ;;  %v13560_v5 = vpop.f32.mrf.mxu0 }
 0x50e   : > { %v9174_v44 = vsel %vm4648_vm2, %v20845_v47, %v20843_v33  ;;  %v20851_v37 = vrot.slane %v20850_v55, 2  ;;  %v10662_v30 = vrot.slane %v10640_v52, %v20727_v32  ;;  %v10669_v48 = vrot.slane %v10641_v63, %v20727_v32  ;;  %v20858_v33 = vld [vmem:[#allocation58_spill] sm:$0xff]  ;;  %v19017_v63 = vpop.f32.mrf.mxu1 }
 0x50f   : > { %v18994_v53 = vrot.slane %v6442_v22, %v20727_v32  ;;  %v20854_v8 = vmax.f32 %v20840_v23, %v20853_v6  ;;  %v19002_v13 = vrot.slane %v6783_v46, %v20727_v32  ;;  %v19005_v34 = vrot.slane %v6781_v62, %v20727_v32  ;;  %v19015_v22 = vpop.f32.mrf.mxu0  ;;  %20861 = vst [vmem:[#allocation90_spill] sm:$0xff] %v19017_v63 }
 0x510   : > { %v9189_v20 = vsel %vm4648_vm2, %v20851_v37, %v20849_v57  ;;  %v19008_v41 = vrot.slane %v6782_v21, %v20727_v32  ;;  %v20859_v47 = vmax.f32 %v20844_v24, %v20858_v33  ;;  %20860 = vst [vmem:[#allocation80_spill] sm:$0xff] %v19015_v22  ;;  %v10670_v23 = vcombine.low %v18713_v58, %v10662_v30  ;;  %v13587_v24 = vpop.f32.mrf.mxu1 }
 0x511   : > { %20852 = vst [vmem:[#allocation77_spill] sm:$0xff] %v18994_v53  ;;  %v18999_v17 = vmax.f32 %v20854_v8, %v9159_v27  ;;  %20855 = vst [vmem:[#allocation107_spill] sm:$0xff] %v19002_v13  ;;  %v10671_v27 = vcombine.high %v18713_v58, %v10662_v30  ;;  %v10672_v46 = vcombine.low %v18719_v35, %v10669_v48  ;;  %v13563_v5 = vpop.f32.mrf.mxu0 }
 0x512   : > { %20856 = vst [vmem:[#allocation32_spill] sm:$0xff] %v19005_v34  ;;  %20857 = vst [vmem:[#allocation108_spill] sm:$0xff] %v19008_v41  ;;  %v19013_v52 = vmax.f32 %v20859_v47, %v9174_v44  ;;  %v10673_v62 = vcombine.high %v18719_v35, %v10669_v48  ;;  %v13374_v60 = vcombine.low %v10662_v30, %v10662_v30 }
 0x513   : > { %v13376_v21 = vcombine.high %v10662_v30, %v10662_v30  ;;  %v13378_v57 = vcombine.low %v10669_v48, %v10669_v48  ;;  %v13380_v37 = vcombine.high %v10669_v48, %v10669_v48  ;;  %v11051_v44 = vrot.slane %v10670_v23, %v20727_v32  ;;  %v20862_v48 = vld [vmem:[#allocation66_spill] sm:$0xff]  ;;  %v19041_v23 = vpop.f32.mrf.mxu0 }
 0x514   : > { %v11084_v54 = vrot.slane %v10671_v27, %v20727_v32  ;;  %v19026_v6 = vrot.slane %v10672_v46, %v20727_v32  ;;  %v19029_v8 = vrot.slane %v10673_v62, %v20727_v32  ;;  %v11058_v58 = vrot.slane %v13374_v60, %v20727_v32  ;;  %20864 = vst [vmem:[#allocation74_spill] sm:$0xff] %v19041_v23  ;;  %v19043_v27 = vpop.f32.mrf.mxu1 }
 0x515   : > { %v11091_v35 = vrot.slane %v13376_v21, %v20727_v32  ;;  %v19034_v30 = vrot.slane %v13378_v57, %v20727_v32  ;;  %v20863_v33 = vmax.f32 %v20850_v55, %v20862_v48  ;;  %20865 = vst [vmem:[#allocation81_spill] sm:$0xff] %v19043_v27  ;;  %v11059_v46 = vcombine.high %v11051_v44, %v11051_v44 }
 0x516   : > { %v11092_v5 = vcombine.high %v11084_v54, %v11084_v54  ;;  %v19048_v60 = vrot.slane %v13380_v37, %v20727_v32  ;;  %v11060_v21 = vcombine.high %v11058_v58, %v11058_v58  ;;  %v13588_v48 = vpop.f32.mrf.mxu1  ;;  %v11827_v61 = vsel %vm2348_vm4, %v11058_v58, -inf }
 0x517   : > { %v19039_v47 = vmax.f32 %v20863_v33, %v9189_v20  ;;  %v11093_v57 = vcombine.high %v11091_v35, %v11091_v35  ;;  %v13564_v20 = vpop.f32.mrf.mxu0  ;;  %v11813_v33 = vsel %vm2348_vm4, %v11051_v44, -inf  ;;  %v11820_v45 = vsel %vm2348_vm4, %v11059_v46, -inf }
 0x518   : > { %v11862_v62 = vsel %vm2348_vm4, %v11084_v54, -inf  ;;  %v11814_v37 = vrot.slane %v11813_v33, 4  ;;  %v11821_v15 = vrot.slane %v11820_v45, 4  ;;  %v11828_v38 = vrot.slane %v11827_v61, 4  ;;  %v19061_v24 = vpop.f32.mrf.mxu1 }
 0x519   : > { %v11834_v11 = vsel %vm2348_vm4, %v11060_v21, -inf  ;;  %v19059_v10 = vpop.f32.mrf.mxu0  ;;  %20867 = vst [vmem:[#allocation87_spill] sm:$0xff] %v19061_v24  ;;  %v11863_v20 = vrot.slane %v11862_v62, 4  ;;  %v11869_v48 = vsel %vm2348_vm4, %v11092_v5, -inf  ;;  %v11876_v44 = vsel %vm2348_vm4, %v11091_v35, -inf }
 0x51a   : > { %20866 = vst [vmem:[#allocation57_spill] sm:$0xff] %v19059_v10  ;;  %v11835_v55 = vrot.slane %v11834_v11, 4  ;;  %v11815_v46 = vmax.f32 %v11813_v33, %v11814_v37  ;;  %v11822_v39 = vmax.f32 %v11820_v45, %v11821_v15  ;;  %v11829_v58 = vmax.f32 %v11827_v61, %v11828_v38  ;;  %v13619_v7 = vpop.f32.mrf.mxu1 }
 0x51b   : > { %v11870_v2 = vrot.slane %v11869_v48, 4  ;;  %v13595_v54 = vpop.f32.mrf.mxu0  ;;  %v11864_v31 = vmax.f32 %v11862_v62, %v11863_v20  ;;  %v11877_v27 = vrot.slane %v11876_v44, 4  ;;  %v11883_v21 = vsel %vm2348_vm4, %v11093_v57, -inf }
 0x51c   : > { %v11836_v51 = vmax.f32 %v11834_v11, %v11835_v55  ;;  %v11816_v23 = vrot.slane %v11815_v46, 2  ;;  %v11823_v10 = vrot.slane %v11822_v39, 2  ;;  %v11830_v24 = vrot.slane %v11829_v58, 2  ;;  %v19068_v5 = vpop.f32.mrf.mxu1 }
 0x51d   : > { %v11871_v63 = vmax.f32 %v11869_v48, %v11870_v2  ;;  %v19066_v22 = vpop.f32.mrf.mxu0  ;;  %20869 = vst [vmem:[#allocation93_spill] sm:$0xff] %v19068_v5  ;;  %v11865_v33 = vrot.slane %v11864_v31, 2  ;;  %v11878_v15 = vmax.f32 %v11876_v44, %v11877_v27  ;;  %v11884_v38 = vrot.slane %v11883_v21, 4 }
 0x51e   : > { %20868 = vst [vmem:[#allocation100_spill] sm:$0xff] %v19066_v22  ;;  %v11837_v35 = vrot.slane %v11836_v51, 2  ;;  %v11817_v61 = vmax.f32 %v11815_v46, %v11816_v23  ;;  %v11824_v45 = vmax.f32 %v11822_v39, %v11823_v10  ;;  %v11831_v7 = vmax.f32 %v11829_v58, %v11830_v24  ;;  %v13620_v55 = vpop.f32.mrf.mxu1 }
 0x51f   : > { %v11872_v11 = vrot.slane %v11871_v63, 2  ;;  %v13596_v62 = vpop.f32.mrf.mxu0  ;;  %v11866_v57 = vmax.f32 %v11864_v31, %v11865_v33  ;;  %v11879_v20 = vrot.slane %v11878_v15, 2  ;;  %v11885_v54 = vmax.f32 %v11883_v21, %v11884_v38 }
 0x520   : > { %v11838_v37 = vmax.f32 %v11836_v51, %v11837_v35  ;;  %v11818_v26 = vrot.slane %v11817_v61, 1  ;;  %v11825_v2 = vrot.slane %v11824_v45, 1  ;;  %v11832_v48 = vrot.slane %v11831_v7, 1  ;;  %v19072_v5 = vpop.f32.mrf.mxu1 }
 0x521   : > { %v11873_v22 = vmax.f32 %v11871_v63, %v11872_v11  ;;  %v19070_v40 = vpop.f32.mrf.mxu0  ;;  %20871 = vst [vmem:[#allocation54_spill] sm:$0xff] %v19072_v5  ;;  %v11867_v44 = vrot.slane %v11866_v57, 1  ;;  %v11880_v23 = vmax.f32 %v11878_v15, %v11879_v20  ;;  %v11886_v10 = vrot.slane %v11885_v54, 2 }
 0x522   : > { %20870 = vst [vmem:[#allocation111_spill] sm:$0xff] %v19070_v40  ;;  %v11839_v27 = vrot.slane %v11838_v37, 1  ;;  %v11159_v39 = vcombine.high %v19048_v60, %v19048_v60  ;;  %v19076_v24 = vmax.f32 %v11817_v61, %v11818_v26  ;;  %v19078_v51 = vmax.f32 %v11824_v45, %v11825_v2  ;;  %v13623_v58 = vpop.f32.mrf.mxu1 }
 0x523   : > { %v11874_v31 = vrot.slane %v11873_v22, 1  ;;  %v13599_v46 = vpop.f32.mrf.mxu0  ;;  %v19080_v21 = vmax.f32 %v11831_v7, %v11832_v48  ;;  %v11881_v35 = vrot.slane %v11880_v23, 1  ;;  %v11887_v33 = vmax.f32 %v11885_v54, %v11886_v10 }
 0x524   : > { %v19082_v63 = vmax.f32 %v11838_v37, %v11839_v27  ;;  %v19084_v38 = vmax.f32 %v11866_v57, %v11867_v44  ;;  %v11911_v15 = vsel %vm2348_vm4, %v19026_v6, -inf  ;;  %v20872_v26 = vcombine.high %v19026_v6, %v19026_v6  ;;  %v19096_v7 = vpop.f32.mrf.mxu1 }
 0x525   : > { %v11925_v45 = vsel %vm2348_vm4, %v19034_v30, -inf  ;;  %v19094_v11 = vpop.f32.mrf.mxu0  ;;  %20874 = vst [vmem:[#allocation99_spill] sm:$0xff] %v19096_v7  ;;  %v19098_v62 = vmax.f32 %v11873_v22, %v11874_v31  ;;  %v19100_v55 = vmax.f32 %v11880_v23, %v11881_v35  ;;  %v11912_v37 = vrot.slane %v11911_v15, 4 }
 0x526   : > { %v11918_v61 = vsel %vm2348_vm4, %v20872_v26, -inf  ;;  %20873 = vst [vmem:[#allocation112_spill] sm:$0xff] %v19094_v11  ;;  %v11926_v20 = vrot.slane %v11925_v45, 4  ;;  %v20875_v54 = vcombine.high %v19034_v30, %v19034_v30  ;;  %v11960_v2 = vsel %vm2348_vm4, %v19029_v8, -inf  ;;  %v13624_v44 = vpop.f32.mrf.mxu1 }
 0x527   : > { %v11919_v57 = vrot.slane %v11918_v61, 4  ;;  %v20876_v48 = vcombine.high %v19029_v8, %v19029_v8  ;;  %v13600_v22 = vpop.f32.mrf.mxu0  ;;  %v11888_v23 = vrot.slane %v11887_v33, 1  ;;  %v11913_v10 = vmax.f32 %v11911_v15, %v11912_v37 }
 0x528   : > { %v11932_v6 = vsel %vm2348_vm4, %v20875_v54, -inf  ;;  %v11927_v58 = vmax.f32 %v11925_v45, %v11926_v20  ;;  %v11961_v35 = vrot.slane %v11960_v2, 4  ;;  %v11974_v30 = vsel %vm2348_vm4, %v19048_v60, -inf  ;;  %v19116_v7 = vpop.f32.mrf.mxu1 }
 0x529   : > { %v11967_v27 = vsel %vm2348_vm4, %v20876_v48, -inf  ;;  %v11920_v31 = vmax.f32 %v11918_v61, %v11919_v57  ;;  %v11933_v46 = vrot.slane %v11932_v6, 4  ;;  %v19114_v54 = vpop.f32.mrf.mxu0  ;;  %20878 = vst [vmem:[#allocation40_spill] sm:$0xff] %v19116_v7  ;;  %v11914_v5 = vrot.slane %v11913_v10, 2 }
 0x52a   : > { %v11968_v26 = vrot.slane %v11967_v27, 4  ;;  %20877 = vst [vmem:[#allocation114_spill] sm:$0xff] %v19114_v54  ;;  %v11975_v48 = vrot.slane %v11974_v30, 4  ;;  %v11928_v22 = vrot.slane %v11927_v58, 2  ;;  %v11962_v44 = vmax.f32 %v11960_v2, %v11961_v35  ;;  %v13627_v45 = vpop.f32.mrf.mxu1 }
 0x52b   : > { %v11921_v8 = vrot.slane %v11920_v31, 2  ;;  %v11934_v11 = vmax.f32 %v11932_v6, %v11933_v46  ;;  %v11981_v15 = vsel %vm2348_vm4, %v11159_v39, -inf  ;;  %v13603_v61 = vpop.f32.mrf.mxu0  ;;  %v11915_v37 = vmax.f32 %v11913_v10, %v11914_v5 }
 0x52c   : > { %v11969_v40 = vmax.f32 %v11967_v27, %v11968_v26  ;;  %v11976_v16 = vmax.f32 %v11974_v30, %v11975_v48  ;;  %v11929_v60 = vmax.f32 %v11927_v58, %v11928_v22  ;;  %v11963_v50 = vrot.slane %v11962_v44, 2  ;;  %v19121_v29 = vpop.f32.mrf.mxu1 }
 0x52d   : > { %v11922_v57 = vmax.f32 %v11920_v31, %v11921_v8  ;;  %v11935_v20 = vrot.slane %v11934_v11, 2  ;;  %v11982_v43 = vrot.slane %v11981_v15, 4  ;;  %v19119_v7 = vpop.f32.mrf.mxu0  ;;  %20880 = vst [vmem:[#allocation44_spill] sm:$0xff] %v19121_v29  ;;  %v11916_v6 = vrot.slane %v11915_v37, 1 }
 0x52e   : > { %v11970_v54 = vrot.slane %v11969_v40, 2  ;;  %20879 = vst [vmem:[#allocation41_spill] sm:$0xff] %v19119_v7  ;;  %v11977_v27 = vrot.slane %v11976_v16, 2  ;;  %v11930_v35 = vrot.slane %v11929_v60, 1  ;;  %v11964_v39 = vmax.f32 %v11962_v44, %v11963_v50  ;;  %v13628_v10 = vpop.f32.mrf.mxu1 }
 0x52f   : > { %v11923_v46 = vrot.slane %v11922_v57, 1  ;;  %v11936_v2 = vmax.f32 %v11934_v11, %v11935_v20  ;;  %v11983_v61 = vmax.f32 %v11981_v15, %v11982_v43  ;;  %v13604_v5 = vpop.f32.mrf.mxu0  ;;  %v11889_v31 = vmax.f32 %v11887_v33, %v11888_v23 }
 0x530   : > { %v11971_v26 = vmax.f32 %v11969_v40, %v11970_v54  ;;  %v11978_v8 = vmax.f32 %v11976_v16, %v11977_v27  ;;  %v11917_v48 = vmax.f32 %v11915_v37, %v11916_v6  ;;  %v11965_v22 = vrot.slane %v11964_v39, 1  ;;  %v19125_v29 = vpop.f32.mrf.mxu1 }
 0x531   : > { %v11924_v30 = vmax.f32 %v11922_v57, %v11923_v46  ;;  %v11937_v58 = vrot.slane %v11936_v2, 1  ;;  %v11984_v7 = vrot.slane %v11983_v61, 2  ;;  %v19123_v4 = vpop.f32.mrf.mxu0  ;;  %v11931_v11 = vmax.f32 %v11929_v60, %v11930_v35 }
 0x532   : > { %v11972_v45 = vrot.slane %v11971_v26, 1  ;;  %v11979_v56 = vrot.slane %v11978_v8, 1  ;;  %v12341_v43 = vcombine.low %v19076_v24, %v19078_v51  ;;  %v11966_v50 = vmax.f32 %v11964_v39, %v11965_v22  ;;  %v13631_v54 = vpop.f32.mrf.mxu1 }
 0x533   : > { %v11938_v20 = vmax.f32 %v11936_v2, %v11937_v58  ;;  %v11985_v33 = vmax.f32 %v11983_v61, %v11984_v7  ;;  %v12344_v16 = vcombine.low %v19084_v38, %v19098_v62  ;;  %v13607_v23 = vpop.f32.mrf.mxu0  ;;  %v12342_v44 = vcombine.low %v19080_v21, %v19082_v63 }
 0x534   : > { %v11973_v40 = vmax.f32 %v11971_v26, %v11972_v45  ;;  %v12345_v15 = vcombine.low %v19100_v55, %v11889_v31  ;;  %v12347_v37 = vcombine.low %v11917_v48, %v11924_v30  ;;  %v11980_v60 = vmax.f32 %v11978_v8, %v11979_v56  ;;  %v19136_v51 = vpop.f32.mrf.mxu1 }
 0x535   : > { %v12348_v57 = vcombine.low %v11931_v11, %v11938_v20  ;;  %v11986_v6 = vrot.slane %v11985_v33, 1  ;;  %v12443_v2 = vrot.slane %v12344_v16, 7  ;;  %v19134_v24 = vpop.f32.mrf.mxu0  ;;  %v6813_v62 = vcombine.high %v19005_v34, %v18994_v53 }
 0x536   : > { %v12350_v46 = vcombine.low %v11966_v50, %v11973_v40  ;;  %v12446_v7 = vrot.slane %v12347_v37, 6  ;;  %v12452_v27 = vrot.slane %v12345_v15, 7  ;;  %v13632_v39 = vpop.f32.mrf.mxu1  ;;  %v13354_v5 = vcombine.low %v18971_v25, %v19005_v34 }
 0x537   : > { %v12455_v38 = vrot.slane %v12348_v57, 6  ;;  %v11987_v35 = vmax.f32 %v11985_v33, %v11986_v6  ;;  %v12444_v21 = vsel %vm12366_vm14, %v12443_v2, %v12341_v43  ;;  %v13608_v55 = vpop.f32.mrf.mxu0  ;;  %v13356_v10 = vcombine.low %v6813_v62, %v19008_v41 }
 0x538   : > { %v12449_v63 = vrot.slane %v12350_v46, 5  ;;  %v12445_v26 = vsel %vm12368_vm15, %v12443_v2, %v12444_v21  ;;  %v12453_v61 = vsel %vm12366_vm14, %v12452_v27, %v12342_v44  ;;  %v9351_v8 = vmax.f32 %v18999_v17, %v19013_v52  ;;  %v19154_v22 = vpop.f32.mrf.mxu1  ;;  %v20883_v46 = vld [vmem:[#allocation27_spill] sm:$0xff]  ;;  %v20884_v2 = vld [vmem:[#allocation29_spill] sm:$0xff] }
 0x539   : > { %v12351_v31 = vcombine.low %v11980_v60, %v11987_v35  ;;  %v12447_v30 = vsel %vm12371_vm5, %v12446_v7, %v12445_v26  ;;  %v12454_v58 = vsel %vm12368_vm15, %v12452_v27, %v12453_v61  ;;  %v19152_v48 = vpop.f32.mrf.mxu0  ;;  %20881 = vst [vmem:[#allocation45_spill] sm:$0xff] %v19154_v22  ;;  %v10174_v25 = vrot.slane %v13354_v5, %v20727_v32  ;;  %v20891_v26 = vld [vmem:[#allocation62_spill] sm:$0xff] }
 0x53a   : > { %v12448_v45 = vsel %vm12373_vm6, %v12446_v7, %v12447_v30  ;;  %v12456_v11 = vsel %vm12371_vm5, %v12455_v38, %v12454_v58  ;;  %v10188_v20 = vrot.slane %v13356_v10, %v20727_v32  ;;  %v9386_v17 = vmax.f32 %v9351_v8, %v19039_v47  ;;  %v13635_v16 = vpop.f32.mrf.mxu1  ;;  %v20893_v10 = vld [vmem:[#allocation43_spill] sm:$0xff]  ;;  %v20895_v30 = vld [vmem:[#allocation73_spill] sm:$0xff] }
 0x53b   : > { %v12450_v43 = vsel %vm12376_vm7, %v12449_v63, %v12448_v45  ;;  %v12457_v50 = vsel %vm12373_vm6, %v12455_v38, %v12456_v11  ;;  %v12458_v40 = vrot.slane %v12351_v31, 5  ;;  %v13611_v33 = vpop.f32.mrf.mxu0  ;;  %v19170_v6 = vadd.f32 %v18633_v42, %v18631_v9  ;;  %v20889_v42 = vld [vmem:[#allocation64_spill] sm:$0xff]  ;;  %v20897_v45 = vld [vmem:[#allocation63_spill] sm:$0xff] }
 0x53c   : > { %v12451_v44 = vsel %vm12378_vm8, %v12449_v63, %v12450_v43  ;;  %v10196_v15 = vcombine.low %v10174_v25, %v10188_v20  ;;  %v10197_v37 = vcombine.high %v10174_v25, %v10188_v20  ;;  %v9416_v60 = vpack.c.bf16 %v9386_v17, %v9351_v8  ;;  %v19178_v62 = vpop.f32.mrf.mxu1  ;;  %v14558_v25 = vld [vmem:[%s15139_s14 + $0x20] sm:$0xff] }
 0x53d   : > { %v12459_v57 = vsel %vm12376_vm7, %v12458_v40, %v12457_v50  ;;  %12540 = vst [vmem:[%s18674_s23 + $0x38] sm:$0xff] %v12451_v44  ;;  %v20885_v7 = vmax.f32 %v20883_v46, %v20884_v2  ;;  %v19176_v38 = vpop.f32.mrf.mxu0  ;;  %20886 = vst [vmem:[#allocation60_spill] sm:$0xff] %v19178_v62  ;;  %v20887_v21 = vcombine.low %v18940_v3, %v18963_v49  ;;  %v20890_v39 = vrot.slane %v20889_v42, 2  ;;  %v20899_v33 = vld [vmem:[#allocation42_spill] sm:$0xff] }
 0x53e   : > { %v12460_v35 = vsel %vm12378_vm8, %v12458_v40, %v12459_v57  ;;  %v20888_v55 = vcombine.high %v18940_v3, %v18963_v49  ;;  %v20892_v61 = vrot.slane %v20891_v26, 2  ;;  %9813 = vmatprep.mubr.bf16.mxu1 %v9416_v60  ;;  %v20894_v31 = vrot.slane %v20893_v10, 2  ;;  %v13636_v50 = vpop.f32.mrf.mxu1 }
 0x53f   : > { %v9415_v27 = vpack.c.bf16 %v20885_v7, %v20883_v46  ;;  %v10461_v63 = vmax.f32 %v20887_v21, %v10196_v15  ;;  %12541 = vst [vmem:[%s18674_s23 + $0x40] sm:$0xff] %v12460_v35  ;;  %v20896_v58 = vrot.slane %v20895_v30, 2  ;;  %v20898_v11 = vmax.f32 %v20891_v26, %v20897_v45  ;;  %v13612_v43 = vpop.f32.mrf.mxu0  ;;  %v14559_v15 = vld [vmem:[%s15139_s14 + $0x48] sm:$0xff] }
 0x540   : > { %v10462_v9 = vmax.f32 %v20888_v55, %v10197_v37  ;;  %v9204_v5 = vsel %vm4648_vm2, %v20892_v61, %v20890_v39  ;;  %v9356_v49 = vmax.f32 %v19013_v52, %v19039_v47  ;;  %v8710_v20 = vrot.slane %v14558_v25, 7 }
 0x541   : > { %v9219_v8 = vsel %vm4648_vm2, %v20896_v58, %v20894_v31  ;;  %v19201_v3 = vmax.f32 %v20898_v11, %v9204_v5  ;;  %9814 = vmatmul.mubr.bf16.vlgmr.msra.gmra.mxu1 %v9415_v27  ;;  %v20900_v16 = vmax.f32 %v20895_v30, %v20899_v33  ;;  %v8715_v37 = vrot.slane %v14559_v15, 7  ;;  %v19223_v7 = vpop.f32.mrf.mxu0  ;;  %v19225_v27 = vpop.f32.mrf.mxu1 }
 0x542   : > { %v10711_v40 = vcombine.low %v10461_v63, %v10462_v9  ;;  %v10712_v17 = vcombine.high %v10461_v63, %v10462_v9  ;;  %v19218_v52 = vsel %vm1865_vm0, -inf, %v8710_v20  ;;  %v19221_v46 = vsel %vm1865_vm0, %v8710_v20, -inf  ;;  %20901 = vst [vmem:[#allocation59_spill] sm:$0xff] %v19223_v7  ;;  %20902 = vst [vmem:[#allocation52_spill] sm:$0xff] %v19225_v27 }
 0x543   : > { %v19209_v44 = vmax.f32 %v20900_v16, %v9219_v8  ;;  %v9361_v57 = vmax.f32 %v19039_v47, %v19201_v3  ;;  %v19215_v60 = vmax.f32 %v9356_v49, %v19201_v3  ;;  %v19230_v63 = vsel %vm1865_vm0, -inf, %v8715_v37  ;;  %v13643_v26 = vpop.f32.mrf.mxu0  ;;  %v13667_v61 = vpop.f32.mrf.mxu1 }
 0x544   : > { %v10733_v35 = vrot.slane %v10711_v40, %v20727_v32  ;;  %v10740_v21 = vrot.slane %v10712_v17, %v20727_v32  ;;  %v19233_v47 = vsel %vm1865_vm0, %v8715_v37, -inf  ;;  %vm10415_vm0 = vcmask 523264  }
 0x545   : > { %v19236_v55 = vmax.f32 %v9361_v57, %v19209_v44  ;;  %v19245_v49 = vpop.f32.mrf.mxu0  ;;  %v19247_v25 = vpop.f32.mrf.mxu1 }
 0x546   : > { %v10741_v5 = vcombine.low %v18844_v19, %v10733_v35  ;;  %v10742_v10 = vcombine.high %v18844_v19, %v10733_v35  ;;  %v10743_v31 = vcombine.low %v18937_v12, %v10740_v21  ;;  %v10744_v30 = vcombine.high %v18937_v12, %v10740_v21  ;;  %20903 = vst [vmem:[#allocation58_spill] sm:$0xff] %v19247_v25 }
 0x547   : > { %v13382_v58 = vcombine.low %v10733_v35, %v10733_v35  ;;  %v13384_v8 = vcombine.high %v10733_v35, %v10733_v35  ;;  %v13386_v45 = vcombine.low %v10740_v21, %v10740_v21  ;;  %v13388_v11 = vcombine.high %v10740_v21, %v10740_v21  ;;  %v13644_v16 = vpop.f32.mrf.mxu0  ;;  %v13668_v15 = vpop.f32.mrf.mxu1 }
 0x548   : > { %v11183_v20 = vrot.slane %v10741_v5, %v20727_v32  ;;  %v11216_v43 = vrot.slane %v10742_v10, %v20727_v32  ;;  %v19252_v50 = vrot.slane %v10743_v31, %v20727_v32  ;;  %v19255_v19 = vrot.slane %v10744_v30, %v20727_v32 }
 0x549   : > { %v11190_v12 = vrot.slane %v13382_v58, %v20727_v32  ;;  %v11223_v40 = vrot.slane %v13384_v8, %v20727_v32  ;;  %v19260_v17 = vrot.slane %v13386_v45, %v20727_v32  ;;  %v19263_v33 = vrot.slane %v13388_v11, %v20727_v32  ;;  %v19273_v31 = vpop.f32.mrf.mxu0  ;;  %v19275_v30 = vpop.f32.mrf.mxu1 }
 0x54a   : > { %v11191_v37 = vcombine.high %v11183_v20, %v11183_v20  ;;  %v11224_v57 = vcombine.high %v11216_v43, %v11216_v43  ;;  %20904 = vst [vmem:[#allocation66_spill] sm:$0xff] %v19273_v31  ;;  %20905 = vst [vmem:[#allocation27_spill] sm:$0xff] %v19275_v30  ;;  %v12009_v58 = vsel %vm2348_vm4, %v11183_v20, -inf  ;;  %v12058_v11 = vsel %vm2348_vm4, %v11216_v43, -inf }
 0x54b   : > { %v11192_v26 = vcombine.high %v11190_v12, %v11190_v12  ;;  %v11225_v61 = vcombine.high %v11223_v40, %v11223_v40  ;;  %v12023_v45 = vsel %vm2348_vm4, %v11190_v12, -inf  ;;  %v12010_v16 = vrot.slane %v12009_v58, 4  ;;  %v13647_v39 = vpop.f32.mrf.mxu0  ;;  %v13671_v9 = vpop.f32.mrf.mxu1 }
 0x54c   : > { %v12016_v8 = vsel %vm2348_vm4, %v11191_v37, -inf  ;;  %v12024_v56 = vrot.slane %v12023_v45, 4  ;;  %v12059_v10 = vrot.slane %v12058_v11, 4  ;;  %v12065_v21 = vsel %vm2348_vm4, %v11224_v57, -inf }
 0x54d   : > { %v12017_v15 = vrot.slane %v12016_v8, 4  ;;  %v12030_v54 = vsel %vm2348_vm4, %v11192_v26, -inf  ;;  %v12072_v5 = vsel %vm2348_vm4, %v11223_v40, -inf  ;;  %v12011_v20 = vmax.f32 %v12009_v58, %v12010_v16  ;;  %v19284_v12 = vpop.f32.mrf.mxu0  ;;  %v19286_v43 = vpop.f32.mrf.mxu1 }
 0x54e   : > { %v12031_v42 = vrot.slane %v12030_v54, 4  ;;  %v12025_v37 = vmax.f32 %v12023_v45, %v12024_v56  ;;  %v12066_v13 = vrot.slane %v12065_v21, 4  ;;  %20906 = vst [vmem:[#allocation29_spill] sm:$0xff] %v19284_v12  ;;  %20907 = vst [vmem:[#allocation64_spill] sm:$0xff] %v19286_v43  ;;  %v12060_v34 = vmax.f32 %v12058_v11, %v12059_v10 }
 0x54f   : > { %v12018_v35 = vmax.f32 %v12016_v8, %v12017_v15  ;;  %v12073_v53 = vrot.slane %v12072_v5, 4  ;;  %v12079_v39 = vsel %vm2348_vm4, %v11225_v61, -inf  ;;  %v12012_v9 = vrot.slane %v12011_v20, 2  ;;  %v13648_v57 = vpop.f32.mrf.mxu0  ;;  %v13672_v27 = vpop.f32.mrf.mxu1 }
 0x550   : > { %v12032_v41 = vmax.f32 %v12030_v54, %v12031_v42  ;;  %v12026_v23 = vrot.slane %v12025_v37, 2  ;;  %v12067_v32 = vmax.f32 %v12065_v21, %v12066_v13  ;;  %v12061_v58 = vrot.slane %v12060_v34, 2 }
 0x551   : > { %v12019_v26 = vrot.slane %v12018_v35, 2  ;;  %v12074_v8 = vmax.f32 %v12072_v5, %v12073_v53  ;;  %v12080_v56 = vrot.slane %v12079_v39, 4  ;;  %v12013_v45 = vmax.f32 %v12011_v20, %v12012_v9  ;;  %v19289_v43 = vpop.f32.mrf.mxu0  ;;  %v19291_v54 = vpop.f32.mrf.mxu1 }
 0x552   : > { %v12033_v40 = vrot.slane %v12032_v41, 2  ;;  %v12027_v15 = vmax.f32 %v12025_v37, %v12026_v23  ;;  %v12068_v30 = vrot.slane %v12067_v32, 2  ;;  %20908 = vst [vmem:[#allocation62_spill] sm:$0xff] %v19289_v43  ;;  %20909 = vst [vmem:[#allocation43_spill] sm:$0xff] %v19291_v54  ;;  %v12062_v61 = vmax.f32 %v12060_v34, %v12061_v58 }
 0x553   : > { %v12020_v16 = vmax.f32 %v12018_v35, %v12019_v26  ;;  %v12075_v10 = vrot.slane %v12074_v8, 2  ;;  %v12081_v11 = vmax.f32 %v12079_v39, %v12080_v56  ;;  %v12014_v25 = vrot.slane %v12013_v45, 1  ;;  %v13651_v57 = vpop.f32.mrf.mxu0  ;;  %v13675_v62 = vpop.f32.mrf.mxu1 }
 0x554   : > { %v12034_v42 = vmax.f32 %v12032_v41, %v12033_v40  ;;  %v12028_v21 = vrot.slane %v12027_v15, 1  ;;  %v12069_v27 = vmax.f32 %v12067_v32, %v12068_v30  ;;  %v12063_v5 = vrot.slane %v12062_v61, 1 }
 0x555   : > { %v12021_v13 = vrot.slane %v12020_v16, 1  ;;  %v12076_v20 = vmax.f32 %v12074_v8, %v12075_v10  ;;  %v12082_v35 = vrot.slane %v12081_v11, 2  ;;  %v19293_v23 = vmax.f32 %v12013_v45, %v12014_v25  ;;  %v19299_v34 = vpop.f32.mrf.mxu0  ;;  %v19301_v39 = vpop.f32.mrf.mxu1 }
 0x556   : > { %v12035_v53 = vrot.slane %v12034_v42, 1  ;;  %v19297_v9 = vmax.f32 %v12027_v15, %v12028_v21  ;;  %v12070_v41 = vrot.slane %v12069_v27, 1  ;;  %20910 = vst [vmem:[#allocation73_spill] sm:$0xff] %v19299_v34  ;;  %20911 = vst [vmem:[#allocation63_spill] sm:$0xff] %v19301_v39  ;;  %v19305_v32 = vmax.f32 %v12062_v61, %v12063_v5 }
 0x557   : > { %v19295_v37 = vmax.f32 %v12020_v16, %v12021_v13  ;;  %v12077_v62 = vrot.slane %v12076_v20, 1  ;;  %v12083_v30 = vmax.f32 %v12081_v11, %v12082_v35  ;;  %v12107_v25 = vsel %vm2348_vm4, %v19252_v50, -inf  ;;  %v13652_v45 = vpop.f32.mrf.mxu0  ;;  %v13676_v16 = vpop.f32.mrf.mxu1 }
 0x558   : > { %v19303_v26 = vmax.f32 %v12034_v42, %v12035_v53  ;;  %v19307_v40 = vmax.f32 %v12069_v27, %v12070_v41  ;;  %v20912_v58 = vcombine.high %v19252_v50, %v19252_v50  ;;  %v12121_v56 = vsel %vm2348_vm4, %v19260_v17, -inf }
 0x559   : > { %v19317_v15 = vmax.f32 %v12076_v20, %v12077_v62  ;;  %v12084_v42 = vrot.slane %v12083_v30, 1  ;;  %v12108_v61 = vrot.slane %v12107_v25, 4  ;;  %v12122_v11 = vrot.slane %v12121_v56, 4  ;;  %v19329_v53 = vpop.f32.mrf.mxu0  ;;  %v19331_v5 = vpop.f32.mrf.mxu1 }
 0x55a   : > { %v12114_v8 = vsel %vm2348_vm4, %v20912_v58, -inf  ;;  %v20913_v13 = vcombine.high %v19260_v17, %v19260_v17  ;;  %v12156_v50 = vsel %vm2348_vm4, %v19255_v19, -inf  ;;  %v20914_v27 = vcombine.high %v19255_v19, %v19255_v19  ;;  %20915 = vst [vmem:[#allocation42_spill] sm:$0xff] %v19329_v53  ;;  %20916 = vst [vmem:[#allocation115_spill] sm:$0xff] %v19331_v5 }
 0x55b   : > { %v12115_v10 = vrot.slane %v12114_v8, 4  ;;  %v19333_v20 = vmax.f32 %v12083_v30, %v12084_v42  ;;  %v12109_v35 = vmax.f32 %v12107_v25, %v12108_v61  ;;  %v12123_v17 = vmax.f32 %v12121_v56, %v12122_v11  ;;  %v13679_v39 = vpop.f32.mrf.mxu1 }
 0x55c   : > { %v12128_v21 = vsel %vm2348_vm4, %v20913_v13, -inf  ;;  %v12163_v57 = vsel %vm2348_vm4, %v20914_v27, -inf  ;;  %v12157_v58 = vrot.slane %v12156_v50, 4  ;;  %v12170_v16 = vsel %vm2348_vm4, %v19263_v33, -inf  ;;  %v13655_v13 = vpop.f32.mrf.mxu0 }
 0x55d   : > { %v12116_v41 = vmax.f32 %v12114_v8, %v12115_v10  ;;  %v12129_v62 = vrot.slane %v12128_v21, 4  ;;  %v12164_v45 = vrot.slane %v12163_v57, 4  ;;  %v12110_v19 = vrot.slane %v12109_v35, 2  ;;  %v19343_v56 = vpop.f32.mrf.mxu1 }
 0x55e   : > { %v12171_v34 = vrot.slane %v12170_v16, 4  ;;  %v12124_v53 = vrot.slane %v12123_v17, 2  ;;  %v12158_v43 = vmax.f32 %v12156_v50, %v12157_v58  ;;  %v20917_v30 = vcombine.high %v19263_v33, %v19263_v33  ;;  %v19341_v8 = vpop.f32.mrf.mxu0  ;;  %20919 = vst [vmem:[#allocation117_spill] sm:$0xff] %v19343_v56 }
 0x55f   : > { %v12117_v54 = vrot.slane %v12116_v41, 2  ;;  %v12130_v27 = vmax.f32 %v12128_v21, %v12129_v62  ;;  %v12165_v5 = vmax.f32 %v12163_v57, %v12164_v45  ;;  %20918 = vst [vmem:[#allocation116_spill] sm:$0xff] %v19341_v8  ;;  %v12111_v42 = vmax.f32 %v12109_v35, %v12110_v19  ;;  %v13680_v50 = vpop.f32.mrf.mxu1 }
 0x560   : > { %v12177_v25 = vsel %vm2348_vm4, %v20917_v30, -inf  ;;  %v12172_v39 = vmax.f32 %v12170_v16, %v12171_v34  ;;  %v12125_v11 = vmax.f32 %v12123_v17, %v12124_v53  ;;  %v12159_v13 = vrot.slane %v12158_v43, 2  ;;  %v13656_v22 = vpop.f32.mrf.mxu0 }
 0x561   : > { %v12118_v61 = vmax.f32 %v12116_v41, %v12117_v54  ;;  %v12131_v10 = vrot.slane %v12130_v27, 2  ;;  %v12166_v21 = vrot.slane %v12165_v5, 2  ;;  %v12178_v62 = vrot.slane %v12177_v25, 4  ;;  %v19347_v35 = vpop.f32.mrf.mxu1 }
 0x562   : > { %v12112_v57 = vrot.slane %v12111_v42, 1  ;;  %v12173_v33 = vrot.slane %v12172_v39, 2  ;;  %v12126_v12 = vrot.slane %v12125_v11, 1  ;;  %v12160_v30 = vmax.f32 %v12158_v43, %v12159_v13  ;;  %v19345_v7 = vpop.f32.mrf.mxu0 }
 0x563   : > { %v12119_v58 = vrot.slane %v12118_v61, 1  ;;  %v12132_v45 = vmax.f32 %v12130_v27, %v12131_v10  ;;  %v12167_v31 = vmax.f32 %v12165_v5, %v12166_v21  ;;  %v12179_v8 = vmax.f32 %v12177_v25, %v12178_v62  ;;  %v13683_v56 = vpop.f32.mrf.mxu1 }
 0x564   : > { %v12113_v54 = vmax.f32 %v12111_v42, %v12112_v57  ;;  %v12174_v41 = vmax.f32 %v12172_v39, %v12173_v33  ;;  %v12127_v17 = vmax.f32 %v12125_v11, %v12126_v12  ;;  %v12161_v16 = vrot.slane %v12160_v30, 1  ;;  %v13659_v50 = vpop.f32.mrf.mxu0 }
 0x565   : > { %v12120_v34 = vmax.f32 %v12118_v61, %v12119_v58  ;;  %v12133_v53 = vrot.slane %v12132_v45, 1  ;;  %v12168_v22 = vrot.slane %v12167_v31, 1  ;;  %v12180_v19 = vrot.slane %v12179_v8, 2  ;;  %v19357_v39 = vpop.f32.mrf.mxu1 }
 0x566   : > { %v12175_v10 = vrot.slane %v12174_v41, 1  ;;  %v12353_v43 = vcombine.low %v19293_v23, %v19295_v37  ;;  %v12354_v5 = vcombine.low %v19297_v9, %v19303_v26  ;;  %v12162_v25 = vmax.f32 %v12160_v30, %v12161_v16  ;;  %v19355_v12 = vpop.f32.mrf.mxu0 }
 0x567   : > { %v12134_v27 = vmax.f32 %v12132_v45, %v12133_v53  ;;  %v12169_v13 = vmax.f32 %v12167_v31, %v12168_v22  ;;  %v12181_v42 = vmax.f32 %v12179_v8, %v12180_v19  ;;  %v12356_v61 = vcombine.low %v19305_v32, %v19307_v40  ;;  %v13684_v26 = vpop.f32.mrf.mxu1 }
 0x568   : > { %v12176_v11 = vmax.f32 %v12174_v41, %v12175_v10  ;;  %v12357_v56 = vcombine.low %v19317_v15, %v19333_v20  ;;  %v12359_v21 = vcombine.low %v12113_v54, %v12120_v34  ;;  %v9421_v31 = vpack.c.bf16 %v19236_v55, %v19215_v60  ;;  %v13660_v9 = vpop.f32.mrf.mxu0 }
 0x569   : > { %v12360_v62 = vcombine.low %v12127_v17, %v12134_v27  ;;  %v12182_v23 = vrot.slane %v12181_v42, 1  ;;  %v12362_v37 = vcombine.low %v12162_v25, %v12169_v13  ;;  %v12479_v57 = vrot.slane %v12356_v61, 7  ;;  %v19372_v60 = vpop.f32.mrf.mxu1  ;;  %v20925_v9 = vld [vmem:[#allocation101_spill] sm:$0xff] }
 0x56a   : > { %v12482_v8 = vrot.slane %v12359_v21, 6  ;;  %v12488_v32 = vrot.slane %v12357_v56, 7  ;;  %v20920_v58 = vrot.slane %v19221_v46, 1  ;;  %v20921_v45 = vrot.slane %v19218_v52, 1  ;;  %9821 = vmatprep.mubr.bf16.mxu1 %v9421_v31  ;;  %v19370_v34 = vpop.f32.mrf.mxu0  ;;  %v20923_v31 = vld [vmem:[#allocation102_spill] sm:$0xff] }
 0x56b   : > { %v12491_v40 = vrot.slane %v12360_v62, 6  ;;  %v12183_v15 = vmax.f32 %v12181_v42, %v12182_v23  ;;  %v12480_v20 = vsel %vm12366_vm14, %v12479_v57, %v12353_v43  ;;  %v12485_v30 = vrot.slane %v12362_v37, 5  ;;  %v13715_v43 = vpop.f32.mrf.mxu1 }
 0x56c   : > { %v8961_v33 = vsel %vm3251_vm1, %v20921_v45, %v20920_v58  ;;  %v8975_v54 = vrot.slane %v19233_v47, 1  ;;  %v12481_v55 = vsel %vm12368_vm15, %v12479_v57, %v12480_v20  ;;  %v12489_v53 = vsel %vm12366_vm14, %v12488_v32, %v12354_v5  ;;  %v13691_v10 = vpop.f32.mrf.mxu0  ;;  %v20927_v58 = vld [vmem:[#allocation103_spill] sm:$0xff] }
 0x56d   : > { %v9111_v41 = vmax.f32 %v19218_v52, %v8961_v33  ;;  %v9160_v17 = vrot.slane %v19218_v52, 2  ;;  %v12363_v16 = vcombine.low %v12176_v11, %v12183_v15  ;;  %v12483_v22 = vsel %vm12371_vm5, %v12482_v8, %v12481_v55  ;;  %v19392_v62 = vpop.f32.mrf.mxu1 }
 0x56e   : > { %v12490_v19 = vsel %vm12368_vm15, %v12488_v32, %v12489_v53  ;;  %v20922_v50 = vrot.slane %v19230_v63, 1  ;;  %v12484_v25 = vsel %vm12373_vm6, %v12482_v8, %v12483_v22  ;;  %v9161_v52 = vrot.slane %v19221_v46, 2  ;;  %v19390_v21 = vpop.f32.mrf.mxu0  ;;  %v20930_v53 = vld [vmem:[#allocation76_spill] sm:$0xff] }
 0x56f   : > { %v12492_v5 = vsel %vm12371_vm5, %v12491_v40, %v12490_v19  ;;  %v12486_v42 = vsel %vm12376_vm7, %v12485_v30, %v12484_v25  ;;  %v12494_v11 = vrot.slane %v12363_v16, 5  ;;  %v9175_v56 = vrot.slane %v19230_v63, 2  ;;  %v20932_v22 = vld [vmem:[#allocation56_spill] sm:$0xff] }
 0x570   : > { %v8976_v27 = vsel %vm3251_vm1, %v20922_v50, %v8975_v54  ;;  %v12493_v61 = vsel %vm12373_vm6, %v12491_v40, %v12492_v5  ;;  %v12487_v23 = vsel %vm12378_vm8, %v12485_v30, %v12486_v42  ;;  %v9162_v37 = vsel %vm4648_vm2, %v9160_v17, %v9161_v52  ;;  %v13692_v15 = vpop.f32.mrf.mxu0  ;;  %v20929_v54 = vld [vmem:[#allocation26_spill] sm:$0xff]  ;;  %v20934_v50 = vld [vmem:[#allocation49_spill] sm:$0xff]  ;;  %v20936_v5 = vld [vmem:[#allocation91_spill] sm:$0xff] }
 0x571   : > { %v9116_v13 = vmax.f32 %v19230_v63, %v8976_v27  ;;  %v9176_v57 = vrot.slane %v19233_v47, 2  ;;  %v20924_v46 = vrot.slane %v20923_v31, 2  ;;  %v20926_v26 = vrot.slane %v20925_v9, 2  ;;  %12544 = vst [vmem:[%s18674_s23 + $0x54] sm:$0xff] %v12487_v23  ;;  %v13716_v47 = vpop.f32.mrf.mxu1  ;;  %v20937_v52 = vld [vmem:[#allocation78_spill] sm:$0xff]  ;;  %v20943_v31 = vld [vmem:[#allocation48_spill] sm:$0xff] }
 0x572   : > { %v12495_v32 = vsel %vm12376_vm7, %v12494_v11, %v12493_v61  ;;  %v19406_v63 = vadd.f32 %v18650_v36, %v18648_v14  ;;  %v9312_v40 = vmax.f32 %v9111_v41, %v9162_v37  ;;  %v20928_v45 = vmax.f32 %v20925_v9, %v20927_v58  ;;  %v20931_v36 = vld [vmem:[#allocation72_spill] sm:$0xff]  ;;  %v19428_v43 = vpop.f32.mrf.mxu0  ;;  %v20939_v61 = vld [vmem:[#allocation70_spill] sm:$0xff]  ;;  %v20944_v9 = vld [vmem:[#allocation97_spill] sm:$0xff] }
 0x573   : > { %v9192_v8 = vsel %vm4648_vm2, %v20926_v26, %v20924_v46  ;;  %v12496_v20 = vsel %vm12378_vm8, %v12494_v11, %v12495_v32  ;;  %v9177_v30 = vsel %vm4648_vm2, %v9175_v56, %v9176_v57  ;;  %v9355_v55 = vmax.f32 %v20929_v54, %v20884_v2  ;;  %v19430_v25 = vpop.f32.mrf.mxu1 }
 0x574   : > { %v9322_v33 = vmax.f32 %v20928_v45, %v9192_v8  ;;  %v9360_v17 = vmax.f32 %v20884_v2, %v20930_v53  ;;  %12545 = vst [vmem:[%s18674_s23 + $0x5c] sm:$0xff] %v12496_v20  ;;  %v9317_v14 = vmax.f32 %v9116_v13, %v9177_v30  ;;  %v19421_v16 = vadd.f32 %v18823_v59, %v18821_v28  ;;  %v20941_v59 = vld [vmem:[#allocation46_spill] sm:$0xff]  ;;  %v13695_v32 = vpop.f32.mrf.mxu0 }
 0x575   : > { %v20933_v19 = vrot.slane %v20932_v22, 2  ;;  %v20935_v27 = vrot.slane %v20934_v50, 2  ;;  %v9390_v2 = vmax.f32 %v9355_v55, %v20930_v53  ;;  %v20938_v42 = vrot.slane %v20937_v52, 2  ;;  %v13719_v58 = vpop.f32.mrf.mxu1  ;;  %v20946_v55 = vld [vmem:[#allocation92_spill] sm:$0xff] }
 0x576   : > { %v9362_v41 = vmax.f32 %v9322_v33, %v20931_v36  ;;  %v9395_v13 = vmax.f32 %v9360_v17, %v20936_v5  ;;  %v20940_v11 = vrot.slane %v20939_v61, 2  ;;  %v20942_v56 = vmax.f32 %v20934_v50, %v20941_v59  ;;  %v20951_v50 = vld [vmem:[#allocation110_spill] sm:$0xff] }
 0x577   : > { %v9234_v10 = vsel %vm4648_vm2, %v20935_v27, %v20933_v19  ;;  %v9352_v37 = vmax.f32 %v9312_v40, %v9317_v14  ;;  %v9357_v57 = vmax.f32 %v9317_v14, %v9322_v33  ;;  %v20945_v26 = vmax.f32 %v20939_v61, %v20944_v9  ;;  %v19463_v14 = vpop.f32.mrf.mxu0  ;;  %v20953_v27 = vld [vmem:[#allocation109_spill] sm:$0xff] }
 0x578   : > { %v9249_v28 = vsel %vm4648_vm2, %v20940_v11, %v20938_v42  ;;  %v19442_v23 = vmax.f32 %v20942_v56, %v9234_v10  ;;  %v9397_v46 = vmax.f32 %v9362_v41, %v20943_v31  ;;  %v9420_v45 = vpack.c.bf16 %v9395_v13, %v9390_v2  ;;  %v19465_v41 = vpop.f32.mrf.mxu1  ;;  %v20955_v42 = vld [vmem:[#allocation75_spill] sm:$0xff]  ;;  %v20956_v56 = vld [vmem:[#allocation113_spill] sm:$0xff] }
 0x579   : > { %v19448_v8 = vmax.f32 %v20945_v26, %v9249_v28  ;;  %v19452_v15 = vadd.f32 %v18868_v1, %v18866_v0  ;;  %v9366_v47 = vmax.f32 %v19201_v3, %v19209_v44  ;;  %v9387_v20 = vmax.f32 %v9352_v37, %v9322_v33  ;;  %v20947_v3 = vld [vmem:[#allocation105_spill] sm:$0xff]  ;;  %v20949_v33 = vld [vmem:[#allocation104_spill] sm:$0xff]  ;;  %v13696_v11 = vpop.f32.mrf.mxu0 }
 0x57a   : > { %v9371_v40 = vmax.f32 %v19209_v44, %v19442_v23  ;;  %v9392_v30 = vmax.f32 %v9357_v57, %v20931_v36  ;;  %v9365_v54 = vmax.f32 %v20930_v53, %v20936_v5  ;;  %v9370_v17 = vmax.f32 %v20936_v5, %v20946_v55  ;;  %9822 = vmatmul.mubr.bf16.gmra.mxu1 %v9420_v45  ;;  %v13720_v28 = vpop.f32.mrf.mxu1  ;;  %v20958_v26 = vld [vmem:[#allocation88_spill] sm:$0xff] }
 0x57b   : > { %v9401_v0 = vmax.f32 %v9366_v47, %v19442_v23  ;;  %v20948_v44 = vrot.slane %v20947_v3, 2  ;;  %v20950_v22 = vrot.slane %v20949_v33, 2  ;;  %v20952_v53 = vrot.slane %v20951_v50, 2  ;;  %v20970_v28 = vld [vmem:[#allocation67_spill] sm:$0xff] }
 0x57c   : > { %v9406_v1 = vmax.f32 %v9371_v40, %v19448_v8  ;;  %v20954_v10 = vrot.slane %v20953_v27, 2  ;;  %v9417_v5 = vpack.c.bf16 %v9387_v20, %v9352_v37  ;;  %v9422_v13 = vpack.c.bf16 %v9397_v46, %v9392_v30  ;;  %v20960_v37 = vld [vmem:[#allocation84_spill] sm:$0xff]  ;;  %v20963_v30 = vld [vmem:[#allocation94_spill] sm:$0xff] }
 0x57d   : > { %v9237_v19 = vsel %vm4648_vm2, %v20950_v22, %v20948_v44  ;;  %v9400_v52 = vmax.f32 %v9365_v54, %v20946_v55  ;;  %v9405_v61 = vmax.f32 %v9370_v17, %v20955_v42  ;;  %v20957_v57 = vmax.f32 %v20949_v33, %v20956_v56  ;;  %v20961_v40 = vld [vmem:[#allocation96_spill] sm:$0xff]  ;;  %v19502_v44 = vpop.f32.mrf.mxu0 }
 0x57e   : > { %v9252_v2 = vsel %vm4648_vm2, %v20954_v10, %v20952_v53  ;;  %v9426_v59 = vpack.c.bf16 %v9406_v1, %v9401_v0  ;;  %v20959_v32 = vmax.f32 %v20953_v27, %v20958_v26  ;;  %v9367_v45 = vmax.f32 %v20931_v36, %v20943_v31  ;;  %13759 = vmatprep.mubr.msk.bf16.mxu0 %vm1334_vm3, %v9417_v5  ;;  %v19504_v36 = vpop.f32.mrf.mxu1  ;;  %v20968_v53 = vld [vmem:[#allocation36_spill] sm:$0xff]  ;;  %v20969_v27 = vld [vmem:[#allocation37_spill] sm:$0xff] }
 0x57f   : > { %v9337_v9 = vmax.f32 %v20957_v57, %v9237_v19  ;;  %v7485_v46 = vadd.f32 %v20960_v37, %v18899_v18  ;;  %v9425_v47 = vpack.c.bf16 %v9405_v61, %v9400_v52  ;;  %v20962_v20 = vrot.slane %v20961_v40, 1  ;;  %13760 = vmatmul.mubr.msk.bf16.vlgmr.msra.gmra.mxu0 %vm1334_vm3, %v9422_v13  ;;  %v20967_v19 = vld [vmem:[#allocation55_spill] sm:$0xff]  ;;  %v13699_v52 = vpop.f32.mrf.mxu0 }
 0x580   : > { %v9342_v58 = vmax.f32 %v20959_v32, %v9252_v2  ;;  %v20964_v54 = vrot.slane %v20963_v30, 1  ;;  %v20965_v0 = vrot.slane %v20961_v40, 2  ;;  %v20966_v1 = vrot.slane %v20963_v30, 2  ;;  %9829 = vmatprep.mubr.bf16.mxu1 %v9426_v59  ;;  %v13723_v61 = vpop.f32.mrf.mxu1  ;;  %v20974_v32 = vld [vmem:[#allocation106_spill] sm:$0xff] }
 0x581   : > { %v9372_v18 = vmax.f32 %v20943_v31, %v9337_v9  ;;  %v9402_v33 = vmax.f32 %v9367_v45, %v9337_v9  ;;  %v7488_v10 = vadd.f32 %v20969_v27, %v20968_v53  ;;  %v9376_v5 = vmax.f32 %v19442_v23, %v19448_v8  ;;  %v20972_v31 = vld [vmem:[#allocation98_spill] sm:$0xff]  ;;  %v20975_v45 = vld [vmem:[#allocation31_spill] sm:$0xff] }
 0x582   : > { %v9063_v17 = vsel %vm3251_vm1, %v20964_v54, %v20962_v20  ;;  %v9264_v3 = vsel %vm4648_vm2, %v20966_v1, %v20965_v0  ;;  %v9377_v22 = vmax.f32 %v9337_v9, %v9342_v58  ;;  %v9382_v50 = vmax.f32 %v9342_v58, %v20967_v19  ;;  %v20976_v23 = vld [vmem:[#allocation83_spill] sm:$0xff]  ;;  %v19531_v0 = vpop.f32.mrf.mxu1  ;;  %9830 = vmatmul.mubr.bf16.gmra.mxu1 %v9425_v47  ;;  %v20984_v47 = vld [vmem:[#allocation81_spill] sm:$0xff] }
 0x583   : > { %v9145_v2 = vmax.f32 %v20963_v30, %v9063_v17  ;;  %v9407_v11 = vmax.f32 %v9372_v18, %v9342_v58  ;;  %v20971_v59 = vrot.slane %v20970_v28, 2  ;;  %v20973_v56 = vrot.slane %v20972_v31, 2  ;;  %v20978_v58 = vld [vmem:[#allocation71_spill] sm:$0xff]  ;;  %v20979_v30 = vld [vmem:[#allocation85_spill] sm:$0xff]  ;;  %v19529_v17 = vpop.f32.mrf.mxu0 }
 0x584   : > { %v9412_v13 = vmax.f32 %v9377_v22, %v20967_v19  ;;  %v9375_v9 = vmax.f32 %v20946_v55, %v20955_v42  ;;  %v7493_v37 = vadd.f32 %v20975_v45, %v20974_v32  ;;  %v20977_v40 = vmax.f32 %v20972_v31, %v20976_v23  ;;  %v20980_v22 = vld [vmem:[#allocation80_spill] sm:$0xff]  ;;  %v20981_v55 = vld [vmem:[#allocation90_spill] sm:$0xff]  ;;  %v20982_v19 = vld [vmem:[#allocation57_spill] sm:$0xff] }
 0x585   : > { %v9261_v57 = vsel %vm4648_vm2, %v20973_v56, %v20971_v59  ;;  %v9346_v26 = vmax.f32 %v9145_v2, %v9264_v3  ;;  %v7496_v54 = vadd.f32 %v20979_v30, %v20978_v58  ;;  %v9427_v1 = vpack.c.bf16 %v9407_v11, %v9402_v33  ;;  %v13700_v28 = vpop.f32.mrf.mxu0  ;;  %v13724_v59 = vpop.f32.mrf.mxu1  ;;  %v20983_v31 = vld [vmem:[#allocation74_spill] sm:$0xff] }
 0x586   : > { %v9345_v20 = vmax.f32 %v20977_v40, %v9261_v57  ;;  %v9432_v18 = vpack.c.bf16 %v9382_v50, %v9412_v13  ;;  %v7501_v3 = vadd.f32 %v20981_v55, %v20980_v22  ;;  %v7629_v53 = vadd.f32 %v20982_v19, %v19170_v6  ;;  %v20985_v50 = vld [vmem:[#allocation100_spill] sm:$0xff]  ;;  %v20986_v13 = vld [vmem:[#allocation111_spill] sm:$0xff] }
 0x587   : > { %v9381_v27 = vmax.f32 %v19448_v8, %v9346_v26  ;;  %v9411_v2 = vmax.f32 %v9376_v5, %v9346_v26  ;;  %13763 = vmatprep.mubr.msk.bf16.mxu0 %vm1334_vm3, %v9427_v1  ;;  %v7504_v33 = vadd.f32 %v20984_v47, %v20983_v31  ;;  %v7630_v11 = vadd.f32 %v20985_v50, %v19406_v63  ;;  %v20987_v6 = vld [vmem:[#allocation112_spill] sm:$0xff]  ;;  %v20989_v26 = vld [vmem:[#allocation41_spill] sm:$0xff]  ;;  %v19550_v45 = vpop.f32.mrf.mxu0  ;;  %v19552_v23 = vpop.f32.mrf.mxu1  ;;  %v20990_v40 = vld [vmem:[#allocation87_spill] sm:$0xff] }
 0x588   : > { %v9380_v52 = vmax.f32 %v20955_v42, %v9345_v20  ;;  %v9410_v61 = vmax.f32 %v9375_v9, %v9345_v20  ;;  %v7631_v56 = vadd.f32 %v20986_v13, %v19421_v16  ;;  %v7632_v8 = vadd.f32 %v20987_v6, %v19452_v15  ;;  %v20988_v42 = vld [vmem:[#allocation114_spill] sm:$0xff]  ;;  %13764 = vmatmul.mubr.msk.bf16.gmra.mxu0 %vm1334_vm3, %v9432_v18  ;;  %v20991_v20 = vld [vmem:[#allocation93_spill] sm:$0xff]  ;;  %v20993_v1 = vld [vmem:[#allocation99_spill] sm:$0xff] }
 0x589   : > { %v9431_v5 = vpack.c.bf16 %v9381_v27, %v9411_v2  ;;  %v7633_v9 = vadd.f32 %v20988_v42, %v7485_v46  ;;  %v7634_v32 = vadd.f32 %v20989_v26, %v7488_v10  ;;  %v7767_v63 = vadd.f32 %v20990_v40, %v7629_v53  ;;  %v20992_v16 = vld [vmem:[#allocation54_spill] sm:$0xff]  ;;  %v20994_v46 = vld [vmem:[#allocation40_spill] sm:$0xff]  ;;  %v13703_v27 = vpop.f32.mrf.mxu0  ;;  %v13727_v2 = vpop.f32.mrf.mxu1  ;;  %v20998_v50 = vld [vmem:[#allocation29_spill] sm:$0xff] }
 0x58a   : > { %v9430_v57 = vpack.c.bf16 %v9380_v52, %v9410_v61  ;;  %v7768_v58 = vadd.f32 %v20991_v20, %v7630_v11  ;;  %v7769_v30 = vadd.f32 %v20992_v16, %v7631_v56  ;;  %v7635_v15 = vadd.f32 %v19123_v4, %v7493_v37  ;;  %v20995_v18 = vld [vmem:[#allocation44_spill] sm:$0xff]  ;;  %v20996_v37 = vld [vmem:[#allocation59_spill] sm:$0xff]  ;;  %v20997_v31 = vld [vmem:[#allocation66_spill] sm:$0xff] }
 0x58b   : > { %9837 = vmatprep.mubr.bf16.mxu1 %v9431_v5  ;;  %v7770_v22 = vadd.f32 %v20993_v1, %v7632_v8  ;;  %v7771_v55 = vadd.f32 %v20994_v46, %v7633_v9  ;;  %v7636_v10 = vadd.f32 %v19134_v24, %v7496_v54  ;;  %v7637_v19 = vadd.f32 %v19152_v48, %v7501_v3  ;;  %v19571_v54 = vpop.f32.mrf.mxu0  ;;  %v19573_v48 = vpop.f32.mrf.mxu1  ;;  %v20999_v3 = vld [vmem:[#allocation45_spill] sm:$0xff]  ;;  %v21004_v8 = vld [vmem:[#allocation64_spill] sm:$0xff]  ;;  %v21006_v26 = vld [vmem:[#allocation42_spill] sm:$0xff] }
 0x58c   : > { %v7772_v52 = vadd.f32 %v20995_v18, %v7634_v32  ;;  %v7773_v53 = vadd.f32 %v19125_v29, %v7635_v15  ;;  %v7638_v61 = vadd.f32 %v19176_v38, %v7504_v33  ;;  %v7936_v28 = vadd.f32 %v19245_v49, %v7768_v58  ;;  %9838 = vmatmul.mubr.bf16.gmra.mxu1 %v9430_v57  ;;  %v21000_v29 = vld [vmem:[#allocation60_spill] sm:$0xff]  ;;  %v21001_v38 = vld [vmem:[#allocation58_spill] sm:$0xff]  ;;  %v21005_v42 = vld [vmem:[#allocation73_spill] sm:$0xff] }
 0x58d   : > { %v7774_v4 = vadd.f32 %v19136_v51, %v7636_v10  ;;  %v7935_v59 = vadd.f32 %v20996_v37, %v7767_v63  ;;  %v7937_v47 = vadd.f32 %v20997_v31, %v7769_v30  ;;  %v7938_v24 = vadd.f32 %v20998_v50, %v7770_v22  ;;  %v21002_v49 = vld [vmem:[#allocation62_spill] sm:$0xff]  ;;  %v21003_v51 = vld [vmem:[#allocation27_spill] sm:$0xff]  ;;  %v13704_v40 = vpop.f32.mrf.mxu0  ;;  %v13728_v63 = vpop.f32.mrf.mxu1  ;;  %v21008_v58 = vld [vmem:[#allocation116_spill] sm:$0xff] }
 0x58e   : > { %v7775_v11 = vadd.f32 %v20999_v3, %v7637_v19  ;;  %v7776_v13 = vadd.f32 %v21000_v29, %v7638_v61  ;;  %v8062_v33 = vadd.f32 %v21001_v38, %v7936_v28  ;;  %v7939_v56 = vadd.f32 %v21002_v49, %v7771_v55  ;;  %v21007_v57 = vld [vmem:[#allocation43_spill] sm:$0xff]  ;;  %v21009_v1 = vld [vmem:[#allocation52_spill] sm:$0xff]  ;;  %v21014_v61 = vld [vmem:[#allocation117_spill] sm:$0xff] }
 0x58f   : > { %v8063_v6 = vadd.f32 %v21003_v51, %v7937_v47  ;;  %v19581_v5 = vadd.f32 %v21004_v8, %v7938_v24  ;;  %v7940_v9 = vadd.f32 %v21005_v42, %v7772_v52  ;;  %v7941_v32 = vadd.f32 %v21006_v26, %v7773_v53  ;;  %v21010_v46 = vld [vmem:[#allocation63_spill] sm:$0xff]  ;;  %v8181_v27 = vpop.f32.mrf.mxu0  ;;  %v8321_v2 = vpop.f32.mrf.mxu1  ;;  %v21013_v52 = vld [vmem:[#allocation53_spill] sm:$0xff]  ;;  %v21016_v50 = vld [vmem:[#allocation68_spill] sm:$0xff] }
 0x590   : > { %v19586_v20 = vadd.f32 %v21007_v57, %v7939_v56  ;;  %v7942_v16 = vadd.f32 %v21008_v58, %v7774_v4  ;;  %v7943_v30 = vadd.f32 %v19345_v7, %v7775_v11  ;;  %v7944_v15 = vadd.f32 %v19355_v12, %v7776_v13  ;;  %v21011_v10 = vld [vmem:[#allocation115_spill] sm:$0xff]  ;;  %v21015_v4 = vld [vmem:[#allocation86_spill] sm:$0xff]  ;;  %v21018_v11 = vld [vmem:[#allocation65_spill] sm:$0xff] }
 0x591   : > { %v8061_v22 = vadd.f32 %v21009_v1, %v7935_v59  ;;  %v19593_v55 = vadd.f32 %v21010_v46, %v7940_v9  ;;  %v19596_v19 = vadd.f32 %v21011_v10, %v7941_v32  ;;  %v21012_v18 = vld [vmem:[#allocation39_spill] sm:$0xff]  ;;  %v6715_v37 = vcombine.high %v21015_v4, %v21015_v4  ;;  %v13707_v31 = vpop.f32.mrf.mxu0  ;;  %v13731_v47 = vpop.f32.mrf.mxu1  ;;  %v21019_v29 = vld [vmem:[#allocation24_spill] sm:$0xff]  ;;  %v21020_v38 = vld [vmem:[#allocation33_spill] sm:$0xff] }
 0x592   : > { %v6599_v53 = vrot.slane %v21013_v52, %v21012_v18  ;;  %v19601_v28 = vadd.f32 %v21014_v61, %v7942_v16  ;;  %v8069_v7 = vadd.f32 %v19347_v35, %v7943_v30  ;;  %v8070_v12 = vadd.f32 %v19357_v39, %v7944_v15  ;;  %v21021_v49 = vld [vmem:[#allocation34_spill] sm:$0xff]  ;;  %v21022_v39 = vld [vmem:[#allocation35_spill] sm:$0xff] }
 0x593   : > { %v8188_v59 = vadd.f32 %v19370_v34, %v8061_v22  ;;  %v21017_v24 = vcombine.high %v21016_v50, %v21016_v50  ;;  %v6641_v13 = vcombine.low %v21019_v29, %v21018_v11  ;;  %v6711_v35 = vcombine.low %v21021_v49, %v21020_v38  ;;  %v8184_v8 = vpop.f32.mrf.mxu0  ;;  %v8324_v42 = vpop.f32.mrf.mxu1  ;;  %v21023_v15 = vld [vmem:[#allocation95_spill] sm:$0xff]  ;;  %v21029_v61 = vld [vmem:[#allocation50_spill] sm:$0xff] }
 0x594   : > { %v6770_v56 = vrot.slane %v21022_v39, %v21012_v18  ;;  %v8196_v51 = vadd.f32 %v8181_v27, %v8069_v7  ;;  %v10020_v34 = vrot.slane %v6599_v53, %v21012_v18  ;;  %v8197_v9 = vadd.f32 %v8184_v8, %v8070_v12  ;;  %v21024_v22 = vld [vmem:[#allocation47_spill] sm:$0xff]  ;;  %v21028_v53 = vld [vmem:[#allocation32_spill] sm:$0xff]  ;;  %v21030_v50 = vld [vmem:[#allocation38_spill] sm:$0xff] }
 0x595   : > { %v6572_v3 = vrot.slane %v21017_v24, %v21012_v18  ;;  %v6743_v26 = vrot.slane %v6715_v37, %v21012_v18  ;;  %v8328_v32 = vadd.f32 %v19372_v60, %v8188_v59  ;;  %v8189_v40 = vadd.f32 %v19390_v21, %v8062_v33  ;;  %v13708_v57 = vpop.f32.mrf.mxu0  ;;  %v13732_v58 = vpop.f32.mrf.mxu1  ;;  %v21025_v46 = vld [vmem:[#allocation51_spill] sm:$0xff]  ;;  %v21027_v60 = vld [vmem:[#allocation77_spill] sm:$0xff] }
 0x596   : > { %v19622_v63 = vadd.f32 %v8321_v2, %v8196_v51  ;;  %v19624_v16 = vadd.f32 %v8324_v42, %v8197_v9  ;;  %v13347_v1 = vcombine.high %v21023_v15, %v6641_v13  ;;  %v21026_v10 = vcombine.low %v21024_v22, %v21025_v46  ;;  %v19635_v2 = vld [vmem:[#allocation13] ss:$0 sm:$0xff] }
 0x597   : > { %v10006_v30 = vrot.slane %v6572_v3, %v21012_v18  ;;  %v10160_v52 = vrot.slane %v6770_v56, %v21012_v18  ;;  %v6812_v21 = vcombine.low %v21028_v53, %v21027_v60  ;;  %v8414_v33 = vpop.f32.mrf.mxu0  ;;  %v13351_v7 = vcombine.high %v21029_v61, %v6711_v35  ;;  %v21031_v56 = vld [vmem:[#allocation89_spill] sm:$0xff] }
 0x598   : > { %v13349_v27 = vcombine.high %v21018_v11, %v21026_v10  ;;  %v8453_v12 = vadd.f32 %v8414_v33, %v8328_v32  ;;  %v10041_v37 = vrot.slane %v13347_v1, %v21012_v18  ;;  %v8190_v31 = vadd.f32 %v19428_v43, %v8063_v6  ;;  %v21032_v43 = vld [vmem:[#allocation108_spill] sm:$0xff]  ;;  %v21033_v6 = vld [vmem:[#allocation107_spill] sm:$0xff] }
 0x599   : > { %v19638_v4 = vcombine.low %v10006_v30, %v10020_v34  ;;  %v13739_v47 = vpop.f32.mrf.mxu0  ;;  %v13353_v24 = vcombine.high %v21020_v38, %v21030_v50  ;;  %v8329_v3 = vadd.f32 %v19392_v62, %v8189_v40  ;;  %v10146_v13 = vrot.slane %v6743_v26, %v21012_v18 }
 0x59a   : > { %v10055_v59 = vrot.slane %v13349_v27, %v21012_v18  ;;  %v8470_v11 = vadd.f32 %v19635_v2, %v8453_v12  ;;  %v10111_v35 = vrot.slane %v13351_v7, %v21012_v18  ;;  %v13355_v51 = vcombine.high %v21031_v56, %v6812_v21 }
 0x59b   : > { %v8417_v49 = vpop.f32.mrf.mxu0  ;;  %v10125_v39 = vrot.slane %v13353_v24, %v21012_v18  ;;  %v21034_v8 = vcombine.low %v21032_v43, %v21033_v6  ;;  %v19657_v34 = vcombine.low %v10146_v13, %v10160_v52  ;;  %v8191_v9 = vadd.f32 %v19463_v14, %v19581_v5 }
 0x59c   : > { %v19647_v29 = vcombine.low %v10041_v37, %v10055_v59  ;;  %v8480_v42 = vmax.f32 %v8470_v11, 0.0  ;;  %v8454_v62 = vadd.f32 %v8417_v49, %v8329_v3  ;;  %v10181_v40 = vrot.slane %v13355_v51, %v21012_v18 }
 0x59d   : > { %v13357_v38 = vcombine.high %v21027_v60, %v21034_v8  ;;  %v13740_v26 = vpop.f32.mrf.mxu0  ;;  %v19661_v32 = vcombine.low %v10111_v35, %v10125_v39  ;;  %v8330_v1 = vadd.f32 %v19430_v25, %v8190_v31  ;;  %v8331_v27 = vadd.f32 %v19465_v41, %v8191_v9 }
 0x59e   : > { %v8500_v58 = vcombine.high %v8480_v42, %v8480_v42  ;;  %v8507_v30 = vrot.slane %v8480_v42, %v21012_v18  ;;  %v8471_v15 = vadd.f32 %v19635_v2, %v8454_v62  ;;  %v8192_v52 = vadd.f32 %v19502_v44, %v19586_v20 }
 0x59f   : > { %v10195_v57 = vrot.slane %v13357_v38, %v21012_v18  ;;  %v8422_v22 = vpop.f32.mrf.mxu0  ;;  %v8193_v41 = vadd.f32 %v19529_v17, %v19593_v55  ;;  %v8194_v17 = vadd.f32 %v19550_v45, %v19596_v19  ;;  %v8195_v19 = vadd.f32 %v19571_v54, %v19601_v28 }
 0x5a0   : > { %v8514_v10 = vrot.slane %v8500_v58, %v21012_v18  ;;  %v8515_v14 = vcombine.high %v8507_v30, %v8507_v30  ;;  %v8481_v5 = vmax.f32 %v8471_v15, 0.0  ;;  %v8455_v60 = vadd.f32 %v8422_v22, %v8330_v1 }
 0x5a1   : > { %v19668_v46 = vcombine.low %v10181_v40, %v10195_v57  ;;  %v13743_v53 = vpop.f32.mrf.mxu0  ;;  %v8332_v20 = vadd.f32 %v19504_v36, %v8192_v52  ;;  %v8333_v9 = vadd.f32 %v19531_v0, %v8193_v41  ;;  %v8334_v1 = vadd.f32 %v19552_v23, %v8194_v17 }
 0x5a2   : > { %v8516_v21 = vcombine.high %v8514_v10, %v8514_v10  ;;  %v10223_v33 = vcombine.low %v8507_v30, %v8515_v14  ;;  %v8517_v61 = vcombine.high %v8481_v5, %v8481_v5  ;;  %v8524_v7 = vrot.slane %v8481_v5, %v21012_v18 }
 0x5a3   : > { %v8472_v25 = vadd.f32 %v19635_v2, %v8455_v60  ;;  %v8425_v12 = vpop.f32.mrf.mxu0  ;;  %vm11462_vm1 = vcmask 517120   ;;  %vm12534_vm2 = vcmask 519168  }
 0x5a4   : > { %v8531_v37 = vrot.slane %v8517_v61, %v21012_v18  ;;  %v8532_v59 = vcombine.high %v8524_v7, %v8524_v7  ;;  %v8456_v31 = vadd.f32 %v8425_v12, %v8331_v27  ;;  %v10224_v47 = vcombine.low %v8514_v10, %v8516_v21 }
 0x5a5   : > { %v8482_v50 = vmax.f32 %v8472_v25, 0.0  ;;  %v13744_v44 = vpop.f32.mrf.mxu0  ;;  %v10231_v11 = vrot.slane %v10223_v33, %v21012_v18 }
 0x5a6   : > { %v8533_v24 = vcombine.high %v8531_v37, %v8531_v37  ;;  %v8473_v3 = vadd.f32 %v19635_v2, %v8456_v31  ;;  %v10240_v13 = vcombine.low %v8532_v59, %v8531_v37  ;;  %v10238_v56 = vrot.slane %v10224_v47, %v21012_v18 }
 0x5a7   : > { %v8534_v49 = vcombine.high %v8482_v50, %v8482_v50  ;;  %v8541_v35 = vrot.slane %v8482_v50, %v21012_v18  ;;  %v8430_v39 = vpop.f32.mrf.mxu0  ;;  %v8335_v37 = vadd.f32 %v19573_v48, %v8195_v19 }
 0x5a8   : > { %v8483_v51 = vmax.f32 %v8473_v3, 0.0  ;;  %v8457_v43 = vadd.f32 %v8430_v39, %v8332_v20  ;;  %v10239_v8 = vcombine.low %v10231_v11, %v10238_v56  ;;  %v10248_v57 = vrot.slane %v10240_v13, %v21012_v18 }
 0x5a9   : > { %v8548_v55 = vrot.slane %v8534_v49, %v21012_v18  ;;  %v10241_v36 = vcombine.low %v8533_v24, %v8541_v35  ;;  %v13747_v6 = vpop.f32.mrf.mxu0 }
 0x5aa   : > { %v8550_v38 = vcombine.high %v8483_v51, %v8483_v51  ;;  %v8557_v42 = vrot.slane %v8483_v51, %v21012_v18  ;;  %v8474_v62 = vadd.f32 %v19635_v2, %v8457_v43  ;;  %10359 = vrot.lane.b32.xlu0 %v10239_v8, %s14902_s28 }
 0x5ab   : > { %v8549_v26 = vcombine.high %v8548_v55, %v8548_v55  ;;  %v8433_v40 = vpop.f32.mrf.mxu0  ;;  %v10255_v45 = vrot.slane %v10241_v36, %v21012_v18 }
 0x5ac   : > { %v8564_v58 = vrot.slane %v8550_v38, %v21012_v18  ;;  %v8565_v30 = vcombine.high %v8557_v42, %v8557_v42  ;;  %v8484_v15 = vmax.f32 %v8474_v62, 0.0  ;;  %v8458_v22 = vadd.f32 %v8433_v40, %v8333_v9 }
 0x5ad   : > { %v13748_v0 = vpop.f32.mrf.mxu0  ;;  %v10256_v10 = vcombine.low %v10248_v57, %v10255_v45  ;;  %v10257_v14 = vcombine.low %v8548_v55, %v8549_v26 }
 0x5ae   : > { %v8566_v5 = vcombine.high %v8564_v58, %v8564_v58  ;;  %v10258_v27 = vcombine.low %v8557_v42, %v8565_v30  ;;  %v8567_v52 = vcombine.high %v8484_v15, %v8484_v15  ;;  %v8574_v60 = vrot.slane %v8484_v15, %v21012_v18 }
 0x5af   : > { %v8475_v53 = vadd.f32 %v19635_v2, %v8458_v22  ;;  %10361 = vrot.lane.b32.xlu1 %v10256_v10, %s14902_s28  ;;  %v8438_v54 = vpop.f32.mrf.mxu0  ;;  %v10265_v25 = vrot.slane %v10257_v14, %v21012_v18 }
 0x5b0   : > { %v8581_v28 = vrot.slane %v8567_v52, %v21012_v18  ;;  %v8582_v21 = vcombine.high %v8574_v60, %v8574_v60  ;;  %v10274_v33 = vcombine.low %v8566_v5, %v8574_v60  ;;  %v8459_v61 = vadd.f32 %v8438_v54, %v8334_v1 }
 0x5b1   : > { %v8485_v23 = vmax.f32 %v8475_v53, 0.0  ;;  %v13751_v7 = vpop.f32.mrf.mxu0  ;;  %v10272_v12 = vrot.slane %v10258_v27, %v21012_v18 }
 0x5b2   : > { %v8476_v59 = vadd.f32 %v19635_v2, %v8459_v61  ;;  %v10275_v31 = vcombine.low %v8582_v21, %v8581_v28  ;;  %v10282_v3 = vrot.slane %v10274_v33, %v21012_v18 }
 0x5b3   : > { %v8583_v47 = vcombine.high %v8485_v23, %v8485_v23  ;;  %v8590_v41 = vrot.slane %v8485_v23, %v21012_v18  ;;  %v8441_v50 = vpop.f32.mrf.mxu0  ;;  %v10273_v44 = vcombine.low %v10265_v25, %v10272_v12 }
 0x5b4   : > { %v8486_v20 = vmax.f32 %v8476_v59, 0.0  ;;  %v8460_v24 = vadd.f32 %v8441_v50, %v8335_v37  ;;  %v10289_v11 = vrot.slane %v10275_v31, %v21012_v18 }
 0x5b5   : > { %v8597_v13 = vrot.slane %v8583_v47, %v21012_v18  ;;  %v8598_v49 = vcombine.high %v8590_v41, %v8590_v41  ;;  %10363 = vrot.lane.b32.xlu0 %v10273_v44, %s14902_s28  ;;  %v13752_v48 = vpop.f32.mrf.mxu0 }
 0x5b6   : > { %v8600_v35 = vcombine.high %v8486_v20, %v8486_v20  ;;  %v8607_v39 = vrot.slane %v8486_v20, %v21012_v18  ;;  %v8477_v56 = vadd.f32 %v19635_v2, %v8460_v24  ;;  %v10290_v51 = vcombine.low %v10282_v3, %v10289_v11  ;;  %v13472_v24 = vpop.f32.mrf.mxu1 }
 0x5b7   : > { %v8599_v43 = vcombine.high %v8597_v13, %v8597_v13  ;;  %v10291_v17 = vcombine.low %v8590_v41, %v8598_v49  ;;  %v8446_v55 = vpop.f32.mrf.mxu0 }
 0x5b8   : > { %v8614_v36 = vrot.slane %v8600_v35, %v21012_v18  ;;  %v8615_v6 = vcombine.high %v8607_v39, %v8607_v39  ;;  %v8487_v8 = vmax.f32 %v8477_v56, 0.0  ;;  %v8461_v38 = vadd.f32 %v8446_v55, %v19622_v63  ;;  %10365 = vrot.lane.b32.xlu1 %v10290_v51, %s14902_s28  ;;  %v13473_v3 = vpop.f32.mrf.mxu1  ;;  %v21035_v56 = vld [vmem:[#allocation30_spill] sm:$0xff]  ;;  %v21036_v51 = vld [vmem:[#allocation69_spill] sm:$0xff] }
 0x5b9   : > { %v13755_v42 = vpop.f32.mrf.mxu0  ;;  %v10292_v62 = vcombine.low %v8597_v13, %v8599_v43  ;;  %v10299_v58 = vrot.slane %v10291_v17, %v21012_v18  ;;  %v6385_v43 = vadd.f32 %v21036_v51, %v21035_v56 }
 0x5ba   : > { %v8616_v9 = vcombine.high %v8614_v36, %v8614_v36  ;;  %v8617_v26 = vcombine.high %v8487_v8, %v8487_v8  ;;  %v8624_v40 = vrot.slane %v8487_v8, %v21012_v18  ;;  %v10308_v57 = vcombine.low %v8615_v6, %v8614_v36  ;;  %v13475_v11 = vpop.f32.mrf.mxu1  ;;  %v21038_v42 = vld [vmem:[#allocation79_spill] sm:$0xff] }
 0x5bb   : > { %v8478_v45 = vadd.f32 %v19635_v2, %v8461_v38  ;;  %v8449_v19 = vpop.f32.mrf.mxu0  ;;  %v10306_v30 = vrot.slane %v10292_v62, %v21012_v18  ;;  %v6415_v55 = vmax.f32 %v6385_v43, 0.0  ;;  %v21037_v38 = vld [vmem:[#allocation82_spill] sm:$0xff] }
 0x5bc   : > { %v8631_v15 = vrot.slane %v8617_v26, %v21012_v18  ;;  %v10309_v1 = vcombine.low %v8616_v9, %v8624_v40  ;;  %v8462_v63 = vadd.f32 %v8449_v19, %v19624_v16  ;;  %v10316_v60 = vrot.slane %v10308_v57, %v21012_v18  ;;  %v13476_v13 = vpop.f32.mrf.mxu1  ;;  %v21039_v40 = vld [vmem:[#allocation25_spill] sm:$0xff] }
 0x5bd   : > { %v8488_v22 = vmax.f32 %v8478_v45, 0.0  ;;  %v13756_v0 = vpop.f32.mrf.mxu0  ;;  %v10307_v10 = vcombine.low %v10299_v58, %v10306_v30  ;;  %v6475_v6 = vcombine.high %v6415_v55, %v6415_v55  ;;  %v6540_v62 = vcombine.low %v21038_v42, %v21037_v38  ;;  %v21040_v19 = vld [vmem:[#allocation61_spill] sm:$0xff] }
 0x5be   : > { %v8632_v14 = vcombine.high %v8631_v15, %v8631_v15  ;;  %v8479_v5 = vadd.f32 %v19635_v2, %v8462_v63  ;;  %v10323_v53 = vrot.slane %v10309_v1, %v21012_v18  ;;  %v13478_v49 = vpop.f32.mrf.mxu1  ;;  %v13345_v57 = vcombine.high %v21037_v38, %v21039_v40 }
 0x5bf   : > { %v8633_v27 = vcombine.high %v8488_v22, %v8488_v22  ;;  %v8640_v52 = vrot.slane %v8488_v22, %v21012_v18  ;;  %10367 = vrot.lane.b32.xlu0 %v10307_v10, %s14902_s28  ;;  %v6503_v9 = vrot.slane %v6475_v6, %v21012_v18  ;;  %v6496_v45 = vrot.slane %v6415_v55, %v21012_v18  ;;  %v21041_v10 = vld [vmem:[#allocation28_spill] sm:$0xff] }
 0x5c0   : > { %v8489_v54 = vmax.f32 %v8479_v5, 0.0  ;;  %v10324_v16 = vcombine.low %v10316_v60, %v10323_v53  ;;  %v10325_v33 = vcombine.low %v8631_v15, %v8632_v14  ;;  %v13479_v48 = vpop.f32.mrf.mxu1  ;;  %v13343_v58 = vcombine.high %v21040_v19, %v6540_v62  ;;  %v19810_v62 = vld [vmem:[#allocation16] ss:$0 sm:$0xff] }
 0x5c1   : > { %v8647_v28 = vrot.slane %v8633_v27, %v21012_v18  ;;  %v8648_v21 = vcombine.high %v8640_v52, %v8640_v52  ;;  %v9950_v15 = vrot.slane %v6503_v9, %v21012_v18  ;;  %v9985_v1 = vrot.slane %v13345_v57, %v21012_v18 }
 0x5c2   : > { %v8650_v61 = vcombine.high %v8489_v54, %v8489_v54  ;;  %v8657_v23 = vrot.slane %v8489_v54, %v21012_v18  ;;  %10369 = vrot.lane.b32.xlu1 %v10324_v16, %s14902_s28  ;;  %v10333_v59 = vrot.slane %v10325_v33, %v21012_v18  ;;  %v19738_v35 = vpop.f32.mrf.mxu1  ;;  %v9936_v63 = vrot.slane %v6496_v45, %v21012_v18 }
 0x5c3   : > { %v8649_v7 = vcombine.high %v8647_v28, %v8647_v28  ;;  %v10326_v2 = vcombine.low %v8640_v52, %v8648_v21  ;;  %v9971_v22 = vrot.slane %v13343_v58, %v21012_v18  ;;  %v6400_v14 = vadd.f32 %v21036_v51, %v21041_v10 }
 0x5c4   : > { %v8664_v25 = vrot.slane %v8650_v61, %v21012_v18  ;;  %v8665_v12 = vcombine.high %v8657_v23, %v8657_v23  ;;  %v19740_v39 = vpop.f32.mrf.mxu1  ;;  %v9953_v27 = vcombine.low %v9936_v63, %v9950_v15  ;;  %v13474_v42 = vadd.f32 %v13473_v3, %v13472_v24 }
 0x5c5   : > { %v10342_v37 = vcombine.low %v8649_v7, %v8657_v23  ;;  %v10340_v31 = vrot.slane %v10326_v2, %v21012_v18  ;;  %v9988_v52 = vcombine.low %v9971_v22, %v9985_v1  ;;  %v6430_v21 = vmax.f32 %v6400_v14, 0.0 }
 0x5c6   : > { %v10343_v41 = vcombine.low %v8665_v12, %v8664_v25  ;;  %v19744_v17 = vpop.f32.mrf.mxu1  ;;  %v9751_v45 = vadd.f32 %v13474_v42, %v19810_v62  ;;  %v13477_v19 = vadd.f32 %v13476_v13, %v13475_v11  ;;  %v13480_v58 = vadd.f32 %v13479_v48, %v13478_v49 }
 0x5c7   : > { %v19732_v47 = vcombine.low %v10333_v59, %v10340_v31  ;;  %v10350_v50 = vrot.slane %v10342_v37, %v21012_v18  ;;  %v6646_v33 = vcombine.high %v6430_v21, %v6430_v21  ;;  %v6667_v31 = vrot.slane %v6430_v21, %v21012_v18 }
 0x5c8   : > { %v10357_v44 = vrot.slane %v10343_v41, %v21012_v18  ;;  %v19746_v36 = vpop.f32.mrf.mxu1  ;;  %v9754_v24 = vadd.f32 %v13477_v19, %v19810_v62  ;;  %v9759_v3 = vadd.f32 %v13480_v58, %v19810_v62 }
 0x5c9   : > { %v6674_v12 = vrot.slane %v6646_v33, %v21012_v18 }
 0x5ca   : > { %v19736_v20 = vcombine.low %v10350_v50, %v10357_v44  ;;  %v19748_v8 = vpop.f32.mrf.mxu1  ;;  %v10076_v44 = vrot.slane %v6667_v31, %v21012_v18 }
 0x5cb   : > { %v10090_v50 = vrot.slane %v6674_v12, %v21012_v18 }
 0x5cc   : > { %v19753_v26 = vpop.f32.mrf.mxu1 }
 0x5ce   : > { %v19759_v30 = vpop.f32.mrf.mxu1 }
 0x5d0   : > { %v19769_v5 = vpop.f32.mrf.mxu1 }
 0x5d2   : > { %v19779_v16 = vpop.f32.mrf.mxu1 }
 0x5d4   : > { %v19781_v61 = vpop.f32.mrf.mxu1 }
 0x601   : > { %v13512_v37 = vpop.f32.mrf.mxu1 }
 0x603   : > { %v13513_v41 = vpop.f32.mrf.mxu1 }
 0x604   : > { %v13514_v40 = vadd.f32 %v13513_v41, %v13512_v37 }
 0x605   : > { %v13515_v51 = vpop.f32.mrf.mxu1 }
 0x606   : > { %v9816_v10 = vadd.f32 %v13514_v40, %v9751_v45 }
 0x607   : > { %v13516_v38 = vpop.f32.mrf.mxu1 }
 0x608   : > { %v13517_v63 = vadd.f32 %v13516_v38, %v13515_v51  ;;  %v13492_v51 = vadd.f32 %v19769_v5, %v19759_v30  ;;  %v13495_v5 = vadd.f32 %v19781_v61, %v19779_v16 }
 0x60a   : > { %v9819_v21 = vadd.f32 %v13517_v63, %v9754_v24  ;;  %v9775_v45 = vadd.f32 %v13492_v51, %v19810_v62 }
 0x61c   : > { %v19765_v0 = vpop.permute.xlu0 %10359 }
 0x61d   : > { %v10416_v53 = vsel %vm10415_vm0, %v9953_v27, %v19765_v0 }
 0x621   : > { %v19771_v60 = vpop.permute.xlu1 %10361 }
 0x622   : > { %v10417_v54 = vsel %vm10415_vm0, %v9988_v52, %v19771_v60  ;;  %v13486_v52 = vadd.f32 %v19746_v36, %v19744_v17 }
 0x623   : > { %v19777_v28 = vmax.f32 %v10416_v53, %v10417_v54 }
 0x627   : > { %v19783_v23 = vpop.permute.xlu0 %10363 }
 0x628   : > { %v10418_v2 = vsel %vm10415_vm0, %v19638_v4, %v19783_v23  ;;  %v10093_v4 = vcombine.low %v10076_v44, %v10090_v50 }
 0x62a   : > { %v19785_v7 = vpop.permute.xlu1 %10365 }
 0x62b   : > { %v10419_v25 = vsel %vm10415_vm0, %v19647_v29, %v19785_v7 }
 0x62c   : > { %v19794_v59 = vmax.f32 %v10418_v2, %v10419_v25  ;;  %v13489_v25 = vadd.f32 %v19753_v26, %v19748_v8 }
 0x631   : > { %v19799_v56 = vpop.permute.xlu0 %10367 }
 0x632   : > { %v10420_v29 = vsel %vm10415_vm0, %v10093_v4, %v19799_v56 }
 0x634   : > { %v19801_v43 = vpop.permute.xlu1 %10369 }
 0x635   : > { %v10421_v55 = vsel %vm10415_vm0, %v19661_v32, %v19801_v43  ;;  %v13483_v32 = vadd.f32 %v19740_v39, %v19738_v35  ;;  %v9767_v39 = vadd.f32 %v13486_v52, %v19810_v62 }
 0x636   : > { %v19808_v6 = vmax.f32 %v10420_v29, %v10421_v55  ;;  %v9770_v55 = vadd.f32 %v13489_v25, %v19810_v62 }
 0x637   : > { %v9762_v33 = vadd.f32 %v13483_v32, %v19810_v62  ;;  %v9778_v32 = vadd.f32 %v13495_v5, %v19810_v62 }
 0x63a   : > { %v13518_v9 = vpop.f32.mrf.mxu1 }
 0x63c   : > { %v13519_v57 = vpop.f32.mrf.mxu1 }
 0x63d   : > { %v13520_v22 = vadd.f32 %v13519_v57, %v13518_v9 }
 0x63e   : > { %v13521_v1 = vpop.f32.mrf.mxu1 }
 0x63f   : > { %v13761_v15 = vpop.f32.mrf.mxu0  ;;  %v9824_v49 = vadd.f32 %v13520_v22, %v9759_v3 }
 0x640   : > { %v13522_v27 = vpop.f32.mrf.mxu1 }
 0x641   : > { %v9880_v14 = vpop.f32.mrf.mxu0  ;;  %v13523_v54 = vadd.f32 %v13522_v27, %v13521_v1  ;;  %v9889_v44 = vadd.f32 %v13761_v15, %v9824_v49 }
 0x642   : > { %v9881_v53 = vadd.f32 %v9880_v14, %v9816_v10  ;;  %v13524_v13 = vpop.f32.mrf.mxu1 }
 0x643   : > { %v13762_v11 = vpop.f32.mrf.mxu0  ;;  %v9827_v31 = vadd.f32 %v13523_v54, %v9762_v33  ;;  %v9913_v9 = vmax.f32 %v9889_v44, 0.0 }
 0x644   : > { %v9911_v48 = vmax.f32 %v9881_v53, 0.0  ;;  %v13525_v35 = vpop.f32.mrf.mxu1 }
 0x645   : > { %v9883_v2 = vpop.f32.mrf.mxu0  ;;  %v13526_v17 = vadd.f32 %v13525_v35, %v13524_v13  ;;  %v9892_v57 = vadd.f32 %v13762_v11, %v9827_v31 }
 0x646   : > { %v9884_v12 = vadd.f32 %v9883_v2, %v9819_v21  ;;  %10391 = vrot.lane.b32.xlu0 %v9911_v48, %s14902_s28  ;;  %v13527_v37 = vpop.f32.mrf.mxu1 }
 0x647   : > { %v9832_v50 = vadd.f32 %v13526_v17, %v9767_v39  ;;  %v9914_v22 = vmax.f32 %v9892_v57, 0.0 }
 0x648   : > { %v13765_v36 = vpop.f32.mrf.mxu0  ;;  %v9912_v41 = vmax.f32 %v9884_v12, 0.0  ;;  %v13528_v29 = vpop.f32.mrf.mxu1 }
 0x649   : > { %v13529_v26 = vadd.f32 %v13528_v29, %v13527_v37 }
 0x64a   : > { %v9896_v4 = vpop.f32.mrf.mxu0  ;;  %10393 = vrot.lane.b32.xlu1 %v9912_v41, %s14902_s28  ;;  %10371 = vrot.lane.b32.xlu0 %v19732_v47, %s14902_s28 }
 0x64b   : > { %v9897_v8 = vadd.f32 %v9896_v4, %v9832_v50  ;;  %v9835_v40 = vadd.f32 %v13529_v26, %v9770_v55 }
 0x64c   : > { %v13766_v38 = vpop.f32.mrf.mxu0  ;;  %v13530_v42 = vpop.f32.mrf.mxu1 }
 0x64d   : > { %v9915_v58 = vmax.f32 %v9897_v8, 0.0 }
 0x64e   : > { %v9899_v19 = vpop.f32.mrf.mxu0  ;;  %v13531_v30 = vpop.f32.mrf.mxu1  ;;  %10373 = vrot.lane.b32.xlu1 %v19736_v20, %s14902_s28  ;;  %10395 = vrot.lane.b32.xlu0 %v9913_v9, %s14902_s28 }
 0x64f   : > { %v9900_v47 = vadd.f32 %v9899_v19, %v9835_v40  ;;  %v13532_v15 = vadd.f32 %v13531_v30, %v13530_v42 }
 0x650   : > { %v13533_v1 = vpop.f32.mrf.mxu1 }
 0x651   : > { %v9840_v63 = vadd.f32 %v13532_v15, %v9775_v45  ;;  %v9916_v14 = vmax.f32 %v9900_v47, 0.0 }
 0x652   : > { %v13534_v10 = vpop.f32.mrf.mxu1  ;;  %10397 = vrot.lane.b32.xlu1 %v9914_v22, %s14902_s28  ;;  %10399 = vrot.lane.b32.xlu0 %v9915_v58, %s14902_s28 }
 0x653   : > { %v13535_v16 = vadd.f32 %v13534_v10, %v13533_v1  ;;  %v9905_v61 = vadd.f32 %v13765_v36, %v9840_v63 }
 0x655   : > { %v9843_v27 = vadd.f32 %v13535_v16, %v9778_v32  ;;  %v9917_v24 = vmax.f32 %v9905_v61, 0.0 }
 0x656   : > { %10401 = vrot.lane.b32.xlu1 %v9916_v14, %s14902_s28 }
 0x657   : > { %10403 = vrot.lane.b32.xlu0 %v9917_v24, %s14902_s28  ;;  %v9908_v20 = vadd.f32 %v13766_v38, %v9843_v27 }
 0x659   : > { %v9918_v3 = vmax.f32 %v9908_v20, 0.0 }
 0x65b   : > { %10405 = vrot.lane.b32.xlu1 %v9918_v3, %s14902_s28 }
 0x6b8   : > { %v10392_v52 = vpop.permute.xlu0 %10391 }
 0x6b9   : > { %v10424_v11 = vsel %vm10415_vm0, %v19765_v0, %v10392_v52  ;;  %v10438_v13 = vsel %vm10415_vm0, %v10392_v52, -inf }
 0x6bc   : > { %v10394_v53 = vpop.permute.xlu1 %10393  ;;  %v19842_v62 = vpop.permute.xlu0 %10371 }
 0x6bd   : > { %v10425_v49 = vsel %vm10415_vm0, %v19771_v60, %v10394_v53  ;;  %v10439_v48 = vsel %vm10415_vm0, %v10394_v53, -inf  ;;  %v10422_v0 = vsel %vm10415_vm0, %v19657_v34, %v19842_v62 }
 0x6be   : > { %v10437_v54 = vmax.f32 %v10424_v11, %v10425_v49  ;;  %v10440_v21 = vmax.f32 %v10438_v13, %v10439_v48 }
 0x6c0   : > { %v10532_v33 = vcombine.low %v19777_v28, %v10437_v54  ;;  %v10533_v2 = vcombine.high %v19777_v28, %v10437_v54  ;;  %v10534_v35 = vcombine.high %v10440_v21, %v10440_v21  ;;  %v10555_v39 = vrot.slane %v10440_v21, %v21012_v18  ;;  %v19853_v25 = vpop.permute.xlu1 %10373  ;;  %v19855_v12 = vpop.permute.xlu0 %10395 }
 0x6c1   : > { %v10423_v60 = vsel %vm10415_vm0, %v19668_v46, %v19853_v25  ;;  %v19871_v50 = vsel %vm10415_vm0, %v19783_v23, %v19855_v12 }
 0x6c2   : > { %v10541_v17 = vrot.slane %v10532_v33, %v21012_v18  ;;  %v10548_v36 = vrot.slane %v10533_v2, %v21012_v18  ;;  %v10562_v28 = vrot.slane %v10534_v35, %v21012_v18  ;;  %v13359_v37 = vcombine.low %v10555_v39, %v10555_v39 }
 0x6c3   : > { %v13361_v31 = vcombine.high %v10555_v39, %v10555_v39  ;;  %v19866_v41 = vmax.f32 %v10422_v0, %v10423_v60 }
 0x6c4   : > { %v10563_v34 = vcombine.low %v10541_v17, %v10555_v39  ;;  %v10564_v44 = vcombine.high %v10541_v17, %v10555_v39  ;;  %v10565_v51 = vcombine.low %v10548_v36, %v10562_v28  ;;  %v10566_v46 = vcombine.high %v10548_v36, %v10562_v28 }
 0x6c5   : > { %v10811_v4 = vrot.slane %v13359_v37, %v21012_v18  ;;  %v10844_v29 = vrot.slane %v13361_v31, %v21012_v18  ;;  %v13363_v55 = vcombine.low %v10562_v28, %v10562_v28  ;;  %v13365_v8 = vcombine.high %v10562_v28, %v10562_v28 }
 0x6c6   : > { %v10804_v26 = vrot.slane %v10563_v34, %v21012_v18  ;;  %v10837_v38 = vrot.slane %v10564_v44, %v21012_v18  ;;  %v10870_v42 = vrot.slane %v10565_v51, %v21012_v18  ;;  %v19879_v9 = vrot.slane %v10566_v46, %v21012_v18 }
 0x6c7   : > { %v10877_v23 = vrot.slane %v13363_v55, %v21012_v18  ;;  %v19883_v40 = vrot.slane %v13365_v8, %v21012_v18  ;;  %v11463_v57 = vsel %vm11462_vm1, %v10811_v4, -inf  ;;  %v11512_v45 = vsel %vm11462_vm1, %v10844_v29, -inf }
 0x6c8   : > { %v10812_v19 = vcombine.high %v10804_v26, %v10804_v26  ;;  %v10845_v30 = vcombine.high %v10837_v38, %v10837_v38  ;;  %v10878_v5 = vcombine.high %v10870_v42, %v10870_v42  ;;  %v10911_v58 = vcombine.high %v19879_v9, %v19879_v9 }
 0x6c9   : > { %v11448_v47 = vsel %vm2348_vm4, %v10804_v26, -inf  ;;  %v11464_v15 = vrot.slane %v11463_v57, 4  ;;  %v11498_v1 = vsel %vm2348_vm4, %v10837_v38, -inf  ;;  %v11513_v63 = vrot.slane %v11512_v45, 4 }
 0x6ca   : > { %v11449_v22 = vrot.slane %v11448_v47, 4  ;;  %v11455_v10 = vsel %vm2348_vm4, %v10812_v19, -inf  ;;  %v11499_v32 = vrot.slane %v11498_v1, 4  ;;  %v11505_v14 = vsel %vm2348_vm4, %v10845_v30, -inf }
 0x6cb   : > { %v11456_v16 = vrot.slane %v11455_v10, 4  ;;  %v11465_v61 = vmax.f32 %v11463_v57, %v11464_v15  ;;  %v11506_v27 = vrot.slane %v11505_v14, 4  ;;  %v11514_v24 = vmax.f32 %v11512_v45, %v11513_v63 }
 0x6cc   : > { %v11450_v20 = vmax.f32 %v11448_v47, %v11449_v22  ;;  %v11500_v3 = vmax.f32 %v11498_v1, %v11499_v32  ;;  %v11547_v52 = vsel %vm2348_vm4, %v10870_v42, -inf  ;;  %v11554_v53 = vsel %vm2348_vm4, %v10878_v5, -inf }
 0x6cd   : > { %v11457_v11 = vmax.f32 %v11455_v10, %v11456_v16  ;;  %v11466_v13 = vrot.slane %v11465_v61, 2  ;;  %v11507_v49 = vmax.f32 %v11505_v14, %v11506_v27  ;;  %v11515_v48 = vrot.slane %v11514_v24, 2 }
 0x6ce   : > { %v11451_v54 = vrot.slane %v11450_v20, 2  ;;  %v11501_v21 = vrot.slane %v11500_v3, 2  ;;  %v11548_v33 = vrot.slane %v11547_v52, 4  ;;  %v11555_v2 = vrot.slane %v11554_v53, 4 }
 0x6cf   : > { %v11458_v35 = vrot.slane %v11457_v11, 2  ;;  %v11467_v39 = vmax.f32 %v11465_v61, %v11466_v13  ;;  %v11508_v0 = vrot.slane %v11507_v49, 2  ;;  %v11516_v60 = vmax.f32 %v11514_v24, %v11515_v48  ;;  %v10398_v24 = vpop.permute.xlu1 %10397 }
 0x6d0   : > { %v11452_v17 = vmax.f32 %v11450_v20, %v11451_v54  ;;  %v11502_v36 = vmax.f32 %v11500_v3, %v11501_v21  ;;  %v11549_v28 = vmax.f32 %v11547_v52, %v11548_v33  ;;  %v11556_v37 = vmax.f32 %v11554_v53, %v11555_v2 }
 0x6d1   : > { %v11459_v31 = vmax.f32 %v11457_v11, %v11458_v35  ;;  %v11468_v34 = vrot.slane %v11467_v39, 1  ;;  %v11509_v44 = vmax.f32 %v11507_v49, %v11508_v0  ;;  %v11517_v51 = vrot.slane %v11516_v60, 1 }
 0x6d2   : > { %v11453_v46 = vrot.slane %v11452_v17, 1  ;;  %v11503_v4 = vrot.slane %v11502_v36, 1  ;;  %v11550_v29 = vrot.slane %v11549_v28, 2  ;;  %v11557_v55 = vrot.slane %v11556_v37, 2 }
 0x6d3   : > { %v11460_v8 = vrot.slane %v11459_v31, 1  ;;  %v11469_v26 = vmax.f32 %v11467_v39, %v11468_v34  ;;  %v11510_v38 = vrot.slane %v11509_v44, 1  ;;  %v11518_v42 = vmax.f32 %v11516_v60, %v11517_v51 }
 0x6d4   : > { %v11454_v57 = vmax.f32 %v11452_v17, %v11453_v46  ;;  %v11504_v45 = vmax.f32 %v11502_v36, %v11503_v4  ;;  %v11551_v19 = vmax.f32 %v11549_v28, %v11550_v29  ;;  %v11558_v30 = vmax.f32 %v11556_v37, %v11557_v55 }
 0x6d5   : > { %v11461_v5 = vmax.f32 %v11459_v31, %v11460_v8  ;;  %v11511_v47 = vmax.f32 %v11509_v44, %v11510_v38  ;;  %v11561_v15 = vsel %vm11462_vm1, %v10877_v23, -inf  ;;  %v11596_v1 = vsel %vm2348_vm4, %v19879_v9, -inf }
 0x6d6   : > { %v11552_v63 = vrot.slane %v11551_v19, 1  ;;  %v11559_v22 = vrot.slane %v11558_v30, 1  ;;  %v11562_v10 = vrot.slane %v11561_v15, 4  ;;  %v11597_v32 = vrot.slane %v11596_v1, 4 }
 0x6d7   : > { %v11603_v14 = vsel %vm2348_vm4, %v10911_v58, -inf  ;;  %v11610_v16 = vsel %vm11462_vm1, %v19883_v40, -inf  ;;  %v12319_v61 = vcombine.low %v11454_v57, %v11461_v5  ;;  %v12322_v27 = vcombine.low %v11504_v45, %v11511_v47 }
 0x6d8   : > { %v11553_v20 = vmax.f32 %v11551_v19, %v11552_v63  ;;  %v11560_v3 = vmax.f32 %v11558_v30, %v11559_v22  ;;  %v11563_v52 = vmax.f32 %v11561_v15, %v11562_v10  ;;  %v11598_v53 = vmax.f32 %v11596_v1, %v11597_v32 }
 0x6d9   : > { %v11604_v23 = vrot.slane %v11603_v14, 4  ;;  %v11611_v11 = vrot.slane %v11610_v16, 4  ;;  %v12389_v13 = vrot.slane %v12322_v27, 7  ;;  %v12398_v9 = vrot.slane %v11518_v42, 7 }
 0x6da   : > { %v11564_v49 = vrot.slane %v11563_v52, 2  ;;  %v11599_v48 = vrot.slane %v11598_v53, 2  ;;  %v12325_v54 = vcombine.low %v11553_v20, %v11560_v3  ;;  %v10427_v58 = vsel %vm10415_vm0, %v19785_v7, %v10398_v24 }
 0x6db   : > { %v11605_v21 = vmax.f32 %v11603_v14, %v11604_v23  ;;  %v11612_v33 = vmax.f32 %v11610_v16, %v11611_v11  ;;  %v12390_v40 = vsel %vm12366_vm14, %v12389_v13, %v12319_v61  ;;  %v12399_v2 = vsel %vm12366_vm14, %v12398_v9, %v11469_v26 }
 0x6dc   : > { %v11565_v35 = vmax.f32 %v11563_v52, %v11564_v49  ;;  %v11600_v39 = vmax.f32 %v11598_v53, %v11599_v48  ;;  %v12391_v0 = vsel %vm12368_vm15, %v12389_v13, %v12390_v40  ;;  %v12392_v60 = vrot.slane %v12325_v54, 6  ;;  %v19924_v53 = vpop.permute.xlu0 %10399 }
 0x6dd   : > { %v11606_v17 = vrot.slane %v11605_v21, 2  ;;  %v11613_v36 = vrot.slane %v11612_v33, 2  ;;  %v10447_v28 = vsel %vm10415_vm0, %v19855_v12, -inf  ;;  %v10446_v37 = vmax.f32 %v19871_v50, %v10427_v58 }
 0x6de   : > { %v11566_v7 = vrot.slane %v11565_v35, 1  ;;  %v11601_v31 = vrot.slane %v11600_v39, 1  ;;  %v12393_v34 = vsel %vm12371_vm5, %v12392_v60, %v12391_v0  ;;  %v10448_v44 = vsel %vm10415_vm0, %v10398_v24, -inf }
 0x6df   : > { %v11607_v51 = vmax.f32 %v11605_v21, %v11606_v17  ;;  %v11614_v46 = vmax.f32 %v11612_v33, %v11613_v36  ;;  %v12400_v4 = vsel %vm12368_vm15, %v12398_v9, %v12399_v2  ;;  %v10449_v29 = vmax.f32 %v10447_v28, %v10448_v44 }
 0x6e0   : > { %v11567_v55 = vmax.f32 %v11565_v35, %v11566_v7  ;;  %v12394_v8 = vsel %vm12373_vm6, %v12392_v60, %v12393_v34  ;;  %v10603_v26 = vcombine.low %v19794_v59, %v10446_v37  ;;  %v10604_v12 = vcombine.high %v19794_v59, %v10446_v37 }
 0x6e1   : > { %v11608_v50 = vrot.slane %v11607_v51, 1  ;;  %v11615_v38 = vrot.slane %v11614_v46, 1  ;;  %v10605_v42 = vcombine.high %v10449_v29, %v10449_v29  ;;  %v10626_v57 = vrot.slane %v10449_v29, %v21012_v18 }
 0x6e2   : > { %v11602_v45 = vmax.f32 %v11600_v39, %v11601_v31  ;;  %v12401_v19 = vrot.slane %v11567_v55, 6  ;;  %v10612_v30 = vrot.slane %v10603_v26, %v21012_v18  ;;  %v10619_v5 = vrot.slane %v10604_v12, %v21012_v18 }
 0x6e3   : > { %v11609_v47 = vmax.f32 %v11607_v51, %v11608_v50  ;;  %v11616_v15 = vmax.f32 %v11614_v46, %v11615_v38  ;;  %v10633_v1 = vrot.slane %v10605_v42, %v21012_v18  ;;  %v13367_v63 = vcombine.low %v10626_v57, %v10626_v57 }
 0x6e4   : > { %v12402_v22 = vsel %vm12371_vm5, %v12401_v19, %v12400_v4  ;;  %v10634_v10 = vcombine.low %v10612_v30, %v10626_v57  ;;  %v10635_v59 = vcombine.high %v10612_v30, %v10626_v57  ;;  %v13369_v32 = vcombine.high %v10626_v57, %v10626_v57 }
 0x6e5   : > { %v12328_v14 = vcombine.low %v11602_v45, %v11609_v47  ;;  %v12403_v16 = vsel %vm12373_vm6, %v12401_v19, %v12402_v22  ;;  %v12404_v61 = vrot.slane %v11616_v15, 5  ;;  %v10636_v27 = vcombine.low %v10619_v5, %v10633_v1 }
 0x6e6   : > { %v10637_v24 = vcombine.high %v10619_v5, %v10633_v1  ;;  %v10936_v20 = vrot.slane %v10634_v10, %v21012_v18  ;;  %v10943_v3 = vrot.slane %v13367_v63, %v21012_v18  ;;  %v10969_v52 = vrot.slane %v10635_v59, %v21012_v18 }
 0x6e7   : > { %v12395_v23 = vrot.slane %v12328_v14, 5  ;;  %v12405_v11 = vsel %vm12376_vm7, %v12404_v61, %v12403_v16  ;;  %v10976_v13 = vrot.slane %v13369_v32, %v21012_v18  ;;  %v13371_v9 = vcombine.low %v10633_v1, %v10633_v1 }
 0x6e8   : > { %v12406_v49 = vsel %vm12378_vm8, %v12404_v61, %v12405_v11  ;;  %v10944_v48 = vcombine.high %v10936_v20, %v10936_v20  ;;  %v10977_v54 = vcombine.high %v10969_v52, %v10969_v52  ;;  %v11002_v58 = vrot.slane %v10636_v27, %v21012_v18 }
 0x6e9   : > { %v12396_v21 = vsel %vm12376_vm7, %v12395_v23, %v12394_v8  ;;  %12535 = vst.msk [vmem:[%s18674_s23 + $0x18] sm:$0xf] %vm12534_vm2, %v12406_v49  ;;  %v11009_v33 = vrot.slane %v13371_v9, %v21012_v18  ;;  %v13373_v40 = vcombine.high %v10633_v1, %v10633_v1  ;;  %v19937_v2 = vsel %vm10415_vm0, %v19799_v56, %v19924_v53 }
 0x6ea   : > { %v12397_v35 = vsel %vm12378_vm8, %v12395_v23, %v12396_v21  ;;  %v11010_v39 = vcombine.high %v11002_v58, %v11002_v58  ;;  %v11645_v0 = vsel %vm2348_vm4, %v10936_v20, -inf  ;;  %v11652_v60 = vsel %vm2348_vm4, %v10944_v48, -inf }
 0x6eb   : > { %12533 = vst [vmem:[%s18674_s23 + $0x10] sm:$0xff] %v12397_v35  ;;  %v11035_v17 = vrot.slane %v10637_v24, %v21012_v18  ;;  %v11042_v36 = vrot.slane %v13373_v40, %v21012_v18  ;;  %v11646_v28 = vrot.slane %v11645_v0, 4  ;;  %v11653_v37 = vrot.slane %v11652_v60, 4 }
 0x6ec   : > { %v11659_v7 = vsel %vm11462_vm1, %v10943_v3, -inf  ;;  %v11694_v31 = vsel %vm2348_vm4, %v10969_v52, -inf  ;;  %v11701_v56 = vsel %vm2348_vm4, %v10977_v54, -inf  ;;  %v11708_v34 = vsel %vm11462_vm1, %v10976_v13, -inf }
 0x6ed   : > { %v11647_v44 = vmax.f32 %v11645_v0, %v11646_v28  ;;  %v11654_v51 = vmax.f32 %v11652_v60, %v11653_v37  ;;  %v11660_v46 = vrot.slane %v11659_v7, 4  ;;  %v11695_v4 = vrot.slane %v11694_v31, 4 }
 0x6ee   : > { %v11702_v29 = vrot.slane %v11701_v56, 4  ;;  %v11709_v55 = vrot.slane %v11708_v34, 4  ;;  %v11743_v8 = vsel %vm2348_vm4, %v11002_v58, -inf  ;;  %v11750_v26 = vsel %vm2348_vm4, %v11010_v39, -inf }
 0x6ef   : > { %v11648_v12 = vrot.slane %v11647_v44, 2  ;;  %v11655_v50 = vrot.slane %v11654_v51, 2  ;;  %v11661_v38 = vmax.f32 %v11659_v7, %v11660_v46  ;;  %v11696_v42 = vmax.f32 %v11694_v31, %v11695_v4 }
 0x6f0   : > { %v11703_v57 = vmax.f32 %v11701_v56, %v11702_v29  ;;  %v11710_v45 = vmax.f32 %v11708_v34, %v11709_v55  ;;  %v11744_v19 = vrot.slane %v11743_v8, 4  ;;  %v11751_v30 = vrot.slane %v11750_v26, 4 }
 0x6f1   : > { %v11649_v5 = vmax.f32 %v11647_v44, %v11648_v12  ;;  %v11656_v47 = vmax.f32 %v11654_v51, %v11655_v50  ;;  %v11662_v15 = vrot.slane %v11661_v38, 2  ;;  %v11697_v1 = vrot.slane %v11696_v42, 2 }
 0x6f2   : > { %v11704_v63 = vrot.slane %v11703_v57, 2  ;;  %v11711_v22 = vrot.slane %v11710_v45, 2  ;;  %v11745_v10 = vmax.f32 %v11743_v8, %v11744_v19  ;;  %v11752_v59 = vmax.f32 %v11750_v26, %v11751_v30 }
 0x6f3   : > { %v11650_v32 = vrot.slane %v11649_v5, 1  ;;  %v11657_v14 = vrot.slane %v11656_v47, 1  ;;  %v11663_v16 = vmax.f32 %v11661_v38, %v11662_v15  ;;  %v11698_v61 = vmax.f32 %v11696_v42, %v11697_v1 }
 0x6f4   : > { %v11705_v27 = vmax.f32 %v11703_v57, %v11704_v63  ;;  %v11712_v24 = vmax.f32 %v11710_v45, %v11711_v22  ;;  %v11746_v20 = vrot.slane %v11745_v10, 2  ;;  %v11753_v3 = vrot.slane %v11752_v59, 2  ;;  %v10402_v45 = vpop.permute.xlu1 %10401 }
 0x6f5   : > { %v11043_v52 = vcombine.high %v11035_v17, %v11035_v17  ;;  %v11651_v23 = vmax.f32 %v11649_v5, %v11650_v32  ;;  %v11658_v11 = vmax.f32 %v11656_v47, %v11657_v14  ;;  %v11699_v13 = vrot.slane %v11698_v61, 1 }
 0x6f6   : > { %v11706_v9 = vrot.slane %v11705_v27, 1  ;;  %v11713_v49 = vrot.slane %v11712_v24, 1  ;;  %v11747_v48 = vmax.f32 %v11745_v10, %v11746_v20  ;;  %v11754_v54 = vmax.f32 %v11752_v59, %v11753_v3 }
 0x6f7   : > { %v11664_v58 = vrot.slane %v11663_v16, 1  ;;  %v11700_v21 = vmax.f32 %v11698_v61, %v11699_v13  ;;  %v11757_v40 = vsel %vm11462_vm1, %v11009_v33, -inf  ;;  %v11792_v35 = vsel %vm2348_vm4, %v11035_v17, -inf }
 0x6f8   : > { %v11707_v39 = vmax.f32 %v11705_v27, %v11706_v9  ;;  %v11714_v0 = vmax.f32 %v11712_v24, %v11713_v49  ;;  %v11748_v60 = vrot.slane %v11747_v48, 1  ;;  %v11755_v28 = vrot.slane %v11754_v54, 1  ;;  %v10404_v9 = vpop.permute.xlu0 %10403 }
 0x6f9   : > { %v11758_v37 = vrot.slane %v11757_v40, 4  ;;  %v11793_v7 = vrot.slane %v11792_v35, 4  ;;  %v11799_v31 = vsel %vm2348_vm4, %v11043_v52, -inf  ;;  %v11806_v56 = vsel %vm11462_vm1, %v11042_v36, -inf }
 0x6fa   : > { %v11749_v34 = vmax.f32 %v11747_v48, %v11748_v60  ;;  %v11756_v44 = vmax.f32 %v11754_v54, %v11755_v28  ;;  %v11800_v51 = vrot.slane %v11799_v31, 4  ;;  %v11807_v46 = vrot.slane %v11806_v56, 4 }
 0x6fb   : > { %v11665_v4 = vmax.f32 %v11663_v16, %v11664_v58  ;;  %v11759_v29 = vmax.f32 %v11757_v40, %v11758_v37  ;;  %v11794_v55 = vmax.f32 %v11792_v35, %v11793_v7  ;;  %v12334_v33 = vcombine.low %v11700_v21, %v11707_v39 }
 0x6fc   : > { %v11801_v8 = vmax.f32 %v11799_v31, %v11800_v51  ;;  %v11808_v17 = vmax.f32 %v11806_v56, %v11807_v46  ;;  %v12337_v26 = vcombine.low %v11749_v34, %v11756_v44  ;;  %v12434_v12 = vrot.slane %v11714_v0, 7 }
 0x6fd   : > { %v11760_v50 = vrot.slane %v11759_v29, 2  ;;  %v11795_v38 = vrot.slane %v11794_v55, 2  ;;  %v12331_v42 = vcombine.low %v11651_v23, %v11658_v11  ;;  %v12425_v57 = vrot.slane %v12334_v33, 7 }
 0x6fe   : > { %v11802_v19 = vrot.slane %v11801_v8, 2  ;;  %v11809_v30 = vrot.slane %v11808_v17, 2  ;;  %v12428_v36 = vrot.slane %v12337_v26, 6  ;;  %v10456_v5 = vsel %vm10415_vm0, %v19924_v53, -inf }
 0x6ff   : > { %v11761_v47 = vmax.f32 %v11759_v29, %v11760_v50  ;;  %v11796_v15 = vmax.f32 %v11794_v55, %v11795_v38  ;;  %v12426_v1 = vsel %vm12366_vm14, %v12425_v57, %v12331_v42  ;;  %v12435_v63 = vsel %vm12366_vm14, %v12434_v12, %v11665_v4 }
 0x700   : > { %v11803_v22 = vmax.f32 %v11801_v8, %v11802_v19  ;;  %v11810_v10 = vmax.f32 %v11808_v17, %v11809_v30  ;;  %v12427_v59 = vsel %vm12368_vm15, %v12425_v57, %v12426_v1  ;;  %v10429_v32 = vsel %vm10415_vm0, %v19801_v43, %v10402_v45 }
 0x701   : > { %v11762_v14 = vrot.slane %v11761_v47, 1  ;;  %v11797_v16 = vrot.slane %v11796_v15, 1  ;;  %v12429_v61 = vsel %vm12371_vm5, %v12428_v36, %v12427_v59  ;;  %v10455_v27 = vmax.f32 %v19937_v2, %v10429_v32 }
 0x702   : > { %v11804_v53 = vrot.slane %v11803_v22, 1  ;;  %v11811_v24 = vrot.slane %v11810_v10, 1  ;;  %v12436_v20 = vsel %vm12368_vm15, %v12434_v12, %v12435_v63  ;;  %v10457_v3 = vsel %vm10415_vm0, %v10402_v45, -inf }
 0x703   : > { %v11763_v52 = vmax.f32 %v11761_v47, %v11762_v14  ;;  %v12430_v23 = vsel %vm12373_vm6, %v12428_v36, %v12429_v61  ;;  %v10458_v11 = vmax.f32 %v10456_v5, %v10457_v3  ;;  %v10674_v13 = vcombine.low %v19808_v6, %v10455_v27 }
 0x704   : > { %v11798_v43 = vmax.f32 %v11796_v15, %v11797_v16  ;;  %v11805_v49 = vmax.f32 %v11803_v22, %v11804_v53  ;;  %v11812_v48 = vmax.f32 %v11810_v10, %v11811_v24  ;;  %v10675_v54 = vcombine.high %v19808_v6, %v10455_v27 }
 0x705   : > { %v12437_v58 = vrot.slane %v11763_v52, 6  ;;  %v10676_v2 = vcombine.high %v10458_v11, %v10458_v11  ;;  %v10683_v21 = vrot.slane %v10674_v13, %v21012_v18  ;;  %v10697_v40 = vrot.slane %v10458_v11, %v21012_v18 }
 0x706   : > { %v12340_v35 = vcombine.low %v11798_v43, %v11805_v49  ;;  %v12440_v39 = vrot.slane %v11812_v48, 5  ;;  %v10690_v0 = vrot.slane %v10675_v54, %v21012_v18  ;;  %v19974_v60 = vsel %vm10415_vm0, %v19842_v62, %v10404_v9 }
 0x707   : > { %v12438_v28 = vsel %vm12371_vm5, %v12437_v58, %v12436_v20  ;;  %v10704_v37 = vrot.slane %v10676_v2, %v21012_v18  ;;  %v10705_v6 = vcombine.low %v10683_v21, %v10697_v40  ;;  %v10706_v7 = vcombine.high %v10683_v21, %v10697_v40 }
 0x708   : > { %v12431_v31 = vrot.slane %v12340_v35, 5  ;;  %v12439_v56 = vsel %vm12373_vm6, %v12437_v58, %v12438_v28  ;;  %v13375_v34 = vcombine.low %v10697_v40, %v10697_v40  ;;  %v13377_v44 = vcombine.high %v10697_v40, %v10697_v40 }
 0x709   : > { %v12441_v51 = vsel %vm12376_vm7, %v12440_v39, %v12439_v56  ;;  %v10707_v46 = vcombine.low %v10690_v0, %v10704_v37  ;;  %v10708_v4 = vcombine.high %v10690_v0, %v10704_v37  ;;  %v11068_v62 = vrot.slane %v10705_v6, %v21012_v18 }
 0x70a   : > { %v12432_v29 = vsel %vm12376_vm7, %v12431_v31, %v12430_v23  ;;  %v12442_v55 = vsel %vm12378_vm8, %v12440_v39, %v12441_v51  ;;  %v11075_v33 = vrot.slane %v13375_v34, %v21012_v18  ;;  %v11101_v8 = vrot.slane %v10706_v7, %v21012_v18 }
 0x70b   : > { %v12433_v17 = vsel %vm12378_vm8, %v12431_v31, %v12432_v29  ;;  %12539 = vst.msk [vmem:[%s18674_s23 + $0x34] sm:$0xf] %vm12534_vm2, %v12442_v55  ;;  %v11076_v26 = vcombine.high %v11068_v62, %v11068_v62  ;;  %v13379_v12 = vcombine.low %v10704_v37, %v10704_v37  ;;  %v19989_v50 = vsel %vm10415_vm0, %v10404_v9, -inf }
 0x70c   : > { %12538 = vst [vmem:[%s18674_s23 + $0x2c] sm:$0xff] %v12433_v17  ;;  %v11108_v38 = vrot.slane %v13377_v44, %v21012_v18  ;;  %v11109_v42 = vcombine.high %v11101_v8, %v11101_v8  ;;  %v11134_v57 = vrot.slane %v10707_v46, %v21012_v18  ;;  %v13381_v45 = vcombine.high %v10704_v37, %v10704_v37 }
 0x70d   : > { %v19995_v19 = vrot.slane %v10708_v4, %v21012_v18  ;;  %v11841_v30 = vsel %vm2348_vm4, %v11068_v62, -inf  ;;  %v11848_v36 = vsel %vm2348_vm4, %v11076_v26, -inf  ;;  %v11855_v5 = vsel %vm11462_vm1, %v11075_v33, -inf }
 0x70e   : > { %v11141_v47 = vrot.slane %v13379_v12, %v21012_v18  ;;  %v11142_v15 = vcombine.high %v11134_v57, %v11134_v57  ;;  %v11174_v1 = vrot.slane %v13381_v45, %v21012_v18  ;;  %v11842_v63 = vrot.slane %v11841_v30, 4 }
 0x70f   : > { %v11849_v22 = vrot.slane %v11848_v36, 4  ;;  %v11856_v10 = vrot.slane %v11855_v5, 4  ;;  %v11890_v59 = vsel %vm2348_vm4, %v11101_v8, -inf  ;;  %v11897_v32 = vsel %vm2348_vm4, %v11109_v42, -inf }
 0x710   : > { %v11843_v14 = vmax.f32 %v11841_v30, %v11842_v63  ;;  %v11891_v16 = vrot.slane %v11890_v59, 4  ;;  %v11898_v61 = vrot.slane %v11897_v32, 4  ;;  %v11904_v27 = vsel %vm11462_vm1, %v11108_v38, -inf }
 0x711   : > { %v11850_v53 = vmax.f32 %v11848_v36, %v11849_v22  ;;  %v11857_v24 = vmax.f32 %v11855_v5, %v11856_v10  ;;  %v11905_v20 = vrot.slane %v11904_v27, 4  ;;  %v11939_v3 = vsel %vm2348_vm4, %v11134_v57, -inf }
 0x712   : > { %v11844_v52 = vrot.slane %v11843_v14, 2  ;;  %v11892_v23 = vmax.f32 %v11890_v59, %v11891_v16  ;;  %v11899_v11 = vmax.f32 %v11897_v32, %v11898_v61  ;;  %v11940_v13 = vrot.slane %v11939_v3, 4 }
 0x713   : > { %v11851_v9 = vrot.slane %v11850_v53, 2  ;;  %v11858_v43 = vrot.slane %v11857_v24, 2  ;;  %v11906_v49 = vmax.f32 %v11904_v27, %v11905_v20  ;;  %v11946_v48 = vsel %vm2348_vm4, %v11142_v15, -inf }
 0x714   : > { %v11845_v54 = vmax.f32 %v11843_v14, %v11844_v52  ;;  %v11893_v58 = vrot.slane %v11892_v23, 2  ;;  %v11900_v2 = vrot.slane %v11899_v11, 2  ;;  %v11941_v21 = vmax.f32 %v11939_v3, %v11940_v13  ;;  %v10406_v14 = vpop.permute.xlu1 %10405 }
 0x715   : > { %v11852_v40 = vmax.f32 %v11850_v53, %v11851_v9  ;;  %v11859_v35 = vmax.f32 %v11857_v24, %v11858_v43  ;;  %v11907_v39 = vrot.slane %v11906_v49, 2  ;;  %v11947_v0 = vrot.slane %v11946_v48, 4 }
 0x716   : > { %v11846_v28 = vrot.slane %v11845_v54, 1  ;;  %v11894_v37 = vmax.f32 %v11892_v23, %v11893_v58  ;;  %v11901_v6 = vmax.f32 %v11899_v11, %v11900_v2  ;;  %v11942_v7 = vrot.slane %v11941_v21, 2 }
 0x717   : > { %v11853_v31 = vrot.slane %v11852_v40, 1  ;;  %v11860_v56 = vrot.slane %v11859_v35, 1  ;;  %v11908_v34 = vmax.f32 %v11906_v49, %v11907_v39  ;;  %v11948_v44 = vmax.f32 %v11946_v48, %v11947_v0 }
 0x718   : > { %v11175_v51 = vcombine.high %v19995_v19, %v19995_v19  ;;  %v11895_v46 = vrot.slane %v11894_v37, 1  ;;  %v11902_v4 = vrot.slane %v11901_v6, 1  ;;  %v11943_v62 = vmax.f32 %v11941_v21, %v11942_v7 }
 0x719   : > { %v11847_v29 = vmax.f32 %v11845_v54, %v11846_v28  ;;  %v11854_v55 = vmax.f32 %v11852_v40, %v11853_v31  ;;  %v11909_v33 = vrot.slane %v11908_v34, 1  ;;  %v11949_v8 = vrot.slane %v11948_v44, 2 }
 0x71a   : > { %v11861_v17 = vmax.f32 %v11859_v35, %v11860_v56  ;;  %v11903_v26 = vmax.f32 %v11901_v6, %v11902_v4  ;;  %v11944_v12 = vrot.slane %v11943_v62, 1  ;;  %v11953_v38 = vsel %vm11462_vm1, %v11141_v47, -inf }
 0x71b   : > { %v11910_v42 = vmax.f32 %v11908_v34, %v11909_v33  ;;  %v11950_v57 = vmax.f32 %v11948_v44, %v11949_v8  ;;  %v11954_v45 = vrot.slane %v11953_v38, 4  ;;  %v11988_v30 = vsel %vm2348_vm4, %v19995_v19, -inf }
 0x71c   : > { %v11896_v36 = vmax.f32 %v11894_v37, %v11895_v46  ;;  %v11989_v5 = vrot.slane %v11988_v30, 4  ;;  %v11995_v15 = vsel %vm2348_vm4, %v11175_v51, -inf  ;;  %v12002_v63 = vsel %vm11462_vm1, %v11174_v1, -inf }
 0x71d   : > { %v11951_v22 = vrot.slane %v11950_v57, 1  ;;  %v11955_v10 = vmax.f32 %v11953_v38, %v11954_v45  ;;  %v11996_v59 = vrot.slane %v11995_v15, 4  ;;  %v12003_v32 = vrot.slane %v12002_v63, 4 }
 0x71e   : > { %v11945_v16 = vmax.f32 %v11943_v62, %v11944_v12  ;;  %v11990_v61 = vmax.f32 %v11988_v30, %v11989_v5  ;;  %v12346_v47 = vcombine.low %v11896_v36, %v11903_v26  ;;  %v12470_v27 = vrot.slane %v11910_v42, 7 }
 0x71f   : > { %v11952_v53 = vmax.f32 %v11950_v57, %v11951_v22  ;;  %v11956_v24 = vrot.slane %v11955_v10, 2  ;;  %v11997_v20 = vmax.f32 %v11995_v15, %v11996_v59  ;;  %v12004_v3 = vmax.f32 %v12002_v63, %v12003_v32 }
 0x720   : > { %v11991_v19 = vrot.slane %v11990_v61, 2  ;;  %v12343_v52 = vcombine.low %v11847_v29, %v11854_v55  ;;  %v12461_v23 = vrot.slane %v12346_v47, 7  ;;  %v10431_v11 = vsel %vm10415_vm0, %v19853_v25, %v10406_v14 }
 0x721   : > { %v11957_v1 = vmax.f32 %v11955_v10, %v11956_v24  ;;  %v11998_v13 = vrot.slane %v11997_v20, 2  ;;  %v12005_v9 = vrot.slane %v12004_v3, 2  ;;  %v12349_v43 = vcombine.low %v11945_v16, %v11952_v53 }
 0x722   : > { %v11992_v49 = vmax.f32 %v11990_v61, %v11991_v19  ;;  %v12462_v48 = vsel %vm12366_vm14, %v12461_v23, %v12343_v52  ;;  %v12471_v54 = vsel %vm12366_vm14, %v12470_v27, %v11861_v17  ;;  %v10464_v58 = vmax.f32 %v19974_v60, %v10431_v11 }
 0x723   : > { %v11958_v2 = vrot.slane %v11957_v1, 1  ;;  %v11999_v21 = vmax.f32 %v11997_v20, %v11998_v13  ;;  %v12006_v40 = vmax.f32 %v12004_v3, %v12005_v9  ;;  %v12463_v35 = vsel %vm12368_vm15, %v12461_v23, %v12462_v48 }
 0x724   : > { %v11993_v39 = vrot.slane %v11992_v49, 1  ;;  %v12464_v0 = vrot.slane %v12349_v43, 6  ;;  %v10466_v25 = vsel %vm10415_vm0, %v10406_v14, -inf  ;;  %v10745_v28 = vcombine.low %v19866_v41, %v10464_v58 }
 0x725   : > { %v11959_v37 = vmax.f32 %v11957_v1, %v11958_v2  ;;  %v12000_v6 = vrot.slane %v11999_v21, 1  ;;  %v12007_v7 = vrot.slane %v12006_v40, 1  ;;  %v10467_v31 = vmax.f32 %v19989_v50, %v10466_v25 }
 0x726   : > { %v12465_v56 = vsel %vm12371_vm5, %v12464_v0, %v12463_v35  ;;  %v12472_v60 = vsel %vm12368_vm15, %v12470_v27, %v12471_v54  ;;  %v10746_v34 = vcombine.high %v19866_v41, %v10464_v58  ;;  %v10754_v44 = vrot.slane %v10745_v28, %v21012_v18 }
 0x727   : > { %v11994_v51 = vmax.f32 %v11992_v49, %v11993_v39  ;;  %v12001_v46 = vmax.f32 %v11999_v21, %v12000_v6  ;;  %v12008_v4 = vmax.f32 %v12006_v40, %v12007_v7  ;;  %v12473_v62 = vrot.slane %v11959_v37, 6 }
 0x728   : > { %v10747_v29 = vcombine.high %v10467_v31, %v10467_v31  ;;  %v10761_v55 = vrot.slane %v10746_v34, %v21012_v18  ;;  %v10768_v33 = vrot.slane %v10467_v31, %v21012_v18  ;;  %v12466_v50 = vsel %vm12373_vm6, %v12464_v0, %v12465_v56 }
 0x729   : > { %v12352_v8 = vcombine.low %v11994_v51, %v12001_v46  ;;  %v12474_v17 = vsel %vm12371_vm5, %v12473_v62, %v12472_v60  ;;  %v12476_v26 = vrot.slane %v12008_v4, 5 }
 0x72a   : > { %v12475_v41 = vsel %vm12373_vm6, %v12473_v62, %v12474_v17  ;;  %v10775_v12 = vrot.slane %v10747_v29, %v21012_v18  ;;  %v10776_v38 = vcombine.low %v10754_v44, %v10768_v33  ;;  %v10777_v42 = vcombine.high %v10754_v44, %v10768_v33 }
 0x72b   : > { %v12467_v57 = vrot.slane %v12352_v8, 5  ;;  %v12477_v45 = vsel %vm12376_vm7, %v12476_v26, %v12475_v41  ;;  %v13383_v30 = vcombine.low %v10768_v33, %v10768_v33  ;;  %v13385_v36 = vcombine.high %v10768_v33, %v10768_v33 }
 0x72c   : > { %v12478_v5 = vsel %vm12378_vm8, %v12476_v26, %v12477_v45  ;;  %v10778_v15 = vcombine.low %v10761_v55, %v10775_v12  ;;  %v10779_v63 = vcombine.high %v10761_v55, %v10775_v12  ;;  %v11200_v22 = vrot.slane %v10776_v38, %v21012_v18 }
 0x72d   : > { %v12468_v10 = vsel %vm12376_vm7, %v12467_v57, %v12466_v50  ;;  %12543 = vst.msk [vmem:[%s18674_s23 + $0x50] sm:$0xf] %vm12534_vm2, %v12478_v5  ;;  %v11207_v59 = vrot.slane %v13383_v30, %v21012_v18  ;;  %v11233_v32 = vrot.slane %v10777_v42, %v21012_v18  ;;  %v13387_v61 = vcombine.low %v10775_v12, %v10775_v12 }
 0x72e   : > { %v12469_v14 = vsel %vm12378_vm8, %v12467_v57, %v12468_v10  ;;  %v11208_v16 = vcombine.high %v11200_v22, %v11200_v22  ;;  %v11266_v47 = vrot.slane %v10778_v15, %v21012_v18  ;;  %v11240_v27 = vrot.slane %v13385_v36, %v21012_v18 }
 0x72f   : > { %12542 = vst [vmem:[%s18674_s23 + $0x48] sm:$0xff] %v12469_v14  ;;  %v11241_v53 = vcombine.high %v11233_v32, %v11233_v32  ;;  %v13389_v24 = vcombine.high %v10775_v12, %v10775_v12  ;;  %v12037_v20 = vsel %vm2348_vm4, %v11200_v22, -inf  ;;  %v11273_v3 = vrot.slane %v13387_v61, %v21012_v18 }
 0x730   : > { %v11299_v19 = vrot.slane %v10779_v63, %v21012_v18  ;;  %v12038_v52 = vrot.slane %v12037_v20, 4  ;;  %v12044_v23 = vsel %vm2348_vm4, %v11208_v16, -inf  ;;  %v11274_v11 = vcombine.high %v11266_v47, %v11266_v47 }
 0x731   : > { %v11306_v1 = vrot.slane %v13389_v24, %v21012_v18  ;;  %v12045_v13 = vrot.slane %v12044_v23, 4  ;;  %v12051_v9 = vsel %vm11462_vm1, %v11207_v59, -inf  ;;  %v12086_v48 = vsel %vm2348_vm4, %v11233_v32, -inf }
 0x732   : > { %v12039_v43 = vmax.f32 %v12037_v20, %v12038_v52  ;;  %v12052_v49 = vrot.slane %v12051_v9, 4  ;;  %v12093_v54 = vsel %vm2348_vm4, %v11241_v53, -inf  ;;  %v12087_v2 = vrot.slane %v12086_v48, 4 }
 0x733   : > { %v12046_v58 = vmax.f32 %v12044_v23, %v12045_v13  ;;  %v12094_v21 = vrot.slane %v12093_v54, 4  ;;  %v12100_v40 = vsel %vm11462_vm1, %v11240_v27, -inf  ;;  %v12135_v25 = vsel %vm2348_vm4, %v11266_v47, -inf }
 0x734   : > { %v12040_v35 = vrot.slane %v12039_v43, 2  ;;  %v12053_v39 = vmax.f32 %v12051_v9, %v12052_v49  ;;  %v12101_v0 = vrot.slane %v12100_v40, 4  ;;  %v12088_v28 = vmax.f32 %v12086_v48, %v12087_v2 }
 0x735   : > { %v12047_v18 = vrot.slane %v12046_v58, 2  ;;  %v12095_v37 = vmax.f32 %v12093_v54, %v12094_v21  ;;  %v12136_v6 = vrot.slane %v12135_v25, 4  ;;  %v12142_v60 = vsel %vm2348_vm4, %v11274_v11, -inf }
 0x736   : > { %v12041_v7 = vmax.f32 %v12039_v43, %v12040_v35  ;;  %v12054_v31 = vrot.slane %v12053_v39, 2  ;;  %v12102_v56 = vmax.f32 %v12100_v40, %v12101_v0  ;;  %v12089_v44 = vrot.slane %v12088_v28, 2 }
 0x737   : > { %v12048_v34 = vmax.f32 %v12046_v58, %v12047_v18  ;;  %v12096_v51 = vrot.slane %v12095_v37, 2  ;;  %v12137_v46 = vmax.f32 %v12135_v25, %v12136_v6  ;;  %v12143_v55 = vrot.slane %v12142_v60, 4 }
 0x738   : > { %v12042_v4 = vrot.slane %v12041_v7, 1  ;;  %v12055_v62 = vmax.f32 %v12053_v39, %v12054_v31  ;;  %v12103_v29 = vrot.slane %v12102_v56, 2  ;;  %v12090_v8 = vmax.f32 %v12088_v28, %v12089_v44 }
 0x739   : > { %v12049_v33 = vrot.slane %v12048_v34, 1  ;;  %v12097_v50 = vmax.f32 %v12095_v37, %v12096_v51  ;;  %v12138_v17 = vrot.slane %v12137_v46, 2  ;;  %v11307_v26 = vcombine.high %v11299_v19, %v11299_v19 }
 0x73a   : > { %v12043_v41 = vmax.f32 %v12041_v7, %v12042_v4  ;;  %v12104_v12 = vmax.f32 %v12102_v56, %v12103_v29  ;;  %v12144_v38 = vmax.f32 %v12142_v60, %v12143_v55  ;;  %v12056_v42 = vrot.slane %v12055_v62, 1 }
 0x73b   : > { %v12091_v57 = vrot.slane %v12090_v8, 1  ;;  %v12098_v45 = vrot.slane %v12097_v50, 1  ;;  %v12139_v30 = vmax.f32 %v12137_v46, %v12138_v17  ;;  %v12050_v36 = vmax.f32 %v12048_v34, %v12049_v33 }
 0x73c   : > { %v12105_v5 = vrot.slane %v12104_v12, 1  ;;  %v12145_v15 = vrot.slane %v12144_v38, 2  ;;  %v12149_v63 = vsel %vm11462_vm1, %v11273_v3, -inf  ;;  %v12184_v61 = vsel %vm2348_vm4, %v11299_v19, -inf }
 0x73d   : > { %v12092_v22 = vmax.f32 %v12090_v8, %v12091_v57  ;;  %v12099_v10 = vmax.f32 %v12097_v50, %v12098_v45  ;;  %v12140_v59 = vrot.slane %v12139_v30, 1  ;;  %v12150_v32 = vrot.slane %v12149_v63, 4 }
 0x73e   : > { %v12106_v14 = vmax.f32 %v12104_v12, %v12105_v5  ;;  %v12146_v16 = vmax.f32 %v12144_v38, %v12145_v15  ;;  %v12191_v47 = vsel %vm2348_vm4, %v11307_v26, -inf  ;;  %v12057_v27 = vmax.f32 %v12055_v62, %v12056_v42 }
 0x73f   : > { %v12151_v53 = vmax.f32 %v12149_v63, %v12150_v32  ;;  %v12185_v24 = vrot.slane %v12184_v61, 4  ;;  %v12192_v20 = vrot.slane %v12191_v47, 4  ;;  %v12141_v52 = vmax.f32 %v12139_v30, %v12140_v59 }
 0x740   : > { %v12147_v23 = vrot.slane %v12146_v16, 1  ;;  %v12198_v11 = vsel %vm11462_vm1, %v11306_v1, -inf  ;;  %v12358_v13 = vcombine.low %v12092_v22, %v12099_v10  ;;  %v12355_v54 = vcombine.low %v12043_v41, %v12050_v36 }
 0x741   : > { %v12152_v3 = vrot.slane %v12151_v53, 2  ;;  %v12186_v9 = vmax.f32 %v12184_v61, %v12185_v24  ;;  %v12193_v43 = vmax.f32 %v12191_v47, %v12192_v20  ;;  %v12199_v49 = vrot.slane %v12198_v11, 4 }
 0x742   : > { %v12148_v48 = vmax.f32 %v12146_v16, %v12147_v23  ;;  %v12497_v58 = vrot.slane %v12358_v13, 7  ;;  %v12506_v2 = vrot.slane %v12106_v14, 7 }
 0x743   : > { %v12153_v19 = vmax.f32 %v12151_v53, %v12152_v3  ;;  %v12187_v21 = vrot.slane %v12186_v9, 2  ;;  %v12194_v40 = vrot.slane %v12193_v43, 2  ;;  %v12200_v35 = vmax.f32 %v12198_v11, %v12199_v49 }
 0x744   : > { %v12361_v39 = vcombine.low %v12141_v52, %v12148_v48  ;;  %v12498_v0 = vsel %vm12366_vm14, %v12497_v58, %v12355_v54  ;;  %v12507_v25 = vsel %vm12366_vm14, %v12506_v2, %v12057_v27 }
 0x745   : > { %v12154_v18 = vrot.slane %v12153_v19, 1  ;;  %v12188_v1 = vmax.f32 %v12186_v9, %v12187_v21  ;;  %v12195_v28 = vmax.f32 %v12193_v43, %v12194_v40  ;;  %v12201_v37 = vrot.slane %v12200_v35, 2 }
 0x746   : > { %v12499_v6 = vsel %vm12368_vm15, %v12497_v58, %v12498_v0  ;;  %v12500_v7 = vrot.slane %v12361_v39, 6  ;;  %v12508_v44 = vsel %vm12368_vm15, %v12506_v2, %v12507_v25 }
 0x747   : > { %v12155_v31 = vmax.f32 %v12153_v19, %v12154_v18  ;;  %v12189_v56 = vrot.slane %v12188_v1, 1  ;;  %v12196_v60 = vrot.slane %v12195_v28, 1  ;;  %v12202_v34 = vmax.f32 %v12200_v35, %v12201_v37 }
 0x748   : > { %v12501_v62 = vsel %vm12371_vm5, %v12500_v7, %v12499_v6 }
 0x749   : > { %v12190_v51 = vmax.f32 %v12188_v1, %v12189_v56  ;;  %v12197_v46 = vmax.f32 %v12195_v28, %v12196_v60  ;;  %v12203_v4 = vrot.slane %v12202_v34, 1  ;;  %v12509_v29 = vrot.slane %v12155_v31, 6 }
 0x74a   : > { %v12502_v8 = vsel %vm12373_vm6, %v12500_v7, %v12501_v62 }
 0x74b   : > { %v12204_v55 = vmax.f32 %v12202_v34, %v12203_v4  ;;  %v12364_v33 = vcombine.low %v12190_v51, %v12197_v46  ;;  %v12510_v50 = vsel %vm12371_vm5, %v12509_v29, %v12508_v44 }
 0x74c   : > { %v12511_v26 = vsel %vm12373_vm6, %v12509_v29, %v12510_v50 }
 0x74d   : > { %v12503_v17 = vrot.slane %v12364_v33, 5  ;;  %v12512_v41 = vrot.slane %v12204_v55, 5 }
 0x74f   : > { %v12504_v12 = vsel %vm12376_vm7, %v12503_v17, %v12502_v8  ;;  %v12513_v38 = vsel %vm12376_vm7, %v12512_v41, %v12511_v26 }
 0x750   : > { %v12505_v42 = vsel %vm12378_vm8, %v12503_v17, %v12504_v12  ;;  %v12514_v57 = vsel %vm12378_vm8, %v12512_v41, %v12513_v38 }
 0x751   : > { %12546 = vst [vmem:[%s18674_s23 + $0x64] sm:$0xff] %v12505_v42  ;;  %12547 = vst.msk [vmem:[%s18674_s23 + $0x6c] sm:$0xf] %vm12534_vm2, %v12514_v57 }
 0x752   : > { %14809 = shalt.err (!%p14806_p5)
}
 0x753   : > { %s14810_s14 = scalar_lea.hbm %s20073_s2, 1792  ;;  %s14814_s23 = scalar_lea.hbm %s20134_s9, 3584 }
 0x754   : > { %p14811_p8 = scmp.ne.s32.totalorder %s20073_s2, %s14810_s14  ;;  %p14815_p13 = scmp.lt.s32.totalorder %s20073_s2, %s20134_s9 }
 0x755   : > { %p14816_p0 = scmp.lt.s32.totalorder %s14814_s23, %s14810_s14 }
 0x756   : > { %p14812_p11 = pnand %p14811_p8, %p21042_p3 }
 0x757   : > { %p14817_p6 = por %p14816_p0, %p14815_p13 }
 0x758   : > { %p14813_p12 = pneg %p14812_p11 }
 0x75a   : > { %p14818_p1 = pnand %p14817_p6, %p14813_p12 }
 0x75c   : > { %14821 = shalt.err (!%p14818_p1)
}
 0x75d   : > { %s14904_s25 = smov 448   ;;  %s14905_s22 = smov 28  }
 0x75e   : > { %13806 = dma.vmem_to_hbm [thread:$0]  (%p21042_p3), %s20077_s13, 1792, %s20073_s2, %s12549_s15, %s14904_s25, %s14904_s25, %s14905_s22  }
 0x75f PF: > { %s12577_s1 = sand.u32 1, %s14864_s30   ;;  %p21043_p9 = scmp.ne.s32.totalorder %s20382_s20, 0 }
 0x760   : > { %p21044_p10 = scmp.ge.s32.totalorder %s14876_s12, 2  ;;  %s12578_s3 = scalar_lea.sflag [#allocation4], %s12577_s1 }
 0x762   : > { %p13838_p7 = pnand %p21044_p10, %p21043_p9 }
 0x764   : > { %p13839_p2 = pneg %p13838_p7 }
 0x766   : > { %14859 = dma.done.wait (%p13839_p2), %s12578_s3, 1792  }
 0x767   : > { %14861 = vsyncadd (%p13839_p2), %s12578_s3, 4294965504  ;;  %p26_p4 = scmp.ge.s32.totalorder %s15069_s19, 4   ;;  %s21045_s30 = smov %s14868_s10 }
 0x768   : > { %s21046_s10 = smov %s14872_s11  ;;  %s21047_s11 = smov %s15080_s29 }
 0x769   : > { %s21048_s12 = smov %s15069_s19  ;;  %28 = sbr.rel (!%p26_p4) target bundleno = 13 (0xd), region = 149 }
 0x76e   :  { %12583 = vsyncpa [#allocation3], 1 }
 0x76f   :  { %12585 = vsyncpa [#allocation3 + $0x1], 1 }
 0x770   :  { %12586 = vsyncpa [#allocation6], 1 }
 0x771   :  { %12587 = vsyncpa [#allocation9], 1 }
 0x772   :  { %12588 = vsyncpa [#allocation12], 1 }
 0x773   :  { %12589 = vsyncpa [#allocation15], 1 }
 0x774   :  { %12590 = vsyncpa [#allocation4], 1 }
 0x775   :  { %12592 = vsyncpa [#allocation4 + $0x1], 1 }

</bundles_post_ra>
